<compile_context>
chip_gen: v7x
topology: tpu7x:2x2x1
jax: 0.10.0
libtpu: 0.0.40
codegen_flags: <defaults>
</compile_context>

<pallas_src>
import numpy as np
import jax
import jax.numpy as jnp
from jax import lax
from jax.experimental import pallas as pl
from jax.experimental.pallas import tpu as pltpu


VMEM_LIMIT = 48 * 1024 * 1024   # below v7x's 64 MiB physical VMEM per TC


# ----------------------------------------------------------------------------
# Conv2dBlock kernel: 3x3 conv (one folded matmul) + BN + GLU + AvgPool (VPU)
# ----------------------------------------------------------------------------
def make_conv_block_kernel(bb, hw, howo, npool):
    inv = 1.0 / npool

    def kernel(t_ref, w_ref, b_ref, scale_ref, shift_ref, wg_ref, bg_ref, o_ref):
        # t_ref:  (bb*HW, 9*Cin) bf16  im2col rows, pool-phase-major per sample
        # w_ref:  (9*Cin, Cout)  bf16  folded 3x3 conv weight
        # b_ref / scale_ref / shift_ref / bg_ref: (1, Cout) f32
        # wg_ref: (Cout, Cout)   bf16  GLU 1x1 conv weight
        # o_ref:  (bb*HoWo, Cout) f32  pooled output (row-major spatial)
        y = jnp.dot(t_ref[...], w_ref[...], preferred_element_type=jnp.float32)
        y = (y + b_ref[...]) * scale_ref[...] + shift_ref[...]      # bias + BN(eval)
        lin = jnp.dot(y.astype(jnp.bfloat16), wg_ref[...],
                      preferred_element_type=jnp.float32) + bg_ref[...]
        g = jax.nn.sigmoid(y) * lin                                 # GLU

        # AvgPool2d: rows are (sample, pool-phase, output-position); average
        # the P contiguous phase slabs per sample — pure VPU adds, no MXU.
        for s in range(bb):
            base = s * hw
            acc = g[base:base + howo]
            for k in range(1, npool):
                acc = acc + g[base + k * howo: base + (k + 1) * howo]
            o_ref[s * howo:(s + 1) * howo, :] = (acc * inv).astype(o_ref.dtype)

    return kernel


def pick_bb(batch, hw, howo):
    # Samples per grid step: fill the matmul M-dim (>=256 rows) while keeping
    # the (8,128) block constraint; fall back to full batch (always legal).
    for cand in range(1, batch + 1):
        if batch % cand:
            continue
        if cand * hw >= 256 and (cand * hw) % 8 == 0 and (cand * howo) % 8 == 0:
            return cand
    return batch


def conv_block(x, prm):
    # x: (B, H, W, Cin) NHWC float32
    B, H, W, Cin = x.shape
    ph, pw = prm["pool"]
    Cout = prm["wfold"].shape[-1]
    Hout, Wout = H // ph, W // pw
    HW, HoWo, P = H * W, Hout * Wout, ph * pw

    # im2col glue: the 9 shifted taps are folded into the channel (lane) dim,
    # rows ordered (sample, pool-phase, output-position) so the kernel pools
    # with contiguous slab adds.
    # TODO(synk): build the taps inside the kernel from the padded sample
    # (pl.ds slices / pltpu.roll) to cut the 9x activation HBM stream.
    xp = jnp.pad(x, ((0, 0), (1, 1), (1, 1), (0, 0)))
    cols = jnp.stack([xp[:, dy:dy + H, dx:dx + W, :]
                      for dy in range(3) for dx in range(3)], axis=-2)  # (B,H,W,9,Cin)
    cols = cols.reshape(B, Hout, ph, Wout, pw, 9 * Cin)
    cols = jnp.transpose(cols, (0, 2, 4, 1, 3, 5))                      # (B,ph,pw,Ho,Wo,9Cin)
    taps = cols.reshape(B * HW, 9 * Cin).astype(jnp.bfloat16)

    bb = pick_bb(B, HW, HoWo)

    out = pl.pallas_call(
        make_conv_block_kernel(bb, HW, HoWo, P),
        out_shape=jax.ShapeDtypeStruct((B * HoWo, Cout), jnp.float32),
        grid=(B // bb,),
        in_specs=[
            pl.BlockSpec((bb * HW, 9 * Cin), lambda i: (i, 0)),
            pl.BlockSpec((9 * Cin, Cout), lambda i: (0, 0)),
            pl.BlockSpec((1, Cout), lambda i: (0, 0)),
            pl.BlockSpec((1, Cout), lambda i: (0, 0)),
            pl.BlockSpec((1, Cout), lambda i: (0, 0)),
            pl.BlockSpec((Cout, Cout), lambda i: (0, 0)),
            pl.BlockSpec((1, Cout), lambda i: (0, 0)),
        ],
        out_specs=pl.BlockSpec((bb * HoWo, Cout), lambda i: (i, 0)),
        compiler_params=pltpu.CompilerParams(
            dimension_semantics=("parallel",),
            vmem_limit_bytes=VMEM_LIMIT),
    )(taps, prm["wfold"], prm["b"], prm["scale"], prm["shift"],
      prm["wg"], prm["bg"])
    return out.reshape(B, Hout, Wout, Cout)


# ----------------------------------------------------------------------------
# Fused bidirectional GRU layer kernel (PyTorch gate order r, z, n)
# ----------------------------------------------------------------------------
def make_bigru_kernel(T, B, H):
    def kernel(x_ref, wih_ref, whhf_ref, whhb_ref, bih_ref, bhhf_ref, bhhb_ref,
               of_ref, ob_ref, gxf_s, gxb_s, hf_s, hb_s):
        # x_ref: (T*B, Din) bf16 time-major.  of/ob: (T, B, H) f32 per direction.
        # Hoisted non-recurrent projection for BOTH directions: one big matmul
        # instead of T tiny M=B matmuls on the serial critical path.
        gx = jnp.dot(x_ref[...], wih_ref[...],
                     preferred_element_type=jnp.float32) + bih_ref[...]
        gxf_s[...] = gx[:, :3 * H]
        gxb_s[...] = gx[:, 3 * H:]
        hf_s[...] = jnp.zeros_like(hf_s)                 # h0 = 0 (PyTorch default)
        hb_s[...] = jnp.zeros_like(hb_s)

        def cell(gx_t, gh_t, h):
            r = jax.nn.sigmoid(gx_t[:, :H] + gh_t[:, :H])
            z = jax.nn.sigmoid(gx_t[:, H:2 * H] + gh_t[:, H:2 * H])
            n = jnp.tanh(gx_t[:, 2 * H:] + r * gh_t[:, 2 * H:])
            return (1.0 - z) * n + z * h

        def step(t, carry):
            # forward direction processes time t
            hf = hf_s[...]
            ghf = jnp.dot(hf.astype(jnp.bfloat16), whhf_ref[...],
                          preferred_element_type=jnp.float32) + bhhf_ref[...]
            hf_new = cell(gxf_s[pl.ds(pl.multiple_of(t * B, B), B), :], ghf, hf)
            hf_s[...] = hf_new
            of_ref[t] = hf_new.astype(of_ref.dtype)

            # backward direction processes time T-1-t (reversed sequence)
            tb = T - 1 - t
            hb = hb_s[...]
            ghb = jnp.dot(hb.astype(jnp.bfloat16), whhb_ref[...],
                          preferred_element_type=jnp.float32) + bhhb_ref[...]
            hb_new = cell(gxb_s[pl.ds(pl.multiple_of(tb * B, B), B), :], ghb, hb)
            hb_s[...] = hb_new
            ob_ref[tb] = hb_new.astype(ob_ref.dtype)
            return carry

        lax.fori_loop(0, T, step, 0)

    return kernel


def bigru_layer(h, prm):
    # h: (T, B, Din) f32 time-major -> (T, B, 2H) f32
    T, B, Din = h.shape
    H = prm["whh_f"].shape[0]
    x2 = h.reshape(T * B, Din).astype(jnp.bfloat16)

    of, ob = pl.pallas_call(
        make_bigru_kernel(T, B, H),
        out_shape=(jax.ShapeDtypeStruct((T, B, H), jnp.float32),
                   jax.ShapeDtypeStruct((T, B, H), jnp.float32)),
        grid=(1,),
        in_specs=[
            pl.BlockSpec((T * B, Din), lambda i: (0, 0)),
            pl.BlockSpec((Din, 6 * H), lambda i: (0, 0)),
            pl.BlockSpec((H, 3 * H), lambda i: (0, 0)),
            pl.BlockSpec((H, 3 * H), lambda i: (0, 0)),
            pl.BlockSpec((1, 6 * H), lambda i: (0, 0)),
            pl.BlockSpec((1, 3 * H), lambda i: (0, 0)),
            pl.BlockSpec((1, 3 * H), lambda i: (0, 0)),
        ],
        out_specs=(pl.BlockSpec((T, B, H), lambda i: (0, 0, 0)),
                   pl.BlockSpec((T, B, H), lambda i: (0, 0, 0))),
        scratch_shapes=[pltpu.VMEM((T * B, 3 * H), jnp.float32),
                        pltpu.VMEM((T * B, 3 * H), jnp.float32),
                        pltpu.VMEM((B, H), jnp.float32),
                        pltpu.VMEM((B, H), jnp.float32)],
        compiler_params=pltpu.CompilerParams(
            dimension_semantics=("arbitrary",),
            vmem_limit_bytes=VMEM_LIMIT),
    )(x2, prm["wih"], prm["whh_f"], prm["whh_b"],
      prm["bih"], prm["bhh_f"], prm["bhh_b"])
    return jnp.concatenate([of, ob], axis=-1)            # (T, B, 2H)


# ----------------------------------------------------------------------------
# Parameter init (deterministic, synthetic) and full forward
# ----------------------------------------------------------------------------
BLOCK_CFG = [
    (1, 16, (2, 2)),
    (16, 32, (2, 2)),
    (32, 64, (2, 1)),
    (64, 128, (2, 1)),
    (128, 128, (2, 1)),
    (128, 128, (2, 1)),
    (128, 128, (2, 1)),
]


def init_params(key):
    eps = 1e-5
    cnn = []
    for cin, cout, pool in BLOCK_CFG:
        key, *ks = jax.random.split(key, 9)
        fan_in = cin * 9
        w = jax.random.normal(ks[0], (9, cin, cout), jnp.float32) / np.sqrt(fan_in)
        b = 0.1 * jax.random.normal(ks[1], (1, cout), jnp.float32)
        gamma = 1.0 + 0.1 * jax.random.normal(ks[2], (1, cout), jnp.float32)
        beta = 0.1 * jax.random.normal(ks[3], (1, cout), jnp.float32)
        rmean = 0.1 * jax.random.normal(ks[4], (1, cout), jnp.float32)
        rvar = 1.0 + 0.1 * jnp.abs(jax.random.normal(ks[5], (1, cout), jnp.float32))
        scale = gamma / jnp.sqrt(rvar + eps)
        shift = beta - rmean * scale
        wg = jax.random.normal(ks[6], (cout, cout), jnp.float32) / np.sqrt(cout)
        bg = 0.1 * jax.random.normal(ks[7], (1, cout), jnp.float32)
        cnn.append(dict(wfold=w.reshape(9 * cin, cout).astype(jnp.bfloat16),
                        b=b, scale=scale, shift=shift,
                        wg=wg.astype(jnp.bfloat16), bg=bg, pool=pool))

    gru = []
    H = 128
    din = 128
    for _layer in range(2):
        key, k1, k2, k3, k4, k5, k6, k7, k8 = jax.random.split(key, 9)
        s = 1.0 / np.sqrt(H)
        u = lambda k, shp: jax.random.uniform(k, shp, jnp.float32, -s, s)
        wih_f, wih_b = u(k1, (din, 3 * H)), u(k2, (din, 3 * H))
        whh_f, whh_b = u(k3, (H, 3 * H)), u(k4, (H, 3 * H))
        bih_f, bih_b = u(k5, (1, 3 * H)), u(k6, (1, 3 * H))
        bhh_f, bhh_b = u(k7, (1, 3 * H)), u(k8, (1, 3 * H))
        gru.append(dict(
            wih=jnp.concatenate([wih_f, wih_b], axis=1).astype(jnp.bfloat16),
            bih=jnp.concatenate([bih_f, bih_b], axis=1),
            whh_f=whh_f.astype(jnp.bfloat16), whh_b=whh_b.astype(jnp.bfloat16),
            bhh_f=bhh_f, bhh_b=bhh_b))
        din = 2 * H
    return dict(cnn=cnn, gru=gru)


def crnn_forward(logx, params):
    # logx: (B, F, T) == 'b (c f) t' with c=1; F must be 128 (7 freq-poolings by 2)
    B, F, T = logx.shape
    x = jnp.transpose(logx[:, None, :, :], (0, 2, 3, 1))   # NCHW -> NHWC (B,F,T,1)
    for blk in params["cnn"]:
        x = conv_block(x, blk)                              # (B, H', W', C')
    # 'b c 1 t -> b c t' -> 'b c t -> b t c' ; here x is (B, 1, T', 128)
    h = x[:, 0, :, :]                                       # (B, T', 128)
    h = jnp.transpose(h, (1, 0, 2))                         # time-major (T', B, 128)

    # 2-layer bidirectional GRU (SingleOutputGRU == output sequence only)
    for layer in params["gru"]:
        h = bigru_layer(h, layer)                           # (T', B, 2H)

    # 'b t c -> b c t'; final Dropout is identity in eval mode
    return jnp.transpose(h, (1, 2, 0))                      # (B, 256, T')


if __name__ == "__main__":
    key = jax.random.PRNGKey(0)
    pkey, xkey = jax.random.split(key)
    params = init_params(pkey)

    B, F, T = 2, 128, 16          # F=128 required by 7x freq-pooling; T small
    logx = jax.random.normal(xkey, (B, F, T), jnp.float32)

    out = crnn_forward(logx, params)
    out = jax.block_until_ready(out)

    assert out.shape == (B, 256, T // 4), out.shape
    assert bool(jnp.all(jnp.isfinite(out)))
    print("KERNEL_OK")
</pallas_src>

<mosaic_0001>
module attributes {stable_mosaic.version = 11 : i64} {
  func.func @kernel(%arg0: i32, %arg1: memref<2048x9xbf16, #tpu.memory_space<vmem>>, %arg2: memref<9x16xbf16, #tpu.memory_space<vmem>>, %arg3: memref<1x16xf32, #tpu.memory_space<vmem>>, %arg4: memref<1x16xf32, #tpu.memory_space<vmem>>, %arg5: memref<1x16xf32, #tpu.memory_space<vmem>>, %arg6: memref<16x16xbf16, #tpu.memory_space<vmem>>, %arg7: memref<1x16xf32, #tpu.memory_space<vmem>>, %arg8: memref<512x16xf32, #tpu.memory_space<vmem>>) attributes {dimension_semantics = [#tpu.dimension_semantics<parallel>], iteration_bounds = array<i64: 2>, scalar_prefetch = 0 : i64, scratch_operands = 0 : i64, tpu.core_type = #tpu.core_type<tc>, window_params = [{transform_indices = @transform_0, window_bounds = array<i64: 2048, 9>}, {pipeline_mode = #tpu.pipeline_mode<synchronous>, transform_indices = @transform_1, window_bounds = array<i64: 9, 16>}, {pipeline_mode = #tpu.pipeline_mode<synchronous>, transform_indices = @transform_2, window_bounds = array<i64: 1, 16>}, {pipeline_mode = #tpu.pipeline_mode<synchronous>, transform_indices = @transform_3, window_bounds = array<i64: 1, 16>}, {pipeline_mode = #tpu.pipeline_mode<synchronous>, transform_indices = @transform_4, window_bounds = array<i64: 1, 16>}, {pipeline_mode = #tpu.pipeline_mode<synchronous>, transform_indices = @transform_5, window_bounds = array<i64: 16, 16>}, {pipeline_mode = #tpu.pipeline_mode<synchronous>, transform_indices = @transform_6, window_bounds = array<i64: 1, 16>}, {transform_indices = @transform_7, window_bounds = array<i64: 512, 16>}]} {
    %c0 = arith.constant 0 : index
    %c0_0 = arith.constant 0 : index
    %0 = vector.load %arg1[%c0, %c0_0] : memref<2048x9xbf16, #tpu.memory_space<vmem>>, vector<2048x9xbf16>
    %c0_1 = arith.constant 0 : index
    %c0_2 = arith.constant 0 : index
    %1 = vector.load %arg2[%c0_1, %c0_2] : memref<9x16xbf16, #tpu.memory_space<vmem>>, vector<9x16xbf16>
    %cst = arith.constant dense<0.000000e+00> : vector<2048x16xf32>
    %2 = tpu.matmul %0, %1, %cst {dimension_numbers = #tpu.dot_dimension_numbers<[1], [0], [0], [1], [0, 0, 1, 1], [], []>} : vector<2048x9xbf16>, vector<9x16xbf16>, vector<2048x16xf32> -> vector<2048x16xf32>
    %c0_3 = arith.constant 0 : index
    %c0_4 = arith.constant 0 : index
    %3 = vector.load %arg3[%c0_3, %c0_4] : memref<1x16xf32, #tpu.memory_space<vmem>>, vector<1x16xf32>
    %4 = vector.broadcast %3 : vector<1x16xf32> to vector<2048x16xf32>
    %5 = arith.addf %2, %4 : vector<2048x16xf32>
    %c0_5 = arith.constant 0 : index
    %c0_6 = arith.constant 0 : index
    %6 = vector.load %arg4[%c0_5, %c0_6] : memref<1x16xf32, #tpu.memory_space<vmem>>, vector<1x16xf32>
    %7 = vector.broadcast %6 : vector<1x16xf32> to vector<2048x16xf32>
    %8 = arith.mulf %5, %7 : vector<2048x16xf32>
    %c0_7 = arith.constant 0 : index
    %c0_8 = arith.constant 0 : index
    %9 = vector.load %arg5[%c0_7, %c0_8] : memref<1x16xf32, #tpu.memory_space<vmem>>, vector<1x16xf32>
    %10 = vector.broadcast %9 : vector<1x16xf32> to vector<2048x16xf32>
    %11 = arith.addf %8, %10 : vector<2048x16xf32>
    %12 = arith.truncf %11 : vector<2048x16xf32> to vector<2048x16xbf16>
    %c0_9 = arith.constant 0 : index
    %c0_10 = arith.constant 0 : index
    %13 = vector.load %arg6[%c0_9, %c0_10] : memref<16x16xbf16, #tpu.memory_space<vmem>>, vector<16x16xbf16>
    %cst_11 = arith.constant dense<0.000000e+00> : vector<2048x16xf32>
    %14 = tpu.matmul %12, %13, %cst_11 {dimension_numbers = #tpu.dot_dimension_numbers<[1], [0], [0], [1], [0, 0, 1, 1], [], []>} : vector<2048x16xbf16>, vector<16x16xbf16>, vector<2048x16xf32> -> vector<2048x16xf32>
    %c0_12 = arith.constant 0 : index
    %c0_13 = arith.constant 0 : index
    %15 = vector.load %arg7[%c0_12, %c0_13] : memref<1x16xf32, #tpu.memory_space<vmem>>, vector<1x16xf32>
    %16 = vector.broadcast %15 : vector<1x16xf32> to vector<2048x16xf32>
    %17 = arith.addf %14, %16 : vector<2048x16xf32>
    %18 = arith.negf %11 : vector<2048x16xf32>
    %19 = math.exp %18 : vector<2048x16xf32>
    %cst_14 = arith.constant 1.000000e+00 : f32
    %20 = vector.broadcast %cst_14 : f32 to vector<2048x16xf32>
    %21 = arith.addf %20, %19 : vector<2048x16xf32>
    %22 = arith.divf %20, %21 : vector<2048x16xf32>
    %23 = arith.mulf %22, %17 : vector<2048x16xf32>
    %24 = vector.extract_strided_slice %23 {offsets = [0, 0], sizes = [512, 16], strides = [1, 1]} : vector<2048x16xf32> to vector<512x16xf32>
    %25 = vector.extract_strided_slice %23 {offsets = [512, 0], sizes = [512, 16], strides = [1, 1]} : vector<2048x16xf32> to vector<512x16xf32>
    %26 = arith.addf %24, %25 : vector<512x16xf32>
    %27 = vector.extract_strided_slice %23 {offsets = [1024, 0], sizes = [512, 16], strides = [1, 1]} : vector<2048x16xf32> to vector<512x16xf32>
    %28 = arith.addf %26, %27 : vector<512x16xf32>
    %29 = vector.extract_strided_slice %23 {offsets = [1536, 0], sizes = [512, 16], strides = [1, 1]} : vector<2048x16xf32> to vector<512x16xf32>
    %30 = arith.addf %28, %29 : vector<512x16xf32>
    %cst_15 = arith.constant 2.500000e-01 : f32
    %31 = vector.broadcast %cst_15 : f32 to vector<512x16xf32>
    %32 = arith.mulf %30, %31 : vector<512x16xf32>
    %c0_16 = arith.constant 0 : index
    %c0_17 = arith.constant 0 : index
    %33 = vector.load %arg8[%c0_16, %c0_17] : memref<512x16xf32, #tpu.memory_space<vmem>>, vector<512x16xf32>
    tpu.vector_store %arg8[%c0_16, %c0_17], %32 {strides = array<i32>} : memref<512x16xf32, #tpu.memory_space<vmem>>, vector<512x16xf32>,
    return
  }
  func.func @transform_0(%arg0: i32) -> (i32, i32) {
    %c0_i32 = arith.constant 0 : i32
    %c0_i32_0 = arith.constant 0 : i32
    return %arg0, %c0_i32 : i32, i32
  }
  func.func @transform_1(%arg0: i32) -> (i32, i32) {
    %c0_i32 = arith.constant 0 : i32
    %c0_i32_0 = arith.constant 0 : i32
    %c0_i32_1 = arith.constant 0 : i32
    return %c0_i32, %c0_i32_0 : i32, i32
  }
  func.func @transform_2(%arg0: i32) -> (i32, i32) {
    %c0_i32 = arith.constant 0 : i32
    %c0_i32_0 = arith.constant 0 : i32
    %c0_i32_1 = arith.constant 0 : i32
    return %c0_i32, %c0_i32_0 : i32, i32
  }
  func.func @transform_3(%arg0: i32) -> (i32, i32) {
    %c0_i32 = arith.constant 0 : i32
    %c0_i32_0 = arith.constant 0 : i32
    %c0_i32_1 = arith.constant 0 : i32
    return %c0_i32, %c0_i32_0 : i32, i32
  }
  func.func @transform_4(%arg0: i32) -> (i32, i32) {
    %c0_i32 = arith.constant 0 : i32
    %c0_i32_0 = arith.constant 0 : i32
    %c0_i32_1 = arith.constant 0 : i32
    return %c0_i32, %c0_i32_0 : i32, i32
  }
  func.func @transform_5(%arg0: i32) -> (i32, i32) {
    %c0_i32 = arith.constant 0 : i32
    %c0_i32_0 = arith.constant 0 : i32
    %c0_i32_1 = arith.constant 0 : i32
    return %c0_i32, %c0_i32_0 : i32, i32
  }
  func.func @transform_6(%arg0: i32) -> (i32, i32) {
    %c0_i32 = arith.constant 0 : i32
    %c0_i32_0 = arith.constant 0 : i32
    %c0_i32_1 = arith.constant 0 : i32
    return %c0_i32, %c0_i32_0 : i32, i32
  }
  func.func @transform_7(%arg0: i32) -> (i32, i32) {
    %c0_i32 = arith.constant 0 : i32
    %c0_i32_0 = arith.constant 0 : i32
    return %arg0, %c0_i32 : i32, i32
  }
}

</mosaic_0001>

<bundles_post_ra>
// kernel: tpu_custom_call.1
= control target key start
LH: loop header
LB: loop body
LE: loop exit
PB: predicated region body
PF: predicated region fallthrough
CT: control target
= control target key end

     0   :  { %s9584_s24 = smov 0   ;;  %s14359_s0 = inlined_call_operand.vmem [shape: bf16[4096,9], index: 0, kind: input, shape index: {}]   ;;  %s14360_s1 = inlined_call_operand.vmem [shape: bf16[9,16], index: 1, kind: input, shape index: {}]   ;;  %s14361_s2 = inlined_call_operand.vmem [shape: f32[1,16], index: 2, kind: input, shape index: {}]   ;;  %s14362_s3 = inlined_call_operand.vmem [shape: f32[1,16], index: 3, kind: input, shape index: {}]   ;;  %s14363_s4 = inlined_call_operand.vmem [shape: f32[1,16], index: 4, kind: input, shape index: {}]   ;;  %s14364_s5 = inlined_call_operand.vmem [shape: bf16[16,16], index: 5, kind: input, shape index: {}]   ;;  %s14365_s6 = inlined_call_operand.vmem [shape: f32[1,16], index: 6, kind: input, shape index: {}]   ;;  %s14366_s7 = inlined_call_operand.vmem [shape: f32[1024,16], index: 7, kind: output, shape index: {}]  }
   0x1 LB: > { %s6921_s25 = sadd.s32 4294967295, %s9541_s24   ;;  %p6925_p0 = scmp.ge.s32.totalorder %s9541_s24, 1  ;;  %s9541_s24 = sphi %s9584_s24, %s17_s24  }
   0x2   : > { %p238_p1 = scmp.lt.s32.totalorder %s9541_s24, 3 }
   0x4   : > { %p239_p2 = pnand %p6925_p0, %p238_p1 }
   0x6   : > { %242 = sbr.rel (%p239_p2) target bundleno = 1046 (0x416), region = 48 }
   0xd   : > { %v8361_v0 = vld [vmem:[%s14360_s1] sm:$0x1f]   ;;  %vm1578_vm0 = vcmask 1043456   ;;  %vm1579_vm1 = vcmask 1044480   ;;  %s6926_s28 = sshll.u32 %s6921_s25, 8  ;;  %v9543_v1 = vmov 65535  }
   0xe   : > { %v1580_v2 = vsel %vm1578_vm0, 4294967295, %v9543_v1  ;;  %p271_p3 = scmp.lt.s32.totalorder %s6926_s28, 511  ;;  %vm1193_vm2 = vcmask 72704   ;;  %v8418_v31 = vld [vmem:[%s14364_s5] sm:$0xff]   ;;  %vm3311_vm3 = vcmask 130048   ;;  %s14012_s16 = sshll.u32 %s6921_s25, 6 }
   0xf   : > { %v1581_v3 = vsel %vm1579_vm1, %v1580_v2, 0  ;;  %8094 = vmatprep.subr.bf16.mxu1 %v8418_v31  ;;  %v9717_v61 = vld [vmem:[%s14361_s2] ss:$0 sm:$0xff]  ;;  %p277_p4 = scmp.lt.s32.totalorder %s14012_s16, 127 }
  0x10   : > { %v1583_v4 = vand.u32 %v8361_v0, %v1581_v3  ;;  %s15487_s28 = smov (!%p271_p3, %s6926_s28), 511  ;;  %8095 = vmatpush3.bf16.msra.mxu1 %v8418_v31  ;;  %v9723_v63 = vld [vmem:[%s14362_s3] ss:$0 sm:$0xff] }
  0x11   : > { %s6927_s29 = sshll.u32 %s15487_s28, 2  ;;  %s15489_s16 = smov (!%p277_p4, %s14012_s16), 127 }
  0x12   : > { %7836 = vmatprep.subr.bf16.mxu0 %v1583_v4  ;;  %s9600_s9 = scalar_lea.vmem %s14359_s0, %s6927_s29  ;;  %s6929_s25 = sshll.u32 %s15489_s16, 3 }
  0x13   : > { %7837 = vmatpush3.bf16.msra.mxu0 %v1583_v4  ;;  %v8362_v5 = vld [vmem:[%s9600_s9] sm:$0xff]   ;;  %v8363_v6 = vld [vmem:[%s9600_s9 + $0x8] sm:$0xff]   ;;  %v8364_v7 = vld [vmem:[%s9600_s9 + $0x10] sm:$0xff]   ;;  %s14050_s19 = scalar_lea.vmem %s14366_s7, %s6929_s25 }
  0x14   : > { %7838 = vmatprep.mubr.msk.bf16.mxu0 %vm1193_vm2, %v8362_v5  ;;  %v8365_v8 = vld [vmem:[%s9600_s9 + $0x18] sm:$0xff]   ;;  %v8366_v9 = vld [vmem:[%s9600_s9 + $0x20] sm:$0xff]   ;;  %v8367_v10 = vld [vmem:[%s9600_s9 + $0x28] sm:$0xff]  }
  0x15   : > { %v8368_v11 = vld [vmem:[%s9600_s9 + $0x30] sm:$0xff]   ;;  %v8369_v12 = vld [vmem:[%s9600_s9 + $0x38] sm:$0xff]   ;;  %v8370_v13 = vld [vmem:[%s9600_s9 + $0x40] sm:$0xff]  }
  0x16   : > { %7839 = vmatmul.mubr.msk.bf16.vlgmr.msra.gmra.mrb[0].mxu0 %vm1193_vm2, %v8363_v6  ;;  %v8371_v14 = vld [vmem:[%s9600_s9 + $0x48] sm:$0xff]   ;;  %v8372_v15 = vld [vmem:[%s9600_s9 + $0x50] sm:$0xff]   ;;  %v8373_v16 = vld [vmem:[%s9600_s9 + $0x58] sm:$0xff]  }
  0x17   : > { %7842 = vmatprep.mubr.msk.bf16.mxu0 %vm1193_vm2, %v8364_v7  ;;  %v8374_v17 = vld [vmem:[%s9600_s9 + $0x60] sm:$0xff]   ;;  %v8375_v18 = vld [vmem:[%s9600_s9 + $0x68] sm:$0xff]   ;;  %v8376_v19 = vld [vmem:[%s9600_s9 + $0x70] sm:$0xff]  }
  0x18   : > { %v8377_v20 = vld [vmem:[%s9600_s9 + $0x78] sm:$0xff]   ;;  %v8378_v21 = vld [vmem:[%s9600_s9 + $0x80] sm:$0xff]   ;;  %v8379_v22 = vld [vmem:[%s9600_s9 + $0x88] sm:$0xff]  }
  0x19   : > { %v8380_v23 = vld [vmem:[%s9600_s9 + $0x90] sm:$0xff]   ;;  %v8381_v24 = vld [vmem:[%s9600_s9 + $0x98] sm:$0xff]   ;;  %v8382_v25 = vld [vmem:[%s9600_s9 + $0xa0] sm:$0xff]  }
  0x1a   : > { %v8383_v26 = vld [vmem:[%s9600_s9 + $0xa8] sm:$0xff]   ;;  %v8384_v27 = vld [vmem:[%s9600_s9 + $0xb0] sm:$0xff]   ;;  %v8385_v28 = vld [vmem:[%s9600_s9 + $0xb8] sm:$0xff]  }
  0x1b   : > { %v8386_v29 = vld [vmem:[%s9600_s9 + $0xc0] sm:$0xff]   ;;  %v8387_v30 = vld [vmem:[%s9600_s9 + $0xc8] sm:$0xff]   ;;  %v8388_v32 = vld [vmem:[%s9600_s9 + $0xd0] sm:$0xff]  }
  0x1c   : > { %v8389_v33 = vld [vmem:[%s9600_s9 + $0xd8] sm:$0xff]   ;;  %v8390_v34 = vld [vmem:[%s9600_s9 + $0xe0] sm:$0xff]   ;;  %v8391_v35 = vld [vmem:[%s9600_s9 + $0xe8] sm:$0xff]  }
  0x1d   : > { %v8392_v36 = vld [vmem:[%s9600_s9 + $0xf0] sm:$0xff]   ;;  %v8393_v37 = vld [vmem:[%s9600_s9 + $0xf8] sm:$0xff]   ;;  %v8394_v38 = vld [vmem:[%s9600_s9 + $0x100] sm:$0xff]  }
  0x1e   : > { %7843 = vmatmul.mubr.msk.bf16.gmra.mrb[4].mxu0 %vm1193_vm2, %v8365_v8  ;;  %v8395_v39 = vld [vmem:[%s9600_s9 + $0x108] sm:$0xff]   ;;  %v8396_v40 = vld [vmem:[%s9600_s9 + $0x110] sm:$0xff]   ;;  %v8397_v41 = vld [vmem:[%s9600_s9 + $0x118] sm:$0xff]  }
  0x1f   : > { %7846 = vmatprep.mubr.msk.bf16.mxu0 %vm1193_vm2, %v8366_v9  ;;  %v8398_v42 = vld [vmem:[%s9600_s9 + $0x120] sm:$0xff]   ;;  %v8399_v43 = vld [vmem:[%s9600_s9 + $0x128] sm:$0xff]   ;;  %v8400_v44 = vld [vmem:[%s9600_s9 + $0x130] sm:$0xff]  }
  0x20   : > { %v8401_v45 = vld [vmem:[%s9600_s9 + $0x138] sm:$0xff]   ;;  %v8402_v46 = vld [vmem:[%s9600_s9 + $0x140] sm:$0xff]   ;;  %v8403_v47 = vld [vmem:[%s9600_s9 + $0x148] sm:$0xff]  }
  0x21   : > { %v8404_v48 = vld [vmem:[%s9600_s9 + $0x150] sm:$0xff]   ;;  %v8405_v49 = vld [vmem:[%s9600_s9 + $0x158] sm:$0xff]   ;;  %v8406_v50 = vld [vmem:[%s9600_s9 + $0x160] sm:$0xff]  }
  0x22   : > { %v8407_v51 = vld [vmem:[%s9600_s9 + $0x168] sm:$0xff]   ;;  %v8408_v52 = vld [vmem:[%s9600_s9 + $0x170] sm:$0xff]   ;;  %v8409_v53 = vld [vmem:[%s9600_s9 + $0x178] sm:$0xff]  }
  0x23   : > { %v8410_v54 = vld [vmem:[%s9600_s9 + $0x180] sm:$0xff]   ;;  %v8411_v55 = vld [vmem:[%s9600_s9 + $0x188] sm:$0xff]   ;;  %v8412_v56 = vld [vmem:[%s9600_s9 + $0x190] sm:$0xff]  }
  0x24   : > { %v8413_v57 = vld [vmem:[%s9600_s9 + $0x198] sm:$0xff]   ;;  %v8414_v58 = vld [vmem:[%s9600_s9 + $0x1a0] sm:$0xff]   ;;  %v8415_v59 = vld [vmem:[%s9600_s9 + $0x1a8] sm:$0xff]  }
  0x25   : > { %v8416_v60 = vld [vmem:[%s9600_s9 + $0x1b0] sm:$0xff]   ;;  %v8417_v2 = vld [vmem:[%s9600_s9 + $0x1b8] sm:$0xff]   ;;  %v8419_v5 = vld [vmem:[%s9600_s9 + $0x1c0] sm:$0xff]  }
  0x26   : > { %7847 = vmatmul.mubr.msk.bf16.gmra.mrb[8].mxu0 %vm1193_vm2, %v8367_v10  ;;  %v9734_v9 = vld [vmem:[%s14363_s4] ss:$0 sm:$0xff] }
  0x27   : > { %7850 = vmatprep.mubr.msk.bf16.mxu0 %vm1193_vm2, %v8368_v11 }
  0x2e   : > { %7851 = vmatmul.mubr.msk.bf16.gmra.mrb[12].mxu0 %vm1193_vm2, %v8369_v12 }
  0x2f   : > { %7854 = vmatprep.mubr.msk.bf16.mxu0 %vm1193_vm2, %v8370_v13 }
  0x36   : > { %7855 = vmatmul.mubr.msk.bf16.gmra.mrb[16].mxu0 %vm1193_vm2, %v8371_v14 }
  0x37   : > { %7858 = vmatprep.mubr.msk.bf16.mxu0 %vm1193_vm2, %v8372_v15 }
  0x3e   : > { %7859 = vmatmul.mubr.msk.bf16.gmra.mrb[20].mxu0 %vm1193_vm2, %v8373_v16 }
  0x3f   : > { %7862 = vmatprep.mubr.msk.bf16.mxu0 %vm1193_vm2, %v8374_v17 }
  0x46   : > { %7863 = vmatmul.mubr.msk.bf16.gmra.mrb[24].mxu0 %vm1193_vm2, %v8375_v18 }
  0x47   : > { %7866 = vmatprep.mubr.msk.bf16.mxu0 %vm1193_vm2, %v8376_v19 }
  0x4e   : > { %7867 = vmatmul.mubr.msk.bf16.gmra.mrb[28].mxu0 %vm1193_vm2, %v8377_v20 }
  0x4f   : > { %7870 = vmatprep.mubr.msk.bf16.mxu0 %vm1193_vm2, %v8378_v21 }
  0x56   : > { %7871 = vmatmul.mubr.msk.bf16.gmra.mrb[32].mxu0 %vm1193_vm2, %v8379_v22  ;;  %v8420_v22 = vld [vmem:[%s9600_s9 + $0x1c8] sm:$0xff]  }
  0x57   : > { %7874 = vmatprep.mubr.msk.bf16.mxu0 %vm1193_vm2, %v8380_v23 }
  0x5e   : > { %7875 = vmatmul.mubr.msk.bf16.gmra.mrb[36].mxu0 %vm1193_vm2, %v8381_v24 }
  0x5f   : > { %7878 = vmatprep.mubr.msk.bf16.mxu0 %vm1193_vm2, %v8382_v25 }
  0x66   : > { %7879 = vmatmul.mubr.msk.bf16.gmra.mrb[40].mxu0 %vm1193_vm2, %v8383_v26  ;;  %v8421_v26 = vld [vmem:[%s9600_s9 + $0x1d0] sm:$0xff]  }
  0x67   : > { %7882 = vmatprep.mubr.msk.bf16.mxu0 %vm1193_vm2, %v8384_v27 }
  0x6e   : > { %7883 = vmatmul.mubr.msk.bf16.gmra.mrb[44].mxu0 %vm1193_vm2, %v8385_v28 }
  0x6f   : > { %7886 = vmatprep.mubr.msk.bf16.mxu0 %vm1193_vm2, %v8386_v29 }
  0x76   : > { %7887 = vmatmul.mubr.msk.bf16.gmra.mrb[48].mxu0 %vm1193_vm2, %v8387_v30 }
  0x77   : > { %7890 = vmatprep.mubr.msk.bf16.mxu0 %vm1193_vm2, %v8388_v32 }
  0x7e   : > { %7891 = vmatmul.mubr.msk.bf16.gmra.mrb[52].mxu0 %vm1193_vm2, %v8389_v33 }
  0x7f   : > { %7894 = vmatprep.mubr.msk.bf16.mxu0 %vm1193_vm2, %v8390_v34 }
  0x86   : > { %7895 = vmatmul.mubr.msk.bf16.gmra.mrb[56].mxu0 %vm1193_vm2, %v8391_v35 }
  0x87   : > { %7898 = vmatprep.mubr.msk.bf16.mxu0 %vm1193_vm2, %v8392_v36 }
  0x8e   : > { %7899 = vmatmul.mubr.msk.bf16.gmra.mrb[60].mxu0 %vm1193_vm2, %v8393_v37 }
  0x8f   : > { %7902 = vmatprep.mubr.msk.bf16.mxu0 %vm1193_vm2, %v8394_v38 }
  0x96   : > { %7903 = vmatmul.mubr.msk.bf16.gmra.mrb[64].mxu0 %vm1193_vm2, %v8395_v39 }
  0x97   : > { %7906 = vmatprep.mubr.msk.bf16.mxu0 %vm1193_vm2, %v8396_v40 }
  0x9e   : > { %7907 = vmatmul.mubr.msk.bf16.gmra.mrb[68].mxu0 %vm1193_vm2, %v8397_v41 }
  0x9f   : > { %7910 = vmatprep.mubr.msk.bf16.mxu0 %vm1193_vm2, %v8398_v42  ;;  %v8422_v42 = vld [vmem:[%s9600_s9 + $0x1d8] sm:$0xff]  }
  0xa6   : > { %7911 = vmatmul.mubr.msk.bf16.gmra.mrb[72].mxu0 %vm1193_vm2, %v8399_v43 }
  0xa7   : > { %7914 = vmatprep.mubr.msk.bf16.mxu0 %vm1193_vm2, %v8400_v44 }
  0xae   : > { %7915 = vmatmul.mubr.msk.bf16.gmra.mrb[76].mxu0 %vm1193_vm2, %v8401_v45 }
  0xaf   : > { %7918 = vmatprep.mubr.msk.bf16.mxu0 %vm1193_vm2, %v8402_v46  ;;  %v8423_v46 = vld [vmem:[%s9600_s9 + $0x1e0] sm:$0xff]  }
  0xb6   : > { %7919 = vmatmul.mubr.msk.bf16.gmra.mrb[80].mxu0 %vm1193_vm2, %v8403_v47 }
  0xb7   : > { %7922 = vmatprep.mubr.msk.bf16.mxu0 %vm1193_vm2, %v8404_v48 }
  0xbe   : > { %7923 = vmatmul.mubr.msk.bf16.gmra.mrb[84].mxu0 %vm1193_vm2, %v8405_v49 }
  0xbf   : > { %7926 = vmatprep.mubr.msk.bf16.mxu0 %vm1193_vm2, %v8406_v50 }
  0xc6   : > { %7927 = vmatmul.mubr.msk.bf16.gmra.mrb[88].mxu0 %vm1193_vm2, %v8407_v51 }
  0xc7   : > { %7930 = vmatprep.mubr.msk.bf16.mxu0 %vm1193_vm2, %v8408_v52 }
  0xce   : > { %7931 = vmatmul.mubr.msk.bf16.gmra.mrb[92].mxu0 %vm1193_vm2, %v8409_v53 }
  0xcf   : > { %7934 = vmatprep.mubr.msk.bf16.mxu0 %vm1193_vm2, %v8410_v54 }
  0xd6   : > { %7935 = vmatmul.mubr.msk.bf16.gmra.mrb[96].mxu0 %vm1193_vm2, %v8411_v55 }
  0xd7   : > { %7938 = vmatprep.mubr.msk.bf16.mxu0 %vm1193_vm2, %v8412_v56 }
  0xde   : > { %7939 = vmatmul.mubr.msk.bf16.gmra.mrb[100].mxu0 %vm1193_vm2, %v8413_v57 }
  0xdf   : > { %7942 = vmatprep.mubr.msk.bf16.mxu0 %vm1193_vm2, %v8414_v58 }
  0xe6   : > { %7943 = vmatmul.mubr.msk.bf16.gmra.mrb[104].mxu0 %vm1193_vm2, %v8415_v59 }
  0xe7   : > { %7946 = vmatprep.mubr.msk.bf16.mxu0 %vm1193_vm2, %v8416_v60 }
  0xe9   : > { %v7840_v62 = vpop.f32.mrb[0].mxu0 }
  0xea   : > { %v1628_v0 = vadd.f32 %v7840_v62, %v9717_v61  ;;  %v1619_v1 = vpop.f32.mrb[1].mxu0 }
  0xeb   : > { %v1620_v3 = vadd.f32 %v9717_v61, %v1619_v1  ;;  %v7841_v4 = vpop.f32.mrb[2].mxu0 }
  0xec   : > { %v2651_v6 = vmul.f32 %v9723_v63, %v1628_v0  ;;  %v1631_v7 = vadd.f32 %v7841_v4, %v9717_v61  ;;  %v1622_v8 = vpop.f32.mrb[3].mxu0  ;;  %v8424_v0 = vld [vmem:[%s9600_s9 + $0x1e8] sm:$0xff]   ;;  %v8425_v4 = vld [vmem:[%s9600_s9 + $0x1f0] sm:$0xff]  }
  0xed   : > { %v2649_v10 = vmul.f32 %v9723_v63, %v1620_v3  ;;  %v1623_v11 = vadd.f32 %v9717_v61, %v1622_v8 }
  0xee   : > { %v2652_v12 = vmul.f32 %v9723_v63, %v1631_v7  ;;  %7947 = vmatmul.mubr.msk.bf16.gmra.mrb[108].mxu0 %vm1193_vm2, %v8417_v2  ;;  %v9743_v14 = vadd.f32 %v9734_v9, %v2651_v6 }
  0xef   : > { %v2650_v13 = vmul.f32 %v9723_v63, %v1623_v11  ;;  %7950 = vmatprep.mubr.msk.bf16.mxu0 %vm1193_vm2, %v8419_v5  ;;  %v9749_v17 = vadd.f32 %v9734_v9, %v2649_v10 }
  0xf0   : > { %v9746_v15 = vadd.f32 %v9734_v9, %v2652_v12 }
  0xf1   : > { %v7844_v16 = vpop.f32.mrb[4].mxu0  ;;  %v9752_v18 = vadd.f32 %v9734_v9, %v2650_v13 }
  0xf2   : > { %v3169_v19 = vpack.c.bf16 %v9746_v15, %v9743_v14  ;;  %v1644_v20 = vadd.f32 %v7844_v16, %v9717_v61  ;;  %v1635_v21 = vpop.f32.mrb[5].mxu0 }
  0xf3   : > { %v1636_v23 = vadd.f32 %v9717_v61, %v1635_v21  ;;  %v7845_v24 = vpop.f32.mrb[6].mxu0  ;;  %v3168_v25 = vpack.c.bf16 %v9752_v18, %v9749_v17 }
  0xf4   : > { %v2655_v27 = vmul.f32 %v9723_v63, %v1644_v20  ;;  %v1647_v28 = vadd.f32 %v7845_v24, %v9717_v61  ;;  %v1638_v29 = vpop.f32.mrb[7].mxu0 }
  0xf5   : > { %v2653_v30 = vmul.f32 %v9723_v63, %v1636_v23  ;;  %v1639_v31 = vadd.f32 %v9717_v61, %v1638_v29  ;;  %8096 = vmatprep.mubr.msk.bf16.mxu1 %vm3311_vm3, %v3168_v25  ;;  %v8426_v25 = vld [vmem:[%s9600_s9 + $0x1f8] sm:$0xff]   ;;  %v8427_v29 = vld [vmem:[%s9600_s9 + $0x200] sm:$0xff]  }
  0xf6   : > { %v2656_v32 = vmul.f32 %v9723_v63, %v1647_v28  ;;  %7951 = vmatmul.mubr.msk.bf16.gmra.mrb[112].mxu0 %vm1193_vm2, %v8420_v22  ;;  %8097 = vmatmul.mubr.msk.bf16.vlgmr.msra.gmra.mrb[0].mxu1 %vm3311_vm3, %v3169_v19  ;;  %v9773_v34 = vadd.f32 %v9734_v9, %v2655_v27 }
  0xf7   : > { %v2654_v33 = vmul.f32 %v9723_v63, %v1639_v31  ;;  %7954 = vmatprep.mubr.msk.bf16.mxu0 %vm1193_vm2, %v8421_v26  ;;  %v9779_v36 = vadd.f32 %v9734_v9, %v2653_v30 }
  0xf8   : > { %v9776_v35 = vadd.f32 %v9734_v9, %v2656_v32 }
  0xf9   : > { %v9782_v37 = vadd.f32 %v9734_v9, %v2654_v33  ;;  %v7848_v38 = vpop.f32.mrb[8].mxu0 }
  0xfa   : > { %v3171_v39 = vpack.c.bf16 %v9776_v35, %v9773_v34  ;;  %v1660_v40 = vadd.f32 %v7848_v38, %v9717_v61  ;;  %v1651_v41 = vpop.f32.mrb[9].mxu0 }
  0xfb   : > { %v3170_v43 = vpack.c.bf16 %v9782_v37, %v9779_v36  ;;  %v1652_v44 = vadd.f32 %v9717_v61, %v1651_v41  ;;  %v7849_v45 = vpop.f32.mrb[10].mxu0 }
  0xfc   : > { %v2659_v47 = vmul.f32 %v9723_v63, %v1660_v40  ;;  %v1663_v48 = vadd.f32 %v7849_v45, %v9717_v61  ;;  %v1654_v49 = vpop.f32.mrb[11].mxu0 }
  0xfd   : > { %v2657_v50 = vmul.f32 %v9723_v63, %v1652_v44  ;;  %v1655_v51 = vadd.f32 %v9717_v61, %v1654_v49  ;;  %8100 = vmatprep.mubr.msk.bf16.mxu1 %vm3311_vm3, %v3170_v43  ;;  %v8428_v49 = vld [vmem:[%s9600_s9 + $0x208] sm:$0xff]  }
  0xfe   : > { %v2660_v52 = vmul.f32 %v9723_v63, %v1663_v48  ;;  %7955 = vmatmul.mubr.msk.bf16.gmra.mrb[116].mxu0 %vm1193_vm2, %v8422_v42  ;;  %8101 = vmatmul.mubr.msk.bf16.gmra.mrb[4].mxu1 %vm3311_vm3, %v3171_v39  ;;  %v9803_v54 = vadd.f32 %v9734_v9, %v2659_v47 }
  0xff   : > { %v2658_v53 = vmul.f32 %v9723_v63, %v1655_v51  ;;  %7958 = vmatprep.mubr.msk.bf16.mxu0 %vm1193_vm2, %v8423_v46  ;;  %v9809_v56 = vadd.f32 %v9734_v9, %v2657_v50 }
 0x100   : > { %v9806_v55 = vadd.f32 %v9734_v9, %v2660_v52 }
 0x101   : > { %v9812_v57 = vadd.f32 %v9734_v9, %v2658_v53  ;;  %v7852_v58 = vpop.f32.mrb[12].mxu0  ;;  %v8429_v53 = vld [vmem:[%s9600_s9 + $0x210] sm:$0xff]  }
 0x102   : > { %v3173_v59 = vpack.c.bf16 %v9806_v55, %v9803_v54  ;;  %v1676_v60 = vadd.f32 %v7852_v58, %v9717_v61  ;;  %v1667_v62 = vpop.f32.mrb[13].mxu0 }
 0x103   : > { %v3172_v1 = vpack.c.bf16 %v9812_v57, %v9809_v56  ;;  %v1668_v2 = vadd.f32 %v9717_v61, %v1667_v62  ;;  %v7853_v3 = vpop.f32.mrb[14].mxu0 }
 0x104   : > { %v2663_v5 = vmul.f32 %v9723_v63, %v1676_v60  ;;  %v1679_v6 = vadd.f32 %v7853_v3, %v9717_v61  ;;  %v1670_v7 = vpop.f32.mrb[15].mxu0 }
 0x105   : > { %v2661_v8 = vmul.f32 %v9723_v63, %v1668_v2  ;;  %v1671_v10 = vadd.f32 %v9717_v61, %v1670_v7  ;;  %8104 = vmatprep.mubr.msk.bf16.mxu1 %vm3311_vm3, %v3172_v1 }
 0x106   : > { %v2664_v11 = vmul.f32 %v9723_v63, %v1679_v6  ;;  %7959 = vmatmul.mubr.msk.bf16.gmra.mrb[120].mxu0 %vm1193_vm2, %v8424_v0  ;;  %8105 = vmatmul.mubr.msk.bf16.gmra.mrb[8].mxu1 %vm3311_vm3, %v3173_v59  ;;  %v9833_v13 = vadd.f32 %v9734_v9, %v2663_v5 }
 0x107   : > { %v2662_v12 = vmul.f32 %v9723_v63, %v1671_v10  ;;  %7962 = vmatprep.mubr.msk.bf16.mxu0 %vm1193_vm2, %v8425_v4  ;;  %v9839_v19 = vadd.f32 %v9734_v9, %v2661_v8 }
 0x108   : > { %v9836_v16 = vadd.f32 %v9734_v9, %v2664_v11 }
 0x109   : > { %v9842_v20 = vadd.f32 %v9734_v9, %v2662_v12  ;;  %v7856_v21 = vpop.f32.mrb[16].mxu0  ;;  %v8430_v12 = vld [vmem:[%s9600_s9 + $0x218] sm:$0xff]  }
 0x10a   : > { %v3175_v22 = vpack.c.bf16 %v9836_v16, %v9833_v13  ;;  %v1692_v23 = vadd.f32 %v7856_v21, %v9717_v61  ;;  %v1683_v24 = vpop.f32.mrb[17].mxu0 }
 0x10b   : > { %v3174_v26 = vpack.c.bf16 %v9842_v20, %v9839_v19  ;;  %v1684_v27 = vadd.f32 %v9717_v61, %v1683_v24  ;;  %v7857_v28 = vpop.f32.mrb[18].mxu0  ;;  %v8431_v24 = vld [vmem:[%s9600_s9 + $0x220] sm:$0xff]  }
 0x10c   : > { %v2667_v30 = vmul.f32 %v9723_v63, %v1692_v23  ;;  %v1695_v31 = vadd.f32 %v7857_v28, %v9717_v61  ;;  %v1686_v32 = vpop.f32.mrb[19].mxu0 }
 0x10d   : > { %v2665_v33 = vmul.f32 %v9723_v63, %v1684_v27  ;;  %v1687_v38 = vadd.f32 %v9717_v61, %v1686_v32  ;;  %8108 = vmatprep.mubr.msk.bf16.mxu1 %vm3311_vm3, %v3174_v26 }
 0x10e   : > { %v2668_v39 = vmul.f32 %v9723_v63, %v1695_v31  ;;  %7963 = vmatmul.mubr.msk.bf16.gmra.mrb[124].mxu0 %vm1193_vm2, %v8426_v25  ;;  %8109 = vmatmul.mubr.msk.bf16.gmra.mrb[12].mxu1 %vm3311_vm3, %v3175_v22  ;;  %v9863_v41 = vadd.f32 %v9734_v9, %v2667_v30 }
 0x10f   : > { %v2666_v40 = vmul.f32 %v9723_v63, %v1687_v38  ;;  %7966 = vmatprep.mubr.msk.bf16.mxu0 %vm1193_vm2, %v8427_v29  ;;  %v9869_v43 = vadd.f32 %v9734_v9, %v2665_v33 }
 0x110   : > { %v9866_v42 = vadd.f32 %v9734_v9, %v2668_v39 }
 0x111   : > { %v9872_v44 = vadd.f32 %v9734_v9, %v2666_v40  ;;  %v7860_v45 = vpop.f32.mrb[20].mxu0 }
 0x112   : > { %v3177_v46 = vpack.c.bf16 %v9866_v42, %v9863_v41  ;;  %v1708_v47 = vadd.f32 %v7860_v45, %v9717_v61  ;;  %v1699_v48 = vpop.f32.mrb[21].mxu0 }
 0x113   : > { %v3176_v50 = vpack.c.bf16 %v9872_v44, %v9869_v43  ;;  %v1700_v51 = vadd.f32 %v9717_v61, %v1699_v48  ;;  %v7861_v52 = vpop.f32.mrb[22].mxu0 }
 0x114   : > { %v2671_v58 = vmul.f32 %v9723_v63, %v1708_v47  ;;  %v1711_v59 = vadd.f32 %v7861_v52, %v9717_v61  ;;  %v1702_v60 = vpop.f32.mrb[23].mxu0  ;;  %v8432_v47 = vld [vmem:[%s9600_s9 + $0x228] sm:$0xff]  }
 0x115   : > { %v2669_v62 = vmul.f32 %v9723_v63, %v1700_v51  ;;  %v1703_v0 = vadd.f32 %v9717_v61, %v1702_v60  ;;  %8112 = vmatprep.mubr.msk.bf16.mxu1 %vm3311_vm3, %v3176_v50  ;;  %v8433_v51 = vld [vmem:[%s9600_s9 + $0x230] sm:$0xff]  }
 0x116   : > { %v2672_v1 = vmul.f32 %v9723_v63, %v1711_v59  ;;  %7967 = vmatmul.mubr.msk.bf16.gmra.mrb[128].mxu0 %vm1193_vm2, %v8428_v49  ;;  %8113 = vmatmul.mubr.msk.bf16.gmra.mrb[16].mxu1 %vm3311_vm3, %v3177_v46  ;;  %v9893_v3 = vadd.f32 %v9734_v9, %v2671_v58 }
 0x117   : > { %v2670_v2 = vmul.f32 %v9723_v63, %v1703_v0  ;;  %7970 = vmatprep.mubr.msk.bf16.mxu0 %vm1193_vm2, %v8429_v53  ;;  %v9899_v5 = vadd.f32 %v9734_v9, %v2669_v62 }
 0x118   : > { %v9896_v4 = vadd.f32 %v9734_v9, %v2672_v1  ;;  %v7322_v1 = vmul.f32 -1.442695, %v9743_v14 }
 0x119   : > { %v9902_v6 = vadd.f32 %v9734_v9, %v2670_v2  ;;  %v7864_v7 = vpop.f32.mrb[24].mxu0 }
 0x11a   : > { %v3179_v8 = vpack.c.bf16 %v9896_v4, %v9893_v3  ;;  %v1724_v10 = vadd.f32 %v7864_v7, %v9717_v61  ;;  %v1715_v11 = vpop.f32.mrb[25].mxu0  ;;  %8491 = vpow2.f32 %v7322_v1 }
 0x11b   : > { %v3178_v21 = vpack.c.bf16 %v9902_v6, %v9899_v5  ;;  %v1716_v22 = vadd.f32 %v9717_v61, %v1715_v11  ;;  %v7865_v23 = vpop.f32.mrb[26].mxu0 }
 0x11c   : > { %v2675_v25 = vmul.f32 %v9723_v63, %v1724_v10  ;;  %v1727_v26 = vadd.f32 %v7865_v23, %v9717_v61  ;;  %v1718_v27 = vpop.f32.mrb[27].mxu0  ;;  %v7320_v10 = vmul.f32 -1.442695, %v9749_v17  ;;  %v8434_v23 = vld [vmem:[%s9600_s9 + $0x238] sm:$0xff]   ;;  %v8435_v17 = vld [vmem:[%s9600_s9 + $0x240] sm:$0xff]  }
 0x11d   : > { %v2673_v28 = vmul.f32 %v9723_v63, %v1716_v22  ;;  %v1719_v29 = vadd.f32 %v9717_v61, %v1718_v27  ;;  %8116 = vmatprep.mubr.msk.bf16.mxu1 %vm3311_vm3, %v3178_v21 }
 0x11e   : > { %v2676_v30 = vmul.f32 %v9723_v63, %v1727_v26  ;;  %7971 = vmatmul.mubr.msk.bf16.gmra.mrb[132].mxu0 %vm1193_vm2, %v8430_v12  ;;  %8117 = vmatmul.mubr.msk.bf16.gmra.mrb[20].mxu1 %vm3311_vm3, %v3179_v8  ;;  %v9923_v32 = vadd.f32 %v9734_v9, %v2675_v25  ;;  %8493 = vpow2.f32 %v7320_v10 }
 0x11f   : > { %v2674_v31 = vmul.f32 %v9723_v63, %v1719_v29  ;;  %7974 = vmatprep.mubr.msk.bf16.mxu0 %vm1193_vm2, %v8431_v24  ;;  %v9929_v38 = vadd.f32 %v9734_v9, %v2673_v28  ;;  %v7323_v24 = vmul.f32 -1.442695, %v9746_v15 }
 0x120   : > { %v9926_v33 = vadd.f32 %v9734_v9, %v2676_v30 }
 0x121   : > { %v9932_v39 = vadd.f32 %v9734_v9, %v2674_v31  ;;  %v7868_v40 = vpop.f32.mrb[28].mxu0  ;;  %8495 = vpow2.f32 %v7323_v24  ;;  %v7327_v24 = vmul.f32 -1.442695, %v9776_v35 }
 0x122   : > { %v3181_v45 = vpack.c.bf16 %v9926_v33, %v9923_v32  ;;  %v1731_v46 = vpop.f32.mrb[29].mxu0  ;;  %v1740_v49 = vadd.f32 %v7868_v40, %v9717_v61 }
 0x123   : > { %v3180_v48 = vpack.c.bf16 %v9932_v39, %v9929_v38  ;;  %v7869_v50 = vpop.f32.mrb[30].mxu0  ;;  %v1732_v52 = vadd.f32 %v9717_v61, %v1731_v46 }
 0x124   : > { %v1743_v53 = vadd.f32 %v7869_v50, %v9717_v61  ;;  %v1734_v58 = vpop.f32.mrb[31].mxu0  ;;  %v2679_v59 = vmul.f32 %v9723_v63, %v1740_v49  ;;  %v8492_v10 = vpop.eup %8491 }
 0x125   : > { %v1735_v60 = vadd.f32 %v9717_v61, %v1734_v58  ;;  %8120 = vmatprep.mubr.msk.bf16.mxu1 %vm3311_vm3, %v3180_v48  ;;  %v2677_v62 = vmul.f32 %v9723_v63, %v1732_v52  ;;  %v8436_v58 = vld [vmem:[%s9600_s9 + $0x248] sm:$0xff]   ;;  %v5523_v35 = vadd.f32 1.0, %v8492_v10 }
 0x126   : > { %v2680_v0 = vmul.f32 %v9723_v63, %v1743_v53  ;;  %7975 = vmatmul.mubr.msk.bf16.gmra.mrb[136].mxu0 %vm1193_vm2, %v8432_v47  ;;  %8121 = vmatmul.mubr.msk.bf16.gmra.mrb[24].mxu1 %vm3311_vm3, %v3181_v45  ;;  %v9954_v7 = vadd.f32 %v9734_v9, %v2679_v59  ;;  %v7321_v47 = vmul.f32 -1.442695, %v9752_v18  ;;  %v8437_v18 = vld [vmem:[%s9600_s9 + $0x250] sm:$0xff]  }
 0x127   : > { %v2678_v2 = vmul.f32 %v9723_v63, %v1735_v60  ;;  %7978 = vmatprep.mubr.msk.bf16.mxu0 %vm1193_vm2, %v8433_v51  ;;  %v9961_v11 = vadd.f32 %v9734_v9, %v2677_v62  ;;  %v7326_v62 = vmul.f32 -1.442695, %v9773_v34 }
 0x128   : > { %v9957_v8 = vadd.f32 %v9734_v9, %v2680_v0  ;;  %8497 = vpow2.f32 %v7321_v47 }
 0x129   : > { %v9964_v12 = vadd.f32 %v9734_v9, %v2678_v2  ;;  %v7872_v14 = vpop.f32.mrb[32].mxu0  ;;  %8499 = vpow2.f32 %v7326_v62 }
 0x12a   : > { %v3183_v21 = vpack.c.bf16 %v9957_v8, %v9954_v7  ;;  %v1747_v22 = vpop.f32.mrb[33].mxu0  ;;  %v1756_v27 = vadd.f32 %v7872_v14, %v9717_v61  ;;  %v7324_v14 = vmul.f32 -1.442695, %v9779_v36 }
 0x12b   : > { %v3182_v25 = vpack.c.bf16 %v9964_v12, %v9961_v11  ;;  %v7873_v26 = vpop.f32.mrb[34].mxu0  ;;  %v1748_v28 = vadd.f32 %v9717_v61, %v1747_v22 }
 0x12c   : > { %v1759_v29 = vadd.f32 %v7873_v26, %v9717_v61  ;;  %v1750_v30 = vpop.f32.mrb[35].mxu0  ;;  %v2683_v15 = vmul.f32 %v9723_v63, %v1756_v27  ;;  %v7325_v26 = vmul.f32 -1.442695, %v9782_v37  ;;  %8501 = vpow2.f32 %v7324_v14 }
 0x12d   : > { %v1751_v31 = vadd.f32 %v9717_v61, %v1750_v30  ;;  %8124 = vmatprep.mubr.msk.bf16.mxu1 %vm3311_vm3, %v3182_v25  ;;  %v2681_v40 = vmul.f32 %v9723_v63, %v1748_v28  ;;  %v8494_v25 = vpop.eup %8493  ;;  %8503 = vpow2.f32 %v7327_v24  ;;  %v7328_v14 = vmul.f32 -1.442695, %v9809_v56 }
 0x12e   : > { %v2684_v45 = vmul.f32 %v9723_v63, %v1759_v29  ;;  %7979 = vmatmul.mubr.msk.bf16.gmra.mrb[140].mxu0 %vm1193_vm2, %v8434_v23  ;;  %8125 = vmatmul.mubr.msk.bf16.gmra.mrb[28].mxu1 %vm3311_vm3, %v3183_v21  ;;  %v9987_v48 = vadd.f32 %v9734_v9, %v2683_v15  ;;  %v8496_v28 = vpop.eup %8495  ;;  %8505 = vpow2.f32 %v7325_v26 }
 0x12f   : > { %v2682_v46 = vmul.f32 %v9723_v63, %v1751_v31  ;;  %7982 = vmatprep.mubr.msk.bf16.mxu0 %vm1193_vm2, %v8435_v17  ;;  %v9996_v52 = vadd.f32 %v9734_v9, %v2681_v40  ;;  %v5521_v31 = vadd.f32 1.0, %v8494_v25  ;;  %8507 = vrcp.f32 %v5523_v35 }
 0x130   : > { %v9990_v49 = vadd.f32 %v9734_v9, %v2684_v45 }
 0x131   : > { %v9993_v50 = vadd.f32 %v9734_v9, %v2682_v46  ;;  %v7876_v51 = vpop.f32.mrb[36].mxu0  ;;  %v8438_v46 = vld [vmem:[%s9600_s9 + $0x258] sm:$0xff]   ;;  %8509 = vrcp.f32 %v5521_v31 }
 0x132   : > { %v1763_v53 = vpop.f32.mrb[37].mxu0  ;;  %v3185_v59 = vpack.c.bf16 %v9990_v49, %v9987_v48  ;;  %v1772_v1 = vadd.f32 %v7876_v51, %v9717_v61 }
 0x133   : > { %v7877_v60 = vpop.f32.mrb[38].mxu0  ;;  %v3184_v0 = vpack.c.bf16 %v9993_v50, %v9996_v52  ;;  %v1764_v21 = vadd.f32 %v9717_v61, %v1763_v53  ;;  %v8439_v53 = vld [vmem:[%s9600_s9 + $0x260] sm:$0xff]  }
 0x134   : > { %v1766_v2 = vpop.f32.mrb[39].mxu0  ;;  %v1775_v22 = vadd.f32 %v7877_v60, %v9717_v61  ;;  %v2687_v34 = vmul.f32 %v9723_v63, %v1772_v1 }
 0x135   : > { %v1767_v23 = vadd.f32 %v9717_v61, %v1766_v2  ;;  %8128 = vmatprep.mubr.msk.bf16.mxu1 %vm3311_vm3, %v3184_v0  ;;  %v2685_v17 = vmul.f32 %v9723_v63, %v1764_v21  ;;  %v8498_v2 = vpop.eup %8497 }
 0x136   : > { %7983 = vmatmul.mubr.msk.bf16.gmra.mrb[144].mxu0 %vm1193_vm2, %v8436_v58  ;;  %v2688_v36 = vmul.f32 %v9723_v63, %v1775_v22  ;;  %8129 = vmatmul.mubr.msk.bf16.gmra.mrb[32].mxu1 %vm3311_vm3, %v3185_v59  ;;  %v10021_v29 = vadd.f32 %v9734_v9, %v2687_v34  ;;  %v5524_v58 = vadd.f32 1.0, %v8496_v28  ;;  %v5522_v34 = vadd.f32 1.0, %v8498_v2  ;;  %v8500_v25 = vpop.eup %8499 }
 0x137   : > { %v2686_v27 = vmul.f32 %v9723_v63, %v1767_v23  ;;  %7986 = vmatprep.mubr.msk.bf16.mxu0 %vm1193_vm2, %v8437_v18  ;;  %v10027_v15 = vadd.f32 %v9734_v9, %v2685_v17  ;;  %v7330_v18 = vmul.f32 -1.442695, %v9803_v54  ;;  %v7331_v23 = vmul.f32 -1.442695, %v9806_v55  ;;  %v8440_v55 = vld [vmem:[%s9600_s9 + $0x268] sm:$0xff]   ;;  %v8502_v28 = vpop.eup %8501 }
 0x138   : > { %v10024_v37 = vadd.f32 %v9734_v9, %v2688_v36  ;;  %8511 = vrcp.f32 %v5524_v58  ;;  %v7334_v2 = vmul.f32 -1.442695, %v9833_v13  ;;  %v5525_v13 = vadd.f32 1.0, %v8502_v28 }
 0x139   : > { %v7880_v30 = vpop.f32.mrb[40].mxu0  ;;  %v10030_v40 = vadd.f32 %v9734_v9, %v2686_v27  ;;  %8513 = vpow2.f32 %v7330_v18 }
 0x13a   : > { %v1779_v45 = vpop.f32.mrb[41].mxu0  ;;  %v3187_v47 = vpack.c.bf16 %v10024_v37, %v10021_v29  ;;  %v1788_v62 = vadd.f32 %v7880_v30, %v9717_v61  ;;  %8515 = vpow2.f32 %v7328_v14  ;;  %v7329_v30 = vmul.f32 -1.442695, %v9812_v57 }
 0x13b   : > { %v7881_v51 = vpop.f32.mrb[42].mxu0  ;;  %v3186_v59 = vpack.c.bf16 %v10030_v40, %v10027_v15  ;;  %v1780_v0 = vadd.f32 %v9717_v61, %v1779_v45  ;;  %8517 = vpow2.f32 %v7331_v23  ;;  %v7332_v14 = vmul.f32 -1.442695, %v9839_v19 }
 0x13c   : > { %v1782_v60 = vpop.f32.mrb[43].mxu0  ;;  %v1791_v1 = vadd.f32 %v7881_v51, %v9717_v61  ;;  %v2691_v21 = vmul.f32 %v9723_v63, %v1788_v62  ;;  %8519 = vrcp.f32 %v5522_v34 }
 0x13d   : > { %v1783_v10 = vadd.f32 %v9717_v61, %v1782_v60  ;;  %8132 = vmatprep.mubr.msk.bf16.mxu1 %vm3311_vm3, %v3186_v59  ;;  %v2689_v54 = vmul.f32 %v9723_v63, %v1780_v0  ;;  %v5527_v59 = vadd.f32 1.0, %v8500_v25  ;;  %8521 = vpow2.f32 %v7329_v30 }
 0x13e   : > { %7987 = vmatmul.mubr.msk.bf16.gmra.mrb[148].mxu0 %vm1193_vm2, %v8438_v46  ;;  %v2692_v22 = vmul.f32 %v9723_v63, %v1791_v1  ;;  %8133 = vmatmul.mubr.msk.bf16.gmra.mrb[36].mxu1 %vm3311_vm3, %v3187_v47  ;;  %v10054_v26 = vadd.f32 %v9734_v9, %v2691_v21  ;;  %v8441_v46 = vld [vmem:[%s9600_s9 + $0x270] sm:$0xff]   ;;  %v8504_v47 = vpop.eup %8503 }
 0x13f   : > { %7990 = vmatprep.mubr.msk.bf16.mxu0 %vm1193_vm2, %v8439_v53  ;;  %v2690_v24 = vmul.f32 %v9723_v63, %v1783_v10  ;;  %v10066_v31 = vadd.f32 %v9734_v9, %v2689_v54  ;;  %v8506_v58 = vpop.eup %8505  ;;  %8523 = vrcp.f32 %v5527_v59  ;;  %v5528_v34 = vadd.f32 1.0, %v8504_v47 }
 0x140   : > { %v10057_v17 = vadd.f32 %v9734_v9, %v2692_v22  ;;  %v10073_v18 = vpop.eup %8507  ;;  %8525 = vpow2.f32 %v7334_v2  ;;  %v5526_v47 = vadd.f32 1.0, %v8506_v58 }
 0x141   : > { %v7884_v56 = vpop.f32.mrb[44].mxu0  ;;  %v10060_v36 = vadd.f32 %v9734_v9, %v2690_v24  ;;  %v10083_v10 = vpop.eup %8509  ;;  %8527 = vpow2.f32 %v7332_v14 }
 0x142   : > { %v1804_v27 = vadd.f32 %v7884_v56, %v9717_v61  ;;  %v1795_v35 = vpop.f32.mrb[45].mxu0  ;;  %v3189_v51 = vpack.c.bf16 %v10057_v17, %v10054_v26  ;;  %v10090_v24 = vpop.eup %8511  ;;  %v7335_v56 = vmul.f32 -1.442695, %v9836_v16  ;;  %v8443_v16 = vld [vmem:[%s9600_s9 + $0x280] sm:$0xff]   ;;  %8529 = vrcp.f32 %v5525_v13 }
 0x143   : > { %v7885_v45 = vpop.f32.mrb[46].mxu0  ;;  %v3188_v60 = vpack.c.bf16 %v10060_v36, %v10066_v31  ;;  %v1796_v62 = vadd.f32 %v9717_v61, %v1795_v35  ;;  %v8442_v35 = vld [vmem:[%s9600_s9 + $0x278] sm:$0xff]   ;;  %8531 = vrcp.f32 %v5528_v34 }
 0x144   : > { %v1798_v53 = vpop.f32.mrb[47].mxu0  ;;  %v2695_v57 = vmul.f32 %v9723_v63, %v1804_v27  ;;  %v1807_v0 = vadd.f32 %v7885_v45, %v9717_v61  ;;  %8533 = vpow2.f32 %v7335_v56 }
 0x145   : > { %v1799_v1 = vadd.f32 %v9717_v61, %v1798_v53  ;;  %8136 = vmatprep.mubr.msk.bf16.mxu1 %vm3311_vm3, %v3188_v60  ;;  %v2693_v21 = vmul.f32 %v9723_v63, %v1796_v62  ;;  %v7333_v60 = vmul.f32 -1.442695, %v9842_v20  ;;  %8535 = vrcp.f32 %v5526_v47 }
 0x146   : > { %7991 = vmatmul.mubr.msk.bf16.gmra.mrb[152].mxu0 %vm1193_vm2, %v8440_v55  ;;  %v2696_v54 = vmul.f32 %v9723_v63, %v1807_v0  ;;  %8137 = vmatmul.mubr.msk.bf16.gmra.mrb[40].mxu1 %vm3311_vm3, %v3189_v51  ;;  %v10094_v25 = vadd.f32 %v9734_v9, %v2695_v57  ;;  %v8514_v55 = vpop.eup %8513 }
 0x147   : > { %7994 = vmatprep.mubr.msk.bf16.mxu0 %vm1193_vm2, %v8441_v46  ;;  %v2694_v22 = vmul.f32 %v9723_v63, %v1799_v1  ;;  %v10101_v30 = vadd.f32 %v9734_v9, %v2693_v21  ;;  %v8516_v59 = vpop.eup %8515  ;;  %v5531_v0 = vadd.f32 1.0, %v8514_v55  ;;  %8537 = vpow2.f32 %v7333_v60  ;;  %v8444_v55 = vld [vmem:[%s9600_s9 + $0x288] sm:$0xff]  }
 0x148   : > { %v10097_v19 = vadd.f32 %v9734_v9, %v2696_v54  ;;  %v8518_v62 = vpop.eup %8517  ;;  %v5529_v20 = vadd.f32 1.0, %v8516_v59  ;;  %v8445_v59 = vld [vmem:[%s9600_s9 + $0x290] sm:$0xff]  }
 0x149   : > { %v7888_v23 = vpop.f32.mrb[48].mxu0  ;;  %v10104_v28 = vadd.f32 %v9734_v9, %v2694_v22  ;;  %v10116_v58 = vpop.eup %8519  ;;  %8539 = vrcp.f32 %v5531_v0 }
 0x14a   : > { %v1811_v27 = vpop.f32.mrb[49].mxu0  ;;  %v1820_v45 = vadd.f32 %v7888_v23, %v9717_v61  ;;  %v3191_v51 = vpack.c.bf16 %v10097_v19, %v10094_v25  ;;  %14510 = vst [vmem:[#allocation2_spill] sm:$0xff] %v10116_v58  ;;  %v8522_v13 = vpop.eup %8521  ;;  %v5532_v23 = vadd.f32 1.0, %v8518_v62  ;;  %8541 = vrcp.f32 %v5529_v20 }
 0x14b   : > { %v7889_v46 = vpop.f32.mrb[50].mxu0  ;;  %v3190_v57 = vpack.c.bf16 %v10104_v28, %v10101_v30  ;;  %v1812_v1 = vadd.f32 %v9717_v61, %v1811_v27  ;;  %v7338_v27 = vmul.f32 -1.442695, %v9863_v41  ;;  %v5530_v60 = vadd.f32 1.0, %v8522_v13 }
 0x14c   : > { %v1814_v53 = vpop.f32.mrb[51].mxu0  ;;  %v1823_v2 = vadd.f32 %v7889_v46, %v9717_v61  ;;  %v2699_v14 = vmul.f32 %v9723_v63, %v1820_v45  ;;  %v10128_v45 = vpop.eup %8523  ;;  %8543 = vrcp.f32 %v5532_v23 }
 0x14d   : > { %v1815_v21 = vadd.f32 %v9717_v61, %v1814_v53  ;;  %8140 = vmatprep.mubr.msk.bf16.mxu1 %vm3311_vm3, %v3190_v57  ;;  %v2697_v54 = vmul.f32 %v9723_v63, %v1812_v1  ;;  %14511 = vst [vmem:[#allocation3_spill] sm:$0xff] %v10128_v45  ;;  %v8526_v0 = vpop.eup %8525  ;;  %v7336_v1 = vmul.f32 -1.442695, %v9869_v43  ;;  %8545 = vpow2.f32 %v7338_v27 }
 0x14e   : > { %7995 = vmatmul.mubr.msk.bf16.gmra.mrb[156].mxu0 %vm1193_vm2, %v8442_v35  ;;  %v2700_v22 = vmul.f32 %v9723_v63, %v1823_v2  ;;  %8141 = vmatmul.mubr.msk.bf16.gmra.mrb[44].mxu1 %vm3311_vm3, %v3191_v51  ;;  %v10131_v46 = vadd.f32 %v9734_v9, %v2699_v14  ;;  %v8528_v14 = vpop.eup %8527  ;;  %8547 = vrcp.f32 %v5530_v60 }
 0x14f   : > { %7998 = vmatprep.mubr.msk.bf16.mxu0 %vm1193_vm2, %v8443_v16  ;;  %v2698_v34 = vmul.f32 %v9723_v63, %v1815_v21  ;;  %v10142_v41 = vadd.f32 %v9734_v9, %v2697_v54  ;;  %v7339_v21 = vmul.f32 -1.442695, %v9866_v42  ;;  %v10152_v54 = vpop.eup %8529  ;;  %v5535_v42 = vadd.f32 1.0, %v8526_v0 }
 0x150   : > { %v10134_v16 = vadd.f32 %v9734_v9, %v2700_v22  ;;  %14512 = vst [vmem:[#allocation4_spill] sm:$0xff] %v10152_v54  ;;  %v7337_v22 = vmul.f32 -1.442695, %v9872_v44  ;;  %8549 = vpow2.f32 %v7336_v1  ;;  %v8453_v54 = vld [vmem:[%s9600_s9 + $0x2d0] sm:$0xff]  }
 0x151   : > { %v7892_v56 = vpop.f32.mrb[52].mxu0  ;;  %v10137_v47 = vadd.f32 %v9734_v9, %v2698_v34  ;;  %v10159_v34 = vpop.eup %8531  ;;  %8551 = vpow2.f32 %v7339_v21 }
 0x152   : > { %v1827_v35 = vpop.f32.mrb[53].mxu0  ;;  %v1836_v51 = vadd.f32 %v7892_v56, %v9717_v61  ;;  %v3193_v2 = vpack.c.bf16 %v10134_v16, %v10131_v46  ;;  %14513 = vst [vmem:[#allocation5_spill] sm:$0xff] %v10159_v34  ;;  %v8534_v27 = vpop.eup %8533  ;;  %8553 = vpow2.f32 %v7337_v22 }
 0x153   : > { %v7893_v53 = vpop.f32.mrb[54].mxu0  ;;  %v1828_v57 = vadd.f32 %v9717_v61, %v1827_v35  ;;  %v3192_v20 = vpack.c.bf16 %v10137_v47, %v10142_v41  ;;  %v5533_v35 = vadd.f32 1.0, %v8528_v14  ;;  %8555 = vrcp.f32 %v5535_v42 }
 0x154   : > { %v1830_v62 = vpop.f32.mrb[55].mxu0  ;;  %v2703_v13 = vmul.f32 %v9723_v63, %v1836_v51  ;;  %v1839_v43 = vadd.f32 %v7893_v53, %v9717_v61  ;;  %v10166_v53 = vpop.eup %8535  ;;  %v5536_v21 = vadd.f32 1.0, %v8534_v27 }
 0x155   : > { %v1831_v23 = vadd.f32 %v9717_v61, %v1830_v62  ;;  %v2701_v56 = vmul.f32 %v9723_v63, %v1828_v57  ;;  %8144 = vmatprep.mubr.msk.bf16.mxu1 %vm3311_vm3, %v3192_v20  ;;  %14514 = vst [vmem:[#allocation6_spill] sm:$0xff] %v10166_v53  ;;  %v8446_v57 = vld [vmem:[%s9600_s9 + $0x298] sm:$0xff]   ;;  %v8538_v62 = vpop.eup %8537  ;;  %8557 = vrcp.f32 %v5533_v35  ;;  %v7340_v53 = vmul.f32 -1.442695, %v9899_v5 }
 0x156   : > { %7999 = vmatmul.mubr.msk.bf16.gmra.mrb[160].mxu0 %vm1193_vm2, %v8444_v55  ;;  %v2704_v44 = vmul.f32 %v9723_v63, %v1839_v43  ;;  %8145 = vmatmul.mubr.msk.bf16.gmra.mrb[48].mxu1 %vm3311_vm3, %v3193_v2  ;;  %v10171_v0 = vadd.f32 %v9734_v9, %v2703_v13  ;;  %v8447_v2 = vld [vmem:[%s9600_s9 + $0x2a0] sm:$0xff]   ;;  %v10178_v43 = vpop.eup %8539  ;;  %v7343_v5 = vmul.f32 -1.442695, %v9896_v4 }
 0x157   : > { %8002 = vmatprep.mubr.msk.bf16.mxu0 %vm1193_vm2, %v8445_v59  ;;  %v2702_v55 = vmul.f32 %v9723_v63, %v1831_v23  ;;  %v7342_v59 = vmul.f32 -1.442695, %v9893_v3  ;;  %14515 = vst [vmem:[#allocation7_spill] sm:$0xff] %v10178_v43  ;;  %v10181_v3 = vadd.f32 %v9734_v9, %v2701_v56  ;;  %v7346_v43 = vmul.f32 -1.442695, %v9923_v32 }
 0x158   : > { %v10174_v1 = vadd.f32 %v9734_v9, %v2704_v44  ;;  %v10188_v44 = vpop.eup %8541  ;;  %v7347_v32 = vmul.f32 -1.442695, %v9926_v33 }
 0x159   : > { %v7896_v51 = vpop.f32.mrb[56].mxu0  ;;  %v10184_v23 = vadd.f32 %v9734_v9, %v2702_v55  ;;  %14516 = vst [vmem:[#allocation8_spill] sm:$0xff] %v10188_v44  ;;  %8559 = vpow2.f32 %v7342_v59  ;;  %v10194_v56 = vpop.eup %8543 }
 0x15a   : > { %v1843_v60 = vpop.f32.mrb[57].mxu0  ;;  %v1852_v14 = vadd.f32 %v7896_v51, %v9717_v61  ;;  %v3195_v13 = vpack.c.bf16 %v10174_v1, %v10171_v0  ;;  %v5534_v51 = vadd.f32 1.0, %v8538_v62  ;;  %14517 = vst [vmem:[#allocation9_spill] sm:$0xff] %v10194_v56  ;;  %v8546_v59 = vpop.eup %8545  ;;  %8561 = vrcp.f32 %v5536_v21  ;;  %v8449_v56 = vld [vmem:[%s9600_s9 + $0x2b0] sm:$0xff]  }
 0x15b   : > { %v7897_v20 = vpop.f32.mrb[58].mxu0  ;;  %v3194_v42 = vpack.c.bf16 %v10184_v23, %v10181_v3  ;;  %v1844_v35 = vadd.f32 %v9717_v61, %v1843_v60  ;;  %8563 = vpow2.f32 %v7340_v53  ;;  %v5539_v4 = vadd.f32 1.0, %v8546_v59 }
 0x15c   : > { %v1846_v22 = vpop.f32.mrb[59].mxu0  ;;  %v2707_v27 = vmul.f32 %v9723_v63, %v1852_v14  ;;  %v1855_v55 = vadd.f32 %v7897_v20, %v9717_v61  ;;  %v10207_v20 = vpop.eup %8547  ;;  %8565 = vrcp.f32 %v5534_v51 }
 0x15d   : > { %v1847_v44 = vadd.f32 %v9717_v61, %v1846_v22  ;;  %8148 = vmatprep.mubr.msk.bf16.mxu1 %vm3311_vm3, %v3194_v42  ;;  %14518 = vst [vmem:[#allocation10_spill] sm:$0xff] %v10207_v20  ;;  %v8448_v22 = vld [vmem:[%s9600_s9 + $0x2a8] sm:$0xff]   ;;  %v8550_v42 = vpop.eup %8549  ;;  %8567 = vpow2.f32 %v7343_v5 }
 0x15e   : > { %8003 = vmatmul.mubr.msk.bf16.gmra.mrb[164].mxu0 %vm1193_vm2, %v8446_v57  ;;  %v2705_v57 = vmul.f32 %v9723_v63, %v1844_v35  ;;  %v2708_v62 = vmul.f32 %v9723_v63, %v1855_v55  ;;  %8149 = vmatmul.mubr.msk.bf16.gmra.mrb[52].mxu1 %vm3311_vm3, %v3195_v13  ;;  %v10212_v35 = vadd.f32 %v9734_v9, %v2707_v27  ;;  %v8552_v13 = vpop.eup %8551  ;;  %v7344_v27 = vmul.f32 -1.442695, %v9929_v38 }
 0x15f   : > { %8006 = vmatprep.mubr.msk.bf16.mxu0 %vm1193_vm2, %v8447_v2  ;;  %v2706_v60 = vmul.f32 %v9723_v63, %v1847_v44  ;;  %v7341_v2 = vmul.f32 -1.442695, %v9902_v6  ;;  %v8554_v20 = vpop.eup %8553 }
 0x160   : > { %v10215_v55 = vadd.f32 %v9734_v9, %v2708_v62  ;;  %v10220_v53 = vadd.f32 %v9734_v9, %v2705_v57  ;;  %v10229_v34 = vpop.eup %8555 }
 0x161   : > { %v7900_v14 = vpop.f32.mrb[60].mxu0  ;;  %v10223_v6 = vadd.f32 %v9734_v9, %v2706_v60  ;;  %14519 = vst [vmem:[#allocation11_spill] sm:$0xff] %v10229_v34  ;;  %8569 = vpow2.f32 %v7341_v2  ;;  %v10235_v60 = vpop.eup %8557 }
 0x162   : > { %v1859_v21 = vpop.f32.mrb[61].mxu0  ;;  %v1868_v51 = vadd.f32 %v7900_v14, %v9717_v61  ;;  %v3197_v62 = vpack.c.bf16 %v10215_v55, %v10212_v35  ;;  %14520 = vst [vmem:[#allocation12_spill] sm:$0xff] %v10235_v60  ;;  %8571 = vrcp.f32 %v5539_v4  ;;  %v5537_v14 = vadd.f32 1.0, %v8550_v42 }
 0x163   : > { %v7901_v44 = vpop.f32.mrb[62].mxu0  ;;  %v3196_v57 = vpack.c.bf16 %v10223_v6, %v10220_v53  ;;  %v1860_v5 = vadd.f32 %v9717_v61, %v1859_v21  ;;  %v8560_v38 = vpop.eup %8559  ;;  %8573 = vpow2.f32 %v7346_v43  ;;  %v7345_v43 = vmul.f32 -1.442695, %v9932_v39 }
 0x164   : > { %v1862_v59 = vpop.f32.mrb[63].mxu0  ;;  %v2711_v2 = vmul.f32 %v9723_v63, %v1868_v51  ;;  %v1871_v33 = vadd.f32 %v7901_v44, %v9717_v61  ;;  %8575 = vpow2.f32 %v7344_v27  ;;  %v8450_v51 = vld [vmem:[%s9600_s9 + $0x2b8] sm:$0xff]  }
 0x165   : > { %v1863_v34 = vadd.f32 %v9717_v61, %v1862_v59  ;;  %8152 = vmatprep.mubr.msk.bf16.mxu1 %vm3311_vm3, %v3196_v57  ;;  %v2709_v42 = vmul.f32 %v9723_v63, %v1860_v5  ;;  %8577 = vpow2.f32 %v7347_v32  ;;  %v5543_v59 = vadd.f32 1.0, %v8560_v38  ;;  %v8451_v57 = vld [vmem:[%s9600_s9 + $0x2c0] sm:$0xff]  }
 0x166   : > { %8007 = vmatmul.mubr.msk.bf16.gmra.mrb[168].mxu0 %vm1193_vm2, %v8448_v22  ;;  %v5540_v22 = vadd.f32 1.0, %v8552_v13  ;;  %8153 = vmatmul.mubr.msk.bf16.gmra.mrb[56].mxu1 %vm3311_vm3, %v3197_v62  ;;  %v2712_v4 = vmul.f32 %v9723_v63, %v1871_v33  ;;  %8579 = vrcp.f32 %v5537_v14  ;;  %v5538_v13 = vadd.f32 1.0, %v8554_v20  ;;  %v10273_v38 = vld [vmem:[%s14363_s4] ss:$0 sm:$0xff] }
 0x167   : > { %8010 = vmatprep.mubr.msk.bf16.mxu0 %vm1193_vm2, %v8449_v56  ;;  %v10245_v56 = vpop.eup %8561  ;;  %v2710_v44 = vmul.f32 %v9723_v63, %v1863_v34  ;;  %v10253_v62 = vadd.f32 %v9734_v9, %v2711_v2  ;;  %v10264_v63 = vld [vmem:[%s14361_s2] ss:$0 sm:$0xff]  ;;  %v7350_v14 = vmul.f32 -1.442695, %v9954_v7  ;;  %v7348_v33 = vmul.f32 -1.442695, %v9961_v11 }
 0x168   : > { %14521 = vst [vmem:[#allocation13_spill] sm:$0xff] %v10245_v56  ;;  %v8564_v5 = vpop.eup %8563  ;;  %v10256_v56 = vadd.f32 %v9734_v9, %v2712_v4  ;;  %8581 = vrcp.f32 %v5540_v22  ;;  %v10290_v11 = vld [vmem:[%s14362_s3] ss:$0 sm:$0xff] }
 0x169   : > { %v7904_v21 = vpop.f32.mrb[64].mxu0  ;;  %v10259_v39 = vadd.f32 %v9734_v9, %v2710_v44  ;;  %v10267_v32 = vpop.eup %8565  ;;  %v10276_v9 = vadd.f32 %v10273_v38, %v2709_v42  ;;  %8583 = vpow2.f32 %v7345_v43  ;;  %v5541_v7 = vadd.f32 1.0, %v8564_v5 }
 0x16a   : > { %v1875_v61 = vpop.f32.mrb[65].mxu0  ;;  %v1884_v34 = vadd.f32 %v10264_v63, %v7904_v21  ;;  %14522 = vst [vmem:[#allocation14_spill] sm:$0xff] %v10267_v32  ;;  %v3199_v21 = vpack.c.bf16 %v10256_v56, %v10253_v62  ;;  %v8568_v22 = vpop.eup %8567  ;;  %8585 = vrcp.f32 %v5538_v13  ;;  %v7351_v44 = vmul.f32 -1.442695, %v9957_v8 }
 0x16b   : > { %v7905_v27 = vpop.f32.mrb[66].mxu0  ;;  %v1876_v2 = vadd.f32 %v10264_v63, %v1875_v61  ;;  %v3198_v4 = vpack.c.bf16 %v10259_v39, %v10276_v9  ;;  %v8570_v42 = vpop.eup %8569  ;;  %8587 = vrcp.f32 %v5543_v59  ;;  %v5544_v5 = vadd.f32 1.0, %v8568_v22 }
 0x16c   : > { %v1878_v20 = vpop.f32.mrb[67].mxu0  ;;  %v2715_v43 = vmul.f32 %v10290_v11, %v1884_v34  ;;  %v1887_v61 = vadd.f32 %v10264_v63, %v7905_v27  ;;  %8589 = vpow2.f32 %v7350_v14  ;;  %v8452_v27 = vld [vmem:[%s9600_s9 + $0x2c8] sm:$0xff]   ;;  %v5542_v14 = vadd.f32 1.0, %v8570_v42 }
 0x16d   : > { %v2713_v13 = vmul.f32 %v10290_v11, %v1876_v2  ;;  %8156 = vmatprep.mubr.msk.bf16.mxu1 %vm3311_vm3, %v3198_v4  ;;  %8591 = vpow2.f32 %v7348_v33  ;;  %v7349_v2 = vmul.f32 -1.442695, %v9964_v12 }
 0x16e   : > { %8011 = vmatmul.mubr.msk.bf16.gmra.mrb[172].mxu0 %vm1193_vm2, %v8450_v51  ;;  %v10294_v51 = vpop.eup %8571  ;;  %v2716_v32 = vmul.f32 %v10290_v11, %v1887_v61  ;;  %8157 = vmatmul.mubr.msk.bf16.gmra.mrb[60].mxu1 %vm3311_vm3, %v3199_v21  ;;  %8593 = vrcp.f32 %v5541_v7  ;;  %v10306_v22 = vadd.f32 %v10273_v38, %v2715_v43 }
 0x16f   : > { %8014 = vmatprep.mubr.msk.bf16.mxu0 %vm1193_vm2, %v8451_v57  ;;  %14523 = vst [vmem:[#allocation15_spill] sm:$0xff] %v10294_v51  ;;  %v1879_v57 = vadd.f32 %v10264_v63, %v1878_v20  ;;  %v8574_v59 = vpop.eup %8573  ;;  %8595 = vpow2.f32 %v7351_v44  ;;  %v10315_v12 = vadd.f32 %v10273_v38, %v2713_v13 }
 0x170   : > { %v8576_v60 = vpop.eup %8575  ;;  %v10309_v33 = vadd.f32 %v10273_v38, %v2716_v32  ;;  %v5547_v7 = vadd.f32 1.0, %v8574_v59  ;;  %8597 = vrcp.f32 %v5544_v5  ;;  %v7354_v5 = vmul.f32 -1.442695, %v9987_v48 }
 0x171   : > { %v7908_v8 = vpop.f32.mrb[68].mxu0  ;;  %v2714_v20 = vmul.f32 %v10290_v11, %v1879_v57  ;;  %v8578_v4 = vpop.eup %8577  ;;  %v5545_v43 = vadd.f32 1.0, %v8576_v60  ;;  %8599 = vpow2.f32 %v7349_v2  ;;  %v7352_v48 = vmul.f32 -1.442695, %v9996_v52 }
 0x172   : > { %v1891_v34 = vpop.f32.mrb[69].mxu0  ;;  %v1900_v21 = vadd.f32 %v10264_v63, %v7908_v8  ;;  %v10312_v45 = vpop.eup %8579  ;;  %v3201_v32 = vpack.c.bf16 %v10309_v33, %v10306_v22  ;;  %v5548_v8 = vadd.f32 1.0, %v8578_v4  ;;  %8601 = vrcp.f32 %v5542_v14 }
 0x173   : > { %v7909_v51 = vpop.f32.mrb[70].mxu0  ;;  %14524 = vst [vmem:[#allocation16_spill] sm:$0xff] %v10312_v45  ;;  %v10318_v42 = vadd.f32 %v10273_v38, %v2714_v20  ;;  %v1892_v44 = vadd.f32 %v10264_v63, %v1891_v34  ;;  %v10324_v57 = vpop.eup %8581  ;;  %8603 = vrcp.f32 %v5547_v7 }
 0x174   : > { %v1894_v61 = vpop.f32.mrb[71].mxu0  ;;  %14525 = vst [vmem:[#allocation17_spill] sm:$0xff] %v10324_v57  ;;  %v8584_v59 = vpop.eup %8583  ;;  %v2719_v60 = vmul.f32 %v10290_v11, %v1900_v21  ;;  %v1903_v34 = vadd.f32 %v10264_v63, %v7909_v51  ;;  %8605 = vrcp.f32 %v5545_v43  ;;  %v8454_v21 = vld [vmem:[%s9600_s9 + $0x2d8] sm:$0xff]   ;;  %v8455_v57 = vld [vmem:[%s9600_s9 + $0x2e0] sm:$0xff]   ;;  %v7355_v43 = vmul.f32 -1.442695, %v9990_v49 }
 0x175   : > { %v3200_v13 = vpack.c.bf16 %v10318_v42, %v10315_v12  ;;  %v10332_v20 = vpop.eup %8585  ;;  %v1895_v2 = vadd.f32 %v10264_v63, %v1894_v61  ;;  %8607 = vrcp.f32 %v5548_v8  ;;  %v7353_v8 = vmul.f32 -1.442695, %v9993_v50 }
 0x176   : > { %8015 = vmatmul.mubr.msk.bf16.gmra.mrb[176].mxu0 %vm1193_vm2, %v8452_v27  ;;  %14526 = vst [vmem:[#allocation18_spill] sm:$0xff] %v10332_v20  ;;  %v2717_v27 = vmul.f32 %v10290_v11, %v1892_v44  ;;  %v10337_v4 = vpop.eup %8587  ;;  %v2720_v14 = vmul.f32 %v10290_v11, %v1903_v34  ;;  %v5546_v44 = vadd.f32 1.0, %v8584_v59  ;;  %8609 = vpow2.f32 %v7354_v5 }
 0x177   : > { %8018 = vmatprep.mubr.msk.bf16.mxu0 %vm1193_vm2, %v8453_v54  ;;  %8160 = vmatprep.mubr.msk.bf16.mxu1 %vm3311_vm3, %v3200_v13  ;;  %14527 = vst [vmem:[#allocation19_spill] sm:$0xff] %v10337_v4  ;;  %v8590_v7 = vpop.eup %8589  ;;  %v2718_v61 = vmul.f32 %v10290_v11, %v1895_v2  ;;  %v10348_v52 = vadd.f32 %v10273_v38, %v2719_v60  ;;  %8611 = vpow2.f32 %v7352_v48  ;;  %v7358_v48 = vmul.f32 -1.442695, %v10021_v29 }
 0x178   : > { %8161 = vmatmul.mubr.msk.bf16.gmra.mrb[64].mxu1 %vm3311_vm3, %v3201_v32  ;;  %v8592_v45 = vpop.eup %8591  ;;  %v10351_v32 = vadd.f32 %v10273_v38, %v2720_v14  ;;  %v10357_v59 = vadd.f32 %v10273_v38, %v2717_v27  ;;  %8613 = vrcp.f32 %v5546_v44 }
 0x179   : > { %v7912_v54 = vpop.f32.mrb[72].mxu0  ;;  %v10353_v4 = vpop.eup %8593  ;;  %v10360_v2 = vadd.f32 %v10273_v38, %v2718_v61  ;;  %v5549_v50 = vadd.f32 1.0, %v8592_v45  ;;  %8615 = vpow2.f32 %v7355_v43 }
 0x17a   : > { %v1907_v51 = vpop.f32.mrb[73].mxu0  ;;  %v1916_v20 = vadd.f32 %v10264_v63, %v7912_v54  ;;  %14528 = vst [vmem:[#allocation20_spill] sm:$0xff] %v10353_v4  ;;  %v8596_v49 = vpop.eup %8595  ;;  %v5551_v54 = vadd.f32 1.0, %v8590_v7  ;;  %v3203_v60 = vpack.c.bf16 %v10351_v32, %v10348_v52  ;;  %8617 = vpow2.f32 %v7353_v8 }
 0x17b   : > { %v7913_v13 = vpop.f32.mrb[74].mxu0  ;;  %v1908_v14 = vadd.f32 %v10264_v63, %v1907_v51  ;;  %v3202_v27 = vpack.c.bf16 %v10360_v2, %v10357_v59  ;;  %v7356_v51 = vmul.f32 -1.442695, %v10027_v15  ;;  %v8456_v15 = vld [vmem:[%s9600_s9 + $0x2e8] sm:$0xff]  }
 0x17c   : > { %v1910_v34 = vpop.f32.mrb[75].mxu0  ;;  %v1919_v5 = vadd.f32 %v10264_v63, %v7913_v13  ;;  %v2723_v61 = vmul.f32 %v10290_v11, %v1916_v20  ;;  %v10371_v13 = vpop.eup %8597  ;;  %8619 = vrcp.f32 %v5551_v54 }
 0x17d   : > { %14529 = vst [vmem:[#allocation21_spill] sm:$0xff] %v10371_v13  ;;  %v8600_v7 = vpop.eup %8599  ;;  %v1911_v45 = vadd.f32 %v10264_v63, %v1910_v34  ;;  %8164 = vmatprep.mubr.msk.bf16.mxu1 %vm3311_vm3, %v3202_v27  ;;  %v2721_v43 = vmul.f32 %v10290_v11, %v1908_v14  ;;  %8621 = vrcp.f32 %v5549_v50  ;;  %v8457_v27 = vld [vmem:[%s9600_s9 + $0x2f0] sm:$0xff]   ;;  %v7359_v50 = vmul.f32 -1.442695, %v10024_v37 }
 0x17e   : > { %8019 = vmatmul.mubr.msk.bf16.gmra.mrb[180].mxu0 %vm1193_vm2, %v8454_v21  ;;  %v2724_v21 = vmul.f32 %v10290_v11, %v1919_v5  ;;  %v10378_v44 = vpop.eup %8601  ;;  %v10387_v34 = vadd.f32 %v10273_v38, %v2723_v61  ;;  %8623 = vpow2.f32 %v7358_v48 }
 0x17f   : > { %8022 = vmatprep.mubr.msk.bf16.mxu0 %vm1193_vm2, %v8455_v57  ;;  %14530 = vst [vmem:[#allocation22_spill] sm:$0xff] %v10378_v44  ;;  %v5552_v57 = vadd.f32 1.0, %v8596_v49  ;;  %v10384_v13 = vpop.eup %8603  ;;  %v2722_v54 = vmul.f32 %v10290_v11, %v1911_v45  ;;  %8625 = vpow2.f32 %v7356_v51  ;;  %v10403_v45 = vadd.f32 %v10273_v38, %v2721_v43 }
 0x180   : > { %8165 = vmatmul.mubr.msk.bf16.gmra.mrb[68].mxu1 %vm3311_vm3, %v3203_v60  ;;  %14531 = vst [vmem:[#allocation23_spill] sm:$0xff] %v10384_v13  ;;  %v10390_v5 = vadd.f32 %v10273_v38, %v2724_v21  ;;  %v10394_v14 = vpop.eup %8605  ;;  %v5550_v60 = vadd.f32 1.0, %v8600_v7  ;;  %v7357_v51 = vmul.f32 -1.442695, %v10030_v40 }
 0x181   : > { %v7916_v20 = vpop.f32.mrb[76].mxu0  ;;  %14533 = vst [vmem:[#allocation25_spill] sm:$0xff] %v10394_v14  ;;  %v10397_v4 = vpop.eup %8607  ;;  %v10406_v13 = vadd.f32 %v10273_v38, %v2722_v54  ;;  %8627 = vrcp.f32 %v5552_v57  ;;  %v8459_v14 = vld [vmem:[%s9600_s9 + $0x300] sm:$0xff]  }
 0x182   : > { %v1932_v29 = vadd.f32 %v10264_v63, %v7916_v20  ;;  %v1923_v8 = vpop.f32.mrb[77].mxu0  ;;  %14532 = vst [vmem:[#allocation24_spill] sm:$0xff] %v10390_v5  ;;  %14534 = vst [vmem:[#allocation26_spill] sm:$0xff] %v10397_v4  ;;  %v3205_v61 = vpack.c.bf16 %v10390_v5, %v10387_v34  ;;  %v8610_v21 = vpop.eup %8609  ;;  %8629 = vrcp.f32 %v5550_v60  ;;  %v8458_v4 = vld [vmem:[%s9600_s9 + $0x2f8] sm:$0xff]  }
 0x183   : > { %v7917_v49 = vpop.f32.mrb[78].mxu0  ;;  %14535 = vst [vmem:[#allocation27_spill] sm:$0xff] %v10406_v13  ;;  %v1924_v7 = vadd.f32 %v10264_v63, %v1923_v8  ;;  %v3204_v43 = vpack.c.bf16 %v10406_v13, %v10403_v45  ;;  %8631 = vpow2.f32 %v7359_v50  ;;  %v7362_v50 = vmul.f32 -1.442695, %v10054_v26 }
 0x184   : > { %v1935_v20 = vadd.f32 %v10264_v63, %v7917_v49  ;;  %v1926_v44 = vpop.f32.mrb[79].mxu0  ;;  %v2727_v48 = vmul.f32 %v10290_v11, %v1932_v29  ;;  %v8612_v49 = vpop.eup %8611  ;;  %v5555_v29 = vadd.f32 1.0, %v8610_v21  ;;  %8633 = vpow2.f32 %v7357_v51 }
 0x185   : > { %v10416_v54 = vpop.eup %8613  ;;  %v2725_v40 = vmul.f32 %v10290_v11, %v1924_v7  ;;  %8168 = vmatprep.mubr.msk.bf16.mxu1 %vm3311_vm3, %v3204_v43  ;;  %v5553_v21 = vadd.f32 1.0, %v8612_v49 }
 0x186   : > { %8023 = vmatmul.mubr.msk.bf16.gmra.mrb[184].mxu0 %vm1193_vm2, %v8456_v15  ;;  %v2728_v37 = vmul.f32 %v10290_v11, %v1935_v20  ;;  %14536 = vst [vmem:[#allocation28_spill] sm:$0xff] %v10416_v54  ;;  %v8616_v15 = vpop.eup %8615  ;;  %v10419_v57 = vadd.f32 %v10273_v38, %v2727_v48  ;;  %8635 = vrcp.f32 %v5555_v29  ;;  %v7363_v29 = vmul.f32 -1.442695, %v10057_v17 }
 0x187   : > { %8026 = vmatprep.mubr.msk.bf16.mxu0 %vm1193_vm2, %v8457_v27  ;;  %v1927_v27 = vadd.f32 %v10264_v63, %v1926_v44  ;;  %v8618_v54 = vpop.eup %8617  ;;  %v5556_v26 = vadd.f32 1.0, %v8616_v15  ;;  %v10442_v58 = vadd.f32 %v10273_v38, %v2725_v40  ;;  %8637 = vrcp.f32 %v5553_v21 }
 0x188   : > { %v10423_v20 = vadd.f32 %v10273_v38, %v2728_v37  ;;  %8169 = vmatmul.mubr.msk.bf16.gmra.mrb[72].mxu1 %vm3311_vm3, %v3205_v61  ;;  %v10431_v13 = vpop.eup %8619  ;;  %v7360_v61 = vmul.f32 -1.442695, %v10066_v31  ;;  %8639 = vpow2.f32 %v7362_v50 }
 0x189   : > { %v7920_v8 = vpop.f32.mrb[80].mxu0  ;;  %14537 = vst [vmem:[#allocation29_spill] sm:$0xff] %v10431_v13  ;;  %v2726_v44 = vmul.f32 %v10290_v11, %v1927_v27  ;;  %v10438_v49 = vpop.eup %8621 }
 0x18a   : > { %v1939_v60 = vpop.f32.mrb[81].mxu0  ;;  %v3207_v7 = vpack.c.bf16 %v10423_v20, %v10419_v57  ;;  %v1948_v37 = vadd.f32 %v10264_v63, %v7920_v8  ;;  %14538 = vst [vmem:[#allocation30_spill] sm:$0xff] %v10438_v49  ;;  %v8624_v51 = vpop.eup %8623  ;;  %8641 = vpow2.f32 %v7360_v61 }
 0x18b   : > { %v7921_v48 = vpop.f32.mrb[82].mxu0  ;;  %v1940_v43 = vadd.f32 %v10264_v63, %v1939_v60  ;;  %v10445_v13 = vadd.f32 %v10273_v38, %v2726_v44  ;;  %v8626_v60 = vpop.eup %8625  ;;  %8643 = vrcp.f32 %v5556_v26  ;;  %v8461_v26 = vld [vmem:[%s9600_s9 + $0x310] sm:$0xff]  }
 0x18c   : > { %v1942_v5 = vpop.f32.mrb[83].mxu0  ;;  %v1951_v27 = vadd.f32 %v10264_v63, %v7921_v48  ;;  %v2731_v15 = vmul.f32 %v10290_v11, %v1948_v37  ;;  %v10456_v48 = vpop.eup %8627  ;;  %v5557_v61 = vadd.f32 1.0, %v8626_v60  ;;  %8645 = vpow2.f32 %v7363_v29 }
 0x18d   : > { %v1943_v8 = vadd.f32 %v10264_v63, %v1942_v5  ;;  %v3206_v31 = vpack.c.bf16 %v10445_v13, %v10442_v58  ;;  %v2729_v40 = vmul.f32 %v10290_v11, %v1940_v43  ;;  %14539 = vst [vmem:[#allocation31_spill] sm:$0xff] %v10456_v48  ;;  %v5554_v5 = vadd.f32 1.0, %v8618_v54  ;;  %v10459_v17 = vpop.eup %8629  ;;  %v8460_v43 = vld [vmem:[%s9600_s9 + $0x308] sm:$0xff]  }
 0x18e   : > { %8027 = vmatmul.mubr.msk.bf16.gmra.mrb[188].mxu0 %vm1193_vm2, %v8458_v4  ;;  %v7361_v4 = vmul.f32 -1.442695, %v10060_v36  ;;  %14540 = vst [vmem:[#allocation32_spill] sm:$0xff] %v10459_v17  ;;  %v8632_v48 = vpop.eup %8631  ;;  %v5559_v54 = vadd.f32 1.0, %v8624_v51 }
 0x18f   : > { %8030 = vmatprep.mubr.msk.bf16.mxu0 %vm1193_vm2, %v8459_v14  ;;  %v2732_v14 = vmul.f32 %v10290_v11, %v1951_v27  ;;  %v2730_v50 = vmul.f32 %v10290_v11, %v1943_v8  ;;  %8172 = vmatprep.mubr.msk.bf16.mxu1 %vm3311_vm3, %v3206_v31  ;;  %v10470_v27 = vadd.f32 %v10273_v38, %v2731_v15  ;;  %v8634_v60 = vpop.eup %8633 }
 0x190   : > { %8173 = vmatmul.mubr.msk.bf16.gmra.mrb[76].mxu1 %vm3311_vm3, %v3207_v7  ;;  %v10473_v8 = vadd.f32 %v10273_v38, %v2729_v40  ;;  %8647 = vpow2.f32 %v7361_v4  ;;  %v7366_v7 = vmul.f32 -1.442695, %v10094_v25 }
 0x191   : > { %v7924_v21 = vpop.f32.mrb[84].mxu0  ;;  %v10476_v31 = vadd.f32 %v10273_v38, %v2732_v14  ;;  %8649 = vrcp.f32 %v5554_v5  ;;  %v5560_v5 = vadd.f32 1.0, %v8632_v48 }
 0x192   : > { %v1964_v44 = vadd.f32 %v10264_v63, %v7924_v21  ;;  %v1955_v37 = vpop.f32.mrb[85].mxu0  ;;  %v10479_v21 = vadd.f32 %v10273_v38, %v2730_v50  ;;  %v10490_v50 = vpop.eup %8635  ;;  %8651 = vrcp.f32 %v5559_v54 }
 0x193   : > { %v1956_v36 = vadd.f32 %v10264_v63, %v1955_v37  ;;  %v7925_v17 = vpop.f32.mrb[86].mxu0  ;;  %14541 = vst [vmem:[#allocation33_spill] sm:$0xff] %v10476_v31  ;;  %v3209_v15 = vpack.c.bf16 %v10476_v31, %v10470_v27  ;;  %14543 = vst [vmem:[#allocation35_spill] sm:$0xff] %v10490_v50  ;;  %8653 = vrcp.f32 %v5557_v61 }
 0x194   : > { %14542 = vst [vmem:[#allocation34_spill] sm:$0xff] %v10479_v21  ;;  %v1958_v51 = vpop.f32.mrb[87].mxu0  ;;  %v1967_v29 = vadd.f32 %v10264_v63, %v7925_v17  ;;  %v3208_v40 = vpack.c.bf16 %v10479_v21, %v10473_v8  ;;  %v2735_v14 = vmul.f32 %v10290_v11, %v1964_v44  ;;  %v10496_v17 = vpop.eup %8637  ;;  %8655 = vpow2.f32 %v7366_v7 }
 0x195   : > { %v1959_v37 = vadd.f32 %v10264_v63, %v1958_v51  ;;  %v2733_v25 = vmul.f32 %v10290_v11, %v1956_v36  ;;  %14544 = vst [vmem:[#allocation36_spill] sm:$0xff] %v10496_v17  ;;  %v5558_v51 = vadd.f32 1.0, %v8634_v60  ;;  %v8640_v54 = vpop.eup %8639  ;;  %v7364_v36 = vmul.f32 -1.442695, %v10101_v30 }
 0x196   : > { %8031 = vmatmul.mubr.msk.bf16.gmra.mrb[192].mxu0 %vm1193_vm2, %v8460_v43  ;;  %v2736_v4 = vmul.f32 %v10290_v11, %v1967_v29  ;;  %8176 = vmatprep.mubr.msk.bf16.mxu1 %vm3311_vm3, %v3208_v40  ;;  %v10502_v61 = vadd.f32 %v10273_v38, %v2735_v14  ;;  %v8462_v40 = vld [vmem:[%s9600_s9 + $0x318] sm:$0xff]   ;;  %v8642_v17 = vpop.eup %8641  ;;  %v8463_v14 = vld [vmem:[%s9600_s9 + $0x320] sm:$0xff]   ;;  %8657 = vrcp.f32 %v5560_v5 }
 0x197   : > { %8034 = vmatprep.mubr.msk.bf16.mxu0 %vm1193_vm2, %v8461_v26  ;;  %v2734_v44 = vmul.f32 %v10290_v11, %v1959_v37  ;;  %v7367_v26 = vmul.f32 -1.442695, %v10097_v19  ;;  %v10509_v60 = vadd.f32 %v10273_v38, %v2733_v25  ;;  %v10518_v50 = vpop.eup %8643  ;;  %8659 = vrcp.f32 %v5558_v51 }
 0x198   : > { %v10505_v48 = vadd.f32 %v10273_v38, %v2736_v4  ;;  %8177 = vmatmul.mubr.msk.bf16.gmra.mrb[80].mxu1 %vm3311_vm3, %v3209_v15  ;;  %14545 = vst [vmem:[#allocation37_spill] sm:$0xff] %v10518_v50  ;;  %v7365_v4 = vmul.f32 -1.442695, %v10104_v28  ;;  %v8646_v21 = vpop.eup %8645  ;;  %v5563_v15 = vadd.f32 1.0, %v8640_v54  ;;  %v5561_v31 = vadd.f32 1.0, %v8642_v17 }
 0x199   : > { %v7928_v43 = vpop.f32.mrb[88].mxu0  ;;  %v10512_v7 = vadd.f32 %v10273_v38, %v2734_v44  ;;  %8661 = vpow2.f32 %v7364_v36 }
 0x19a   : > { %v1971_v29 = vpop.f32.mrb[89].mxu0  ;;  %v1980_v30 = vadd.f32 %v10264_v63, %v7928_v43  ;;  %v3211_v25 = vpack.c.bf16 %v10505_v48, %v10502_v61  ;;  %v8648_v50 = vpop.eup %8647  ;;  %8663 = vpow2.f32 %v7367_v26 }
 0x19b   : > { %v1972_v19 = vadd.f32 %v10264_v63, %v1971_v29  ;;  %v7929_v37 = vpop.f32.mrb[90].mxu0  ;;  %v3210_v43 = vpack.c.bf16 %v10512_v7, %v10509_v60  ;;  %v10534_v54 = vpop.eup %8649  ;;  %8665 = vpow2.f32 %v7365_v4 }
 0x19c   : > { %v1983_v49 = vadd.f32 %v10264_v63, %v7929_v37  ;;  %v1974_v44 = vpop.f32.mrb[91].mxu0  ;;  %v2739_v29 = vmul.f32 %v10290_v11, %v1980_v30  ;;  %v7370_v37 = vmul.f32 -1.442695, %v10131_v46  ;;  %14546 = vst [vmem:[#allocation38_spill] sm:$0xff] %v10534_v54  ;;  %v10543_v26 = vpop.eup %8651  ;;  %8667 = vrcp.f32 %v5563_v15 }
 0x19d   : > { %v1975_v28 = vadd.f32 %v10264_v63, %v1974_v44  ;;  %v2737_v51 = vmul.f32 %v10290_v11, %v1972_v19  ;;  %8180 = vmatprep.mubr.msk.bf16.mxu1 %vm3311_vm3, %v3210_v43  ;;  %14547 = vst [vmem:[#allocation39_spill] sm:$0xff] %v10543_v26  ;;  %v5564_v46 = vadd.f32 1.0, %v8646_v21  ;;  %v10546_v19 = vpop.eup %8653  ;;  %8669 = vrcp.f32 %v5561_v31  ;;  %v8464_v44 = vld [vmem:[%s9600_s9 + $0x328] sm:$0xff]   ;;  %v8465_v31 = vld [vmem:[%s9600_s9 + $0x330] sm:$0xff]  }
 0x19e   : > { %v2740_v5 = vmul.f32 %v10290_v11, %v1983_v49  ;;  %8035 = vmatmul.mubr.msk.bf16.gmra.mrb[196].mxu0 %vm1193_vm2, %v8462_v40  ;;  %v7368_v49 = vmul.f32 -1.442695, %v10142_v41  ;;  %v10538_v17 = vadd.f32 %v10273_v38, %v2739_v29  ;;  %14548 = vst [vmem:[#allocation40_spill] sm:$0xff] %v10546_v19  ;;  %v8656_v43 = vpop.eup %8655  ;;  %8671 = vpow2.f32 %v7370_v37 }
 0x19f   : > { %8038 = vmatprep.mubr.msk.bf16.mxu0 %vm1193_vm2, %v8463_v14  ;;  %v2738_v40 = vmul.f32 %v10290_v11, %v1975_v28  ;;  %v5562_v14 = vadd.f32 1.0, %v8648_v50  ;;  %v7371_v29 = vmul.f32 -1.442695, %v10134_v16  ;;  %v10553_v15 = vadd.f32 %v10273_v38, %v2737_v51 }
 0x1a0   : > { %v10541_v36 = vadd.f32 %v10273_v38, %v2740_v5  ;;  %8181 = vmatmul.mubr.msk.bf16.gmra.mrb[84].mxu1 %vm3311_vm3, %v3211_v25  ;;  %8673 = vpow2.f32 %v7368_v49  ;;  %v7369_v16 = vmul.f32 -1.442695, %v10137_v47  ;;  %v10567_v26 = vpop.eup %8657  ;;  %v5567_v25 = vadd.f32 1.0, %v8656_v43 }
 0x1a1   : > { %v7932_v30 = vpop.f32.mrb[92].mxu0  ;;  %v10556_v21 = vadd.f32 %v10273_v38, %v2738_v40  ;;  %8675 = vrcp.f32 %v5564_v46  ;;  %14549 = vst [vmem:[#allocation41_spill] sm:$0xff] %v10567_v26  ;;  %v7374_v47 = vmul.f32 -1.442695, %v10171_v0 }
 0x1a2   : > { %v3213_v41 = vpack.c.bf16 %v10541_v36, %v10538_v17  ;;  %v1987_v4 = vpop.f32.mrb[93].mxu0  ;;  %v1996_v50 = vadd.f32 %v10264_v63, %v7932_v30  ;;  %8677 = vrcp.f32 %v5562_v14 }
 0x1a3   : > { %v7933_v5 = vpop.f32.mrb[94].mxu0  ;;  %v1988_v28 = vadd.f32 %v10264_v63, %v1987_v4  ;;  %v3212_v51 = vpack.c.bf16 %v10556_v21, %v10553_v15  ;;  %8679 = vpow2.f32 %v7371_v29 }
 0x1a4   : > { %v1999_v19 = vadd.f32 %v10264_v63, %v7933_v5  ;;  %v1990_v37 = vpop.f32.mrb[95].mxu0  ;;  %v2743_v49 = vmul.f32 %v10290_v11, %v1996_v50  ;;  %v10573_v5 = vpop.eup %8659  ;;  %v7372_v50 = vmul.f32 -1.442695, %v10181_v3  ;;  %8681 = vpow2.f32 %v7369_v16  ;;  %v8466_v16 = vld [vmem:[%s9600_s9 + $0x338] sm:$0xff]  }
 0x1a5   : > { %v1991_v40 = vadd.f32 %v10264_v63, %v1990_v37  ;;  %v2741_v30 = vmul.f32 %v10290_v11, %v1988_v28  ;;  %14550 = vst [vmem:[#allocation42_spill] sm:$0xff] %v10573_v5  ;;  %8184 = vmatprep.mubr.msk.bf16.mxu1 %vm3311_vm3, %v3212_v51  ;;  %v8662_v43 = vpop.eup %8661  ;;  %8683 = vrcp.f32 %v5567_v25 }
 0x1a6   : > { %v2744_v4 = vmul.f32 %v10290_v11, %v1999_v19  ;;  %8039 = vmatmul.mubr.msk.bf16.gmra.mrb[200].mxu0 %vm1193_vm2, %v8464_v44  ;;  %v8664_v28 = vpop.eup %8663  ;;  %v10581_v19 = vadd.f32 %v10273_v38, %v2743_v49  ;;  %8685 = vpow2.f32 %v7374_v47 }
 0x1a7   : > { %v2742_v46 = vmul.f32 %v10290_v11, %v1991_v40  ;;  %8042 = vmatprep.mubr.msk.bf16.mxu0 %vm1193_vm2, %v8465_v31  ;;  %v8666_v37 = vpop.eup %8665  ;;  %v7375_v31 = vmul.f32 -1.442695, %v10174_v1  ;;  %v10591_v29 = vadd.f32 %v10273_v38, %v2741_v30  ;;  %v7373_v40 = vmul.f32 -1.442695, %v10184_v23 }
 0x1a8   : > { %14551 = vst [vmem:[#allocation43_spill] sm:$0xff] %v10581_v19  ;;  %v10584_v14 = vadd.f32 %v10273_v38, %v2744_v4  ;;  %v10594_v51 = vpop.eup %8667  ;;  %8185 = vmatmul.mubr.msk.bf16.gmra.mrb[88].mxu1 %vm3311_vm3, %v3213_v41  ;;  %v5565_v1 = vadd.f32 1.0, %v8662_v43  ;;  %8687 = vpow2.f32 %v7372_v50  ;;  %v5568_v26 = vadd.f32 1.0, %v8664_v28 }
 0x1a9   : > { %v10587_v0 = vadd.f32 %v10273_v38, %v2742_v46  ;;  %v7936_v44 = vpop.f32.mrb[96].mxu0  ;;  %14553 = vst [vmem:[#allocation45_spill] sm:$0xff] %v10594_v51  ;;  %v8467_v46 = vld [vmem:[%s9600_s9 + $0x340] sm:$0xff]   ;;  %v10601_v25 = vpop.eup %8669  ;;  %8689 = vpow2.f32 %v7375_v31  ;;  %v7378_v43 = vmul.f32 -1.442695, %v10212_v35 }
 0x1aa   : > { %14552 = vst [vmem:[#allocation44_spill] sm:$0xff] %v10584_v14  ;;  %v2003_v3 = vpop.f32.mrb[97].mxu0  ;;  %v3215_v49 = vpack.c.bf16 %v10584_v14, %v10581_v19  ;;  %14554 = vst [vmem:[#allocation46_spill] sm:$0xff] %v10601_v25  ;;  %v2012_v5 = vadd.f32 %v10264_v63, %v7936_v44  ;;  %v8672_v47 = vpop.eup %8671  ;;  %v5566_v19 = vadd.f32 1.0, %v8666_v37  ;;  %8691 = vpow2.f32 %v7373_v40 }
 0x1ab   : > { %v7937_v4 = vpop.f32.mrb[98].mxu0  ;;  %v3214_v30 = vpack.c.bf16 %v10587_v0, %v10591_v29  ;;  %v2004_v23 = vadd.f32 %v10264_v63, %v2003_v3  ;;  %v8674_v14 = vpop.eup %8673  ;;  %8693 = vrcp.f32 %v5565_v1  ;;  %v5571_v35 = vadd.f32 1.0, %v8672_v47 }
 0x1ac   : > { %v2006_v51 = vpop.f32.mrb[99].mxu0  ;;  %v2015_v54 = vadd.f32 %v10264_v63, %v7937_v4  ;;  %v2747_v50 = vmul.f32 %v10290_v11, %v2012_v5  ;;  %v10613_v44 = vpop.eup %8675  ;;  %8695 = vrcp.f32 %v5568_v26  ;;  %v5569_v5 = vadd.f32 1.0, %v8674_v14  ;;  %v8468_v14 = vld [vmem:[%s9600_s9 + $0x348] sm:$0xff]  }
 0x1ad   : > { %v2007_v41 = vadd.f32 %v10264_v63, %v2006_v51  ;;  %8188 = vmatprep.mubr.msk.bf16.mxu1 %vm3311_vm3, %v3214_v30  ;;  %14555 = vst [vmem:[#allocation47_spill] sm:$0xff] %v10613_v44  ;;  %v2745_v28 = vmul.f32 %v10290_v11, %v2004_v23  ;;  %v10619_v37 = vpop.eup %8677  ;;  %8697 = vpow2.f32 %v7378_v43  ;;  %v7376_v4 = vmul.f32 -1.442695, %v10220_v53  ;;  %v8469_v43 = vld [vmem:[%s9600_s9 + $0x350] sm:$0xff]  }
 0x1ae   : > { %8043 = vmatmul.mubr.msk.bf16.gmra.mrb[204].mxu0 %vm1193_vm2, %v8466_v16  ;;  %v2748_v3 = vmul.f32 %v10290_v11, %v2015_v54  ;;  %14556 = vst [vmem:[#allocation48_spill] sm:$0xff] %v10619_v37  ;;  %v10622_v31 = vadd.f32 %v10273_v38, %v2747_v50  ;;  %v8680_v54 = vpop.eup %8679  ;;  %8699 = vrcp.f32 %v5566_v19  ;;  %v7379_v47 = vmul.f32 -1.442695, %v10215_v55 }
 0x1af   : > { %v2746_v51 = vmul.f32 %v10290_v11, %v2007_v41  ;;  %8046 = vmatprep.mubr.msk.bf16.mxu0 %vm1193_vm2, %v8467_v46  ;;  %v10629_v46 = vadd.f32 %v10273_v38, %v2745_v28  ;;  %v8682_v30 = vpop.eup %8681  ;;  %8701 = vrcp.f32 %v5571_v35  ;;  %v7377_v50 = vmul.f32 -1.442695, %v10223_v6 }
 0x1b0   : > { %v10625_v16 = vadd.f32 %v10273_v38, %v2748_v3  ;;  %8189 = vmatmul.mubr.msk.bf16.gmra.mrb[92].mxu1 %vm3311_vm3, %v3215_v49  ;;  %v10640_v53 = vpop.eup %8683  ;;  %8703 = vrcp.f32 %v5569_v5  ;;  %v5572_v19 = vadd.f32 1.0, %v8680_v54  ;;  %v5570_v49 = vadd.f32 1.0, %v8682_v30 }
 0x1b1   : > { %v7940_v40 = vpop.f32.mrb[100].mxu0  ;;  %v10632_v1 = vadd.f32 %v10273_v38, %v2746_v51  ;;  %14557 = vst [vmem:[#allocation49_spill] sm:$0xff] %v10640_v53  ;;  %v8686_v51 = vpop.eup %8685  ;;  %8705 = vpow2.f32 %v7376_v4  ;;  %v7382_v6 = vmul.f32 -1.442695, %v10253_v62 }
 0x1b2   : > { %v2019_v26 = vpop.f32.mrb[101].mxu0  ;;  %v3217_v23 = vpack.c.bf16 %v10625_v16, %v10622_v31  ;;  %v2028_v55 = vadd.f32 %v10264_v63, %v7940_v40  ;;  %v8688_v44 = vpop.eup %8687  ;;  %8707 = vpow2.f32 %v7379_v47  ;;  %v5575_v4 = vadd.f32 1.0, %v8686_v51 }
 0x1b3   : > { %v7941_v41 = vpop.f32.mrb[102].mxu0  ;;  %v3216_v28 = vpack.c.bf16 %v10632_v1, %v10629_v46  ;;  %v2020_v37 = vadd.f32 %v10264_v63, %v2019_v26  ;;  %v8690_v54 = vpop.eup %8689  ;;  %8709 = vpow2.f32 %v7377_v50 }
 0x1b4   : > { %v2022_v3 = vpop.f32.mrb[103].mxu0  ;;  %v2031_v25 = vadd.f32 %v10264_v63, %v7941_v41  ;;  %v2751_v5 = vmul.f32 %v10290_v11, %v2028_v55  ;;  %v8692_v41 = vpop.eup %8691  ;;  %8711 = vrcp.f32 %v5572_v19  ;;  %v5576_v51 = vadd.f32 1.0, %v8690_v54  ;;  %v8471_v55 = vld [vmem:[%s9600_s9 + $0x360] sm:$0xff]  }
 0x1b5   : > { %v2023_v35 = vadd.f32 %v10264_v63, %v2022_v3  ;;  %8192 = vmatprep.mubr.msk.bf16.mxu1 %vm3311_vm3, %v3216_v28  ;;  %v2749_v40 = vmul.f32 %v10290_v11, %v2020_v37  ;;  %v10657_v62 = vpop.eup %8693  ;;  %8713 = vrcp.f32 %v5570_v49  ;;  %v8470_v28 = vld [vmem:[%s9600_s9 + $0x358] sm:$0xff]   ;;  %v7380_v54 = vmul.f32 -1.442695, %v10276_v9 }
 0x1b6   : > { %8047 = vmatmul.mubr.msk.bf16.gmra.mrb[208].mxu0 %vm1193_vm2, %v8468_v14  ;;  %v2752_v26 = vmul.f32 %v10290_v11, %v2031_v25  ;;  %v5573_v14 = vadd.f32 1.0, %v8688_v44  ;;  %14558 = vst [vmem:[#allocation50_spill] sm:$0xff] %v10657_v62  ;;  %v10660_v37 = vadd.f32 %v10273_v38, %v2751_v5  ;;  %v10669_v3 = vpop.eup %8695  ;;  %8715 = vpow2.f32 %v7382_v6 }
 0x1b7   : > { %8050 = vmatprep.mubr.msk.bf16.mxu0 %vm1193_vm2, %v8469_v43  ;;  %v2750_v30 = vmul.f32 %v10290_v11, %v2023_v35  ;;  %14559 = vst [vmem:[#allocation51_spill] sm:$0xff] %v10669_v3  ;;  %v10672_v44 = vadd.f32 %v10273_v38, %v2749_v40  ;;  %v8698_v49 = vpop.eup %8697  ;;  %8717 = vrcp.f32 %v5575_v4  ;;  %v5574_v35 = vadd.f32 1.0, %v8692_v41 }
 0x1b8   : > { %v10663_v43 = vadd.f32 %v10273_v38, %v2752_v26  ;;  %8193 = vmatmul.mubr.msk.bf16.gmra.mrb[96].mxu1 %vm3311_vm3, %v3217_v23  ;;  %8719 = vrcp.f32 %v5573_v14  ;;  %v7383_v23 = vmul.f32 -1.442695, %v10256_v56  ;;  %v5579_v14 = vadd.f32 1.0, %v8698_v49 }
 0x1b9   : > { %v7944_v47 = vpop.f32.mrb[104].mxu0  ;;  %v10666_v50 = vadd.f32 %v10273_v38, %v2750_v30  ;;  %v10678_v30 = vpop.eup %8699  ;;  %8721 = vrcp.f32 %v5576_v51  ;;  %v7381_v51 = vmul.f32 -1.442695, %v10259_v39 }
 0x1ba   : > { %v2035_v25 = vpop.f32.mrb[105].mxu0  ;;  %v3219_v5 = vpack.c.bf16 %v10663_v43, %v10660_v37  ;;  %14560 = vst [vmem:[#allocation52_spill] sm:$0xff] %v10678_v30  ;;  %v10683_v40 = vpop.eup %8701  ;;  %v2044_v3 = vadd.f32 %v10264_v63, %v7944_v47  ;;  %8723 = vrcp.f32 %v5574_v35  ;;  %v8472_v35 = vld [vmem:[%s9600_s9 + $0x368] sm:$0xff]  }
 0x1bb   : > { %v7945_v19 = vpop.f32.mrb[106].mxu0  ;;  %v3218_v6 = vpack.c.bf16 %v10666_v50, %v10672_v44  ;;  %14561 = vst [vmem:[#allocation53_spill] sm:$0xff] %v10683_v40  ;;  %v2036_v4 = vadd.f32 %v10264_v63, %v2035_v25  ;;  %v10690_v62 = vpop.eup %8703  ;;  %8725 = vpow2.f32 %v7380_v54 }
 0x1bc   : > { %v2038_v26 = vpop.f32.mrb[107].mxu0  ;;  %v2047_v41 = vadd.f32 %v10264_v63, %v7945_v19  ;;  %14562 = vst [vmem:[#allocation54_spill] sm:$0xff] %v10690_v62  ;;  %v8706_v56 = vpop.eup %8705  ;;  %v2755_v47 = vmul.f32 %v10290_v11, %v2044_v3  ;;  %8727 = vpow2.f32 %v7383_v23  ;;  %v8473_v23 = vld [vmem:[%s9600_s9 + $0x370] sm:$0xff]  }
 0x1bd   : > { %v2039_v9 = vadd.f32 %v10264_v63, %v2038_v26  ;;  %8196 = vmatprep.mubr.msk.bf16.mxu1 %vm3311_vm3, %v3218_v6  ;;  %v2753_v25 = vmul.f32 %v10290_v11, %v2036_v4  ;;  %v5577_v3 = vadd.f32 1.0, %v8706_v56  ;;  %8729 = vrcp.f32 %v5579_v14 }
 0x1be   : > { %8051 = vmatmul.mubr.msk.bf16.gmra.mrb[212].mxu0 %vm1193_vm2, %v8470_v28  ;;  %v2756_v19 = vmul.f32 %v10290_v11, %v2047_v41  ;;  %v8708_v28 = vpop.eup %8707  ;;  %v10705_v4 = vadd.f32 %v10273_v38, %v2755_v47  ;;  %8731 = vpow2.f32 %v7381_v51 }
 0x1bf   : > { %8054 = vmatprep.mubr.msk.bf16.mxu0 %vm1193_vm2, %v8471_v55  ;;  %v2754_v49 = vmul.f32 %v10290_v11, %v2039_v9  ;;  %v8710_v6 = vpop.eup %8709  ;;  %v7386_v55 = vmul.f32 -1.442695, %v10306_v22  ;;  %v5580_v22 = vadd.f32 1.0, %v8708_v28 }
 0x1c0   : > { %v10702_v40 = vpop.eup %8711  ;;  %v10708_v54 = vadd.f32 %v10273_v38, %v2756_v19  ;;  %8197 = vmatmul.mubr.msk.bf16.gmra.mrb[100].mxu1 %vm3311_vm3, %v3219_v5  ;;  %v5578_v30 = vadd.f32 1.0, %v8710_v6  ;;  %v7384_v5 = vmul.f32 -1.442695, %v10315_v12  ;;  %v7387_v6 = vmul.f32 -1.442695, %v10309_v33 }
 0x1c1   : > { %v7948_v26 = vpop.f32.mrb[108].mxu0  ;;  %14563 = vst [vmem:[#allocation55_spill] sm:$0xff] %v10702_v40  ;;  %v10711_v39 = vadd.f32 %v10273_v38, %v2754_v49  ;;  %v10715_v9 = vpop.eup %8713  ;;  %v10718_v40 = vadd.f32 %v10273_v38, %v2753_v25  ;;  %8733 = vpow2.f32 %v7386_v55  ;;  %v10741_v55 = vld [vmem:[%s14365_s6] ss:$0 sm:$0xff] }
 0x1c2   : > { %v2051_v62 = vpop.f32.mrb[109].mxu0  ;;  %14564 = vst [vmem:[#allocation56_spill] sm:$0xff] %v10708_v54  ;;  %14566 = vst [vmem:[#allocation58_spill] sm:$0xff] %v10715_v9  ;;  %v8716_v47 = vpop.eup %8715  ;;  %v3221_v19 = vpack.c.bf16 %v10708_v54, %v10705_v4  ;;  %v2060_v14 = vadd.f32 %v10264_v63, %v7948_v26  ;;  %8735 = vrcp.f32 %v5577_v3 }
 0x1c3   : > { %14565 = vst [vmem:[#allocation57_spill] sm:$0xff] %v10711_v39  ;;  %v7949_v41 = vpop.f32.mrb[110].mxu0  ;;  %v10722_v49 = vpop.eup %8717  ;;  %v3220_v9 = vpack.c.bf16 %v10711_v39, %v10718_v40  ;;  %v2052_v25 = vadd.f32 %v10264_v63, %v2051_v62  ;;  %8737 = vrcp.f32 %v5580_v22  ;;  %v5583_v12 = vadd.f32 1.0, %v8716_v47  ;;  %v8474_v47 = vld [vmem:[%s9600_s9 + $0x378] sm:$0xff]  }
 0x1c4   : > { %v2054_v56 = vpop.f32.mrb[111].mxu0  ;;  %14567 = vst [vmem:[#allocation59_spill] sm:$0xff] %v10722_v49  ;;  %v10729_v38 = vpop.eup %8719  ;;  %v2063_v28 = vadd.f32 %v10264_v63, %v7949_v41  ;;  %v2759_v26 = vmul.f32 %v10290_v11, %v2060_v14  ;;  %8739 = vrcp.f32 %v5578_v30  ;;  %v7390_v30 = vmul.f32 -1.442695, %v10348_v52 }
 0x1c5   : > { %14568 = vst [vmem:[#allocation60_spill] sm:$0xff] %v10729_v38  ;;  %v2055_v51 = vadd.f32 %v10264_v63, %v2054_v56  ;;  %8200 = vmatprep.mubr.msk.bf16.mxu1 %vm3311_vm3, %v3220_v9  ;;  %v10743_v62 = vpop.eup %8721  ;;  %v2757_v63 = vmul.f32 %v10290_v11, %v2052_v25  ;;  %8741 = vpow2.f32 %v7384_v5  ;;  %v7385_v9 = vmul.f32 -1.442695, %v10318_v42  ;;  %v10756_v25 = vld [vmem:[%s14363_s4] ss:$0 sm:$0xff] }
 0x1c6   : > { %8055 = vmatmul.mubr.msk.bf16.gmra.mrb[216].mxu0 %vm1193_vm2, %v8472_v35  ;;  %14569 = vst [vmem:[#allocation61_spill] sm:$0xff] %v10743_v62  ;;  %v2760_v35 = vmul.f32 %v10290_v11, %v2063_v28  ;;  %8743 = vpow2.f32 %v7387_v6  ;;  %v7388_v49 = vmul.f32 -1.442695, %v10357_v59 }
 0x1c7   : > { %8058 = vmatprep.mubr.msk.bf16.mxu0 %vm1193_vm2, %v8473_v23  ;;  %v2758_v3 = vmul.f32 %v10290_v11, %v2055_v51  ;;  %v10748_v23 = vpop.eup %8723  ;;  %v10759_v11 = vadd.f32 %v10756_v25, %v2759_v26  ;;  %v10768_v52 = vadd.f32 %v10756_v25, %v2757_v63  ;;  %v10776_v26 = vld [vmem:[%s14361_s2] ss:$0 sm:$0xff]  ;;  %8745 = vrcp.f32 %v5583_v12 }
 0x1c8   : > { %14570 = vst [vmem:[#allocation62_spill] sm:$0xff] %v10748_v23  ;;  %v8726_v14 = vpop.eup %8725  ;;  %v10762_v28 = vadd.f32 %v10756_v25, %v2760_v35  ;;  %8201 = vmatmul.mubr.msk.bf16.gmra.mrb[104].mxu1 %vm3311_vm3, %v3221_v19  ;;  %v8475_v23 = vld [vmem:[%s9600_s9 + $0x380] sm:$0xff]   ;;  %8747 = vpow2.f32 %v7385_v9 }
 0x1c9   : > { %v7952_v33 = vpop.f32.mrb[112].mxu0  ;;  %v8098_v41 = vpop.f32.mrb[0].mxu1  ;;  %v10771_v38 = vadd.f32 %v10756_v25, %v2758_v3  ;;  %v5581_v39 = vadd.f32 1.0, %v8726_v14  ;;  %8749 = vpow2.f32 %v7390_v30  ;;  %v10794_v12 = vld [vmem:[%s14362_s3] ss:$0 sm:$0xff] }
 0x1ca   : > { %v2067_v22 = vpop.f32.mrb[113].mxu0  ;;  %v3730_v56 = vpop.f32.mrb[1].mxu1  ;;  %14571 = vst [vmem:[#allocation63_spill] sm:$0xff] %v10762_v28  ;;  %v3739_v42 = vadd.f32 %v8098_v41, %v10741_v55  ;;  %v2076_v19 = vadd.f32 %v10776_v26, %v7952_v33  ;;  %v3223_v6 = vpack.c.bf16 %v10762_v28, %v10759_v11  ;;  %8751 = vpow2.f32 %v7388_v49 }
 0x1cb   : > { %v7953_v5 = vpop.f32.mrb[114].mxu0  ;;  %v8099_v51 = vpop.f32.mrb[2].mxu1  ;;  %14572 = vst [vmem:[#allocation64_spill] sm:$0xff] %v10771_v38  ;;  %v3222_v3 = vpack.c.bf16 %v10771_v38, %v10768_v52  ;;  %8753 = vrcp.f32 %v5581_v39 }
 0x1cc   : > { %v8728_v62 = vpop.eup %8727  ;;  %v2070_v35 = vpop.f32.mrb[115].mxu0  ;;  %v10788_v33 = vmul.f32 %v10073_v18, %v3739_v42  ;;  %v2763_v9 = vmul.f32 %v10794_v12, %v2076_v19 }
 0x1cd   : > { %v3733_v41 = vpop.f32.mrb[3].mxu1  ;;  %v10782_v63 = vpop.eup %8729  ;;  %v5584_v54 = vadd.f32 1.0, %v8728_v62  ;;  %v2079_v62 = vadd.f32 %v10776_v26, %v7953_v5  ;;  %8204 = vmatprep.mubr.msk.bf16.mxu1 %vm3311_vm3, %v3222_v3  ;;  %v2071_v14 = vadd.f32 %v10776_v26, %v2070_v35  ;;  %v7389_v35 = vmul.f32 -1.442695, %v10360_v2 }
 0x1ce   : > { %14573 = vst [vmem:[#allocation65_spill] sm:$0xff] %v10782_v63  ;;  %8059 = vmatmul.mubr.msk.bf16.gmra.mrb[220].mxu0 %vm1193_vm2, %v8474_v47  ;;  %v8732_v53 = vpop.eup %8731  ;;  %14574 = vst [vmem:[#allocation66_spill] sm:$0xff] %v10788_v33  ;;  %v2068_v63 = vadd.f32 %v10776_v26, %v2067_v22  ;;  %v3731_v47 = vadd.f32 %v10741_v55, %v3730_v56  ;;  %v7391_v22 = vmul.f32 -1.442695, %v10351_v32 }
 0x1cf   : > { %8062 = vmatprep.mubr.msk.bf16.mxu0 %vm1193_vm2, %v8475_v23  ;;  %v8734_v59 = vpop.eup %8733  ;;  %v3742_v23 = vadd.f32 %v8099_v51, %v10741_v55  ;;  %v2764_v19 = vmul.f32 %v10794_v12, %v2079_v62  ;;  %v2762_v32 = vmul.f32 %v10794_v12, %v2071_v14  ;;  %8755 = vrcp.f32 %v5584_v54 }
 0x1d0   : > { %v10801_v18 = vpop.eup %8735  ;;  %v2761_v56 = vmul.f32 %v10794_v12, %v2068_v63  ;;  %v10810_v5 = vmul.f32 %v10083_v10, %v3731_v47  ;;  %8205 = vmatmul.mubr.msk.bf16.gmra.mrb[108].mxu1 %vm3311_vm3, %v3223_v6  ;;  %v8477_v47 = vld [vmem:[%s9600_s9 + $0x390] sm:$0xff]   ;;  %v7394_v62 = vmul.f32 -1.442695, %v10387_v34  ;;  %v10825_v38 = vadd.f32 %v10756_v25, %v2763_v9 }
 0x1d1   : > { %14575 = vst [vmem:[#allocation67_spill] sm:$0xff] %v10801_v18  ;;  %v7956_v30 = vpop.f32.mrb[116].mxu0  ;;  %v8102_v42 = vpop.f32.mrb[4].mxu1  ;;  %v8476_v18 = vld [vmem:[%s9600_s9 + $0x388] sm:$0xff]   ;;  %v10828_v39 = vadd.f32 %v10756_v25, %v2764_v19  ;;  %v10835_v6 = vadd.f32 %v10756_v25, %v2762_v32  ;;  %v3734_v54 = vadd.f32 %v10741_v55, %v3733_v41  ;;  %v5582_v34 = vadd.f32 1.0, %v8732_v53  ;;  %v14585_v41 = vld [vmem:[#allocation2_spill] sm:$0xff] }
 0x1d2   : > { %v10805_v33 = vpop.eup %8737  ;;  %14577 = vst [vmem:[#allocation69_spill] sm:$0xff] %v10810_v5  ;;  %v2083_v3 = vpop.f32.mrb[117].mxu0  ;;  %14580 = vst [vmem:[#allocation72_spill] sm:$0xff] %v10825_v38  ;;  %v10832_v14 = vadd.f32 %v10756_v25, %v2761_v56  ;;  %8757 = vpow2.f32 %v7391_v22  ;;  %v2092_v22 = vadd.f32 %v10776_v26, %v7956_v30 }
 0x1d3   : > { %14576 = vst [vmem:[#allocation68_spill] sm:$0xff] %v10805_v33  ;;  %v3746_v49 = vpop.f32.mrb[5].mxu1  ;;  %v10814_v51 = vpop.eup %8739  ;;  %v10818_v33 = vmul.f32 %v10090_v24, %v3742_v23  ;;  %14581 = vst [vmem:[#allocation73_spill] sm:$0xff] %v10828_v39  ;;  %v7392_v23 = vmul.f32 -1.442695, %v10403_v45  ;;  %v3225_v9 = vpack.c.bf16 %v10828_v39, %v10825_v38  ;;  %8759 = vpow2.f32 %v7389_v35  ;;  %v14592_v38 = vld [vmem:[#allocation5_spill] sm:$0xff] }
 0x1d4   : > { %14578 = vst [vmem:[#allocation70_spill] sm:$0xff] %v10814_v51  ;;  %v7957_v63 = vpop.f32.mrb[118].mxu0  ;;  %v8103_v10 = vpop.f32.mrb[6].mxu1  ;;  %14582 = vst [vmem:[#allocation74_spill] sm:$0xff] %v10832_v14  ;;  %v5587_v51 = vadd.f32 1.0, %v8734_v59  ;;  %v3224_v56 = vpack.c.bf16 %v10835_v6, %v10832_v14  ;;  %8761 = vpow2.f32 %v7394_v62  ;;  %v10847_v53 = vmul.f32 %v14585_v41, %v3734_v54  ;;  %v14587_v54 = vld [vmem:[#allocation3_spill] sm:$0xff] }
 0x1d5   : > { %14579 = vst [vmem:[#allocation71_spill] sm:$0xff] %v10818_v33  ;;  %v8742_v5 = vpop.eup %8741  ;;  %v2086_v2 = vpop.f32.mrb[119].mxu0  ;;  %14583 = vst [vmem:[#allocation75_spill] sm:$0xff] %v10835_v6  ;;  %8763 = vpow2.f32 %v7392_v23  ;;  %v3747_v59 = vadd.f32 %v10741_v55, %v3746_v49  ;;  %v2767_v62 = vmul.f32 %v10794_v12, %v2092_v22  ;;  %v2084_v30 = vadd.f32 %v10776_v26, %v2083_v3  ;;  %v14589_v6 = vld [vmem:[#allocation4_spill] sm:$0xff] }
 0x1d6   : > { %v3749_v24 = vpop.f32.mrb[7].mxu1  ;;  %v8744_v33 = vpop.eup %8743  ;;  %8063 = vmatmul.mubr.msk.bf16.gmra.mrb[224].mxu0 %vm1193_vm2, %v8476_v18  ;;  %v5585_v45 = vadd.f32 1.0, %v8742_v5  ;;  %14586 = vst [vmem:[#allocation2_spill] sm:$0xff] %v10847_v53  ;;  %v3755_v18 = vadd.f32 %v8102_v42, %v10741_v55  ;;  %v2095_v5 = vadd.f32 %v10776_v26, %v7957_v63  ;;  %8208 = vmatprep.mubr.msk.bf16.mxu1 %vm3311_vm3, %v3224_v56  ;;  %v8478_v53 = vld [vmem:[%s9600_s9 + $0x398] sm:$0xff]   ;;  %8765 = vrcp.f32 %v5582_v34 }
 0x1d7   : > { %v10841_v19 = vpop.eup %8745  ;;  %8066 = vmatprep.mubr.msk.bf16.mxu0 %vm1193_vm2, %v8477_v47  ;;  %v3758_v42 = vadd.f32 %v8103_v10, %v10741_v55  ;;  %v10862_v56 = vmul.f32 %v14589_v6, %v3747_v59  ;;  %8767 = vrcp.f32 %v5587_v51  ;;  %v14591_v10 = vld [vmem:[#allocation24_spill] sm:$0xff]  ;;  %v2087_v51 = vadd.f32 %v10776_v26, %v2086_v2 }
 0x1d8   : > { %14584 = vst [vmem:[#allocation76_spill] sm:$0xff] %v10841_v19  ;;  %v8748_v32 = vpop.eup %8747  ;;  %v5588_v19 = vadd.f32 1.0, %v8744_v33  ;;  %v10856_v41 = vmul.f32 %v14587_v54, %v3755_v18  ;;  %v2768_v14 = vmul.f32 %v10794_v12, %v2095_v5  ;;  %8209 = vmatmul.mubr.msk.bf16.gmra.mrb[112].mxu1 %vm3311_vm3, %v3225_v9  ;;  %v8479_v54 = vld [vmem:[%s9600_s9 + $0x3a0] sm:$0xff]   ;;  %8769 = vrcp.f32 %v5585_v45  ;;  %v14598_v45 = vld [vmem:[#allocation27_spill] sm:$0xff] }
 0x1d9   : > { %v8750_v39 = vpop.eup %8749  ;;  %v7960_v35 = vpop.f32.mrb[120].mxu0  ;;  %v5586_v63 = vadd.f32 1.0, %v8748_v32  ;;  %14590 = vst [vmem:[#allocation4_spill] sm:$0xff] %v10862_v56  ;;  %v10871_v28 = vmul.f32 %v14592_v38, %v3758_v42  ;;  %v10880_v9 = vadd.f32 %v10756_v25, %v2767_v62  ;;  %v2765_v38 = vmul.f32 %v10794_v12, %v2084_v30  ;;  %v14599_v30 = vld [vmem:[#allocation6_spill] sm:$0xff]  ;;  %v14602_v56 = vld [vmem:[#allocation7_spill] sm:$0xff] }
 0x1da   : > { %v8106_v47 = vpop.f32.mrb[8].mxu1  ;;  %14588 = vst [vmem:[#allocation3_spill] sm:$0xff] %v10856_v41  ;;  %v2099_v33 = vpop.f32.mrb[121].mxu0  ;;  %v5591_v3 = vadd.f32 1.0, %v8750_v39  ;;  %v7395_v41 = vmul.f32 -1.442695, %v14591_v10  ;;  %v10883_v59 = vadd.f32 %v10756_v25, %v2768_v14  ;;  %8771 = vrcp.f32 %v5588_v19 }
 0x1db   : > { %v3762_v23 = vpop.f32.mrb[9].mxu1  ;;  %v8752_v49 = vpop.eup %8751  ;;  %14593 = vst [vmem:[#allocation24_spill] sm:$0xff] %v10871_v28  ;;  %14595 = vst [vmem:[#allocation77_spill] sm:$0xff] %v10880_v9  ;;  %v3750_v5 = vadd.f32 %v10741_v55, %v3749_v24  ;;  %8773 = vrcp.f32 %v5586_v63  ;;  %v7393_v10 = vmul.f32 -1.442695, %v14598_v45  ;;  %v2766_v19 = vmul.f32 %v10794_v12, %v2087_v51 }
 0x1dc   : > { %v7961_v22 = vpop.f32.mrb[122].mxu0  ;;  %v10866_v18 = vpop.f32.mrb[10].mxu1  ;;  %14596 = vst [vmem:[#allocation78_spill] sm:$0xff] %v10883_v59  ;;  %v5589_v42 = vadd.f32 1.0, %v8752_v49  ;;  %v3227_v62 = vpack.c.bf16 %v10883_v59, %v10880_v9  ;;  %8775 = vrcp.f32 %v5591_v3  ;;  %v7398_v2 = vmul.f32 -1.442695, %v10419_v57 }
 0x1dd   : > { %v10873_v34 = vpop.f32.mrb[123].mxu0  ;;  %v10875_v32 = vpop.f32.mrb[11].mxu1  ;;  %v10898_v24 = vmul.f32 %v14599_v30, %v3750_v5  ;;  %8777 = vpow2.f32 %v7395_v41  ;;  %v7396_v49 = vmul.f32 -1.442695, %v10442_v58  ;;  %v2108_v63 = vadd.f32 %v10776_v26, %v7960_v35  ;;  %v8480_v35 = vld [vmem:[%s9600_s9 + $0x3a8] sm:$0xff]  }
 0x1de   : > { %v10877_v6 = vpop.eup %8753  ;;  %8067 = vmatmul.mubr.msk.bf16.gmra.mrb[228].mxu0 %vm1193_vm2, %v8478_v53  ;;  %v3771_v45 = vadd.f32 %v8106_v47, %v10741_v55  ;;  %v10904_v57 = vadd.f32 %v10756_v25, %v2765_v38  ;;  %v10907_v51 = vadd.f32 %v10756_v25, %v2766_v19  ;;  %v3763_v5 = vadd.f32 %v10741_v55, %v3762_v23  ;;  %v8481_v23 = vld [vmem:[%s9600_s9 + $0x3b0] sm:$0xff]  }
 0x1df   : > { %14594 = vst [vmem:[#allocation5_spill] sm:$0xff] %v10877_v6  ;;  %v10886_v39 = vpop.eup %8755  ;;  %8070 = vmatprep.mubr.msk.bf16.mxu0 %vm1193_vm2, %v8479_v54  ;;  %14600 = vst [vmem:[#allocation27_spill] sm:$0xff] %v10898_v24  ;;  %v2111_v41 = vadd.f32 %v10776_v26, %v7961_v22  ;;  %8779 = vpow2.f32 %v7393_v10  ;;  %v2100_v38 = vadd.f32 %v10776_v26, %v2099_v33  ;;  %v14605_v33 = vld [vmem:[#allocation8_spill] sm:$0xff] }
 0x1e0   : > { %14597 = vst [vmem:[#allocation79_spill] sm:$0xff] %v10886_v39  ;;  %v8758_v14 = vpop.eup %8757  ;;  %14601 = vst [vmem:[#allocation6_spill] sm:$0xff] %v10907_v51  ;;  %v10917_v39 = vmul.f32 %v14602_v56, %v3771_v45  ;;  %8781 = vrcp.f32 %v5589_v42  ;;  %v3226_v22 = vpack.c.bf16 %v10907_v51, %v10904_v57  ;;  %v2771_v59 = vmul.f32 %v10794_v12, %v2108_v63 }
 0x1e1   : > { %v8760_v53 = vpop.eup %8759  ;;  %v7964_v28 = vpop.f32.mrb[124].mxu0  ;;  %v5592_v24 = vadd.f32 1.0, %v8758_v14  ;;  %8783 = vpow2.f32 %v7398_v2  ;;  %v10935_v45 = vmul.f32 %v14605_v33, %v3763_v5  ;;  %v7399_v42 = vmul.f32 -1.442695, %v10423_v20 }
 0x1e2   : > { %v8110_v54 = vpop.f32.mrb[12].mxu1  ;;  %v8762_v3 = vpop.eup %8761  ;;  %14603 = vst [vmem:[#allocation7_spill] sm:$0xff] %v10917_v39  ;;  %v5590_v56 = vadd.f32 1.0, %v8760_v53  ;;  %8785 = vpow2.f32 %v7396_v49  ;;  %v2772_v51 = vmul.f32 %v10794_v12, %v2111_v41  ;;  %v3774_v63 = vadd.f32 %v10866_v18, %v10741_v55  ;;  %8212 = vmatprep.mubr.msk.bf16.mxu1 %vm3311_vm3, %v3226_v22  ;;  %v14611_v41 = vld [vmem:[#allocation9_spill] sm:$0xff] }
 0x1e3   : > { %v10911_v30 = vpop.f32.mrb[125].mxu0  ;;  %v10913_v58 = vpop.f32.mrb[13].mxu1  ;;  %14606 = vst [vmem:[#allocation8_spill] sm:$0xff] %v10935_v45  ;;  %8787 = vrcp.f32 %v5592_v24  ;;  %v5595_v2 = vadd.f32 1.0, %v8762_v3  ;;  %v2769_v5 = vmul.f32 %v10794_v12, %v2100_v38  ;;  %8213 = vmatmul.mubr.msk.bf16.gmra.mrb[116].mxu1 %vm3311_vm3, %v3227_v62  ;;  %v10953_v49 = vadd.f32 %v10756_v25, %v2771_v59 }
 0x1e4   : > { %v8764_v47 = vpop.eup %8763  ;;  %v10920_v6 = vpop.f32.mrb[126].mxu0  ;;  %v10956_v18 = vadd.f32 %v10756_v25, %v2772_v51  ;;  %v2103_v24 = vadd.f32 %v10776_v26, %v10873_v34  ;;  %8789 = vrcp.f32 %v5590_v56  ;;  %v7397_v62 = vmul.f32 -1.442695, %v10445_v13 }
 0x1e5   : > { %v10922_v19 = vpop.f32.mrb[14].mxu1  ;;  %v10928_v9 = vpop.f32.mrb[127].mxu0  ;;  %v5593_v53 = vadd.f32 1.0, %v8764_v47  ;;  %v3766_v47 = vadd.f32 %v10741_v55, %v10875_v32  ;;  %v3787_v59 = vadd.f32 %v8110_v54, %v10741_v55  ;;  %v7402_v22 = vmul.f32 -1.442695, %v10470_v27  ;;  %v8482_v54 = vld [vmem:[%s9600_s9 + $0x3b8] sm:$0xff]  }
 0x1e6   : > { %v10930_v14 = vpop.f32.mrb[15].mxu1  ;;  %v10932_v10 = vpop.eup %8765  ;;  %8071 = vmatmul.mubr.msk.bf16.gmra.mrb[232].mxu0 %vm1193_vm2, %v8480_v35  ;;  %14610 = vst [vmem:[#allocation84_spill] sm:$0xff] %v10956_v18  ;;  %v10959_v35 = vmul.f32 %v14611_v41, %v3774_v63  ;;  %v3229_v34 = vpack.c.bf16 %v10956_v18, %v10953_v49  ;;  %v2770_v56 = vmul.f32 %v10794_v12, %v2103_v24  ;;  %8791 = vrcp.f32 %v5595_v2  ;;  %v14617_v27 = vld [vmem:[#allocation11_spill] sm:$0xff] }
 0x1e7   : > { %14604 = vst [vmem:[#allocation80_spill] sm:$0xff] %v10932_v10  ;;  %v10937_v39 = vpop.eup %8767  ;;  %8074 = vmatprep.mubr.msk.bf16.mxu0 %vm1193_vm2, %v8481_v23  ;;  %v2124_v13 = vadd.f32 %v10776_v26, %v7964_v28  ;;  %v7400_v41 = vmul.f32 -1.442695, %v10473_v8  ;;  %v8483_v28 = vld [vmem:[%s9600_s9 + $0x3c0] sm:$0xff]   ;;  %8793 = vrcp.f32 %v5593_v53  ;;  %v3779_v8 = vadd.f32 %v10741_v55, %v10913_v58 }
 0x1e8   : > { %14607 = vst [vmem:[#allocation81_spill] sm:$0xff] %v10937_v39  ;;  %v10945_v10 = vpop.eup %8769  ;;  %14612 = vst [vmem:[#allocation9_spill] sm:$0xff] %v10959_v35  ;;  %v14615_v35 = vld [vmem:[#allocation10_spill] sm:$0xff]  ;;  %8795 = vpow2.f32 %v7399_v42  ;;  %v2116_v53 = vadd.f32 %v10776_v26, %v10911_v30 }
 0x1e9   : > { %14608 = vst [vmem:[#allocation82_spill] sm:$0xff] %v10945_v10  ;;  %v10950_v20 = vpop.eup %8771  ;;  %v10969_v38 = vpop.f32.mrb[128].mxu0  ;;  %v10987_v45 = vmul.f32 %v14615_v35, %v3766_v47  ;;  %v11001_v10 = vadd.f32 %v10756_v25, %v2770_v56  ;;  %8797 = vpow2.f32 %v7397_v62  ;;  %v2775_v56 = vmul.f32 %v10794_v12, %v2124_v13 }
 0x1ea   : > { %14609 = vst [vmem:[#allocation83_spill] sm:$0xff] %v10950_v20  ;;  %v10963_v3 = vpop.eup %8773  ;;  %v10971_v51 = vpop.f32.mrb[16].mxu1  ;;  %v10998_v20 = vadd.f32 %v10756_v25, %v2769_v5  ;;  %v2127_v5 = vadd.f32 %v10776_v26, %v10920_v6  ;;  %8799 = vpow2.f32 %v7402_v22  ;;  %v2773_v22 = vmul.f32 %v10794_v12, %v2116_v53 }
 0x1eb   : > { %14613 = vst [vmem:[#allocation85_spill] sm:$0xff] %v10963_v3  ;;  %v10973_v23 = vpop.eup %8775  ;;  %v10980_v33 = vpop.f32.mrb[129].mxu0  ;;  %14616 = vst [vmem:[#allocation10_spill] sm:$0xff] %v10987_v45  ;;  %8801 = vpow2.f32 %v7400_v41 }
 0x1ec   : > { %14614 = vst [vmem:[#allocation86_spill] sm:$0xff] %v10973_v23  ;;  %v10982_v32 = vpop.f32.mrb[17].mxu1  ;;  %v8778_v63 = vpop.eup %8777  ;;  %v10990_v23 = vmul.f32 %v14617_v27, %v3787_v59  ;;  %14619 = vst [vmem:[#allocation87_spill] sm:$0xff] %v11001_v10  ;;  %v14620_v59 = vld [vmem:[#allocation33_spill] sm:$0xff]  ;;  %v3228_v58 = vpack.c.bf16 %v11001_v10, %v10998_v20  ;;  %v2776_v62 = vmul.f32 %v10794_v12, %v2127_v5 }
 0x1ed   : > { %v10992_v3 = vpop.f32.mrb[130].mxu0  ;;  %v10994_v24 = vpop.f32.mrb[18].mxu1  ;;  %v7403_v27 = vmul.f32 -1.442695, %v14620_v59  ;;  %v5596_v42 = vadd.f32 1.0, %v8778_v63  ;;  %v14622_v59 = vld [vmem:[#allocation12_spill] sm:$0xff]  ;;  %v3782_v63 = vadd.f32 %v10741_v55, %v10930_v14 }
 0x1ee   : > { %14618 = vst [vmem:[#allocation11_spill] sm:$0xff] %v10990_v23  ;;  %v11005_v2 = vpop.f32.mrb[131].mxu0  ;;  %v11007_v35 = vpop.f32.mrb[19].mxu1  ;;  %8075 = vmatmul.mubr.msk.bf16.gmra.mrb[236].mxu0 %vm1193_vm2, %v8482_v54  ;;  %v11021_v39 = vmul.f32 %v14622_v59, %v3779_v8  ;;  %8216 = vmatprep.mubr.msk.bf16.mxu1 %vm3311_vm3, %v3228_v58  ;;  %v2119_v54 = vadd.f32 %v10776_v26, %v10928_v9  ;;  %v14630_v59 = vld [vmem:[#allocation34_spill] sm:$0xff] }
 0x1ef   : > { %v8780_v47 = vpop.eup %8779  ;;  %8078 = vmatprep.mubr.msk.bf16.mxu0 %vm1193_vm2, %v8483_v28  ;;  %8803 = vpow2.f32 %v7403_v27  ;;  %8217 = vmatmul.mubr.msk.bf16.gmra.mrb[120].mxu1 %vm3311_vm3, %v3229_v34  ;;  %v11041_v8 = vadd.f32 %v10756_v25, %v2775_v56  ;;  %v14627_v27 = vld [vmem:[#allocation13_spill] sm:$0xff]  ;;  %v8484_v34 = vld [vmem:[%s9600_s9 + $0x3c8] sm:$0xff]   ;;  %v14631_v56 = vld [vmem:[#allocation14_spill] sm:$0xff] }
 0x1f0   : > { %v11014_v23 = vpop.eup %8781  ;;  %14623 = vst [vmem:[#allocation12_spill] sm:$0xff] %v11021_v39  ;;  %v5594_v6 = vadd.f32 1.0, %v8780_v47  ;;  %v11044_v47 = vadd.f32 %v10756_v25, %v2776_v62  ;;  %v7401_v39 = vmul.f32 -1.442695, %v14630_v59  ;;  %8805 = vrcp.f32 %v5596_v42 }
 0x1f1   : > { %14621 = vst [vmem:[#allocation33_spill] sm:$0xff] %v11014_v23  ;;  %v8784_v45 = vpop.eup %8783  ;;  %v3790_v23 = vadd.f32 %v10922_v19, %v10741_v55  ;;  %v11036_v41 = vpop.f32.mrb[132].mxu0  ;;  %14625 = vst [vmem:[#allocation89_spill] sm:$0xff] %v11041_v8 }
 0x1f2   : > { %v8786_v30 = vpop.eup %8785  ;;  %v11038_v19 = vpop.f32.mrb[20].mxu1  ;;  %v5599_v28 = vadd.f32 1.0, %v8784_v45  ;;  %14626 = vst [vmem:[#allocation90_spill] sm:$0xff] %v11044_v47  ;;  %v2774_v45 = vmul.f32 %v10794_v12, %v2119_v54  ;;  %8807 = vrcp.f32 %v5594_v6  ;;  %v3795_v6 = vadd.f32 %v10741_v55, %v10982_v32  ;;  %v14639_v32 = vld [vmem:[#allocation16_spill] sm:$0xff] }
 0x1f3   : > { %v11028_v13 = vpop.eup %8787  ;;  %v11047_v53 = vmul.f32 %v14627_v27, %v3790_v23  ;;  %v11049_v9 = vpop.f32.mrb[133].mxu0  ;;  %v5597_v58 = vadd.f32 1.0, %v8786_v30  ;;  %v8485_v23 = vld [vmem:[%s9600_s9 + $0x3d0] sm:$0xff]   ;;  %v7406_v27 = vmul.f32 -1.442695, %v10502_v61  ;;  %v3803_v30 = vadd.f32 %v10971_v51, %v10741_v55  ;;  %v14637_v51 = vld [vmem:[#allocation15_spill] sm:$0xff] }
 0x1f4   : > { %14624 = vst [vmem:[#allocation88_spill] sm:$0xff] %v11028_v13  ;;  %v11051_v14 = vpop.f32.mrb[21].mxu1  ;;  %v11054_v5 = vpop.eup %8789  ;;  %v11059_v13 = vmul.f32 %v14631_v56, %v3782_v63  ;;  %v11078_v56 = vadd.f32 %v10756_v25, %v2773_v22  ;;  %v11081_v42 = vadd.f32 %v10756_v25, %v2774_v45  ;;  %v2140_v61 = vadd.f32 %v10776_v26, %v10969_v38 }
 0x1f5   : > { %14628 = vst [vmem:[#allocation13_spill] sm:$0xff] %v11047_v53  ;;  %14629 = vst [vmem:[#allocation91_spill] sm:$0xff] %v11054_v5  ;;  %v11061_v62 = vpop.f32.mrb[134].mxu0  ;;  %v11063_v10 = vpop.f32.mrb[22].mxu1  ;;  %v3231_v53 = vpack.c.bf16 %v11044_v47, %v11041_v8  ;;  %8809 = vrcp.f32 %v5599_v28  ;;  %v11088_v5 = vmul.f32 %v14637_v51, %v3803_v30  ;;  %v2132_v47 = vadd.f32 %v10776_v26, %v10980_v33 }
 0x1f6   : > { %14632 = vst [vmem:[#allocation34_spill] sm:$0xff] %v11059_v13  ;;  %v11071_v59 = vpop.f32.mrb[135].mxu0  ;;  %v11073_v54 = vpop.f32.mrb[23].mxu1  ;;  %14634 = vst [vmem:[#allocation92_spill] sm:$0xff] %v11078_v56  ;;  %8079 = vmatmul.mubr.msk.bf16.gmra.mrb[240].mxu0 %vm1193_vm2, %v8484_v34  ;;  %8811 = vrcp.f32 %v5597_v58  ;;  %v7404_v45 = vmul.f32 -1.442695, %v10509_v60  ;;  %v3230_v38 = vpack.c.bf16 %v11081_v42, %v11078_v56  ;;  %v2779_v33 = vmul.f32 %v10794_v12, %v2140_v61 }
 0x1f7   : > { %v11075_v63 = vpop.eup %8791  ;;  %14635 = vst [vmem:[#allocation93_spill] sm:$0xff] %v11081_v42  ;;  %14638 = vst [vmem:[#allocation15_spill] sm:$0xff] %v11088_v5  ;;  %8082 = vmatprep.mubr.msk.bf16.mxu0 %vm1193_vm2, %v8485_v23  ;;  %8813 = vpow2.f32 %v7401_v39  ;;  %v7407_v30 = vmul.f32 -1.442695, %v10505_v48  ;;  %v11102_v5 = vmul.f32 %v14639_v32, %v3795_v6  ;;  %v2143_v34 = vadd.f32 %v10776_v26, %v10992_v3  ;;  %v14643_v56 = vld [vmem:[#allocation18_spill] sm:$0xff] }
 0x1f8   : > { %14633 = vst [vmem:[#allocation14_spill] sm:$0xff] %v11075_v63  ;;  %v11085_v13 = vpop.eup %8793  ;;  %v3806_v60 = vadd.f32 %v10994_v24, %v10741_v55  ;;  %8220 = vmatprep.mubr.msk.bf16.mxu1 %vm3311_vm3, %v3230_v38  ;;  %8815 = vpow2.f32 %v7406_v27  ;;  %v2777_v23 = vmul.f32 %v10794_v12, %v2132_v47  ;;  %v2135_v61 = vadd.f32 %v10776_v26, %v11005_v2  ;;  %v8486_v38 = vld [vmem:[%s9600_s9 + $0x3d8] sm:$0xff]  }
 0x1f9   : > { %14636 = vst [vmem:[#allocation94_spill] sm:$0xff] %v11085_v13  ;;  %v8796_v22 = vpop.eup %8795  ;;  %14640 = vst [vmem:[#allocation16_spill] sm:$0xff] %v11102_v5  ;;  %v11109_v58 = vpop.f32.mrb[136].mxu0  ;;  %v3798_v3 = vadd.f32 %v10741_v55, %v11007_v35  ;;  %8221 = vmatmul.mubr.msk.bf16.gmra.mrb[124].mxu1 %vm3311_vm3, %v3231_v53  ;;  %8817 = vpow2.f32 %v7404_v45  ;;  %v2780_v27 = vmul.f32 %v10794_v12, %v2143_v34  ;;  %v14641_v13 = vld [vmem:[#allocation17_spill] sm:$0xff]  ;;  %v8487_v35 = vld [vmem:[%s9600_s9 + $0x3e0] sm:$0xff]  }
 0x1fa   : > { %v8798_v28 = vpop.eup %8797  ;;  %v11111_v39 = vpop.f32.mrb[24].mxu1  ;;  %v5600_v5 = vadd.f32 1.0, %v8796_v22  ;;  %v11126_v47 = vmul.f32 %v14641_v13, %v3806_v60  ;;  %8819 = vpow2.f32 %v7407_v30  ;;  %v2778_v53 = vmul.f32 %v10794_v12, %v2135_v61 }
 0x1fb   : > { %v8800_v51 = vpop.eup %8799  ;;  %v11119_v24 = vpop.f32.mrb[137].mxu0  ;;  %v5598_v42 = vadd.f32 1.0, %v8798_v28  ;;  %v11135_v8 = vmul.f32 %v14643_v56, %v3798_v3  ;;  %v11142_v13 = vadd.f32 %v10756_v25, %v2779_v33  ;;  %v11145_v34 = vadd.f32 %v10756_v25, %v2780_v27 }
 0x1fc   : > { %v8802_v48 = vpop.eup %8801  ;;  %v11121_v6 = vpop.f32.mrb[25].mxu1  ;;  %14642 = vst [vmem:[#allocation17_spill] sm:$0xff] %v11126_v47  ;;  %v5603_v45 = vadd.f32 1.0, %v8800_v51  ;;  %v3819_v28 = vadd.f32 %v11038_v19, %v10741_v55  ;;  %v11152_v56 = vadd.f32 %v10756_v25, %v2777_v23  ;;  %v11155_v61 = vadd.f32 %v10756_v25, %v2778_v53  ;;  %v14651_v53 = vld [vmem:[#allocation19_spill] sm:$0xff] }
 0x1fd   : > { %v8804_v32 = vpop.eup %8803  ;;  %v11128_v63 = vpop.f32.mrb[138].mxu0  ;;  %14644 = vst [vmem:[#allocation18_spill] sm:$0xff] %v11135_v8  ;;  %14645 = vst [vmem:[#allocation95_spill] sm:$0xff] %v11145_v34  ;;  %v5601_v60 = vadd.f32 1.0, %v8802_v48  ;;  %v2156_v51 = vadd.f32 %v10776_v26, %v11036_v41  ;;  %8821 = vrcp.f32 %v5600_v5  ;;  %v3233_v19 = vpack.c.bf16 %v11145_v34, %v11142_v13 }
 0x1fe   : > { %v11130_v2 = vpop.f32.mrb[26].mxu1  ;;  %v11137_v18 = vpop.f32.mrb[139].mxu0  ;;  %14647 = vst [vmem:[#allocation97_spill] sm:$0xff] %v11155_v61  ;;  %8083 = vmatmul.mubr.msk.bf16.gmra.mrb[244].mxu0 %vm1193_vm2, %v8486_v38  ;;  %v5604_v3 = vadd.f32 1.0, %v8804_v32  ;;  %v2148_v48 = vadd.f32 %v10776_v26, %v11049_v9  ;;  %8823 = vrcp.f32 %v5598_v42  ;;  %v7405_v27 = vmul.f32 -1.442695, %v10512_v7 }
 0x1ff   : > { %v11139_v22 = vpop.f32.mrb[27].mxu1  ;;  %v11149_v30 = vpop.eup %8805  ;;  %8086 = vmatprep.mubr.msk.bf16.mxu0 %vm1193_vm2, %v8487_v35  ;;  %v3232_v41 = vpack.c.bf16 %v11155_v61, %v11152_v56  ;;  %8825 = vrcp.f32 %v5603_v45  ;;  %v7410_v5 = vmul.f32 -1.442695, %v10538_v17  ;;  %v7408_v32 = vmul.f32 -1.442695, %v10553_v15 }
 0x200   : > { %14646 = vst [vmem:[#allocation96_spill] sm:$0xff] %v11149_v30  ;;  %v11160_v33 = vpop.eup %8807  ;;  %v11177_v9 = vmul.f32 %v14651_v53, %v3819_v28  ;;  %8827 = vrcp.f32 %v5601_v60  ;;  %v2783_v7 = vmul.f32 %v10794_v12, %v2156_v51  ;;  %v3811_v47 = vadd.f32 %v10741_v55, %v11051_v14  ;;  %v8488_v28 = vld [vmem:[%s9600_s9 + $0x3e8] sm:$0xff]   ;;  %v14655_v30 = vld [vmem:[#allocation21_spill] sm:$0xff] }
 0x201   : > { %14648 = vst [vmem:[#allocation98_spill] sm:$0xff] %v11160_v33  ;;  %v11167_v23 = vpop.eup %8809  ;;  %v11179_v35 = vpop.f32.mrb[140].mxu0  ;;  %v2159_v17 = vadd.f32 %v10776_v26, %v11061_v62  ;;  %8224 = vmatprep.mubr.msk.bf16.mxu1 %vm3311_vm3, %v3232_v41  ;;  %8829 = vrcp.f32 %v5604_v3  ;;  %v2781_v53 = vmul.f32 %v10794_v12, %v2148_v48  ;;  %v3822_v60 = vadd.f32 %v11063_v10, %v10741_v55  ;;  %v8489_v41 = vld [vmem:[%s9600_s9 + $0x3f0] sm:$0xff]  }
 0x202   : > { %14649 = vst [vmem:[#allocation99_spill] sm:$0xff] %v11167_v23  ;;  %v11172_v38 = vpop.eup %8811  ;;  %14652 = vst [vmem:[#allocation19_spill] sm:$0xff] %v11177_v9  ;;  %v11181_v8 = vpop.f32.mrb[28].mxu1  ;;  %v2151_v51 = vadd.f32 %v10776_v26, %v11071_v59  ;;  %8225 = vmatmul.mubr.msk.bf16.gmra.mrb[128].mxu1 %vm3311_vm3, %v3233_v19  ;;  %8831 = vpow2.f32 %v7405_v27  ;;  %v3814_v10 = vadd.f32 %v10741_v55, %v11073_v54  ;;  %v7411_v33 = vmul.f32 -1.442695, %v10541_v36 }
 0x203   : > { %14650 = vst [vmem:[#allocation100_spill] sm:$0xff] %v11172_v38  ;;  %v8814_v42 = vpop.eup %8813  ;;  %v11189_v15 = vpop.f32.mrb[141].mxu0  ;;  %v14653_v38 = vld [vmem:[#allocation20_spill] sm:$0xff]  ;;  %v2784_v3 = vmul.f32 %v10794_v12, %v2159_v17  ;;  %8833 = vpow2.f32 %v7410_v5  ;;  %v11217_v61 = vmul.f32 %v14655_v30, %v3822_v60  ;;  %v11221_v17 = vadd.f32 %v10756_v25, %v2783_v7 }
 0x204   : > { %v11191_v45 = vpop.f32.mrb[29].mxu1  ;;  %v11200_v14 = vpop.f32.mrb[142].mxu0  ;;  %v11206_v23 = vmul.f32 %v14653_v38, %v3811_v47  ;;  %v2782_v27 = vmul.f32 %v10794_v12, %v2151_v51  ;;  %v5602_v38 = vadd.f32 1.0, %v8814_v42  ;;  %v11231_v36 = vadd.f32 %v10756_v25, %v2781_v53 }
 0x205   : > { %v11202_v62 = vpop.f32.mrb[30].mxu1  ;;  %v8816_v9 = vpop.eup %8815  ;;  %14656 = vst [vmem:[#allocation21_spill] sm:$0xff] %v11217_v61  ;;  %v11224_v54 = vadd.f32 %v10756_v25, %v2784_v3  ;;  %v2172_v5 = vadd.f32 %v10776_v26, %v11109_v58  ;;  %v3835_v42 = vadd.f32 %v11111_v39, %v10741_v55  ;;  %8835 = vpow2.f32 %v7408_v32 }
 0x206   : > { %14654 = vst [vmem:[#allocation20_spill] sm:$0xff] %v11206_v23  ;;  %v11211_v48 = vpop.f32.mrb[143].mxu0  ;;  %v11213_v59 = vpop.f32.mrb[31].mxu1  ;;  %v14657_v23 = vld [vmem:[#allocation22_spill] sm:$0xff]  ;;  %8087 = vmatmul.mubr.msk.bf16.gmra.mrb[248].mxu0 %vm1193_vm2, %v8488_v28  ;;  %v11234_v30 = vadd.f32 %v10756_v25, %v2782_v27  ;;  %v5607_v7 = vadd.f32 1.0, %v8816_v9  ;;  %8837 = vpow2.f32 %v7411_v33  ;;  %v2164_v3 = vadd.f32 %v10776_v26, %v11119_v24 }
 0x207   : > { %v8818_v19 = vpop.eup %8817  ;;  %v11227_v34 = vmul.f32 %v14657_v23, %v3814_v10  ;;  %8090 = vmatprep.mubr.msk.bf16.mxu0 %vm1193_vm2, %v8489_v41  ;;  %v3235_v23 = vpack.c.bf16 %v11224_v54, %v11221_v17  ;;  %v7409_v60 = vmul.f32 -1.442695, %v10556_v21  ;;  %8839 = vrcp.f32 %v5602_v38  ;;  %v14661_v41 = vld [vmem:[#allocation23_spill] sm:$0xff]  ;;  %v8490_v21 = vld [vmem:[%s9600_s9 + $0x3f8] sm:$0xff]  }
 0x208   : > { %v8820_v47 = vpop.eup %8819  ;;  %v5605_v53 = vadd.f32 1.0, %v8818_v19  ;;  %v3234_v58 = vpack.c.bf16 %v11234_v30, %v11231_v36  ;;  %v11253_v32 = vmul.f32 %v14661_v41, %v3835_v42  ;;  %v2787_v27 = vmul.f32 %v10794_v12, %v2172_v5 }
 0x209   : > { %14658 = vst [vmem:[#allocation22_spill] sm:$0xff] %v11227_v34  ;;  %v11243_v28 = vpop.eup %8821  ;;  %v11248_v51 = vpop.f32.mrb[144].mxu0  ;;  %v5608_v9 = vadd.f32 1.0, %v8820_v47  ;;  %v3827_v34 = vadd.f32 %v10741_v55, %v11121_v6  ;;  %v2175_v47 = vadd.f32 %v10776_v26, %v11128_v63  ;;  %v3838_v38 = vadd.f32 %v11130_v2, %v10741_v55 }
 0x20a   : > { %14659 = vst [vmem:[#allocation101_spill] sm:$0xff] %v11243_v28  ;;  %v11250_v39 = vpop.eup %8823  ;;  %14662 = vst [vmem:[#allocation23_spill] sm:$0xff] %v11253_v32  ;;  %v11257_v10 = vpop.f32.mrb[32].mxu1  ;;  %8228 = vmatprep.mubr.msk.bf16.mxu1 %vm3311_vm3, %v3234_v58  ;;  %8841 = vrcp.f32 %v5607_v7  ;;  %v14665_v32 = vld [vmem:[#allocation43_spill] sm:$0xff]  ;;  %v2785_v61 = vmul.f32 %v10794_v12, %v2164_v3  ;;  %v2167_v6 = vadd.f32 %v10776_v26, %v11137_v18 }
 0x20b   : > { %14660 = vst [vmem:[#allocation102_spill] sm:$0xff] %v11250_v39  ;;  %v11259_v33 = vpop.f32.mrb[145].mxu0  ;;  %v11262_v19 = vpop.eup %8825  ;;  %v7414_v5 = vmul.f32 -1.442695, %v14665_v32  ;;  %8229 = vmatmul.mubr.msk.bf16.gmra.mrb[132].mxu1 %vm3311_vm3, %v3235_v23  ;;  %8843 = vrcp.f32 %v5605_v53  ;;  %v2788_v7 = vmul.f32 %v10794_v12, %v2175_v47  ;;  %v14669_v32 = vld [vmem:[#allocation26_spill] sm:$0xff]  ;;  %v14671_v53 = vld [vmem:[#allocation44_spill] sm:$0xff]  ;;  %v11305_v47 = vadd.f32 %v10756_v25, %v2787_v27 }
 0x20c   : > { %14663 = vst [vmem:[#allocation103_spill] sm:$0xff] %v11262_v19  ;;  %v11272_v24 = vpop.f32.mrb[33].mxu1  ;;  %v11274_v42 = vpop.f32.mrb[146].mxu0  ;;  %v14667_v19 = vld [vmem:[#allocation25_spill] sm:$0xff]  ;;  %8845 = vrcp.f32 %v5608_v9  ;;  %v7412_v23 = vmul.f32 -1.442695, %v10591_v29  ;;  %v2786_v28 = vmul.f32 %v10794_v12, %v2167_v6  ;;  %v11311_v9 = vadd.f32 %v10756_v25, %v2785_v61 }
 0x20d   : > { %v11276_v41 = vpop.eup %8827  ;;  %v11283_v63 = vpop.f32.mrb[34].mxu1  ;;  %v11290_v39 = vmul.f32 %v14667_v19, %v3827_v34  ;;  %8847 = vpow2.f32 %v7409_v60  ;;  %v7415_v19 = vmul.f32 -1.442695, %v14671_v53  ;;  %14672 = vst [vmem:[#allocation44_spill] sm:$0xff] %v11305_v47  ;;  %v14676_v6 = vld [vmem:[#allocation28_spill] sm:$0xff]  ;;  %v2188_v60 = vadd.f32 %v10776_v26, %v11179_v35 }
 0x20e   : > { %14664 = vst [vmem:[#allocation104_spill] sm:$0xff] %v11276_v41  ;;  %v11285_v2 = vpop.f32.mrb[147].mxu0  ;;  %v11287_v58 = vpop.eup %8829  ;;  %v11294_v41 = vmul.f32 %v14669_v32, %v3838_v38  ;;  %8091 = vmatmul.mubr.msk.bf16.gmra.mrb[252].mxu0 %vm1193_vm2, %v8490_v21  ;;  %v11308_v38 = vadd.f32 %v10756_v25, %v2788_v7  ;;  %14674 = vst [vmem:[#allocation106_spill] sm:$0xff] %v11311_v9  ;;  %v11314_v29 = vadd.f32 %v10756_v25, %v2786_v28 }
 0x20f   : > { %14666 = vst [vmem:[#allocation43_spill] sm:$0xff] %v11287_v58  ;;  %14668 = vst [vmem:[#allocation25_spill] sm:$0xff] %v11290_v39  ;;  %v11296_v3 = vpop.f32.mrb[35].mxu1  ;;  %v8832_v18 = vpop.eup %8831  ;;  %v3830_v58 = vadd.f32 %v10741_v55, %v11139_v22  ;;  %8849 = vpow2.f32 %v7414_v5  ;;  %v7413_v21 = vmul.f32 -1.442695, %v10587_v0  ;;  %v3851_v0 = vadd.f32 %v11181_v8, %v10741_v55 }
 0x210   : > { %14670 = vst [vmem:[#allocation26_spill] sm:$0xff] %v11294_v41  ;;  %v8834_v34 = vpop.eup %8833  ;;  %14673 = vst [vmem:[#allocation105_spill] sm:$0xff] %v11308_v38  ;;  %v3237_v27 = vpack.c.bf16 %v11308_v38, %v11305_v47  ;;  %v5606_v61 = vadd.f32 1.0, %v8832_v18  ;;  %8851 = vpow2.f32 %v7412_v23  ;;  %v3236_v28 = vpack.c.bf16 %v11314_v29, %v11311_v9 }
 0x211   : > { %14675 = vst [vmem:[#allocation107_spill] sm:$0xff] %v11314_v29  ;;  %v11317_v22 = vmul.f32 %v14676_v6, %v3830_v58  ;;  %v11324_v7 = vpop.f32.mrb[148].mxu0  ;;  %v8836_v32 = vpop.eup %8835  ;;  %v5611_v35 = vadd.f32 1.0, %v8834_v34  ;;  %8853 = vpow2.f32 %v7415_v19  ;;  %v2180_v5 = vadd.f32 %v10776_v26, %v11189_v15 }
 0x212   : > { %v11328_v53 = vpop.f32.mrb[36].mxu1  ;;  %v11330_v58 = vpop.f32.mrb[149].mxu0  ;;  %v2791_v41 = vmul.f32 %v10794_v12, %v2188_v60  ;;  %v3843_v39 = vadd.f32 %v10741_v55, %v11191_v45  ;;  %v2191_v34 = vadd.f32 %v10776_v26, %v11200_v14  ;;  %v3854_v8 = vadd.f32 %v11202_v62, %v10741_v55  ;;  %8232 = vmatprep.mubr.msk.bf16.mxu1 %vm3311_vm3, %v3236_v28  ;;  %v14679_v60 = vld [vmem:[#allocation29_spill] sm:$0xff]  ;;  %v14682_v28 = vld [vmem:[#allocation30_spill] sm:$0xff] }
 0x213   : > { %14677 = vst [vmem:[#allocation28_spill] sm:$0xff] %v11317_v22  ;;  %v8838_v6 = vpop.eup %8837  ;;  %v11336_v22 = vpop.f32.mrb[37].mxu1  ;;  %v5609_v29 = vadd.f32 1.0, %v8836_v32  ;;  %8855 = vpow2.f32 %v7413_v21  ;;  %v11356_v38 = vmul.f32 %v14679_v60, %v3851_v0  ;;  %8233 = vmatmul.mubr.msk.bf16.gmra.mrb[136].mxu1 %vm3311_vm3, %v3237_v27  ;;  %v2789_v21 = vmul.f32 %v10794_v12, %v2180_v5  ;;  %v14685_v0 = vld [vmem:[#allocation31_spill] sm:$0xff] }
 0x214   : > { %v11338_v18 = vpop.f32.mrb[150].mxu0  ;;  %v11340_v23 = vpop.eup %8839  ;;  %8857 = vrcp.f32 %v5606_v61  ;;  %v5612_v62 = vadd.f32 1.0, %v8838_v6  ;;  %v11364_v9 = vmul.f32 %v14682_v28, %v3843_v39  ;;  %v2792_v47 = vmul.f32 %v10794_v12, %v2191_v34 }
 0x215   : > { %14678 = vst [vmem:[#allocation108_spill] sm:$0xff] %v11340_v23  ;;  %v11350_v15 = vpop.f32.mrb[38].mxu1  ;;  %v11352_v19 = vpop.f32.mrb[151].mxu0  ;;  %v7418_v23 = vmul.f32 -1.442695, %v10622_v31  ;;  %14680 = vst [vmem:[#allocation29_spill] sm:$0xff] %v11356_v38  ;;  %v11372_v60 = vmul.f32 %v14685_v0, %v3854_v8  ;;  %v2183_v27 = vadd.f32 %v10776_v26, %v11211_v48  ;;  %8859 = vrcp.f32 %v5611_v35 }
 0x216   : > { %v11359_v45 = vpop.f32.mrb[39].mxu1  ;;  %v11361_v14 = vpop.eup %8841  ;;  %14683 = vst [vmem:[#allocation30_spill] sm:$0xff] %v11364_v9  ;;  %v7416_v31 = vmul.f32 -1.442695, %v10629_v46  ;;  %v11379_v39 = vadd.f32 %v10756_v25, %v2791_v41  ;;  %v11382_v61 = vadd.f32 %v10756_v25, %v2792_v47  ;;  %v3846_v46 = vadd.f32 %v10741_v55, %v11213_v59  ;;  %v14689_v35 = vld [vmem:[#allocation32_spill] sm:$0xff]  ;;  %v14692_v9 = vld [vmem:[#allocation35_spill] sm:$0xff] }
 0x217   : > { %14681 = vst [vmem:[#allocation109_spill] sm:$0xff] %v11361_v14  ;;  %v11367_v32 = vpop.eup %8843  ;;  %14686 = vst [vmem:[#allocation31_spill] sm:$0xff] %v11372_v60  ;;  %8861 = vrcp.f32 %v5609_v29  ;;  %v7419_v5 = vmul.f32 -1.442695, %v10625_v16  ;;  %v2790_v34 = vmul.f32 %v10794_v12, %v2183_v27  ;;  %v2204_v48 = vadd.f32 %v10776_v26, %v11248_v51 }
 0x218   : > { %14684 = vst [vmem:[#allocation110_spill] sm:$0xff] %v11367_v32  ;;  %v11376_v38 = vpop.eup %8845  ;;  %14688 = vst [vmem:[#allocation112_spill] sm:$0xff] %v11382_v61  ;;  %8863 = vrcp.f32 %v5612_v62  ;;  %v7417_v41 = vmul.f32 -1.442695, %v10632_v1  ;;  %v3239_v47 = vpack.c.bf16 %v11382_v61, %v11379_v39  ;;  %v11396_v28 = vmul.f32 %v14689_v35, %v3846_v46 }
 0x219   : > { %14687 = vst [vmem:[#allocation111_spill] sm:$0xff] %v11376_v38  ;;  %v8848_v6 = vpop.eup %8847  ;;  %v11390_v8 = vpop.f32.mrb[152].mxu0  ;;  %8865 = vpow2.f32 %v7418_v23  ;;  %v11401_v16 = vadd.f32 %v10756_v25, %v2789_v21  ;;  %v11404_v51 = vadd.f32 %v10756_v25, %v2790_v34  ;;  %v3867_v62 = vadd.f32 %v11257_v10, %v10741_v55  ;;  %v11417_v23 = vld [vmem:[%s14365_s6] ss:$0 sm:$0xff]  ;;  %v14694_v38 = vld [vmem:[#allocation36_spill] sm:$0xff] }
 0x21a   : > { %14690 = vst [vmem:[#allocation32_spill] sm:$0xff] %v11396_v28  ;;  %v11398_v59 = vpop.f32.mrb[153].mxu0  ;;  %v8850_v29 = vpop.eup %8849  ;;  %v5610_v46 = vadd.f32 1.0, %v8848_v6  ;;  %v2196_v35 = vadd.f32 %v10776_v26, %v11259_v33  ;;  %v3859_v25 = vadd.f32 %v11417_v23, %v11272_v24  ;;  %v2207_v55 = vadd.f32 %v10776_v26, %v11274_v42 }
 0x21b   : > { %14691 = vst [vmem:[#allocation113_spill] sm:$0xff] %v11404_v51  ;;  %v11408_v1 = vpop.f32.mrb[40].mxu1  ;;  %v11410_v0 = vpop.f32.mrb[154].mxu0  ;;  %8867 = vpow2.f32 %v7416_v31  ;;  %v3238_v33 = vpack.c.bf16 %v11404_v51, %v11401_v16  ;;  %v2795_v6 = vmul.f32 %v10794_v12, %v2204_v48  ;;  %v5615_v60 = vadd.f32 1.0, %v8850_v29 }
 0x21c   : > { %v8852_v27 = vpop.eup %8851  ;;  %v11423_v10 = vpop.f32.mrb[41].mxu1  ;;  %8869 = vpow2.f32 %v7419_v5  ;;  %v11433_v24 = vmul.f32 %v14692_v9, %v3867_v62  ;;  %v11436_v26 = vmul.f32 %v14694_v38, %v3859_v25  ;;  %v2796_v31 = vmul.f32 %v10794_v12, %v2207_v55  ;;  %v11451_v5 = vld [vmem:[%s14361_s2] ss:$0 sm:$0xff] }
 0x21d   : > { %v11425_v21 = vpop.f32.mrb[155].mxu0  ;;  %v8854_v34 = vpop.eup %8853  ;;  %v5613_v61 = vadd.f32 1.0, %v8852_v27  ;;  %8871 = vpow2.f32 %v7417_v41  ;;  %v3870_v48 = vadd.f32 %v11417_v23, %v11283_v63  ;;  %8236 = vmatprep.mubr.msk.bf16.mxu1 %vm3311_vm3, %v3238_v33  ;;  %v7422_v9 = vmul.f32 -1.442695, %v10660_v37  ;;  %v11459_v62 = vld [vmem:[%s14363_s4] ss:$0 sm:$0xff] }
 0x21e   : > { %v11430_v28 = vpop.f32.mrb[42].mxu1  ;;  %14693 = vst [vmem:[#allocation35_spill] sm:$0xff] %v11433_v24  ;;  %14695 = vst [vmem:[#allocation36_spill] sm:$0xff] %v11436_v26  ;;  %v8856_v32 = vpop.eup %8855  ;;  %8873 = vrcp.f32 %v5610_v46  ;;  %v2793_v38 = vmul.f32 %v10794_v12, %v2196_v35  ;;  %v2199_v41 = vadd.f32 %v11451_v5, %v11285_v2  ;;  %8237 = vmatmul.mubr.msk.bf16.gmra.mrb[140].mxu1 %vm3311_vm3, %v3239_v47  ;;  %v5616_v63 = vadd.f32 1.0, %v8854_v34  ;;  %v14699_v46 = vld [vmem:[#allocation37_spill] sm:$0xff] }
 0x21f   : > { %v11438_v42 = vpop.f32.mrb[43].mxu1  ;;  %v11444_v29 = vpop.eup %8857  ;;  %v11462_v37 = vadd.f32 %v11459_v62, %v2795_v6  ;;  %v11465_v27 = vadd.f32 %v11459_v62, %v2796_v31  ;;  %v11468_v35 = vmul.f32 %v14699_v46, %v3870_v48  ;;  %8875 = vrcp.f32 %v5615_v60 }
 0x220   : > { %14696 = vst [vmem:[#allocation114_spill] sm:$0xff] %v11444_v29  ;;  %v11472_v2 = vpop.eup %8859  ;;  %v5614_v47 = vadd.f32 1.0, %v8856_v32  ;;  %v2794_v55 = vmul.f32 %v10794_v12, %v2199_v41  ;;  %v3862_v34 = vadd.f32 %v11417_v23, %v11296_v3  ;;  %8877 = vrcp.f32 %v5613_v61  ;;  %v14706_v61 = vld [vmem:[#allocation38_spill] sm:$0xff] }
 0x221   : > { %14697 = vst [vmem:[#allocation115_spill] sm:$0xff] %v11462_v37  ;;  %14698 = vst [vmem:[#allocation116_spill] sm:$0xff] %v11465_v27  ;;  %v11470_v25 = vpop.f32.mrb[156].mxu0  ;;  %v11479_v6 = vpop.eup %8861  ;;  %v7420_v31 = vmul.f32 -1.442695, %v10672_v44  ;;  %v3241_v46 = vpack.c.bf16 %v11465_v27, %v11462_v37  ;;  %v11492_v3 = vadd.f32 %v11459_v62, %v2793_v38  ;;  %8879 = vrcp.f32 %v5616_v63  ;;  %v14710_v27 = vld [vmem:[#allocation40_spill] sm:$0xff] }
 0x222   : > { %14700 = vst [vmem:[#allocation37_spill] sm:$0xff] %v11468_v35  ;;  %14701 = vst [vmem:[#allocation117_spill] sm:$0xff] %v11472_v2  ;;  %v11477_v33 = vpop.f32.mrb[157].mxu0  ;;  %v7423_v48 = vmul.f32 -1.442695, %v10663_v43  ;;  %v11485_v35 = vpop.f32.mrb[44].mxu1  ;;  %v11495_v60 = vadd.f32 %v11459_v62, %v2794_v55  ;;  %v11498_v41 = vmul.f32 %v14706_v61, %v3862_v34  ;;  %v2220_v43 = vadd.f32 %v11451_v5, %v11324_v7 }
 0x223   : > { %14702 = vst [vmem:[#allocation118_spill] sm:$0xff] %v11479_v6  ;;  %v11487_v32 = vpop.f32.mrb[158].mxu0  ;;  %v11489_v12 = vpop.eup %8863  ;;  %14704 = vst [vmem:[#allocation120_spill] sm:$0xff] %v11492_v3  ;;  %v2212_v38 = vadd.f32 %v11451_v5, %v11330_v58  ;;  %v3875_v55 = vadd.f32 %v11417_v23, %v11336_v22  ;;  %8881 = vrcp.f32 %v5614_v47  ;;  %v7421_v7 = vmul.f32 -1.442695, %v10666_v50  ;;  %v14708_v6 = vld [vmem:[#allocation39_spill] sm:$0xff] }
 0x224   : > { %14703 = vst [vmem:[#allocation119_spill] sm:$0xff] %v11489_v12  ;;  %14705 = vst [vmem:[#allocation121_spill] sm:$0xff] %v11495_v60  ;;  %v11502_v44 = vpop.f32.mrb[45].mxu1  ;;  %v11504_v26 = vpop.f32.mrb[159].mxu0  ;;  %v3883_v12 = vadd.f32 %v11417_v23, %v11328_v53  ;;  %v3240_v61 = vpack.c.bf16 %v11495_v60, %v11492_v3  ;;  %8883 = vpow2.f32 %v7422_v9  ;;  %v11528_v22 = vld [vmem:[%s14362_s3] ss:$0 sm:$0xff]  ;;  %v2223_v9 = vadd.f32 %v11451_v5, %v11338_v18 }
 0x225   : > { %14707 = vst [vmem:[#allocation38_spill] sm:$0xff] %v11498_v41  ;;  %v8866_v24 = vpop.eup %8865  ;;  %v11512_v34 = vpop.f32.mrb[46].mxu1  ;;  %v11523_v58 = vmul.f32 %v14710_v27, %v3875_v55  ;;  %8885 = vpow2.f32 %v7420_v31  ;;  %v2799_v50 = vmul.f32 %v11528_v22, %v2220_v43  ;;  %v2797_v47 = vmul.f32 %v11528_v22, %v2212_v38 }
 0x226   : > { %v11517_v41 = vpop.f32.mrb[47].mxu1  ;;  %v8868_v63 = vpop.eup %8867  ;;  %v11520_v53 = vmul.f32 %v14708_v6, %v3883_v12  ;;  %8240 = vmatprep.mubr.msk.bf16.mxu1 %vm3311_vm3, %v3240_v61  ;;  %8887 = vpow2.f32 %v7423_v48  ;;  %v3886_v27 = vadd.f32 %v11417_v23, %v11350_v15  ;;  %v2215_v31 = vadd.f32 %v11451_v5, %v11352_v19 }
 0x227   : > { %14711 = vst [vmem:[#allocation40_spill] sm:$0xff] %v11523_v58  ;;  %v8870_v2 = vpop.eup %8869  ;;  %8241 = vmatmul.mubr.msk.bf16.gmra.mrb[144].mxu1 %vm3311_vm3, %v3241_v46  ;;  %v5619_v38 = vadd.f32 1.0, %v8866_v24  ;;  %v5617_v55 = vadd.f32 1.0, %v8868_v63  ;;  %8889 = vpow2.f32 %v7421_v7  ;;  %v2800_v18 = vmul.f32 %v11528_v22, %v2223_v9  ;;  %v14713_v58 = vld [vmem:[#allocation41_spill] sm:$0xff] }
 0x228   : > { %14709 = vst [vmem:[#allocation39_spill] sm:$0xff] %v11520_v53  ;;  %v8872_v6 = vpop.eup %8871  ;;  %v5620_v48 = vadd.f32 1.0, %v8870_v2  ;;  %v11548_v53 = vmul.f32 %v14713_v58, %v3886_v27  ;;  %v2798_v15 = vmul.f32 %v11528_v22, %v2215_v31  ;;  %v3878_v19 = vadd.f32 %v11417_v23, %v11359_v45  ;;  %v14721_v31 = vld [vmem:[#allocation42_spill] sm:$0xff] }
 0x229   : > { %v11540_v12 = vpop.f32.mrb[160].mxu0  ;;  %v11542_v43 = vpop.eup %8873  ;;  %v5618_v24 = vadd.f32 1.0, %v8872_v6  ;;  %v11558_v7 = vadd.f32 %v11459_v62, %v2799_v50  ;;  %v11561_v63 = vadd.f32 %v11459_v62, %v2797_v47  ;;  %v11564_v2 = vadd.f32 %v11459_v62, %v2800_v18 }
 0x22a   : > { %14712 = vst [vmem:[#allocation122_spill] sm:$0xff] %v11542_v43  ;;  %v11545_v61 = vpop.f32.mrb[161].mxu0  ;;  %14714 = vst [vmem:[#allocation41_spill] sm:$0xff] %v11548_v53  ;;  %v11555_v60 = vpop.eup %8875  ;;  %v11573_v45 = vadd.f32 %v11459_v62, %v2798_v15  ;;  %v11576_v6 = vmul.f32 %v14721_v31, %v3878_v19  ;;  %v2236_v50 = vadd.f32 %v11451_v5, %v11390_v8  ;;  %8891 = vrcp.f32 %v5619_v38  ;;  %v14725_v38 = vld [vmem:[#allocation56_spill] sm:$0xff] }
 0x22b   : > { %v11553_v46 = vpop.f32.mrb[162].mxu0  ;;  %14715 = vst [vmem:[#allocation123_spill] sm:$0xff] %v11555_v60  ;;  %14716 = vst [vmem:[#allocation124_spill] sm:$0xff] %v11558_v7  ;;  %v11566_v58 = vpop.f32.mrb[48].mxu1  ;;  %v3899_v47 = vadd.f32 %v11417_v23, %v11408_v1  ;;  %v7426_v53 = vmul.f32 -1.442695, %v10705_v4  ;;  %8893 = vrcp.f32 %v5617_v55  ;;  %v3891_v55 = vadd.f32 %v11417_v23, %v11423_v10 }
 0x22c   : > { %14717 = vst [vmem:[#allocation125_spill] sm:$0xff] %v11561_v63  ;;  %14718 = vst [vmem:[#allocation126_spill] sm:$0xff] %v11564_v2  ;;  %v11568_v9 = vpop.f32.mrb[163].mxu0  ;;  %v11570_v27 = vpop.eup %8877  ;;  %v7424_v19 = vmul.f32 -1.442695, %v10718_v40  ;;  %v3242_v8 = vpack.c.bf16 %v11573_v45, %v11561_v63  ;;  %8895 = vrcp.f32 %v5620_v48  ;;  %v2803_v40 = vmul.f32 %v11528_v22, %v2236_v50  ;;  %v14729_v10 = vld [vmem:[#allocation46_spill] sm:$0xff] }
 0x22d   : > { %14719 = vst [vmem:[#allocation127_spill] sm:$0xff] %v11570_v27  ;;  %14720 = vst [vmem:[#allocation128_spill] sm:$0xff] %v11573_v45  ;;  %v11582_v18 = vpop.f32.mrb[49].mxu1  ;;  %v3243_v27 = vpack.c.bf16 %v11564_v2, %v11558_v7  ;;  %v11589_v15 = vpop.eup %8879  ;;  %v7427_v4 = vmul.f32 -1.442695, %v14725_v38  ;;  %v2228_v2 = vadd.f32 %v11451_v5, %v11398_v59  ;;  %8897 = vrcp.f32 %v5618_v24 }
 0x22e   : > { %14722 = vst [vmem:[#allocation42_spill] sm:$0xff] %v11576_v6  ;;  %v11587_v60 = vpop.f32.mrb[50].mxu1  ;;  %14723 = vst [vmem:[#allocation129_spill] sm:$0xff] %v11589_v15  ;;  %v11596_v1 = vpop.eup %8881  ;;  %v14726_v6 = vld [vmem:[#allocation45_spill] sm:$0xff]  ;;  %v2239_v45 = vadd.f32 %v11451_v5, %v11410_v0  ;;  %8244 = vmatprep.mubr.msk.bf16.mxu1 %vm3311_vm3, %v3242_v8  ;;  %8899 = vpow2.f32 %v7426_v53  ;;  %v3902_v59 = vadd.f32 %v11417_v23, %v11430_v28 }
 0x22f   : > { %v11594_v31 = vpop.f32.mrb[51].mxu1  ;;  %14724 = vst [vmem:[#allocation130_spill] sm:$0xff] %v11596_v1  ;;  %v11600_v43 = vmul.f32 %v14726_v6, %v3899_v47  ;;  %v8884_v15 = vpop.eup %8883  ;;  %v14728_v6 = vld [vmem:[#allocation57_spill] sm:$0xff]  ;;  %8245 = vmatmul.mubr.msk.bf16.gmra.mrb[148].mxu1 %vm3311_vm3, %v3243_v27  ;;  %8901 = vpow2.f32 %v7424_v19  ;;  %v2801_v53 = vmul.f32 %v11528_v22, %v2228_v2  ;;  %v2231_v28 = vadd.f32 %v11451_v5, %v11425_v21 }
 0x230   : > { %v8886_v38 = vpop.eup %8885  ;;  %v7425_v47 = vmul.f32 -1.442695, %v14728_v6  ;;  %v2804_v0 = vmul.f32 %v11528_v22, %v2239_v45  ;;  %8903 = vpow2.f32 %v7427_v4  ;;  %v14731_v6 = vld [vmem:[#allocation47_spill] sm:$0xff]  ;;  %v3894_v2 = vadd.f32 %v11417_v23, %v11438_v42 }
 0x231   : > { %14727 = vst [vmem:[#allocation56_spill] sm:$0xff] %v11600_v43  ;;  %v11610_v48 = vpop.f32.mrb[164].mxu0  ;;  %v8888_v50 = vpop.eup %8887  ;;  %v11619_v43 = vmul.f32 %v14729_v10, %v3891_v55  ;;  %v11626_v63 = vmul.f32 %v14731_v6, %v3902_v59  ;;  %v5623_v55 = vadd.f32 1.0, %v8884_v15  ;;  %v11635_v10 = vadd.f32 %v11459_v62, %v2803_v40 }
 0x232   : > { %v11616_v24 = vpop.f32.mrb[165].mxu0  ;;  %v8890_v1 = vpop.eup %8889  ;;  %v11638_v45 = vadd.f32 %v11459_v62, %v2804_v0  ;;  %v5621_v59 = vadd.f32 1.0, %v8886_v38  ;;  %8905 = vpow2.f32 %v7425_v47  ;;  %v2802_v21 = vmul.f32 %v11528_v22, %v2231_v28  ;;  %v14735_v0 = vld [vmem:[#allocation48_spill] sm:$0xff] }
 0x233   : > { %14730 = vst [vmem:[#allocation45_spill] sm:$0xff] %v11619_v43  ;;  %v11622_v8 = vpop.f32.mrb[166].mxu0  ;;  %14732 = vst [vmem:[#allocation57_spill] sm:$0xff] %v11626_v63  ;;  %v11630_v27 = vpop.f32.mrb[52].mxu1  ;;  %v3915_v6 = vadd.f32 %v11417_v23, %v11485_v35  ;;  %v5624_v15 = vadd.f32 1.0, %v8888_v50  ;;  %v11652_v43 = vmul.f32 %v14735_v0, %v3894_v2  ;;  %v2252_v42 = vadd.f32 %v11451_v5, %v11470_v25  ;;  %v14740_v50 = vld [vmem:[#allocation49_spill] sm:$0xff] }
 0x234   : > { %v11632_v19 = vpop.f32.mrb[167].mxu0  ;;  %14733 = vst [vmem:[#allocation46_spill] sm:$0xff] %v11635_v10  ;;  %14734 = vst [vmem:[#allocation47_spill] sm:$0xff] %v11638_v45  ;;  %v11642_v4 = vpop.f32.mrb[53].mxu1  ;;  %v3245_v40 = vpack.c.bf16 %v11638_v45, %v11635_v10  ;;  %v11661_v47 = vadd.f32 %v11459_v62, %v2801_v53  ;;  %v11664_v35 = vadd.f32 %v11459_v62, %v2802_v21  ;;  %8907 = vrcp.f32 %v5623_v55 }
 0x235   : > { %v11647_v63 = vpop.f32.mrb[54].mxu1  ;;  %14736 = vst [vmem:[#allocation48_spill] sm:$0xff] %v11652_v43  ;;  %v11658_v38 = vpop.eup %8891  ;;  %v11667_v28 = vmul.f32 %v14740_v50, %v3915_v6  ;;  %v2244_v2 = vadd.f32 %v11451_v5, %v11477_v33  ;;  %v5622_v25 = vadd.f32 1.0, %v8890_v1  ;;  %v3907_v43 = vadd.f32 %v11417_v23, %v11502_v44  ;;  %v14745_v44 = vld [vmem:[#allocation50_spill] sm:$0xff] }
 0x236   : > { %v11656_v7 = vpop.f32.mrb[55].mxu1  ;;  %14737 = vst [vmem:[#allocation131_spill] sm:$0xff] %v11658_v38  ;;  %14738 = vst [vmem:[#allocation132_spill] sm:$0xff] %v11661_v47  ;;  %v11671_v0 = vpop.eup %8893  ;;  %8909 = vrcp.f32 %v5621_v59  ;;  %v7430_v21 = vmul.f32 -1.442695, %v10759_v11  ;;  %v3244_v6 = vpack.c.bf16 %v11664_v35, %v11661_v47  ;;  %v2807_v55 = vmul.f32 %v11528_v22, %v2252_v42 }
 0x237   : > { %14739 = vst [vmem:[#allocation133_spill] sm:$0xff] %v11664_v35  ;;  %14741 = vst [vmem:[#allocation49_spill] sm:$0xff] %v11667_v28  ;;  %v11677_v53 = vpop.eup %8895  ;;  %8911 = vrcp.f32 %v5624_v15  ;;  %v7428_v1 = vmul.f32 -1.442695, %v10768_v52  ;;  %v11689_v28 = vmul.f32 %v14745_v44, %v3907_v43  ;;  %v2805_v11 = vmul.f32 %v11528_v22, %v2244_v2  ;;  %v14747_v44 = vld [vmem:[#allocation63_spill] sm:$0xff]  ;;  %v14748_v2 = vld [vmem:[#allocation64_spill] sm:$0xff] }
 0x238   : > { %14742 = vst [vmem:[#allocation134_spill] sm:$0xff] %v11671_v0  ;;  %14743 = vst [vmem:[#allocation135_spill] sm:$0xff] %v11677_v53  ;;  %v11684_v33 = vpop.eup %8897  ;;  %v2255_v35 = vadd.f32 %v11451_v5, %v11487_v32  ;;  %v3918_v47 = vadd.f32 %v11417_v23, %v11512_v34  ;;  %v2247_v15 = vadd.f32 %v11451_v5, %v11504_v26  ;;  %8248 = vmatprep.mubr.msk.bf16.mxu1 %vm3311_vm3, %v3244_v6  ;;  %v14749_v53 = vld [vmem:[#allocation51_spill] sm:$0xff] }
 0x239   : > { %v11675_v45 = vpop.f32.mrb[168].mxu0  ;;  %14744 = vst [vmem:[#allocation136_spill] sm:$0xff] %v11684_v33  ;;  %14746 = vst [vmem:[#allocation50_spill] sm:$0xff] %v11689_v28  ;;  %v8900_v59 = vpop.eup %8899  ;;  %8913 = vrcp.f32 %v5622_v25  ;;  %v7431_v28 = vmul.f32 -1.442695, %v14747_v44  ;;  %v3910_v32 = vadd.f32 %v11417_v23, %v11517_v41  ;;  %8249 = vmatmul.mubr.msk.bf16.gmra.mrb[152].mxu1 %vm3311_vm3, %v3245_v40  ;;  %v14752_v41 = vld [vmem:[#allocation52_spill] sm:$0xff] }
 0x23a   : > { %v11682_v50 = vpop.f32.mrb[169].mxu0  ;;  %v11701_v52 = vpop.f32.mrb[56].mxu1  ;;  %v7429_v33 = vmul.f32 -1.442695, %v14748_v2  ;;  %8915 = vpow2.f32 %v7430_v21  ;;  %v2808_v6 = vmul.f32 %v11528_v22, %v2255_v35  ;;  %v11714_v0 = vmul.f32 %v14749_v53, %v3918_v47 }
 0x23b   : > { %v11691_v10 = vpop.f32.mrb[170].mxu0  ;;  %v8902_v42 = vpop.eup %8901  ;;  %v2806_v25 = vmul.f32 %v11528_v22, %v2247_v15  ;;  %v5627_v44 = vadd.f32 1.0, %v8900_v59  ;;  %8917 = vpow2.f32 %v7428_v1  ;;  %v11720_v2 = vadd.f32 %v11459_v62, %v2807_v55 }
 0x23c   : > { %v11703_v43 = vpop.f32.mrb[171].mxu0  ;;  %v11710_v34 = vpop.f32.mrb[57].mxu1  ;;  %14750 = vst [vmem:[#allocation63_spill] sm:$0xff] %v11714_v0  ;;  %v11723_v40 = vmul.f32 %v14752_v41, %v3910_v32  ;;  %v11728_v35 = vadd.f32 %v11459_v62, %v2805_v11  ;;  %v11731_v47 = vadd.f32 %v11459_v62, %v2808_v6  ;;  %v3931_v1 = vadd.f32 %v11417_v23, %v11566_v58  ;;  %v14761_v0 = vld [vmem:[#allocation72_spill] sm:$0xff] }
 0x23d   : > { %v8904_v26 = vpop.eup %8903  ;;  %v11717_v38 = vpop.f32.mrb[58].mxu1  ;;  %14751 = vst [vmem:[#allocation64_spill] sm:$0xff] %v11720_v2  ;;  %v11734_v53 = vadd.f32 %v11459_v62, %v2806_v25  ;;  %8919 = vpow2.f32 %v7431_v28  ;;  %v2268_v55 = vadd.f32 %v11451_v5, %v11540_v12  ;;  %v3923_v59 = vadd.f32 %v11417_v23, %v11582_v18  ;;  %v14758_v12 = vld [vmem:[#allocation53_spill] sm:$0xff] }
 0x23e   : > { %14753 = vst [vmem:[#allocation51_spill] sm:$0xff] %v11723_v40  ;;  %v11725_v3 = vpop.f32.mrb[59].mxu1  ;;  %v8906_v21 = vpop.eup %8905  ;;  %14754 = vst [vmem:[#allocation52_spill] sm:$0xff] %v11728_v35  ;;  %v5625_v11 = vadd.f32 1.0, %v8902_v42  ;;  %v3247_v32 = vpack.c.bf16 %v11731_v47, %v11720_v2  ;;  %v2260_v25 = vadd.f32 %v11451_v5, %v11545_v61  ;;  %8921 = vpow2.f32 %v7429_v33  ;;  %v14765_v33 = vld [vmem:[#allocation74_spill] sm:$0xff] }
 0x23f   : > { %14755 = vst [vmem:[#allocation137_spill] sm:$0xff] %v11731_v47  ;;  %14756 = vst [vmem:[#allocation138_spill] sm:$0xff] %v11734_v53  ;;  %v3246_v6 = vpack.c.bf16 %v11734_v53, %v11728_v35  ;;  %v11752_v28 = vpop.eup %8907  ;;  %v11755_v41 = vmul.f32 %v14758_v12, %v3931_v1  ;;  %8923 = vrcp.f32 %v5627_v44  ;;  %v5628_v40 = vadd.f32 1.0, %v8904_v26  ;;  %v14762_v53 = vld [vmem:[#allocation54_spill] sm:$0xff] }
 0x240   : > { %14757 = vst [vmem:[#allocation139_spill] sm:$0xff] %v11752_v28  ;;  %v11759_v42 = vpop.eup %8909  ;;  %v7434_v47 = vmul.f32 -1.442695, %v14761_v0  ;;  %v11763_v35 = vmul.f32 %v14762_v53, %v3923_v59  ;;  %v7432_v1 = vmul.f32 -1.442695, %v14765_v33  ;;  %v2811_v12 = vmul.f32 %v11528_v22, %v2268_v55  ;;  %v14767_v33 = vld [vmem:[#allocation73_spill] sm:$0xff] }
 0x241   : > { %v11742_v15 = vpop.f32.mrb[172].mxu0  ;;  %14759 = vst [vmem:[#allocation53_spill] sm:$0xff] %v11755_v41  ;;  %14760 = vst [vmem:[#allocation140_spill] sm:$0xff] %v11759_v42  ;;  %8252 = vmatprep.mubr.msk.bf16.mxu1 %vm3311_vm3, %v3246_v6  ;;  %v11768_v2 = vpop.eup %8911  ;;  %v2271_v41 = vadd.f32 %v11451_v5, %v11553_v46  ;;  %v3934_v26 = vadd.f32 %v11417_v23, %v11587_v60  ;;  %8925 = vrcp.f32 %v5625_v11  ;;  %v5626_v46 = vadd.f32 1.0, %v8906_v21  ;;  %v14771_v28 = vld [vmem:[#allocation58_spill] sm:$0xff] }
 0x242   : > { %v11750_v58 = vpop.f32.mrb[173].mxu0  ;;  %14763 = vst [vmem:[#allocation72_spill] sm:$0xff] %v11763_v35  ;;  %14764 = vst [vmem:[#allocation54_spill] sm:$0xff] %v11768_v2  ;;  %8253 = vmatmul.mubr.msk.bf16.gmra.mrb[156].mxu1 %vm3311_vm3, %v3247_v32  ;;  %v11777_v0 = vpop.f32.mrb[60].mxu1  ;;  %v2809_v44 = vmul.f32 %v11528_v22, %v2260_v25  ;;  %v2263_v53 = vadd.f32 %v11451_v5, %v11568_v9  ;;  %v3926_v59 = vadd.f32 %v11417_v23, %v11594_v31  ;;  %v14768_v35 = vld [vmem:[#allocation55_spill] sm:$0xff] }
 0x243   : > { %v11757_v18 = vpop.f32.mrb[174].mxu0  ;;  %v11784_v55 = vpop.f32.mrb[61].mxu1  ;;  %v7435_v60 = vmul.f32 -1.442695, %v14767_v33  ;;  %v2812_v32 = vmul.f32 %v11528_v22, %v2271_v41  ;;  %v11791_v2 = vmul.f32 %v14768_v35, %v3934_v26  ;;  %8927 = vpow2.f32 %v7434_v47  ;;  %v14770_v9 = vld [vmem:[#allocation75_spill] sm:$0xff] }
 0x244   : > { %v11766_v61 = vpop.f32.mrb[175].mxu0  ;;  %v11786_v6 = vpop.eup %8913  ;;  %v7433_v42 = vmul.f32 -1.442695, %v14770_v9  ;;  %v2810_v31 = vmul.f32 %v11528_v22, %v2263_v53  ;;  %v11798_v29 = vmul.f32 %v14771_v28, %v3926_v59  ;;  %8929 = vpow2.f32 %v7432_v1 }
 0x245   : > { %14766 = vst [vmem:[#allocation74_spill] sm:$0xff] %v11786_v6  ;;  %14769 = vst [vmem:[#allocation73_spill] sm:$0xff] %v11791_v2  ;;  %v11793_v11 = vpop.f32.mrb[62].mxu1  ;;  %v8916_v25 = vpop.eup %8915  ;;  %v11803_v41 = vadd.f32 %v11459_v62, %v2811_v12  ;;  %v11806_v35 = vadd.f32 %v11459_v62, %v2812_v32  ;;  %v3947_v47 = vadd.f32 %v11417_v23, %v11630_v27  ;;  %8931 = vrcp.f32 %v5628_v40 }
 0x246   : > { %14772 = vst [vmem:[#allocation55_spill] sm:$0xff] %v11798_v29  ;;  %v11800_v6 = vpop.f32.mrb[63].mxu1  ;;  %v8918_v21 = vpop.eup %8917  ;;  %v11813_v53 = vadd.f32 %v11459_v62, %v2809_v44  ;;  %v11816_v28 = vadd.f32 %v11459_v62, %v2810_v31  ;;  %v2284_v1 = vadd.f32 %v11451_v5, %v11610_v48  ;;  %v3939_v12 = vadd.f32 %v11417_v23, %v11642_v4  ;;  %v14777_v31 = vld [vmem:[#allocation59_spill] sm:$0xff] }
 0x247   : > { %14773 = vst [vmem:[#allocation75_spill] sm:$0xff] %v11803_v41  ;;  %14774 = vst [vmem:[#allocation58_spill] sm:$0xff] %v11806_v35  ;;  %v8920_v33 = vpop.eup %8919  ;;  %v5631_v32 = vadd.f32 1.0, %v8916_v25  ;;  %v3249_v27 = vpack.c.bf16 %v11806_v35, %v11803_v41  ;;  %v2276_v44 = vadd.f32 %v11451_v5, %v11616_v24  ;;  %8933 = vrcp.f32 %v5626_v46  ;;  %v14779_v25 = vld [vmem:[#allocation60_spill] sm:$0xff]  ;;  %v14795_v41 = vld [vmem:[#allocation65_spill] sm:$0xff] }
 0x248   : > { %14775 = vst [vmem:[#allocation141_spill] sm:$0xff] %v11813_v53  ;;  %14776 = vst [vmem:[#allocation142_spill] sm:$0xff] %v11816_v28  ;;  %v3248_v48 = vpack.c.bf16 %v11816_v28, %v11813_v53  ;;  %v11833_v29 = vmul.f32 %v14777_v31, %v3947_v47  ;;  %v8922_v2 = vpop.eup %8921  ;;  %v5629_v40 = vadd.f32 1.0, %v8918_v21  ;;  %8935 = vpow2.f32 %v7435_v60 }
 0x249   : > { %v11810_v26 = vpop.f32.mrb[176].mxu0  ;;  %v11838_v37 = vmul.f32 %v14779_v25, %v3939_v12  ;;  %v11842_v24 = vpop.eup %8923  ;;  %8937 = vpow2.f32 %v7433_v42  ;;  %v2815_v46 = vmul.f32 %v11528_v22, %v2284_v1  ;;  %v2287_v28 = vadd.f32 %v11451_v5, %v11622_v8  ;;  %v14783_v8 = vld [vmem:[#allocation77_spill] sm:$0xff] }
 0x24a   : > { %v11822_v59 = vpop.f32.mrb[177].mxu0  ;;  %14778 = vst [vmem:[#allocation59_spill] sm:$0xff] %v11833_v29  ;;  %14781 = vst [vmem:[#allocation143_spill] sm:$0xff] %v11842_v24  ;;  %v3950_v47 = vadd.f32 %v11417_v23, %v11647_v63  ;;  %8256 = vmatprep.mubr.msk.bf16.mxu1 %vm3311_vm3, %v3248_v48  ;;  %8939 = vrcp.f32 %v5631_v32  ;;  %v5632_v60 = vadd.f32 1.0, %v8920_v33  ;;  %v2813_v12 = vmul.f32 %v11528_v22, %v2276_v44  ;;  %v14784_v48 = vld [vmem:[#allocation61_spill] sm:$0xff]  ;;  %v14835_v24 = vld [vmem:[#allocation82_spill] sm:$0xff] }
 0x24b   : > { %v11828_v9 = vpop.f32.mrb[178].mxu0  ;;  %14780 = vst [vmem:[#allocation60_spill] sm:$0xff] %v11838_v37  ;;  %v11840_v35 = vpop.f32.mrb[64].mxu1  ;;  %v2279_v31 = vadd.f32 %v11451_v5, %v11632_v19  ;;  %8257 = vmatmul.mubr.msk.bf16.gmra.mrb[160].mxu1 %vm3311_vm3, %v3249_v27  ;;  %v7438_v25 = vmul.f32 -1.442695, %v14783_v8  ;;  %v2816_v63 = vmul.f32 %v11528_v22, %v2287_v28  ;;  %v3942_v33 = vadd.f32 %v11417_v23, %v11656_v7 }
 0x24c   : > { %v11835_v4 = vpop.f32.mrb[179].mxu0  ;;  %v11850_v21 = vpop.f32.mrb[65].mxu1  ;;  %v11863_v37 = vmul.f32 %v14784_v48, %v3950_v47  ;;  %8941 = vrcp.f32 %v5629_v40  ;;  %v5630_v19 = vadd.f32 1.0, %v8922_v2  ;;  %v7436_v53 = vmul.f32 -1.442695, %v10904_v57  ;;  %v14788_v47 = vld [vmem:[#allocation62_spill] sm:$0xff] }
 0x24d   : > { %v11856_v42 = vpop.f32.mrb[66].mxu1  ;;  %v11858_v1 = vpop.eup %8925  ;;  %v2814_v27 = vmul.f32 %v11528_v22, %v2279_v31  ;;  %v11874_v8 = vadd.f32 %v11459_v62, %v2815_v46  ;;  %v11877_v28 = vadd.f32 %v11459_v62, %v2816_v63  ;;  %v11880_v48 = vmul.f32 %v14788_v47, %v3942_v33  ;;  %v14792_v63 = vld [vmem:[#allocation78_spill] sm:$0xff] }
 0x24e   : > { %14782 = vst [vmem:[#allocation144_spill] sm:$0xff] %v11858_v1  ;;  %14785 = vst [vmem:[#allocation77_spill] sm:$0xff] %v11863_v37  ;;  %v11867_v32 = vpop.f32.mrb[67].mxu1  ;;  %v8928_v29 = vpop.eup %8927  ;;  %8943 = vrcp.f32 %v5632_v60  ;;  %v11885_v2 = vadd.f32 %v11459_v62, %v2813_v12  ;;  %v2300_v57 = vadd.f32 %v11451_v5, %v11675_v45  ;;  %v7439_v37 = vmul.f32 -1.442695, %v14792_v63 }
 0x24f   : > { %14786 = vst [vmem:[#allocation61_spill] sm:$0xff] %v11874_v8  ;;  %14787 = vst [vmem:[#allocation145_spill] sm:$0xff] %v11877_v28  ;;  %v8930_v40 = vpop.eup %8929  ;;  %v11888_v31 = vadd.f32 %v11459_v62, %v2814_v27  ;;  %8945 = vpow2.f32 %v7438_v25  ;;  %v3251_v33 = vpack.c.bf16 %v11877_v28, %v11874_v8  ;;  %v3963_v60 = vadd.f32 %v11417_v23, %v11701_v52 }
 0x250   : > { %14789 = vst [vmem:[#allocation62_spill] sm:$0xff] %v11880_v48  ;;  %14790 = vst [vmem:[#allocation146_spill] sm:$0xff] %v11885_v2  ;;  %v11901_v12 = vpop.eup %8931  ;;  %8947 = vrcp.f32 %v5630_v19  ;;  %v5635_v27 = vadd.f32 1.0, %v8928_v29  ;;  %v5633_v63 = vadd.f32 1.0, %v8930_v40  ;;  %v2292_v52 = vadd.f32 %v11451_v5, %v11682_v50  ;;  %v14797_v50 = vld [vmem:[#allocation6_spill] sm:$0xff] }
 0x251   : > { %v11870_v44 = vpop.f32.mrb[180].mxu0  ;;  %14791 = vst [vmem:[#allocation147_spill] sm:$0xff] %v11888_v31  ;;  %14793 = vst [vmem:[#allocation78_spill] sm:$0xff] %v11901_v12  ;;  %v3250_v45 = vpack.c.bf16 %v11888_v31, %v11885_v2  ;;  %v11907_v25 = vpop.eup %8933  ;;  %8949 = vpow2.f32 %v7436_v53  ;;  %v11910_v28 = vmul.f32 %v14795_v41, %v3963_v60  ;;  %v2819_v29 = vmul.f32 %v11528_v22, %v2300_v57 }
 0x252   : > { %v11882_v7 = vpop.f32.mrb[181].mxu0  ;;  %14794 = vst [vmem:[#allocation148_spill] sm:$0xff] %v11907_v25  ;;  %v8936_v12 = vpop.eup %8935  ;;  %v3955_v19 = vadd.f32 %v11417_v23, %v11710_v34  ;;  %v2303_v31 = vadd.f32 %v11451_v5, %v11691_v10  ;;  %v3966_v53 = vadd.f32 %v11417_v23, %v11717_v38  ;;  %8951 = vpow2.f32 %v7439_v37  ;;  %v14799_v38 = vld [vmem:[#allocation67_spill] sm:$0xff]  ;;  %v14801_v37 = vld [vmem:[#allocation68_spill] sm:$0xff] }
 0x253   : > { %v11892_v46 = vpop.f32.mrb[182].mxu0  ;;  %v11905_v48 = vpop.f32.mrb[68].mxu1  ;;  %14796 = vst [vmem:[#allocation65_spill] sm:$0xff] %v11910_v28  ;;  %8260 = vmatprep.mubr.msk.bf16.mxu1 %vm3311_vm3, %v3250_v45  ;;  %v7437_v60 = vmul.f32 -1.442695, %v14797_v50  ;;  %v2817_v28 = vmul.f32 %v11528_v22, %v2292_v52  ;;  %v2295_v57 = vadd.f32 %v11451_v5, %v11703_v43  ;;  %8953 = vrcp.f32 %v5635_v27 }
 0x254   : > { %v11899_v47 = vpop.f32.mrb[183].mxu0  ;;  %v11914_v8 = vpop.f32.mrb[69].mxu1  ;;  %8261 = vmatmul.mubr.msk.bf16.gmra.mrb[164].mxu1 %vm3311_vm3, %v3251_v33  ;;  %v11936_v45 = vmul.f32 %v14799_v38, %v3955_v19  ;;  %v2820_v2 = vmul.f32 %v11528_v22, %v2303_v31  ;;  %v11940_v25 = vmul.f32 %v14801_v37, %v3966_v53  ;;  %8955 = vrcp.f32 %v5633_v63  ;;  %v14808_v38 = vld [vmem:[#allocation70_spill] sm:$0xff] }
 0x255   : > { %v11924_v41 = vpop.f32.mrb[70].mxu1  ;;  %v8938_v40 = vpop.eup %8937  ;;  %v5636_v52 = vadd.f32 1.0, %v8936_v12  ;;  %v2818_v43 = vmul.f32 %v11528_v22, %v2295_v57  ;;  %v3958_v33 = vadd.f32 %v11417_v23, %v11725_v3  ;;  %v7442_v19 = vmul.f32 -1.442695, %v10953_v49 }
 0x256   : > { %v11931_v34 = vpop.f32.mrb[71].mxu1  ;;  %v11933_v10 = vpop.eup %8939  ;;  %14800 = vst [vmem:[#allocation67_spill] sm:$0xff] %v11936_v45  ;;  %14802 = vst [vmem:[#allocation68_spill] sm:$0xff] %v11940_v25  ;;  %v11953_v31 = vadd.f32 %v11459_v62, %v2819_v29  ;;  %v11956_v53 = vadd.f32 %v11459_v62, %v2820_v2  ;;  %v2316_v12 = vadd.f32 %v11451_v5, %v11742_v15  ;;  %v5634_v25 = vadd.f32 1.0, %v8938_v40 }
 0x257   : > { %14798 = vst [vmem:[#allocation6_spill] sm:$0xff] %v11933_v10  ;;  %v11949_v27 = vpop.eup %8941  ;;  %v11963_v57 = vadd.f32 %v11459_v62, %v2817_v28  ;;  %v11966_v3 = vadd.f32 %v11459_v62, %v2818_v43  ;;  %v11969_v37 = vmul.f32 %v14808_v38, %v3958_v33  ;;  %v3979_v49 = vadd.f32 %v11417_v23, %v11777_v0  ;;  %v14812_v0 = vld [vmem:[#allocation84_spill] sm:$0xff] }
 0x258   : > { %14803 = vst [vmem:[#allocation149_spill] sm:$0xff] %v11949_v27  ;;  %14804 = vst [vmem:[#allocation150_spill] sm:$0xff] %v11953_v31  ;;  %v11975_v2 = vpop.eup %8943  ;;  %8957 = vpow2.f32 %v7437_v60  ;;  %v3253_v15 = vpack.c.bf16 %v11956_v53, %v11953_v31  ;;  %v7440_v43 = vmul.f32 -1.442695, %v10998_v20  ;;  %v7443_v45 = vmul.f32 -1.442695, %v14812_v0 }
 0x259   : > { %v11942_v50 = vpop.f32.mrb[184].mxu0  ;;  %14805 = vst [vmem:[#allocation151_spill] sm:$0xff] %v11956_v53  ;;  %14806 = vst [vmem:[#allocation152_spill] sm:$0xff] %v11963_v57  ;;  %v8946_v28 = vpop.eup %8945  ;;  %8959 = vrcp.f32 %v5636_v52  ;;  %v3252_v33 = vpack.c.bf16 %v11966_v3, %v11963_v57  ;;  %v2823_v40 = vmul.f32 %v11528_v22, %v2316_v12  ;;  %v14813_v60 = vld [vmem:[#allocation76_spill] sm:$0xff]  ;;  %v2308_v20 = vadd.f32 %v11451_v5, %v11750_v58 }
 0x25a   : > { %v11947_v1 = vpop.f32.mrb[185].mxu0  ;;  %14807 = vst [vmem:[#allocation153_spill] sm:$0xff] %v11966_v3  ;;  %14809 = vst [vmem:[#allocation70_spill] sm:$0xff] %v11969_v37  ;;  %v11984_v37 = vpop.eup %8947  ;;  %8961 = vpow2.f32 %v7442_v19  ;;  %v3971_v3 = vadd.f32 %v11417_v23, %v11784_v55  ;;  %v2319_v57 = vadd.f32 %v11451_v5, %v11757_v18  ;;  %v3982_v19 = vadd.f32 %v11417_v23, %v11793_v11  ;;  %v14815_v55 = vld [vmem:[#allocation5_spill] sm:$0xff]  ;;  %v14817_v11 = vld [vmem:[#allocation79_spill] sm:$0xff] }
 0x25b   : > { %v11960_v63 = vpop.f32.mrb[186].mxu0  ;;  %14810 = vst [vmem:[#allocation154_spill] sm:$0xff] %v11975_v2  ;;  %v11982_v38 = vpop.f32.mrb[72].mxu1  ;;  %14811 = vst [vmem:[#allocation155_spill] sm:$0xff] %v11984_v37  ;;  %v11989_v2 = vmul.f32 %v14813_v60, %v3979_v49  ;;  %8264 = vmatprep.mubr.msk.bf16.mxu1 %vm3311_vm3, %v3252_v33  ;;  %8963 = vrcp.f32 %v5634_v25  ;;  %v5639_v49 = vadd.f32 1.0, %v8946_v28  ;;  %v12022_v37 = vadd.f32 %v11459_v62, %v2823_v40  ;;  %v14829_v10 = vld [vmem:[#allocation92_spill] sm:$0xff] }
 0x25c   : > { %v11973_v29 = vpop.f32.mrb[187].mxu0  ;;  %v11991_v53 = vpop.f32.mrb[73].mxu1  ;;  %8265 = vmatmul.mubr.msk.bf16.gmra.mrb[168].mxu1 %vm3311_vm3, %v3253_v15  ;;  %8965 = vpow2.f32 %v7440_v43  ;;  %v2824_v18 = vmul.f32 %v11528_v22, %v2319_v57  ;;  %v12014_v31 = vmul.f32 %v14817_v11, %v3982_v19  ;;  %v14820_v15 = vld [vmem:[#allocation87_spill] sm:$0xff]  ;;  %v2311_v19 = vadd.f32 %v11451_v5, %v11766_v61 }
 0x25d   : > { %14814 = vst [vmem:[#allocation84_spill] sm:$0xff] %v11989_v2  ;;  %v8950_v52 = vpop.eup %8949  ;;  %v12002_v12 = vpop.f32.mrb[74].mxu1  ;;  %v12010_v2 = vmul.f32 %v14815_v55, %v3971_v3  ;;  %8967 = vpow2.f32 %v7443_v45  ;;  %v7441_v28 = vmul.f32 -1.442695, %v14820_v15  ;;  %14821 = vst [vmem:[#allocation87_spill] sm:$0xff] %v12022_v37  ;;  %v2821_v3 = vmul.f32 %v11528_v22, %v2308_v20 }
 0x25e   : > { %v12005_v0 = vpop.f32.mrb[75].mxu1  ;;  %v8952_v60 = vpop.eup %8951  ;;  %14818 = vst [vmem:[#allocation5_spill] sm:$0xff] %v12014_v31  ;;  %v12030_v57 = vadd.f32 %v11459_v62, %v2824_v18  ;;  %v3974_v45 = vadd.f32 %v11417_v23, %v11800_v6  ;;  %8969 = vrcp.f32 %v5639_v49  ;;  %v5637_v40 = vadd.f32 1.0, %v8950_v52  ;;  %v14824_v31 = vld [vmem:[#allocation89_spill] sm:$0xff]  ;;  %v14825_v6 = vld [vmem:[#allocation80_spill] sm:$0xff] }
 0x25f   : > { %14816 = vst [vmem:[#allocation76_spill] sm:$0xff] %v12010_v2  ;;  %v12018_v25 = vpop.eup %8953  ;;  %v3995_v11 = vadd.f32 %v11417_v23, %v11840_v35  ;;  %v5640_v15 = vadd.f32 1.0, %v8952_v60  ;;  %v7446_v2 = vmul.f32 -1.442695, %v14824_v31  ;;  %v2822_v18 = vmul.f32 %v11528_v22, %v2311_v19  ;;  %v14827_v49 = vld [vmem:[#allocation81_spill] sm:$0xff] }
 0x260   : > { %14819 = vst [vmem:[#allocation79_spill] sm:$0xff] %v12018_v25  ;;  %v12026_v43 = vpop.eup %8955  ;;  %14823 = vst [vmem:[#allocation157_spill] sm:$0xff] %v12030_v57  ;;  %v3255_v20 = vpack.c.bf16 %v12030_v57, %v12022_v37  ;;  %8971 = vpow2.f32 %v7441_v28  ;;  %v12047_v25 = vmul.f32 %v14825_v6, %v3974_v45  ;;  %v2332_v52 = vadd.f32 %v11451_v5, %v11810_v26 }
 0x261   : > { %v12007_v58 = vpop.f32.mrb[188].mxu0  ;;  %14822 = vst [vmem:[#allocation156_spill] sm:$0xff] %v12026_v43  ;;  %v6355_v35 = vmul.f32 %v14827_v49, %v3995_v11  ;;  %v7444_v57 = vmul.f32 -1.442695, %v14829_v10  ;;  %v12058_v19 = vadd.f32 %v11459_v62, %v2821_v3  ;;  %v12061_v37 = vadd.f32 %v11459_v62, %v2822_v18  ;;  %v14832_v11 = vld [vmem:[#allocation90_spill] sm:$0xff] }
 0x262   : > { %v12016_v33 = vpop.f32.mrb[189].mxu0  ;;  %v8958_v61 = vpop.eup %8957  ;;  %14826 = vst [vmem:[#allocation89_spill] sm:$0xff] %v12047_v25  ;;  %v3987_v28 = vadd.f32 %v11417_v23, %v11850_v21  ;;  %8973 = vrcp.f32 %v5637_v40  ;;  %v7447_v6 = vmul.f32 -1.442695, %v14832_v11  ;;  %v14833_v49 = vld [vmem:[#allocation66_spill] sm:$0xff]  ;;  %v2324_v10 = vadd.f32 %v11451_v5, %v11822_v59 }
 0x263   : > { %v12024_v27 = vpop.f32.mrb[190].mxu0  ;;  %v12044_v43 = vpop.f32.mrb[76].mxu1  ;;  %14830 = vst [vmem:[#allocation81_spill] sm:$0xff] %v12058_v19  ;;  %14831 = vst [vmem:[#allocation92_spill] sm:$0xff] %v12061_v37  ;;  %v12069_v25 = vadd.f32 %v6355_v35, %v14833_v49  ;;  %8975 = vrcp.f32 %v5640_v15  ;;  %v5638_v18 = vadd.f32 1.0, %v8958_v61  ;;  %v3254_v21 = vpack.c.bf16 %v12061_v37, %v12058_v19  ;;  %v14837_v37 = vld [vmem:[#allocation69_spill] sm:$0xff] }
 0x264   : > { %v12036_v55 = vpop.f32.mrb[191].mxu0  ;;  %v12052_v60 = vpop.f32.mrb[77].mxu1  ;;  %v6353_v51 = vmul.f32 %v14835_v24, %v3987_v28  ;;  %8977 = vpow2.f32 %v7446_v2  ;;  %v2827_v35 = vmul.f32 %v11528_v22, %v2332_v52  ;;  %v2335_v59 = vadd.f32 %v11451_v5, %v11828_v9  ;;  %v14839_v19 = vld [vmem:[#allocation83_spill] sm:$0xff] }
 0x265   : > { %v12054_v31 = vpop.eup %8959  ;;  %v12065_v45 = vpop.f32.mrb[78].mxu1  ;;  %14834 = vst [vmem:[#allocation90_spill] sm:$0xff] %v12069_v25  ;;  %v3998_v49 = vadd.f32 %v11417_v23, %v11856_v42  ;;  %8979 = vpow2.f32 %v7444_v57  ;;  %8268 = vmatprep.mubr.msk.bf16.mxu1 %vm3311_vm3, %v3254_v21  ;;  %v2825_v52 = vmul.f32 %v11528_v22, %v2324_v10  ;;  %v2327_v57 = vadd.f32 %v11451_v5, %v11835_v4 }
 0x266   : > { %14828 = vst [vmem:[#allocation80_spill] sm:$0xff] %v12054_v31  ;;  %v8962_v26 = vpop.eup %8961  ;;  %v12073_v3 = vpop.f32.mrb[79].mxu1  ;;  %v12092_v24 = vadd.f32 %v6353_v51, %v14837_v37  ;;  %8981 = vpow2.f32 %v7447_v6  ;;  %v2828_v9 = vmul.f32 %v11528_v22, %v2335_v59  ;;  %8269 = vmatmul.mubr.msk.bf16.gmra.mrb[172].mxu1 %vm3311_vm3, %v3255_v20  ;;  %v3990_v51 = vadd.f32 %v11417_v23, %v11867_v32  ;;  %v14845_v32 = vld [vmem:[#allocation85_spill] sm:$0xff] }
 0x267   : > { %v12082_v11 = vpop.eup %8963  ;;  %v5643_v25 = vadd.f32 1.0, %v8962_v26  ;;  %v6356_v42 = vmul.f32 %v14839_v19, %v3998_v49  ;;  %8983 = vrcp.f32 %v5638_v18  ;;  %v12110_v10 = vadd.f32 %v11459_v62, %v2827_v35  ;;  %v14843_v19 = vld [vmem:[#allocation71_spill] sm:$0xff] }
 0x268   : > { %14836 = vst [vmem:[#allocation66_spill] sm:$0xff] %v12082_v11  ;;  %v8966_v61 = vpop.eup %8965  ;;  %14838 = vst [vmem:[#allocation82_spill] sm:$0xff] %v12092_v24  ;;  %v12113_v21 = vadd.f32 %v11459_v62, %v2828_v9  ;;  %v2826_v59 = vmul.f32 %v11528_v22, %v2327_v57  ;;  %v6354_v49 = vmul.f32 %v14845_v32, %v3990_v51 }
 0x269   : > { %v12075_v31 = vpop.f32.mrb[192].mxu0  ;;  %v8968_v2 = vpop.eup %8967  ;;  %v5641_v6 = vadd.f32 1.0, %v8966_v61  ;;  %14841 = vst [vmem:[#allocation83_spill] sm:$0xff] %v12110_v10  ;;  %v12116_v20 = vadd.f32 %v6356_v42, %v14843_v19  ;;  %v4011_v24 = vadd.f32 %v11417_v23, %v11905_v48  ;;  %8985 = vrcp.f32 %v5643_v25  ;;  %v14849_v48 = vld [vmem:[#allocation2_spill] sm:$0xff] }
 0x26a   : > { %v12080_v40 = vpop.f32.mrb[193].mxu0  ;;  %v12107_v26 = vpop.eup %8969  ;;  %14842 = vst [vmem:[#allocation158_spill] sm:$0xff] %v12113_v21  ;;  %v5644_v4 = vadd.f32 1.0, %v8968_v2  ;;  %v12128_v11 = vadd.f32 %v11459_v62, %v2825_v52  ;;  %v3257_v42 = vpack.c.bf16 %v12113_v21, %v12110_v10  ;;  %v12137_v51 = vadd.f32 %v11459_v62, %v2826_v59 }
 0x26b   : > { %v12089_v15 = vpop.f32.mrb[194].mxu0  ;;  %v12105_v37 = vpop.f32.mrb[80].mxu1  ;;  %14840 = vst [vmem:[#allocation69_spill] sm:$0xff] %v12107_v26  ;;  %14844 = vst [vmem:[#allocation71_spill] sm:$0xff] %v12116_v20  ;;  %v14846_v26 = vld [vmem:[#allocation93_spill] sm:$0xff]  ;;  %v12140_v19 = vadd.f32 %v6354_v49, %v14849_v48  ;;  %v2348_v25 = vadd.f32 %v11451_v5, %v11870_v44  ;;  %8987 = vrcp.f32 %v5641_v6  ;;  %v2340_v10 = vadd.f32 %v11451_v5, %v11882_v7 }
 0x26c   : > { %v12095_v28 = vpop.f32.mrb[195].mxu0  ;;  %v12118_v18 = vpop.f32.mrb[81].mxu1  ;;  %v7445_v9 = vmul.f32 -1.442695, %v14846_v26  ;;  %14847 = vst [vmem:[#allocation85_spill] sm:$0xff] %v12128_v11  ;;  %14848 = vst [vmem:[#allocation93_spill] sm:$0xff] %v12137_v51  ;;  %v4003_v59 = vadd.f32 %v11417_v23, %v11914_v8  ;;  %8989 = vrcp.f32 %v5644_v4  ;;  %v2351_v4 = vadd.f32 %v11451_v5, %v11892_v46 }
 0x26d   : > { %v12124_v61 = vpop.f32.mrb[82].mxu1  ;;  %v8972_v35 = vpop.eup %8971  ;;  %14850 = vst [vmem:[#allocation2_spill] sm:$0xff] %v12140_v19  ;;  %v14851_v26 = vld [vmem:[#allocation86_spill] sm:$0xff]  ;;  %v7450_v21 = vmul.f32 -1.442695, %v11142_v13  ;;  %v14855_v19 = vld [vmem:[#allocation3_spill] sm:$0xff]  ;;  %v2831_v8 = vmul.f32 %v11528_v22, %v2348_v25 }
 0x26e   : > { %v12132_v2 = vpop.f32.mrb[83].mxu1  ;;  %v6359_v32 = vmul.f32 %v14851_v26, %v4011_v24  ;;  %v12147_v20 = vpop.eup %8973  ;;  %v7448_v44 = vmul.f32 -1.442695, %v11152_v56  ;;  %v3256_v24 = vpack.c.bf16 %v12137_v51, %v12128_v11  ;;  %v5642_v13 = vadd.f32 1.0, %v8972_v35  ;;  %v14859_v46 = vld [vmem:[#allocation4_spill] sm:$0xff]  ;;  %v14870_v11 = vld [vmem:[#allocation91_spill] sm:$0xff] }
 0x26f   : > { %14852 = vst [vmem:[#allocation86_spill] sm:$0xff] %v12147_v20  ;;  %v12156_v48 = vpop.eup %8975  ;;  %8991 = vpow2.f32 %v7445_v9  ;;  %v4014_v56 = vadd.f32 %v11417_v23, %v11924_v41  ;;  %v2829_v9 = vmul.f32 %v11528_v22, %v2340_v10  ;;  %v2832_v41 = vmul.f32 %v11528_v22, %v2351_v4  ;;  %v14861_v10 = vld [vmem:[#allocation88_spill] sm:$0xff] }
 0x270   : > { %14854 = vst [vmem:[#allocation160_spill] sm:$0xff] %v12156_v48  ;;  %v8978_v6 = vpop.eup %8977  ;;  %v12164_v7 = vadd.f32 %v6359_v32, %v14855_v19  ;;  %8272 = vmatprep.mubr.msk.bf16.mxu1 %vm3311_vm3, %v3256_v24  ;;  %8993 = vpow2.f32 %v7450_v21  ;;  %v2343_v19 = vadd.f32 %v11451_v5, %v11899_v47 }
 0x271   : > { %v12134_v57 = vpop.f32.mrb[196].mxu0  ;;  %v8980_v20 = vpop.eup %8979  ;;  %8273 = vmatmul.mubr.msk.bf16.gmra.mrb[176].mxu1 %vm3311_vm3, %v3257_v42  ;;  %8995 = vpow2.f32 %v7448_v44  ;;  %v5647_v21 = vadd.f32 1.0, %v8978_v6  ;;  %v12196_v44 = vadd.f32 %v11459_v62, %v2831_v8  ;;  %v12214_v8 = vadd.f32 %v11459_v62, %v2829_v9 }
 0x272   : > { %v12145_v52 = vpop.f32.mrb[197].mxu0  ;;  %14856 = vst [vmem:[#allocation3_spill] sm:$0xff] %v12164_v7  ;;  %v8982_v35 = vpop.eup %8981  ;;  %8997 = vrcp.f32 %v5642_v13  ;;  %v2830_v5 = vmul.f32 %v11528_v22, %v2343_v19  ;;  %v5645_v24 = vadd.f32 1.0, %v8980_v20  ;;  %v12204_v13 = vld [vmem:[%s14365_s6] ss:$0 sm:$0xff]  ;;  %v14865_v19 = vld [vmem:[#allocation95_spill] sm:$0xff] }
 0x273   : > { %v12154_v49 = vpop.f32.mrb[198].mxu0  ;;  %v12173_v51 = vpop.f32.mrb[84].mxu1  ;;  %14862 = vst [vmem:[#allocation88_spill] sm:$0xff] %v12196_v44  ;;  %v4006_v6 = vadd.f32 %v12204_v13, %v11931_v34  ;;  %v7451_v20 = vmul.f32 -1.442695, %v14865_v19  ;;  %14866 = vst [vmem:[#allocation95_spill] sm:$0xff] %v12214_v8  ;;  %8999 = vrcp.f32 %v5647_v21 }
 0x274   : > { %14853 = vst [vmem:[#allocation159_spill] sm:$0xff] %v12154_v49  ;;  %v12161_v26 = vpop.f32.mrb[199].mxu0  ;;  %v14857_v49 = vld [vmem:[#allocation33_spill] sm:$0xff]  ;;  %v12179_v25 = vpop.f32.mrb[85].mxu1  ;;  %v5648_v7 = vadd.f32 1.0, %v8982_v35  ;;  %9001 = vrcp.f32 %v5645_v24 }
 0x275   : > { %v6357_v14 = vmul.f32 %v14857_v49, %v4003_v59  ;;  %v12181_v32 = vpop.eup %8983  ;;  %v12187_v59 = vpop.f32.mrb[86].mxu1  ;;  %v6360_v49 = vmul.f32 %v14861_v10, %v4014_v56  ;;  %v12220_v10 = vadd.f32 %v11459_v62, %v2830_v5  ;;  %v12230_v19 = vld [vmem:[%s14361_s2] ss:$0 sm:$0xff]  ;;  %v4027_v5 = vadd.f32 %v12204_v13, %v11982_v38 }
 0x276   : > { %14858 = vst [vmem:[#allocation33_spill] sm:$0xff] %v12181_v32  ;;  %v12191_v47 = vpop.f32.mrb[87].mxu1  ;;  %v12210_v56 = vpop.eup %8985  ;;  %v6358_v32 = vmul.f32 %v14870_v11, %v4006_v6  ;;  %v2364_v9 = vadd.f32 %v12230_v19, %v11942_v50  ;;  %v14873_v6 = vld [vmem:[#allocation97_spill] sm:$0xff]  ;;  %v2356_v50 = vadd.f32 %v12230_v19, %v11947_v1  ;;  %9003 = vpow2.f32 %v7451_v20 }
 0x277   : > { %v12184_v23 = vadd.f32 %v6357_v14, %v14859_v46  ;;  %v12199_v14 = vadd.f32 %v11459_v62, %v2832_v41  ;;  %14864 = vst [vmem:[#allocation162_spill] sm:$0xff] %v12210_v56  ;;  %v14867_v46 = vld [vmem:[#allocation24_spill] sm:$0xff]  ;;  %14869 = vst [vmem:[#allocation163_spill] sm:$0xff] %v12220_v10  ;;  %v12236_v62 = vpop.eup %8987  ;;  %v3258_v35 = vpack.c.bf16 %v12220_v10, %v12214_v8  ;;  %v7454_v10 = vmul.f32 -1.442695, %v11221_v17  ;;  %v14876_v8 = vld [vmem:[#allocation14_spill] sm:$0xff] }
 0x278   : > { %v12217_v41 = vadd.f32 %v6360_v49, %v14867_v46  ;;  %14871 = vst [vmem:[#allocation91_spill] sm:$0xff] %v12236_v62  ;;  %v12242_v11 = vpop.eup %8989  ;;  %v7449_v46 = vmul.f32 -1.442695, %v14873_v6  ;;  %v6363_v62 = vmul.f32 %v14876_v8, %v4027_v5  ;;  %v4019_v38 = vadd.f32 %v12204_v13, %v11991_v53  ;;  %v14879_v5 = vld [vmem:[#allocation94_spill] sm:$0xff] }
 0x279   : > { %14860 = vst [vmem:[#allocation4_spill] sm:$0xff] %v12184_v23  ;;  %v12193_v42 = vpop.f32.mrb[200].mxu0  ;;  %14863 = vst [vmem:[#allocation161_spill] sm:$0xff] %v12199_v14  ;;  %v3259_v34 = vpack.c.bf16 %v12199_v14, %v12196_v44  ;;  %v8992_v21 = vpop.eup %8991  ;;  %8276 = vmatprep.mubr.msk.bf16.mxu1 %vm3311_vm3, %v3258_v35  ;;  %9005 = vrcp.f32 %v5648_v7  ;;  %v2367_v1 = vadd.f32 %v12230_v19, %v11960_v63  ;;  %v14891_v56 = vld [vmem:[#allocation98_spill] sm:$0xff] }
 0x27a   : > { %v12208_v4 = vpop.f32.mrb[201].mxu0  ;;  %14868 = vst [vmem:[#allocation24_spill] sm:$0xff] %v12217_v41  ;;  %14872 = vst [vmem:[#allocation164_spill] sm:$0xff] %v12242_v11  ;;  %v14874_v41 = vld [vmem:[#allocation27_spill] sm:$0xff]  ;;  %v4030_v20 = vadd.f32 %v12204_v13, %v12002_v12  ;;  %v8994_v8 = vpop.eup %8993  ;;  %v2833_v35 = vmul.f32 %v11528_v22, %v2356_v50  ;;  %v6361_v7 = vmul.f32 %v14879_v5, %v4019_v38  ;;  %9007 = vpow2.f32 %v7449_v46  ;;  %v14881_v50 = vld [vmem:[#allocation8_spill] sm:$0xff] }
 0x27b   : > { %v12222_v23 = vpop.f32.mrb[202].mxu0  ;;  %v12246_v14 = vadd.f32 %v6358_v32, %v14874_v41  ;;  %v12250_v44 = vpop.f32.mrb[88].mxu1  ;;  %v2835_v32 = vmul.f32 %v11528_v22, %v2364_v9  ;;  %8277 = vmatmul.mubr.msk.bf16.gmra.mrb[180].mxu1 %vm3311_vm3, %v3259_v34  ;;  %v14877_v41 = vld [vmem:[#allocation7_spill] sm:$0xff]  ;;  %v2359_v9 = vadd.f32 %v12230_v19, %v11973_v29  ;;  %v7452_v34 = vmul.f32 -1.442695, %v11231_v36 }
 0x27c   : > { %v12234_v49 = vpop.f32.mrb[203].mxu0  ;;  %v12257_v24 = vpop.f32.mrb[89].mxu1  ;;  %v12268_v53 = vadd.f32 %v6363_v62, %v14877_v41  ;;  %9009 = vpow2.f32 %v7454_v10  ;;  %v12285_v38 = vadd.f32 %v6361_v7, %v14881_v50  ;;  %v14883_v41 = vld [vmem:[#allocation96_spill] sm:$0xff]  ;;  %v12291_v5 = vld [vmem:[%s14362_s3] ss:$0 sm:$0xff]  ;;  %v4022_v7 = vadd.f32 %v12204_v13, %v12005_v0 }
 0x27d   : > { %14875 = vst [vmem:[#allocation97_spill] sm:$0xff] %v12246_v14  ;;  %v12265_v17 = vpop.f32.mrb[90].mxu1  ;;  %v8996_v12 = vpop.eup %8995  ;;  %v2836_v14 = vmul.f32 %v11528_v22, %v2367_v1  ;;  %v6364_v29 = vmul.f32 %v14883_v41, %v4030_v20  ;;  %v2834_v46 = vmul.f32 %v12291_v5, %v2359_v9  ;;  %v5646_v22 = vadd.f32 1.0, %v8992_v21  ;;  %v12299_v1 = vld [vmem:[%s14363_s4] ss:$0 sm:$0xff]  ;;  %v14887_v21 = vld [vmem:[#allocation9_spill] sm:$0xff] }
 0x27e   : > { %14878 = vst [vmem:[#allocation27_spill] sm:$0xff] %v12268_v53  ;;  %v12274_v6 = vpop.f32.mrb[91].mxu1  ;;  %v12282_v62 = vpop.eup %8997  ;;  %14882 = vst [vmem:[#allocation7_spill] sm:$0xff] %v12285_v38  ;;  %v12302_v10 = vadd.f32 %v12299_v1, %v2835_v32  ;;  %v5651_v9 = vadd.f32 1.0, %v8994_v8  ;;  %v12312_v41 = vadd.f32 %v12299_v1, %v2833_v35  ;;  %9011 = vpow2.f32 %v7452_v34 }
 0x27f   : > { %14880 = vst [vmem:[#allocation14_spill] sm:$0xff] %v12282_v62  ;;  %v12305_v20 = vadd.f32 %v12299_v1, %v2836_v14  ;;  %v12315_v38 = vadd.f32 %v6364_v29, %v14887_v21  ;;  %v12318_v53 = vadd.f32 %v12299_v1, %v2834_v46  ;;  %v7455_v32 = vmul.f32 -1.442695, %v11224_v54  ;;  %v12325_v0 = vpop.eup %8999 }
 0x280   : > { %14884 = vst [vmem:[#allocation94_spill] sm:$0xff] %v12302_v10  ;;  %14886 = vst [vmem:[#allocation96_spill] sm:$0xff] %v12312_v41  ;;  %v5649_v8 = vadd.f32 1.0, %v8996_v12  ;;  %v6362_v29 = vmul.f32 %v14891_v56, %v4022_v7  ;;  %v2380_v46 = vadd.f32 %v12230_v19, %v12007_v58  ;;  %v12334_v34 = vpop.eup %9001  ;;  %9013 = vrcp.f32 %v5646_v22  ;;  %v14893_v56 = vld [vmem:[#allocation44_spill] sm:$0xff]  ;;  %v14894_v58 = vld [vmem:[#allocation10_spill] sm:$0xff] }
 0x281   : > { %v12276_v63 = vpop.f32.mrb[204].mxu0  ;;  %14885 = vst [vmem:[#allocation8_spill] sm:$0xff] %v12305_v20  ;;  %14888 = vst [vmem:[#allocation9_spill] sm:$0xff] %v12315_v38  ;;  %v3261_v14 = vpack.c.bf16 %v12305_v20, %v12302_v10  ;;  %v3260_v35 = vpack.c.bf16 %v12318_v53, %v12312_v41  ;;  %v7453_v54 = vmul.f32 -1.442695, %v11234_v30  ;;  %v4043_v38 = vadd.f32 %v12204_v13, %v12044_v43  ;;  %v14897_v43 = vld [vmem:[#allocation99_spill] sm:$0xff] }
 0x282   : > { %v12280_v11 = vpop.f32.mrb[205].mxu0  ;;  %14889 = vst [vmem:[#allocation165_spill] sm:$0xff] %v12318_v53  ;;  %14890 = vst [vmem:[#allocation166_spill] sm:$0xff] %v12325_v0  ;;  %v4035_v12 = vadd.f32 %v12204_v13, %v12052_v60  ;;  %v9004_v53 = vpop.eup %9003  ;;  %9015 = vrcp.f32 %v5651_v9  ;;  %v7458_v7 = vmul.f32 -1.442695, %v14893_v56  ;;  %v12345_v41 = vadd.f32 %v6362_v29, %v14894_v58  ;;  %v14904_v0 = vld [vmem:[#allocation101_spill] sm:$0xff] }
 0x283   : > { %v12294_v36 = vpop.f32.mrb[206].mxu0  ;;  %v12323_v62 = vpop.f32.mrb[92].mxu1  ;;  %14892 = vst [vmem:[#allocation98_spill] sm:$0xff] %v12334_v34  ;;  %8280 = vmatprep.mubr.msk.bf16.mxu1 %vm3311_vm3, %v3260_v35  ;;  %9017 = vpow2.f32 %v7455_v32  ;;  %v6367_v60 = vmul.f32 %v14897_v43, %v4043_v38  ;;  %v2372_v34 = vadd.f32 %v12230_v19, %v12016_v33  ;;  %v2839_v29 = vmul.f32 %v12291_v5, %v2380_v46  ;;  %v14898_v35 = vld [vmem:[#allocation100_spill] sm:$0xff]  ;;  %v14899_v38 = vld [vmem:[#allocation11_spill] sm:$0xff] }
 0x284   : > { %v12309_v50 = vpop.f32.mrb[207].mxu0  ;;  %v12332_v21 = vpop.f32.mrb[93].mxu1  ;;  %14895 = vst [vmem:[#allocation44_spill] sm:$0xff] %v12345_v41  ;;  %8281 = vmatmul.mubr.msk.bf16.gmra.mrb[184].mxu1 %vm3311_vm3, %v3261_v14  ;;  %9019 = vrcp.f32 %v5649_v8  ;;  %v6365_v56 = vmul.f32 %v14898_v35, %v4035_v12  ;;  %v2383_v58 = vadd.f32 %v12230_v19, %v12024_v27  ;;  %v4046_v33 = vadd.f32 %v12204_v13, %v12065_v45  ;;  %v14902_v46 = vld [vmem:[#allocation12_spill] sm:$0xff] }
 0x285   : > { %v12341_v20 = vpop.f32.mrb[94].mxu1  ;;  %v12352_v10 = vpop.eup %9005  ;;  %9021 = vpow2.f32 %v7453_v54  ;;  %v12367_v43 = vadd.f32 %v6367_v60, %v14899_v38  ;;  %v2837_v35 = vmul.f32 %v12291_v5, %v2372_v34  ;;  %v2375_v60 = vadd.f32 %v12230_v19, %v12036_v55 }
 0x286   : > { %v12348_v22 = vpop.f32.mrb[95].mxu1  ;;  %14896 = vst [vmem:[#allocation10_spill] sm:$0xff] %v12352_v10  ;;  %v9008_v32 = vpop.eup %9007  ;;  %v5652_v10 = vadd.f32 1.0, %v9004_v53  ;;  %9023 = vpow2.f32 %v7458_v7  ;;  %v12374_v12 = vadd.f32 %v6365_v56, %v14902_v46  ;;  %v2840_v27 = vmul.f32 %v12291_v5, %v2383_v58  ;;  %v14907_v58 = vld [vmem:[#allocation13_spill] sm:$0xff] }
 0x287   : > { %14900 = vst [vmem:[#allocation99_spill] sm:$0xff] %v12367_v43  ;;  %v9010_v8 = vpop.eup %9009  ;;  %v6368_v54 = vmul.f32 %v14904_v0, %v4046_v33  ;;  %v4038_v45 = vadd.f32 %v12204_v13, %v12073_v3  ;;  %v5650_v43 = vadd.f32 1.0, %v9008_v32  ;;  %v12386_v53 = vadd.f32 %v12299_v1, %v2839_v29  ;;  %v14909_v33 = vld [vmem:[#allocation102_spill] sm:$0xff] }
 0x288   : > { %14903 = vst [vmem:[#allocation11_spill] sm:$0xff] %v12374_v12  ;;  %v12389_v7 = vadd.f32 %v12299_v1, %v2840_v27  ;;  %v4059_v34 = vadd.f32 %v12204_v13, %v12105_v37  ;;  %v9012_v0 = vpop.eup %9011  ;;  %v2838_v3 = vmul.f32 %v12291_v5, %v2375_v60  ;;  %v2396_v29 = vadd.f32 %v12230_v19, %v12075_v31  ;;  %v14910_v12 = vld [vmem:[#allocation106_spill] sm:$0xff] }
 0x289   : > { %v12350_v30 = vpop.f32.mrb[208].mxu0  ;;  %14905 = vst [vmem:[#allocation12_spill] sm:$0xff] %v12386_v53  ;;  %v12396_v55 = vadd.f32 %v6368_v54, %v14907_v58  ;;  %v6366_v46 = vmul.f32 %v14909_v33, %v4038_v45  ;;  %9025 = vrcp.f32 %v5652_v10  ;;  %v5655_v27 = vadd.f32 1.0, %v9010_v8  ;;  %v14916_v45 = vld [vmem:[#allocation34_spill] sm:$0xff]  ;;  %v14918_v8 = vld [vmem:[#allocation103_spill] sm:$0xff] }
 0x28a   : > { %v12358_v9 = vpop.f32.mrb[209].mxu0  ;;  %14906 = vst [vmem:[#allocation101_spill] sm:$0xff] %v12389_v7  ;;  %v7456_v48 = vmul.f32 -1.442695, %v14910_v12  ;;  %v3263_v37 = vpack.c.bf16 %v12389_v7, %v12386_v53  ;;  %v12411_v58 = vpop.eup %9013  ;;  %v12414_v60 = vadd.f32 %v12299_v1, %v2837_v35  ;;  %v12417_v31 = vadd.f32 %v12299_v1, %v2838_v3 }
 0x28b   : > { %v12364_v41 = vpop.f32.mrb[210].mxu0  ;;  %v12383_v38 = vpop.f32.mrb[96].mxu1  ;;  %14908 = vst [vmem:[#allocation13_spill] sm:$0xff] %v12396_v55  ;;  %14913 = vst [vmem:[#allocation167_spill] sm:$0xff] %v12411_v58  ;;  %v12420_v10 = vadd.f32 %v6366_v46, %v14916_v45  ;;  %v6371_v12 = vmul.f32 %v14918_v8, %v4059_v34  ;;  %v14921_v55 = vld [vmem:[#allocation105_spill] sm:$0xff]  ;;  %v2388_v58 = vadd.f32 %v12230_v19, %v12080_v40  ;;  %9027 = vrcp.f32 %v5650_v43 }
 0x28c   : > { %v12371_v14 = vpop.f32.mrb[211].mxu0  ;;  %v12393_v56 = vpop.f32.mrb[97].mxu1  ;;  %14914 = vst [vmem:[#allocation168_spill] sm:$0xff] %v12414_v60  ;;  %14915 = vst [vmem:[#allocation169_spill] sm:$0xff] %v12417_v31  ;;  %v7459_v53 = vmul.f32 -1.442695, %v14921_v55  ;;  %v4051_v35 = vadd.f32 %v12204_v13, %v12118_v18  ;;  %v2399_v3 = vadd.f32 %v12230_v19, %v12089_v15  ;;  %v3262_v34 = vpack.c.bf16 %v12417_v31, %v12414_v60 }
 0x28d   : > { %14901 = vst [vmem:[#allocation100_spill] sm:$0xff] %v12371_v14  ;;  %v12402_v32 = vpop.f32.mrb[98].mxu1  ;;  %14917 = vst [vmem:[#allocation34_spill] sm:$0xff] %v12420_v10  ;;  %v12425_v7 = vpop.eup %9015  ;;  %v2843_v45 = vmul.f32 %v12291_v5, %v2396_v29  ;;  %9029 = vrcp.f32 %v5655_v27  ;;  %v5653_v40 = vadd.f32 1.0, %v9012_v0  ;;  %v14924_v10 = vld [vmem:[#allocation107_spill] sm:$0xff]  ;;  %v4062_v29 = vadd.f32 %v12204_v13, %v12124_v61  ;;  %v14949_v60 = vld [vmem:[#allocation110_spill] sm:$0xff] }
 0x28e   : > { %v12407_v14 = vpop.f32.mrb[99].mxu1  ;;  %14920 = vst [vmem:[#allocation170_spill] sm:$0xff] %v12425_v7  ;;  %v9018_v46 = vpop.eup %9017  ;;  %v7457_v18 = vmul.f32 -1.442695, %v14924_v10  ;;  %v14925_v7 = vld [vmem:[#allocation15_spill] sm:$0xff]  ;;  %9031 = vpow2.f32 %v7456_v48  ;;  %8284 = vmatprep.mubr.msk.bf16.mxu1 %vm3311_vm3, %v3262_v34  ;;  %v2841_v0 = vmul.f32 %v12291_v5, %v2388_v58  ;;  %v4054_v48 = vadd.f32 %v12204_v13, %v12132_v2 }
 0x28f   : > { %14911 = vst [vmem:[#allocation102_spill] sm:$0xff] %v12407_v14  ;;  %v12441_v55 = vpop.eup %9019  ;;  %v2844_v14 = vmul.f32 %v12291_v5, %v2399_v3  ;;  %9033 = vpow2.f32 %v7459_v53  ;;  %8285 = vmatmul.mubr.msk.bf16.gmra.mrb[188].mxu1 %vm3311_vm3, %v3263_v37  ;;  %v5656_v10 = vadd.f32 1.0, %v9018_v46  ;;  %v12463_v61 = vadd.f32 %v12299_v1, %v2843_v45  ;;  %v14932_v2 = vld [vmem:[#allocation43_spill] sm:$0xff] }
 0x290   : > { %14923 = vst [vmem:[#allocation171_spill] sm:$0xff] %v12441_v55  ;;  %v9022_v15 = vpop.eup %9021  ;;  %9035 = vpow2.f32 %v7457_v18  ;;  %v6372_v3 = vmul.f32 %v14932_v2, %v4062_v29  ;;  %v14936_v29 = vld [vmem:[#allocation17_spill] sm:$0xff] }
 0x291   : > { %v12409_v54 = vpop.f32.mrb[212].mxu0  ;;  %v9024_v27 = vpop.eup %9023  ;;  %14928 = vst [vmem:[#allocation15_spill] sm:$0xff] %v12463_v61  ;;  %v12469_v53 = vadd.f32 %v12299_v1, %v2844_v14  ;;  %9037 = vrcp.f32 %v5653_v40  ;;  %v5654_v18 = vadd.f32 1.0, %v9022_v15  ;;  %v4075_v15 = vadd.f32 %v12204_v13, %v12173_v51 }
 0x292   : > { %14912 = vst [vmem:[#allocation106_spill] sm:$0xff] %v12409_v54  ;;  %v12423_v33 = vpop.f32.mrb[213].mxu0  ;;  %9039 = vrcp.f32 %v5656_v10  ;;  %v2404_v10 = vadd.f32 %v12230_v19, %v12145_v52  ;;  %v4067_v51 = vadd.f32 %v12204_v13, %v12179_v25  ;;  %v14946_v25 = vld [vmem:[#allocation113_spill] sm:$0xff] }
 0x293   : > { %14919 = vst [vmem:[#allocation103_spill] sm:$0xff] %v12423_v33  ;;  %v12434_v54 = vpop.f32.mrb[214].mxu0  ;;  %v12445_v33 = vadd.f32 %v6371_v12, %v14925_v7  ;;  %v12452_v31 = vpop.f32.mrb[100].mxu1  ;;  %v2391_v7 = vadd.f32 %v12230_v19, %v12095_v28  ;;  %v14929_v12 = vld [vmem:[#allocation16_spill] sm:$0xff]  ;;  %v7462_v28 = vmul.f32 -1.442695, %v11379_v39  ;;  %v3265_v45 = vpack.c.bf16 %v12469_v53, %v12463_v61 }
 0x294   : > { %14922 = vst [vmem:[#allocation105_spill] sm:$0xff] %v12434_v54  ;;  %v12439_v8 = vpop.f32.mrb[215].mxu0  ;;  %v14927_v54 = vld [vmem:[#allocation104_spill] sm:$0xff]  ;;  %14931 = vst [vmem:[#allocation16_spill] sm:$0xff] %v12469_v53  ;;  %v12488_v39 = vadd.f32 %v12299_v1, %v2841_v0  ;;  %v14939_v53 = vld [vmem:[#allocation18_spill] sm:$0xff] }
 0x295   : > { %14926 = vst [vmem:[#allocation107_spill] sm:$0xff] %v12445_v33  ;;  %v6369_v43 = vmul.f32 %v14927_v54, %v4051_v35  ;;  %v12460_v54 = vpop.f32.mrb[101].mxu1  ;;  %v2842_v37 = vmul.f32 %v12291_v5, %v2391_v7  ;;  %v12491_v7 = vadd.f32 %v6372_v3, %v14936_v29  ;;  %9041 = vpow2.f32 %v7462_v28  ;;  %v14943_v29 = vld [vmem:[#allocation159_spill] sm:$0xff] }
 0x296   : > { %v12471_v58 = vpop.f32.mrb[102].mxu1  ;;  %v7460_v3 = vmul.f32 -1.442695, %v11401_v16  ;;  %v2415_v28 = vadd.f32 %v12230_v19, %v14943_v29  ;;  %9043 = vrcp.f32 %v5654_v18  ;;  %v14947_v33 = vld [vmem:[#allocation19_spill] sm:$0xff] }
 0x297   : > { %v12466_v35 = vadd.f32 %v6369_v43, %v14929_v12  ;;  %v12476_v34 = vpop.f32.mrb[103].mxu1  ;;  %v14933_v43 = vld [vmem:[#allocation108_spill] sm:$0xff]  ;;  %14937 = vst [vmem:[#allocation17_spill] sm:$0xff] %v12491_v7  ;;  %v12494_v2 = vadd.f32 %v12299_v1, %v2842_v37  ;;  %v4078_v7 = vadd.f32 %v12204_v13, %v12187_v59  ;;  %v2845_v59 = vmul.f32 %v12291_v5, %v2404_v10 }
 0x298   : > { %v6370_v14 = vmul.f32 %v14933_v43, %v4054_v48  ;;  %14935 = vst [vmem:[#allocation108_spill] sm:$0xff] %v12488_v39  ;;  %v2412_v48 = vadd.f32 %v12230_v19, %v12134_v57  ;;  %v2848_v18 = vmul.f32 %v12291_v5, %v2415_v28  ;;  %9045 = vpow2.f32 %v7460_v3  ;;  %v14955_v28 = vld [vmem:[#allocation21_spill] sm:$0xff] }
 0x299   : > { %14930 = vst [vmem:[#allocation104_spill] sm:$0xff] %v12466_v35  ;;  %v12478_v46 = vpop.f32.mrb[216].mxu0  ;;  %v12485_v35 = vpop.eup %9025  ;;  %14938 = vst [vmem:[#allocation172_spill] sm:$0xff] %v12494_v2  ;;  %v3264_v37 = vpack.c.bf16 %v12494_v2, %v12488_v39  ;;  %v5659_v2 = vadd.f32 1.0, %v9024_v27  ;;  %v14945_v39 = vld [vmem:[#allocation112_spill] sm:$0xff]  ;;  %v4070_v3 = vadd.f32 %v12204_v13, %v12191_v47 }
 0x29a   : > { %v12483_v12 = vpop.f32.mrb[217].mxu0  ;;  %14934 = vst [vmem:[#allocation43_spill] sm:$0xff] %v12485_v35  ;;  %v12499_v61 = vadd.f32 %v6370_v14, %v14939_v53  ;;  %v12512_v43 = vpop.eup %9027  ;;  %v2847_v53 = vmul.f32 %v12291_v5, %v2412_v48  ;;  %v14942_v14 = vld [vmem:[#allocation109_spill] sm:$0xff]  ;;  %v7463_v52 = vmul.f32 -1.442695, %v14945_v39 }
 0x29b   : > { %v12496_v40 = vpop.f32.mrb[218].mxu0  ;;  %14941 = vst [vmem:[#allocation173_spill] sm:$0xff] %v12512_v43  ;;  %v6375_v57 = vmul.f32 %v14942_v14, %v4075_v15  ;;  %v12522_v16 = vpop.eup %9029  ;;  %8288 = vmatprep.mubr.msk.bf16.mxu1 %vm3311_vm3, %v3264_v37  ;;  %v7461_v14 = vmul.f32 -1.442695, %v14946_v25  ;;  %v6373_v43 = vmul.f32 %v14949_v60, %v4067_v51  ;;  %v14950_v37 = vld [vmem:[#allocation111_spill] sm:$0xff]  ;;  %v2407_v25 = vadd.f32 %v12230_v19, %v12161_v26 }
 0x29c   : > { %14940 = vst [vmem:[#allocation18_spill] sm:$0xff] %v12499_v61  ;;  %v12505_v0 = vpop.f32.mrb[219].mxu0  ;;  %v12520_v61 = vpop.f32.mrb[104].mxu1  ;;  %14944 = vst [vmem:[#allocation109_spill] sm:$0xff] %v12522_v16  ;;  %8289 = vmatmul.mubr.msk.bf16.gmra.mrb[192].mxu1 %vm3311_vm3, %v3265_v45  ;;  %v6376_v16 = vmul.f32 %v14950_v37, %v4078_v7  ;;  %v12548_v60 = vadd.f32 %v12299_v1, %v2847_v53  ;;  %v12554_v51 = vadd.f32 %v12299_v1, %v2848_v18  ;;  %v14958_v18 = vld [vmem:[#allocation115_spill] sm:$0xff] }
 0x29d   : > { %v12528_v48 = vpop.f32.mrb[105].mxu1  ;;  %v9032_v15 = vpop.eup %9031  ;;  %v12532_v29 = vadd.f32 %v6375_v57, %v14947_v33  ;;  %v14952_v57 = vld [vmem:[#allocation20_spill] sm:$0xff]  ;;  %9047 = vpow2.f32 %v7463_v52  ;;  %v2846_v53 = vmul.f32 %v12291_v5, %v2407_v25  ;;  %v12574_v52 = vadd.f32 %v12299_v1, %v2845_v59 }
 0x29e   : > { %v12537_v27 = vpop.f32.mrb[106].mxu1  ;;  %v9034_v39 = vpop.eup %9033  ;;  %14951 = vst [vmem:[#allocation112_spill] sm:$0xff] %v12548_v60  ;;  %v12551_v45 = vadd.f32 %v6373_v43, %v14952_v57  ;;  %14954 = vst [vmem:[#allocation19_spill] sm:$0xff] %v12554_v51  ;;  %v5657_v26 = vadd.f32 1.0, %v9032_v15  ;;  %v12561_v37 = vadd.f32 %v6376_v16, %v14955_v28  ;;  %9049 = vpow2.f32 %v7461_v14  ;;  %v14961_v15 = vld [vmem:[#allocation114_spill] sm:$0xff] }
 0x29f   : > { %14948 = vst [vmem:[#allocation159_spill] sm:$0xff] %v12532_v29  ;;  %v12543_v35 = vpop.f32.mrb[107].mxu1  ;;  %v9036_v10 = vpop.eup %9035  ;;  %v5660_v57 = vadd.f32 1.0, %v9034_v39  ;;  %v3267_v47 = vpack.c.bf16 %v12554_v51, %v12548_v60  ;;  %14959 = vst [vmem:[#allocation20_spill] sm:$0xff] %v12574_v52  ;;  %v12577_v16 = vadd.f32 %v12299_v1, %v2846_v53  ;;  %v6374_v25 = vmul.f32 %v14961_v15, %v4070_v3 }
 0x2a0   : > { %14953 = vst [vmem:[#allocation113_spill] sm:$0xff] %v12551_v45  ;;  %14956 = vst [vmem:[#allocation110_spill] sm:$0xff] %v12561_v37  ;;  %v12566_v43 = vpop.eup %9037  ;;  %v7466_v45 = vmul.f32 -1.442695, %v14958_v18  ;;  %v2428_v28 = vadd.f32 %v12230_v19, %v12193_v42  ;;  %9051 = vrcp.f32 %v5659_v2  ;;  %v5658_v14 = vadd.f32 1.0, %v9036_v10  ;;  %v14963_v42 = vld [vmem:[#allocation120_spill] sm:$0xff] }
 0x2a1   : > { %v12545_v33 = vpop.f32.mrb[220].mxu0  ;;  %14957 = vst [vmem:[#allocation111_spill] sm:$0xff] %v12566_v43  ;;  %14960 = vst [vmem:[#allocation21_spill] sm:$0xff] %v12577_v16  ;;  %v12582_v39 = vpop.eup %9039  ;;  %v4091_v18 = vadd.f32 %v12204_v13, %v12250_v44  ;;  %9053 = vrcp.f32 %v5657_v26  ;;  %v3266_v59 = vpack.c.bf16 %v12577_v16, %v12574_v52  ;;  %v2420_v3 = vadd.f32 %v12230_v19, %v12208_v4  ;;  %v14964_v2 = vld [vmem:[#allocation22_spill] sm:$0xff]  ;;  %v14966_v37 = vld [vmem:[#allocation117_spill] sm:$0xff] }
 0x2a2   : > { %v12558_v7 = vpop.f32.mrb[221].mxu0  ;;  %14962 = vst [vmem:[#allocation115_spill] sm:$0xff] %v12582_v39  ;;  %v9042_v60 = vpop.eup %9041  ;;  %9055 = vpow2.f32 %v7466_v45  ;;  %v7464_v15 = vmul.f32 -1.442695, %v14963_v42  ;;  %v12596_v10 = vadd.f32 %v6374_v25, %v14964_v2  ;;  %v2851_v26 = vmul.f32 %v12291_v5, %v2428_v28  ;;  %v14971_v52 = vld [vmem:[#allocation118_spill] sm:$0xff] }
 0x2a3   : > { %v12564_v29 = vpop.f32.mrb[222].mxu0  ;;  %v12586_v51 = vpop.f32.mrb[108].mxu1  ;;  %v6379_v44 = vmul.f32 %v14966_v37, %v4091_v18  ;;  %9057 = vrcp.f32 %v5660_v57  ;;  %v4083_v4 = vadd.f32 %v12204_v13, %v12257_v24  ;;  %v2431_v45 = vadd.f32 %v12230_v19, %v12222_v23  ;;  %8292 = vmatprep.mubr.msk.bf16.mxu1 %vm3311_vm3, %v3266_v59  ;;  %v14968_v18 = vld [vmem:[#allocation23_spill] sm:$0xff]  ;;  %v14970_v24 = vld [vmem:[#allocation116_spill] sm:$0xff] }
 0x2a4   : > { %v12571_v55 = vpop.f32.mrb[223].mxu0  ;;  %v12592_v53 = vpop.f32.mrb[109].mxu1  ;;  %14965 = vst [vmem:[#allocation114_spill] sm:$0xff] %v12596_v10  ;;  %9059 = vrcp.f32 %v5658_v14  ;;  %v5663_v37 = vadd.f32 1.0, %v9042_v60  ;;  %8293 = vmatmul.mubr.msk.bf16.gmra.mrb[196].mxu1 %vm3311_vm3, %v3267_v47  ;;  %v7467_v16 = vmul.f32 -1.442695, %v14970_v24  ;;  %v2849_v23 = vmul.f32 %v12291_v5, %v2420_v3 }
 0x2a5   : > { %v12599_v39 = vpop.f32.mrb[110].mxu1  ;;  %v12601_v43 = vpop.eup %9043  ;;  %v12614_v2 = vadd.f32 %v6379_v44, %v14968_v18  ;;  %v6377_v59 = vmul.f32 %v14971_v52, %v4083_v4  ;;  %v2852_v10 = vmul.f32 %v12291_v5, %v2431_v45  ;;  %9061 = vpow2.f32 %v7464_v15  ;;  %v14973_v60 = vld [vmem:[#allocation121_spill] sm:$0xff] }
 0x2a6   : > { %14967 = vst [vmem:[#allocation120_spill] sm:$0xff] %v12601_v43  ;;  %v12609_v42 = vpop.f32.mrb[111].mxu1  ;;  %v9046_v28 = vpop.eup %9045  ;;  %v7465_v14 = vmul.f32 -1.442695, %v14973_v60  ;;  %v4094_v44 = vadd.f32 %v12204_v13, %v12265_v17  ;;  %v2423_v47 = vadd.f32 %v12230_v19, %v12234_v49  ;;  %v12633_v3 = vadd.f32 %v12299_v1, %v2851_v26  ;;  %v14976_v52 = vld [vmem:[#allocation25_spill] sm:$0xff] }
 0x2a7   : > { %14969 = vst [vmem:[#allocation22_spill] sm:$0xff] %v12614_v2  ;;  %v9048_v24 = vpop.eup %9047  ;;  %v12636_v4 = vadd.f32 %v6377_v59, %v14976_v52  ;;  %v12639_v45 = vadd.f32 %v12299_v1, %v2852_v10  ;;  %v4086_v15 = vadd.f32 %v12204_v13, %v12274_v6  ;;  %9063 = vrcp.f32 %v5663_v37  ;;  %v14979_v2 = vld [vmem:[#allocation119_spill] sm:$0xff]  ;;  %v14982_v6 = vld [vmem:[#allocation26_spill] sm:$0xff] }
 0x2a8   : > { %14975 = vst [vmem:[#allocation116_spill] sm:$0xff] %v12633_v3  ;;  %v9050_v60 = vpop.eup %9049  ;;  %v5661_v17 = vadd.f32 1.0, %v9046_v28  ;;  %v6380_v49 = vmul.f32 %v14979_v2, %v4094_v44  ;;  %9065 = vpow2.f32 %v7467_v16  ;;  %v12648_v26 = vadd.f32 %v12299_v1, %v2849_v23  ;;  %v14985_v28 = vld [vmem:[#allocation122_spill] sm:$0xff] }
 0x2a9   : > { %v12611_v25 = vpop.f32.mrb[224].mxu0  ;;  %14977 = vst [vmem:[#allocation118_spill] sm:$0xff] %v12636_v4  ;;  %14978 = vst [vmem:[#allocation121_spill] sm:$0xff] %v12639_v45  ;;  %v3269_v10 = vpack.c.bf16 %v12639_v45, %v12633_v3  ;;  %v6378_v44 = vmul.f32 %v14985_v28, %v4086_v15  ;;  %v2444_v16 = vadd.f32 %v12230_v19, %v12276_v63  ;;  %v5664_v45 = vadd.f32 1.0, %v9048_v24 }
 0x2aa   : > { %v12617_v57 = vpop.f32.mrb[225].mxu0  ;;  %14980 = vst [vmem:[#allocation25_spill] sm:$0xff] %v12648_v26  ;;  %v12654_v52 = vpop.eup %9051  ;;  %v12657_v37 = vadd.f32 %v6380_v49, %v14982_v6  ;;  %9067 = vpow2.f32 %v7465_v14  ;;  %v4107_v3 = vadd.f32 %v12204_v13, %v12323_v62  ;;  %v4099_v49 = vadd.f32 %v12204_v13, %v12332_v21  ;;  %v14990_v14 = vld [vmem:[#allocation124_spill] sm:$0xff]  ;;  %v14993_v21 = vld [vmem:[#allocation123_spill] sm:$0xff] }
 0x2ab   : > { %v12623_v43 = vpop.f32.mrb[226].mxu0  ;;  %14981 = vst [vmem:[#allocation119_spill] sm:$0xff] %v12654_v52  ;;  %9069 = vrcp.f32 %v5661_v17  ;;  %v5662_v28 = vadd.f32 1.0, %v9050_v60  ;;  %v7470_v4 = vmul.f32 -1.442695, %v14990_v14  ;;  %v14991_v62 = vld [vmem:[#allocation28_spill] sm:$0xff]  ;;  %v2855_v17 = vmul.f32 %v12291_v5, %v2444_v16 }
 0x2ac   : > { %14972 = vst [vmem:[#allocation117_spill] sm:$0xff] %v12623_v43  ;;  %v12630_v18 = vpop.f32.mrb[227].mxu0  ;;  %v12645_v43 = vpop.f32.mrb[112].mxu1  ;;  %14983 = vst [vmem:[#allocation26_spill] sm:$0xff] %v12657_v37  ;;  %v6383_v52 = vmul.f32 %v14993_v21, %v4107_v3  ;;  %9071 = vrcp.f32 %v5664_v45  ;;  %v14996_v14 = vld [vmem:[#allocation29_spill] sm:$0xff]  ;;  %v14999_v21 = vld [vmem:[#allocation30_spill] sm:$0xff]  ;;  %v2439_v45 = vadd.f32 %v12230_v19, %v12309_v50 }
 0x2ad   : > { %14974 = vst [vmem:[#allocation23_spill] sm:$0xff] %v12630_v18  ;;  %v2850_v18 = vmul.f32 %v12291_v5, %v2423_v47  ;;  %v12652_v59 = vpop.f32.mrb[113].mxu1  ;;  %v12667_v47 = vpop.eup %9053  ;;  %9073 = vrcp.f32 %v5662_v28 }
 0x2ae   : > { %v12665_v23 = vpop.f32.mrb[114].mxu1  ;;  %14986 = vst [vmem:[#allocation122_spill] sm:$0xff] %v12667_v47  ;;  %v9056_v15 = vpop.eup %9055  ;;  %v12685_v47 = vadd.f32 %v6378_v44, %v14991_v62  ;;  %v4110_v44 = vadd.f32 %v12204_v13, %v12341_v20  ;;  %v12704_v62 = vadd.f32 %v6383_v52, %v14996_v14  ;;  %v4102_v52 = vadd.f32 %v12204_v13, %v12348_v22 }
 0x2af   : > { %v12660_v2 = vadd.f32 %v12299_v1, %v2850_v18  ;;  %v12673_v6 = vpop.f32.mrb[115].mxu1  ;;  %v12681_v24 = vpop.eup %9057  ;;  %9075 = vpow2.f32 %v7470_v4  ;;  %v2854_v50 = vmul.f32 %v12291_v5, %v2439_v45  ;;  %v2460_v45 = vadd.f32 %v12230_v19, %v12350_v30 }
 0x2b0   : > { %14987 = vst [vmem:[#allocation175_spill] sm:$0xff] %v12673_v6  ;;  %14989 = vst [vmem:[#allocation177_spill] sm:$0xff] %v12681_v24  ;;  %v12692_v60 = vpop.eup %9059  ;;  %v2447_v24 = vadd.f32 %v12230_v19, %v12294_v36 }
 0x2b1   : > { %14984 = vst [vmem:[#allocation174_spill] sm:$0xff] %v12660_v2  ;;  %v12675_v18 = vpop.f32.mrb[228].mxu0  ;;  %v3268_v63 = vpack.c.bf16 %v12660_v2, %v12648_v26  ;;  %14992 = vst [vmem:[#allocation124_spill] sm:$0xff] %v12685_v47  ;;  %v14995_v2 = vld [vmem:[#allocation127_spill] sm:$0xff]  ;;  %v9062_v16 = vpop.eup %9061  ;;  %v15001_v47 = vld [vmem:[#allocation129_spill] sm:$0xff] }
 0x2b2   : > { %14988 = vst [vmem:[#allocation176_spill] sm:$0xff] %v12675_v18  ;;  %v12679_v37 = vpop.f32.mrb[229].mxu0  ;;  %v2436_v18 = vadd.f32 %v12230_v19, %v12280_v11  ;;  %14994 = vst [vmem:[#allocation28_spill] sm:$0xff] %v12692_v60  ;;  %v6381_v26 = vmul.f32 %v14995_v2, %v4099_v49  ;;  %v5667_v11 = vadd.f32 1.0, %v9056_v15  ;;  %v14998_v2 = vld [vmem:[#allocation125_spill] sm:$0xff]  ;;  %v2856_v20 = vmul.f32 %v12291_v5, %v2447_v24  ;;  %v15003_v15 = vld [vmem:[#allocation126_spill] sm:$0xff] }
 0x2b3   : > { %v12690_v6 = vpop.f32.mrb[230].mxu0  ;;  %8296 = vmatprep.mubr.msk.bf16.mxu1 %vm3311_vm3, %v3268_v63  ;;  %14997 = vst [vmem:[#allocation123_spill] sm:$0xff] %v12704_v62  ;;  %v7468_v49 = vmul.f32 -1.442695, %v14998_v2  ;;  %v6384_v60 = vmul.f32 %v15001_v47, %v4110_v44  ;;  %v7471_v28 = vmul.f32 -1.442695, %v15003_v15 }
 0x2b4   : > { %v12701_v3 = vpop.f32.mrb[231].mxu0  ;;  %8297 = vmatmul.mubr.msk.bf16.gmra.mrb[200].mxu1 %vm3311_vm3, %v3269_v10  ;;  %v12709_v36 = vadd.f32 %v6381_v26, %v14999_v21  ;;  %v2853_v63 = vmul.f32 %v12291_v5, %v2436_v18  ;;  %v12718_v10 = vpop.eup %9063  ;;  %v12722_v26 = vadd.f32 %v12299_v1, %v2855_v17  ;;  %v12725_v24 = vadd.f32 %v12299_v1, %v2856_v20  ;;  %v15006_v44 = vld [vmem:[#allocation31_spill] sm:$0xff] }
 0x2b5   : > { %15002 = vst [vmem:[#allocation29_spill] sm:$0xff] %v12718_v10  ;;  %v9066_v18 = vpop.eup %9065  ;;  %9077 = vrcp.f32 %v5667_v11  ;;  %v5665_v47 = vadd.f32 1.0, %v9062_v16  ;;  %v12728_v14 = vadd.f32 %v6384_v60, %v15006_v44  ;;  %v12743_v11 = vadd.f32 %v12299_v1, %v2854_v50  ;;  %v15010_v60 = vld [vmem:[#allocation130_spill] sm:$0xff] }
 0x2b6   : > { %15000 = vst [vmem:[#allocation127_spill] sm:$0xff] %v12709_v36  ;;  %15004 = vst [vmem:[#allocation125_spill] sm:$0xff] %v12722_v26  ;;  %9079 = vpow2.f32 %v7468_v49  ;;  %v3271_v4 = vpack.c.bf16 %v12725_v24, %v12722_v26  ;;  %v12735_v2 = vpop.f32.mrb[116].mxu1  ;;  %v9068_v21 = vpop.eup %9067  ;;  %v12740_v20 = vadd.f32 %v12299_v1, %v2853_v63  ;;  %v6382_v16 = vmul.f32 %v15010_v60, %v4102_v52 }
 0x2b7   : > { %15005 = vst [vmem:[#allocation30_spill] sm:$0xff] %v12725_v24  ;;  %15007 = vst [vmem:[#allocation129_spill] sm:$0xff] %v12728_v14  ;;  %v12748_v49 = vpop.f32.mrb[117].mxu1  ;;  %v12752_v44 = vpop.eup %9069  ;;  %9081 = vpow2.f32 %v7471_v28  ;;  %v15013_v24 = vld [vmem:[#allocation128_spill] sm:$0xff]  ;;  %v4123_v63 = vadd.f32 %v12204_v13, %v12383_v38  ;;  %v4115_v50 = vadd.f32 %v12204_v13, %v12393_v56  ;;  %v5668_v36 = vadd.f32 1.0, %v9066_v18 }
 0x2b8   : > { %15008 = vst [vmem:[#allocation126_spill] sm:$0xff] %v12740_v20  ;;  %15009 = vst [vmem:[#allocation31_spill] sm:$0xff] %v12743_v11  ;;  %v7469_v26 = vmul.f32 -1.442695, %v15013_v24  ;;  %v12759_v14 = vpop.f32.mrb[118].mxu1  ;;  %9083 = vrcp.f32 %v5665_v47  ;;  %v3270_v30 = vpack.c.bf16 %v12743_v11, %v12740_v20  ;;  %v15015_v28 = vld [vmem:[#allocation32_spill] sm:$0xff]  ;;  %v2452_v38 = vadd.f32 %v12230_v19, %v12358_v9  ;;  %v12773_v56 = vpop.eup %9071 }
 0x2b9   : > { %v12731_v22 = vpop.f32.mrb[232].mxu0  ;;  %15012 = vst [vmem:[#allocation178_spill] sm:$0xff] %v12752_v44  ;;  %v12765_v60 = vpop.f32.mrb[119].mxu1  ;;  %v12768_v62 = vadd.f32 %v6382_v16, %v15015_v28  ;;  %v15017_v24 = vld [vmem:[#allocation131_spill] sm:$0xff]  ;;  %v2859_v10 = vmul.f32 %v12291_v5, %v2460_v45  ;;  %v2463_v11 = vadd.f32 %v12230_v19, %v12364_v41  ;;  %v4126_v18 = vadd.f32 %v12204_v13, %v12402_v32 }
 0x2ba   : > { %v12737_v17 = vpop.f32.mrb[233].mxu0  ;;  %v6387_v44 = vmul.f32 %v15017_v24, %v4123_v63  ;;  %15018 = vst [vmem:[#allocation131_spill] sm:$0xff] %v12773_v56  ;;  %8300 = vmatprep.mubr.msk.bf16.mxu1 %vm3311_vm3, %v3270_v30  ;;  %v12782_v16 = vpop.eup %9073  ;;  %9085 = vpow2.f32 %v7469_v26  ;;  %v15021_v63 = vld [vmem:[#allocation46_spill] sm:$0xff]  ;;  %v15022_v9 = vld [vmem:[#allocation35_spill] sm:$0xff]  ;;  %v5666_v45 = vadd.f32 1.0, %v9068_v21  ;;  %v2857_v26 = vmul.f32 %v12291_v5, %v2452_v38 }
 0x2bb   : > { %v12750_v15 = vpop.f32.mrb[234].mxu0  ;;  %15016 = vst [vmem:[#allocation32_spill] sm:$0xff] %v12768_v62  ;;  %v7474_v28 = vmul.f32 -1.442695, %v15021_v63  ;;  %v2860_v41 = vmul.f32 %v12291_v5, %v2463_v11  ;;  %v15026_v20 = vld [vmem:[#allocation135_spill] sm:$0xff]  ;;  %v9076_v30 = vpop.eup %9075  ;;  %9087 = vrcp.f32 %v5668_v36  ;;  %v15028_v63 = vld [vmem:[#allocation100_spill] sm:$0xff] }
 0x2bc   : > { %15011 = vst [vmem:[#allocation130_spill] sm:$0xff] %v12750_v15  ;;  %v12761_v52 = vpop.f32.mrb[235].mxu0  ;;  %v12786_v24 = vadd.f32 %v6387_v44, %v15022_v9  ;;  %8301 = vmatmul.mubr.msk.bf16.gmra.mrb[204].mxu1 %vm3311_vm3, %v3271_v4  ;;  %v6388_v32 = vmul.f32 %v15026_v20, %v4126_v18  ;;  %v2455_v44 = vadd.f32 %v12230_v19, %v15028_v63  ;;  %v15029_v9 = vld [vmem:[#allocation102_spill] sm:$0xff]  ;;  %v15035_v36 = vld [vmem:[#allocation37_spill] sm:$0xff] }
 0x2bd   : > { %15014 = vst [vmem:[#allocation128_spill] sm:$0xff] %v12761_v52  ;;  %v15019_v52 = vld [vmem:[#allocation134_spill] sm:$0xff]  ;;  %v4118_v4 = vadd.f32 %v12204_v13, %v15029_v9  ;;  %v12807_v20 = vadd.f32 %v12299_v1, %v2859_v10  ;;  %v12810_v18 = vadd.f32 %v12299_v1, %v2860_v41  ;;  %9089 = vpow2.f32 %v7474_v28  ;;  %v15038_v9 = vld [vmem:[#allocation47_spill] sm:$0xff]  ;;  %v15052_v15 = vld [vmem:[#allocation105_spill] sm:$0xff] }
 0x2be   : > { %v6385_v47 = vmul.f32 %v15019_v52, %v4115_v50  ;;  %15020 = vst [vmem:[#allocation134_spill] sm:$0xff] %v12782_v16  ;;  %15023 = vst [vmem:[#allocation46_spill] sm:$0xff] %v12786_v24  ;;  %v15024_v50 = vld [vmem:[#allocation36_spill] sm:$0xff]  ;;  %v12813_v38 = vadd.f32 %v6388_v32, %v15035_v36  ;;  %v7475_v24 = vmul.f32 -1.442695, %v15038_v9  ;;  %v2858_v16 = vmul.f32 %v12291_v5, %v2455_v44  ;;  %v15041_v32 = vld [vmem:[#allocation106_spill] sm:$0xff] }
 0x2bf   : > { %15033 = vst [vmem:[#allocation102_spill] sm:$0xff] %v12807_v20  ;;  %9091 = vrcp.f32 %v5666_v45  ;;  %v3273_v41 = vpack.c.bf16 %v12810_v18, %v12807_v20  ;;  %v2476_v36 = vadd.f32 %v12230_v19, %v15041_v32  ;;  %v12831_v9 = vadd.f32 %v12299_v1, %v2857_v26 }
 0x2c0   : > { %v12790_v52 = vadd.f32 %v6385_v47, %v15024_v50  ;;  %v12803_v47 = vpop.eup %9077  ;;  %v15032_v50 = vld [vmem:[#allocation132_spill] sm:$0xff]  ;;  %15036 = vst [vmem:[#allocation37_spill] sm:$0xff] %v12813_v38  ;;  %v12834_v44 = vadd.f32 %v12299_v1, %v2858_v16  ;;  %v4139_v32 = vadd.f32 %v12204_v13, %v12452_v31  ;;  %v4131_v26 = vadd.f32 %v12204_v13, %v12460_v54 }
 0x2c1   : > { %v12794_v62 = vpop.f32.mrb[236].mxu0  ;;  %15031 = vst [vmem:[#allocation100_spill] sm:$0xff] %v12803_v47  ;;  %v7472_v11 = vmul.f32 -1.442695, %v15032_v50  ;;  %15034 = vst [vmem:[#allocation132_spill] sm:$0xff] %v12810_v18  ;;  %v9080_v63 = vpop.eup %9079  ;;  %v15039_v47 = vld [vmem:[#allocation136_spill] sm:$0xff] }
 0x2c2   : > { %15025 = vst [vmem:[#allocation35_spill] sm:$0xff] %v12790_v52  ;;  %15027 = vst [vmem:[#allocation36_spill] sm:$0xff] %v12794_v62  ;;  %v12801_v21 = vpop.f32.mrb[237].mxu0  ;;  %v6386_v56 = vmul.f32 %v15039_v47, %v4118_v4  ;;  %v12820_v50 = vpop.f32.mrb[120].mxu1  ;;  %v15044_v4 = vld [vmem:[#allocation38_spill] sm:$0xff]  ;;  %v15048_v18 = vld [vmem:[#allocation103_spill] sm:$0xff] }
 0x2c3   : > { %15030 = vst [vmem:[#allocation135_spill] sm:$0xff] %v12801_v21  ;;  %v12815_v52 = vpop.f32.mrb[238].mxu0  ;;  %v12828_v38 = vpop.f32.mrb[121].mxu1  ;;  %15042 = vst [vmem:[#allocation136_spill] sm:$0xff] %v12831_v9  ;;  %9093 = vpow2.f32 %v7472_v11  ;;  %v5669_v16 = vadd.f32 1.0, %v9080_v63  ;;  %v2863_v11 = vmul.f32 %v12291_v5, %v2476_v36  ;;  %v15051_v31 = vld [vmem:[#allocation140_spill] sm:$0xff]  ;;  %v2479_v63 = vadd.f32 %v12230_v19, %v15052_v15 }
 0x2c4   : > { %15037 = vst [vmem:[#allocation179_spill] sm:$0xff] %v12815_v52  ;;  %v12822_v10 = vpop.f32.mrb[239].mxu0  ;;  %v9082_v28 = vpop.eup %9081  ;;  %v5671_v52 = vadd.f32 1.0, %v9076_v30  ;;  %15043 = vst [vmem:[#allocation106_spill] sm:$0xff] %v12834_v44  ;;  %v12837_v47 = vadd.f32 %v6386_v56, %v15044_v4  ;;  %v2468_v30 = vadd.f32 %v12230_v19, %v15048_v18  ;;  %9095 = vpow2.f32 %v7475_v24  ;;  %v15049_v4 = vld [vmem:[#allocation133_spill] sm:$0xff] }
 0x2c5   : > { %15040 = vst [vmem:[#allocation47_spill] sm:$0xff] %v12822_v10  ;;  %v12839_v45 = vpop.f32.mrb[122].mxu1  ;;  %v12841_v10 = vpop.eup %9083  ;;  %v3272_v56 = vpack.c.bf16 %v12834_v44, %v12831_v9  ;;  %v6389_v62 = vmul.f32 %v15051_v31, %v4131_v26  ;;  %v4142_v24 = vadd.f32 %v12204_v13, %v12471_v58  ;;  %v15054_v31 = vld [vmem:[#allocation39_spill] sm:$0xff]  ;;  %v15058_v58 = vld [vmem:[#allocation40_spill] sm:$0xff]  ;;  %v15060_v9 = vld [vmem:[#allocation54_spill] sm:$0xff] }
 0x2c6   : > { %15045 = vst [vmem:[#allocation38_spill] sm:$0xff] %v12837_v47  ;;  %15046 = vst [vmem:[#allocation180_spill] sm:$0xff] %v12839_v45  ;;  %v12849_v20 = vpop.f32.mrb[123].mxu1  ;;  %v7473_v47 = vmul.f32 -1.442695, %v15049_v4  ;;  %v9086_v18 = vpop.eup %9085  ;;  %v2861_v54 = vmul.f32 %v12291_v5, %v2468_v30  ;;  %v2471_v4 = vadd.f32 %v12230_v19, %v12439_v8  ;;  %9097 = vrcp.f32 %v5671_v52 }
 0x2c7   : > { %15047 = vst [vmem:[#allocation181_spill] sm:$0xff] %v12841_v10  ;;  %v15050_v10 = vld [vmem:[#allocation139_spill] sm:$0xff]  ;;  %8304 = vmatprep.mubr.msk.bf16.mxu1 %vm3311_vm3, %v3272_v56  ;;  %v12876_v30 = vpop.eup %9087  ;;  %9099 = vrcp.f32 %v5669_v16  ;;  %v12879_v8 = vadd.f32 %v6389_v62, %v15058_v58  ;;  %v2864_v56 = vmul.f32 %v12291_v5, %v2479_v63  ;;  %v6392_v52 = vmul.f32 %v15060_v9, %v4142_v24  ;;  %v15065_v63 = vld [vmem:[#allocation41_spill] sm:$0xff] }
 0x2c8   : > { %v6391_v21 = vmul.f32 %v15050_v10, %v4139_v32  ;;  %v5672_v10 = vadd.f32 1.0, %v9082_v28  ;;  %v15053_v32 = vld [vmem:[#allocation64_spill] sm:$0xff]  ;;  %8305 = vmatmul.mubr.msk.bf16.gmra.mrb[208].mxu1 %vm3311_vm3, %v3273_v41  ;;  %15057 = vst [vmem:[#allocation139_spill] sm:$0xff] %v12876_v30  ;;  %9101 = vpow2.f32 %v7473_v47  ;;  %v4134_v41 = vadd.f32 %v12204_v13, %v12476_v34 }
 0x2c9   : > { %v12857_v45 = vpop.f32.mrb[240].mxu0  ;;  %v7478_v26 = vmul.f32 -1.442695, %v15053_v32  ;;  %15059 = vst [vmem:[#allocation140_spill] sm:$0xff] %v12879_v8  ;;  %v5670_v32 = vadd.f32 1.0, %v9086_v18  ;;  %v12891_v16 = vadd.f32 %v12299_v1, %v2863_v11  ;;  %v12894_v62 = vadd.f32 %v12299_v1, %v2861_v54 }
 0x2ca   : > { %v12867_v36 = vpop.f32.mrb[241].mxu0  ;;  %v12871_v44 = vadd.f32 %v6391_v21, %v15054_v31  ;;  %v2862_v21 = vmul.f32 %v12291_v5, %v2471_v4  ;;  %v12897_v9 = vadd.f32 %v12299_v1, %v2864_v56  ;;  %v12900_v18 = vadd.f32 %v6392_v52, %v15065_v63  ;;  %v15069_v4 = vld [vmem:[#allocation74_spill] sm:$0xff]  ;;  %v15070_v52 = vld [vmem:[#allocation52_spill] sm:$0xff] }
 0x2cb   : > { %v12874_v15 = vpop.f32.mrb[242].mxu0  ;;  %15062 = vst [vmem:[#allocation64_spill] sm:$0xff] %v12891_v16  ;;  %15063 = vst [vmem:[#allocation39_spill] sm:$0xff] %v12894_v62  ;;  %v6390_v58 = vmul.f32 %v15069_v4, %v4134_v41  ;;  %v2492_v11 = vadd.f32 %v12230_v19, %v12478_v46  ;;  %v4155_v54 = vadd.f32 %v12204_v13, %v12520_v61  ;;  %9103 = vpow2.f32 %v7478_v26  ;;  %v15071_v46 = vld [vmem:[#allocation42_spill] sm:$0xff]  ;;  %v15073_v26 = vld [vmem:[#allocation137_spill] sm:$0xff] }
 0x2cc   : > { %15055 = vst [vmem:[#allocation103_spill] sm:$0xff] %v12871_v44  ;;  %15056 = vst [vmem:[#allocation133_spill] sm:$0xff] %v12874_v15  ;;  %v12883_v28 = vpop.f32.mrb[243].mxu0  ;;  %v12888_v31 = vpop.f32.mrb[124].mxu1  ;;  %v12907_v34 = vadd.f32 %v12299_v1, %v2862_v21  ;;  %v7476_v63 = vmul.f32 -1.442695, %v15070_v52  ;;  %9105 = vrcp.f32 %v5672_v10  ;;  %v4147_v10 = vadd.f32 %v12204_v13, %v12528_v48 }
 0x2cd   : > { %15061 = vst [vmem:[#allocation105_spill] sm:$0xff] %v12883_v28  ;;  %v9090_v44 = vpop.eup %9089  ;;  %15064 = vst [vmem:[#allocation40_spill] sm:$0xff] %v12897_v9  ;;  %v12902_v47 = vpop.f32.mrb[125].mxu1  ;;  %v12924_v4 = vadd.f32 %v6390_v58, %v15071_v46  ;;  %v7479_v28 = vmul.f32 -1.442695, %v15073_v26  ;;  %v15074_v52 = vld [vmem:[#allocation143_spill] sm:$0xff]  ;;  %9107 = vrcp.f32 %v5670_v32  ;;  %v2495_v58 = vadd.f32 %v12230_v19, %v12496_v40 }
 0x2ce   : > { %15066 = vst [vmem:[#allocation54_spill] sm:$0xff] %v12900_v18  ;;  %v12904_v24 = vpop.eup %9091  ;;  %15068 = vst [vmem:[#allocation182_spill] sm:$0xff] %v12907_v34  ;;  %v12914_v56 = vpop.f32.mrb[126].mxu1  ;;  %v3275_v18 = vpack.c.bf16 %v12897_v9, %v12891_v16  ;;  %v3274_v41 = vpack.c.bf16 %v12907_v34, %v12894_v62  ;;  %v6395_v15 = vmul.f32 %v15074_v52, %v4155_v54  ;;  %9109 = vpow2.f32 %v7476_v63  ;;  %v15075_v54 = vld [vmem:[#allocation56_spill] sm:$0xff]  ;;  %v15080_v63 = vld [vmem:[#allocation45_spill] sm:$0xff] }
 0x2cf   : > { %15067 = vst [vmem:[#allocation41_spill] sm:$0xff] %v12904_v24  ;;  %v12919_v8 = vpop.f32.mrb[127].mxu1  ;;  %v9094_v21 = vpop.eup %9093  ;;  %v5675_v24 = vadd.f32 1.0, %v9090_v44  ;;  %15072 = vst [vmem:[#allocation74_spill] sm:$0xff] %v12924_v4  ;;  %v2484_v9 = vadd.f32 %v12230_v19, %v12483_v12  ;;  %v2867_v34 = vmul.f32 %v12291_v5, %v2492_v11  ;;  %v15077_v12 = vld [vmem:[#allocation144_spill] sm:$0xff]  ;;  %v2868_v40 = vmul.f32 %v12291_v5, %v2495_v58  ;;  %v15089_v16 = vld [vmem:[#allocation141_spill] sm:$0xff] }
 0x2d0   : > { %v9096_v30 = vpop.eup %9095  ;;  %8308 = vmatprep.mubr.msk.bf16.mxu1 %vm3311_vm3, %v3274_v41  ;;  %v5673_v26 = vadd.f32 1.0, %v9094_v21  ;;  %v12943_v52 = vadd.f32 %v6395_v15, %v15075_v54  ;;  %v6393_v62 = vmul.f32 %v15077_v12, %v4147_v10  ;;  %v4158_v41 = vadd.f32 %v12204_v13, %v12537_v27  ;;  %v15085_v27 = vld [vmem:[#allocation78_spill] sm:$0xff] }
 0x2d1   : > { %v12926_v61 = vpop.f32.mrb[244].mxu0  ;;  %8309 = vmatmul.mubr.msk.bf16.gmra.mrb[212].mxu1 %vm3311_vm3, %v3275_v18  ;;  %v12949_v32 = vpop.eup %9097  ;;  %9111 = vrcp.f32 %v5675_v24  ;;  %v5676_v11 = vadd.f32 1.0, %v9096_v30  ;;  %v2865_v15 = vmul.f32 %v12291_v5, %v2484_v9  ;;  %v2487_v18 = vadd.f32 %v12230_v19, %v12505_v0  ;;  %v15082_v30 = vld [vmem:[#allocation138_spill] sm:$0xff] }
 0x2d2   : > { %v12934_v44 = vpop.f32.mrb[245].mxu0  ;;  %15076 = vst [vmem:[#allocation52_spill] sm:$0xff] %v12943_v52  ;;  %15078 = vst [vmem:[#allocation42_spill] sm:$0xff] %v12949_v32  ;;  %v12954_v21 = vpop.eup %9099  ;;  %9113 = vpow2.f32 %v7479_v28  ;;  %v12958_v10 = vadd.f32 %v6393_v62, %v15080_v63  ;;  %v7477_v12 = vmul.f32 -1.442695, %v15082_v30  ;;  %v12966_v58 = vadd.f32 %v12299_v1, %v2867_v34  ;;  %v15086_v62 = vld [vmem:[#allocation75_spill] sm:$0xff] }
 0x2d3   : > { %v12940_v46 = vpop.f32.mrb[246].mxu0  ;;  %15079 = vst [vmem:[#allocation137_spill] sm:$0xff] %v12954_v21  ;;  %v9102_v24 = vpop.eup %9101  ;;  %v12969_v13 = vadd.f32 %v12299_v1, %v2868_v40  ;;  %v6396_v28 = vmul.f32 %v15085_v27, %v4158_v41  ;;  %9115 = vrcp.f32 %v5673_v26  ;;  %v7482_v63 = vmul.f32 -1.442695, %v15086_v62  ;;  %v12979_v0 = vld [vmem:[%s14365_s6] ss:$0 sm:$0xff] }
 0x2d4   : > { %v12947_v48 = vpop.f32.mrb[247].mxu0  ;;  %15081 = vst [vmem:[#allocation143_spill] sm:$0xff] %v12958_v10  ;;  %15083 = vst [vmem:[#allocation56_spill] sm:$0xff] %v12966_v58  ;;  %v2866_v19 = vmul.f32 %v12291_v5, %v2487_v18  ;;  %v4150_v34 = vadd.f32 %v12979_v0, %v12543_v35  ;;  %9117 = vrcp.f32 %v5676_v11  ;;  %v15087_v41 = vld [vmem:[#allocation57_spill] sm:$0xff]  ;;  %v7480_v10 = vmul.f32 -1.442695, %v15089_v16 }
 0x2d5   : > { %v12962_v54 = vpop.f32.mrb[128].mxu1  ;;  %15084 = vst [vmem:[#allocation144_spill] sm:$0xff] %v12969_v13  ;;  %v3277_v40 = vpack.c.bf16 %v12969_v13, %v12966_v58  ;;  %v12988_v26 = vadd.f32 %v6396_v28, %v15087_v41  ;;  %v9104_v62 = vpop.eup %9103  ;;  %v12996_v52 = vadd.f32 %v12299_v1, %v2865_v15  ;;  %v15092_v11 = vld [vmem:[#allocation148_spill] sm:$0xff]  ;;  %v5674_v28 = vadd.f32 1.0, %v9102_v24  ;;  %v13009_v41 = vld [vmem:[%s14361_s2] ss:$0 sm:$0xff] }
 0x2d6   : > { %v12972_v9 = vpop.f32.mrb[129].mxu1  ;;  %v12999_v35 = vadd.f32 %v12299_v1, %v2866_v19  ;;  %v6394_v4 = vmul.f32 %v15092_v11, %v4150_v34  ;;  %v13004_v13 = vpop.eup %9105  ;;  %9119 = vpow2.f32 %v7477_v12  ;;  %v2508_v16 = vadd.f32 %v13009_v41, %v12545_v33  ;;  %v15094_v34 = vld [vmem:[#allocation48_spill] sm:$0xff] }
 0x2d7   : > { %v12983_v30 = vpop.f32.mrb[130].mxu1  ;;  %15088 = vst [vmem:[#allocation45_spill] sm:$0xff] %v12988_v26  ;;  %15090 = vst [vmem:[#allocation138_spill] sm:$0xff] %v12996_v52  ;;  %v4171_v1 = vadd.f32 %v12979_v0, %v12586_v51  ;;  %9121 = vpow2.f32 %v7482_v63  ;;  %v13024_v11 = vpop.eup %9107  ;;  %v5679_v58 = vadd.f32 1.0, %v9104_v62  ;;  %v15098_v26 = vld [vmem:[#allocation6_spill] sm:$0xff]  ;;  %v2500_v33 = vadd.f32 %v13009_v41, %v12558_v7 }
 0x2d8   : > { %v12990_v27 = vpop.f32.mrb[131].mxu1  ;;  %15091 = vst [vmem:[#allocation78_spill] sm:$0xff] %v12999_v35  ;;  %15093 = vst [vmem:[#allocation75_spill] sm:$0xff] %v13004_v13  ;;  %v3276_v19 = vpack.c.bf16 %v12999_v35, %v12996_v52  ;;  %v13020_v24 = vadd.f32 %v6394_v4, %v15094_v34  ;;  %v4163_v51 = vadd.f32 %v12979_v0, %v12592_v53  ;;  %v9110_v63 = vpop.eup %9109  ;;  %9123 = vpow2.f32 %v7480_v10 }
 0x2d9   : > { %v12992_v18 = vpop.f32.mrb[248].mxu0  ;;  %15097 = vst [vmem:[#allocation148_spill] sm:$0xff] %v13024_v11  ;;  %v6399_v13 = vmul.f32 %v15098_v26, %v4171_v1  ;;  %v2871_v35 = vmul.f32 %v12291_v5, %v2508_v16  ;;  %v2511_v4 = vadd.f32 %v13009_v41, %v12564_v29  ;;  %v4174_v34 = vadd.f32 %v12979_v0, %v12599_v39  ;;  %v15100_v26 = vld [vmem:[#allocation58_spill] sm:$0xff]  ;;  %v15101_v1 = vld [vmem:[#allocation49_spill] sm:$0xff] }
 0x2da   : > { %v13002_v21 = vpop.f32.mrb[249].mxu0  ;;  %15095 = vst [vmem:[#allocation57_spill] sm:$0xff] %v13020_v24  ;;  %8312 = vmatprep.mubr.msk.bf16.mxu1 %vm3311_vm3, %v3276_v19  ;;  %9125 = vrcp.f32 %v5674_v28  ;;  %v7483_v7 = vmul.f32 -1.442695, %v15100_v26  ;;  %v15103_v16 = vld [vmem:[#allocation142_spill] sm:$0xff]  ;;  %v15104_v24 = vld [vmem:[#allocation149_spill] sm:$0xff]  ;;  %v2503_v26 = vadd.f32 %v13009_v41, %v12571_v55 }
 0x2db   : > { %v13015_v15 = vpop.f32.mrb[250].mxu0  ;;  %v13037_v62 = vpop.eup %9111  ;;  %v13041_v52 = vadd.f32 %v6399_v13, %v15101_v1  ;;  %8313 = vmatmul.mubr.msk.bf16.gmra.mrb[216].mxu1 %vm3311_vm3, %v3277_v40  ;;  %v7481_v29 = vmul.f32 -1.442695, %v15103_v16  ;;  %v6397_v11 = vmul.f32 %v15104_v24, %v4163_v51  ;;  %v2872_v39 = vmul.f32 %v12291_v5, %v2511_v4  ;;  %v15105_v19 = vld [vmem:[#allocation154_spill] sm:$0xff]  ;;  %v15112_v55 = vld [vmem:[#allocation63_spill] sm:$0xff] }
 0x2dc   : > { %v13022_v12 = vpop.f32.mrb[251].mxu0  ;;  %15099 = vst [vmem:[#allocation48_spill] sm:$0xff] %v13037_v62  ;;  %v9114_v10 = vpop.eup %9113  ;;  %v6400_v32 = vmul.f32 %v15105_v19, %v4174_v34  ;;  %9127 = vrcp.f32 %v5679_v58  ;;  %v5677_v28 = vadd.f32 1.0, %v9110_v63  ;;  %v13055_v13 = vld [vmem:[%s14362_s3] ss:$0 sm:$0xff] }
 0x2dd   : > { %15096 = vst [vmem:[#allocation141_spill] sm:$0xff] %v13022_v12  ;;  %15102 = vst [vmem:[#allocation6_spill] sm:$0xff] %v13041_v52  ;;  %v2869_v40 = vmul.f32 %v13055_v13, %v2500_v33  ;;  %v13064_v5 = vpop.eup %9115  ;;  %v13069_v58 = vld [vmem:[%s14363_s4] ss:$0 sm:$0xff]  ;;  %9129 = vpow2.f32 %v7483_v7 }
 0x2de   : > { %v13044_v53 = vpop.f32.mrb[132].mxu1  ;;  %15107 = vst [vmem:[#allocation49_spill] sm:$0xff] %v13064_v5  ;;  %v13072_v51 = vadd.f32 %v13069_v58, %v2871_v35  ;;  %v15109_v63 = vld [vmem:[#allocation50_spill] sm:$0xff]  ;;  %v13078_v33 = vadd.f32 %v13069_v58, %v2872_v39  ;;  %v13081_v34 = vadd.f32 %v6400_v32, %v15112_v55  ;;  %v13087_v52 = vpop.eup %9117  ;;  %v5680_v5 = vadd.f32 1.0, %v9114_v10  ;;  %v15117_v39 = vld [vmem:[#allocation61_spill] sm:$0xff] }
 0x2df   : > { %v13050_v62 = vpop.f32.mrb[133].mxu1  ;;  %v13075_v4 = vadd.f32 %v6397_v11, %v15109_v63  ;;  %15115 = vst [vmem:[#allocation183_spill] sm:$0xff] %v13087_v52  ;;  %v2870_v35 = vmul.f32 %v13055_v13, %v2503_v26  ;;  %v4166_v11 = vadd.f32 %v12979_v0, %v12609_v42  ;;  %9131 = vpow2.f32 %v7481_v29  ;;  %v15121_v42 = vld [vmem:[#allocation155_spill] sm:$0xff] }
 0x2e0   : > { %v13060_v1 = vpop.f32.mrb[134].mxu1  ;;  %15108 = vst [vmem:[#allocation142_spill] sm:$0xff] %v13072_v51  ;;  %15111 = vst [vmem:[#allocation154_spill] sm:$0xff] %v13078_v33  ;;  %v3279_v32 = vpack.c.bf16 %v13078_v33, %v13072_v51  ;;  %v4187_v55 = vadd.f32 %v12979_v0, %v12645_v43  ;;  %v9120_v10 = vpop.eup %9119  ;;  %v13102_v7 = vadd.f32 %v13069_v58, %v2869_v40  ;;  %9133 = vrcp.f32 %v5677_v28  ;;  %v15122_v33 = vld [vmem:[#allocation146_spill] sm:$0xff]  ;;  %v15124_v40 = vld [vmem:[#allocation51_spill] sm:$0xff] }
 0x2e1   : > { %v13062_v24 = vpop.f32.mrb[252].mxu0  ;;  %15110 = vst [vmem:[#allocation149_spill] sm:$0xff] %v13075_v4  ;;  %15113 = vst [vmem:[#allocation50_spill] sm:$0xff] %v13081_v34  ;;  %v13083_v16 = vpop.f32.mrb[135].mxu1  ;;  %v7486_v4 = vmul.f32 -1.442695, %v15117_v39  ;;  %v13105_v26 = vadd.f32 %v13069_v58, %v2870_v35  ;;  %v6398_v52 = vmul.f32 %v15121_v42, %v4166_v11  ;;  %v2524_v29 = vadd.f32 %v13009_v41, %v12611_v25 }
 0x2e2   : > { %15106 = vst [vmem:[#allocation58_spill] sm:$0xff] %v13062_v24  ;;  %v13085_v19 = vpop.f32.mrb[253].mxu0  ;;  %15119 = vst [vmem:[#allocation185_spill] sm:$0xff] %v13102_v7  ;;  %v9122_v39 = vpop.eup %9121  ;;  %v7484_v51 = vmul.f32 -1.442695, %v15122_v33  ;;  %9135 = vrcp.f32 %v5680_v5  ;;  %v5678_v24 = vadd.f32 1.0, %v9120_v10  ;;  %v2516_v25 = vadd.f32 %v13009_v41, %v12617_v57 }
 0x2e3   : > { %15114 = vst [vmem:[#allocation63_spill] sm:$0xff] %v13085_v19  ;;  %v13092_v63 = vpop.f32.mrb[254].mxu0  ;;  %15120 = vst [vmem:[#allocation186_spill] sm:$0xff] %v13105_v26  ;;  %v13115_v19 = vadd.f32 %v6398_v52, %v15124_v40  ;;  %v9124_v35 = vpop.eup %9123  ;;  %9137 = vpow2.f32 %v7486_v4  ;;  %v15126_v11 = vld [vmem:[#allocation53_spill] sm:$0xff]  ;;  %v5683_v5 = vadd.f32 1.0, %v9122_v39  ;;  %v4179_v52 = vadd.f32 %v12979_v0, %v12652_v59  ;;  %v15130_v40 = vld [vmem:[#allocation23_spill] sm:$0xff] }
 0x2e4   : > { %15116 = vst [vmem:[#allocation184_spill] sm:$0xff] %v13092_v63  ;;  %v13099_v34 = vpop.f32.mrb[255].mxu0  ;;  %v15123_v63 = vld [vmem:[#allocation79_spill] sm:$0xff]  ;;  %v13124_v33 = vpop.eup %9125  ;;  %9139 = vpow2.f32 %v7484_v51  ;;  %v2873_v57 = vmul.f32 %v13055_v13, %v2516_v25  ;;  %v2519_v39 = vadd.f32 %v13009_v41, %v15130_v40 }
 0x2e5   : > { %15118 = vst [vmem:[#allocation61_spill] sm:$0xff] %v13099_v34  ;;  %v6403_v43 = vmul.f32 %v15123_v63, %v4187_v55  ;;  %v3278_v34 = vpack.c.bf16 %v13105_v26, %v13102_v7  ;;  %15125 = vst [vmem:[#allocation155_spill] sm:$0xff] %v13115_v19  ;;  %v2875_v63 = vmul.f32 %v13055_v13, %v2524_v29  ;;  %v15129_v55 = vld [vmem:[#allocation117_spill] sm:$0xff]  ;;  %v15134_v7 = vld [vmem:[#allocation175_spill] sm:$0xff]  ;;  %9141 = vrcp.f32 %v5678_v24 }
 0x2e6   : > { %v13122_v28 = vpop.f32.mrb[136].mxu1  ;;  %15128 = vst [vmem:[#allocation79_spill] sm:$0xff] %v13124_v33  ;;  %v2527_v10 = vadd.f32 %v13009_v41, %v15129_v55  ;;  %v13142_v59 = vpop.eup %9127  ;;  %v4182_v25 = vadd.f32 %v12979_v0, %v15134_v7  ;;  %v15137_v19 = vld [vmem:[#allocation80_spill] sm:$0xff]  ;;  %v2874_v33 = vmul.f32 %v13055_v13, %v2519_v39  ;;  %v15142_v7 = vld [vmem:[#allocation66_spill] sm:$0xff]  ;;  %v5681_v24 = vadd.f32 1.0, %v9124_v35 }
 0x2e7   : > { %v13118_v42 = vadd.f32 %v6403_v43, %v15126_v11  ;;  %8316 = vmatprep.mubr.msk.bf16.mxu1 %vm3311_vm3, %v3278_v34  ;;  %v13132_v4 = vpop.f32.mrb[137].mxu1  ;;  %v4190_v43 = vadd.f32 %v12979_v0, %v12665_v23  ;;  %15131 = vst [vmem:[#allocation51_spill] sm:$0xff] %v13142_v59  ;;  %v15132_v11 = vld [vmem:[#allocation145_spill] sm:$0xff]  ;;  %v15133_v34 = vld [vmem:[#allocation156_spill] sm:$0xff]  ;;  %v15136_v23 = vld [vmem:[#allocation147_spill] sm:$0xff]  ;;  %v9130_v12 = vpop.eup %9129  ;;  %v13155_v59 = vadd.f32 %v13069_v58, %v2875_v63 }
 0x2e8   : > { %8317 = vmatmul.mubr.msk.bf16.gmra.mrb[220].mxu1 %vm3311_vm3, %v3279_v32  ;;  %v13140_v29 = vpop.f32.mrb[138].mxu1  ;;  %v7487_v55 = vmul.f32 -1.442695, %v15132_v11  ;;  %v6401_v26 = vmul.f32 %v15133_v34, %v4179_v52  ;;  %v2876_v51 = vmul.f32 %v13055_v13, %v2527_v10  ;;  %v7485_v40 = vmul.f32 -1.442695, %v15136_v23  ;;  %v15139_v11 = vld [vmem:[#allocation72_spill] sm:$0xff] }
 0x2e9   : > { %15127 = vst [vmem:[#allocation146_spill] sm:$0xff] %v13118_v42  ;;  %v13149_v42 = vpop.f32.mrb[139].mxu1  ;;  %v6404_v32 = vmul.f32 %v15137_v19, %v4190_v43  ;;  %15138 = vst [vmem:[#allocation117_spill] sm:$0xff] %v13155_v59  ;;  %v6402_v34 = vmul.f32 %v15142_v7, %v4182_v25  ;;  %v13165_v23 = vadd.f32 %v13069_v58, %v2873_v57  ;;  %v15144_v19 = vld [vmem:[#allocation73_spill] sm:$0xff]  ;;  %v15147_v63 = vld [vmem:[#allocation55_spill] sm:$0xff] }
 0x2ea   : > { %15135 = vst [vmem:[#allocation53_spill] sm:$0xff] %v13149_v42  ;;  %v13158_v52 = vadd.f32 %v6401_v26, %v15139_v11  ;;  %v13161_v10 = vadd.f32 %v13069_v58, %v2876_v51  ;;  %v9132_v42 = vpop.eup %9131  ;;  %v13171_v39 = vadd.f32 %v13069_v58, %v2874_v33  ;;  %9143 = vpow2.f32 %v7487_v55  ;;  %v15149_v11 = vld [vmem:[#allocation176_spill] sm:$0xff]  ;;  %v15150_v57 = vld [vmem:[#allocation150_spill] sm:$0xff] }
 0x2eb   : > { %15143 = vst [vmem:[#allocation156_spill] sm:$0xff] %v13165_v23  ;;  %v13168_v43 = vadd.f32 %v6404_v32, %v15144_v19  ;;  %v13176_v51 = vadd.f32 %v6402_v34, %v15147_v63  ;;  %v2540_v25 = vadd.f32 %v13009_v41, %v15149_v11  ;;  %v13180_v35 = vpop.eup %9133  ;;  %9145 = vrcp.f32 %v5683_v5 }
 0x2ec   : > { %15140 = vst [vmem:[#allocation23_spill] sm:$0xff] %v13158_v52  ;;  %15141 = vst [vmem:[#allocation145_spill] sm:$0xff] %v13161_v10  ;;  %v3281_v26 = vpack.c.bf16 %v13161_v10, %v13155_v59  ;;  %v7490_v7 = vmul.f32 -1.442695, %v15150_v57  ;;  %v3280_v32 = vpack.c.bf16 %v13171_v39, %v13165_v23  ;;  %v13185_v33 = vpop.eup %9135  ;;  %v5684_v55 = vadd.f32 1.0, %v9130_v12  ;;  %v15153_v23 = vld [vmem:[#allocation86_spill] sm:$0xff] }
 0x2ed   : > { %15145 = vst [vmem:[#allocation175_spill] sm:$0xff] %v13168_v43  ;;  %15146 = vst [vmem:[#allocation147_spill] sm:$0xff] %v13171_v39  ;;  %9147 = vpow2.f32 %v7485_v40  ;;  %v4203_v19 = vadd.f32 %v12979_v0, %v12735_v2  ;;  %v9138_v34 = vpop.eup %9137  ;;  %v5682_v63 = vadd.f32 1.0, %v9132_v42  ;;  %v2532_v11 = vadd.f32 %v13009_v41, %v12679_v37  ;;  %v15151_v40 = vld [vmem:[#allocation69_spill] sm:$0xff]  ;;  %v15179_v43 = vld [vmem:[#allocation128_spill] sm:$0xff] }
 0x2ee   : > { %15148 = vst [vmem:[#allocation80_spill] sm:$0xff] %v13176_v51  ;;  %v4195_v5 = vadd.f32 %v12979_v0, %v12748_v49  ;;  %v2543_v57 = vadd.f32 %v13009_v41, %v12690_v6  ;;  %8320 = vmatprep.mubr.msk.bf16.mxu1 %vm3311_vm3, %v3280_v32  ;;  %9149 = vrcp.f32 %v5681_v24  ;;  %v2879_v12 = vmul.f32 %v13055_v13, %v2540_v25  ;;  %v9140_v37 = vpop.eup %9139  ;;  %v15152_v49 = vld [vmem:[#allocation152_spill] sm:$0xff]  ;;  %v15154_v24 = vld [vmem:[#allocation59_spill] sm:$0xff] }
 0x2ef   : > { %v6407_v39 = vmul.f32 %v15151_v40, %v4203_v19  ;;  %v4206_v2 = vadd.f32 %v12979_v0, %v12759_v14  ;;  %9151 = vpow2.f32 %v7490_v7  ;;  %v7488_v10 = vmul.f32 -1.442695, %v15152_v49  ;;  %v15156_v19 = vld [vmem:[#allocation160_spill] sm:$0xff] }
 0x2f0   : > { %8321 = vmatmul.mubr.msk.bf16.gmra.mrb[224].mxu1 %vm3311_vm3, %v3281_v26  ;;  %v6405_v6 = vmul.f32 %v15153_v23, %v4195_v5  ;;  %9153 = vrcp.f32 %v5684_v55  ;;  %v2880_v32 = vmul.f32 %v13055_v13, %v2543_v57  ;;  %v13214_v26 = vpop.eup %9141  ;;  %v2877_v7 = vmul.f32 %v13055_v13, %v2532_v11  ;;  %v15157_v49 = vld [vmem:[#allocation60_spill] sm:$0xff] }
 0x2f1   : > { %v13201_v42 = vpop.f32.mrb[140].mxu1  ;;  %v13208_v25 = vadd.f32 %v6407_v39, %v15154_v24  ;;  %v6408_v14 = vmul.f32 %v15156_v19, %v4206_v2  ;;  %9155 = vrcp.f32 %v5682_v63  ;;  %v2535_v23 = vadd.f32 %v13009_v41, %v12701_v3  ;;  %v15161_v2 = vld [vmem:[#allocation77_spill] sm:$0xff]  ;;  %v15163_v19 = vld [vmem:[#allocation151_spill] sm:$0xff] }
 0x2f2   : > { %v13205_v59 = vpop.f32.mrb[141].mxu1  ;;  %v13218_v51 = vadd.f32 %v6405_v6, %v15157_v49  ;;  %v5687_v39 = vadd.f32 1.0, %v9138_v34  ;;  %v13225_v5 = vadd.f32 %v13069_v58, %v2879_v12  ;;  %v13228_v57 = vadd.f32 %v13069_v58, %v2880_v32  ;;  %v15164_v34 = vld [vmem:[#allocation153_spill] sm:$0xff] }
 0x2f3   : > { %15155 = vst [vmem:[#allocation72_spill] sm:$0xff] %v13208_v25  ;;  %v13212_v40 = vpop.f32.mrb[142].mxu1  ;;  %v13231_v24 = vadd.f32 %v6408_v14, %v15161_v2  ;;  %v5685_v63 = vadd.f32 1.0, %v9140_v37  ;;  %9157 = vpow2.f32 %v7488_v10  ;;  %v2878_v11 = vmul.f32 %v13055_v13, %v2535_v23  ;;  %v15176_v25 = vld [vmem:[#allocation91_spill] sm:$0xff] }
 0x2f4   : > { %15158 = vst [vmem:[#allocation66_spill] sm:$0xff] %v13218_v51  ;;  %v13222_v55 = vpop.f32.mrb[143].mxu1  ;;  %15159 = vst [vmem:[#allocation73_spill] sm:$0xff] %v13225_v5  ;;  %v4198_v6 = vadd.f32 %v12979_v0, %v12765_v60  ;;  %v9144_v3 = vpop.eup %9143  ;;  %v7491_v49 = vmul.f32 -1.442695, %v15163_v19  ;;  %v3283_v12 = vpack.c.bf16 %v13228_v57, %v13225_v5  ;;  %v4219_v32 = vadd.f32 %v12979_v0, %v12820_v50  ;;  %v15168_v60 = vld [vmem:[#allocation33_spill] sm:$0xff] }
 0x2f5   : > { %15160 = vst [vmem:[#allocation55_spill] sm:$0xff] %v13228_v57  ;;  %15162 = vst [vmem:[#allocation176_spill] sm:$0xff] %v13231_v24  ;;  %v7489_v51 = vmul.f32 -1.442695, %v15164_v34  ;;  %v13242_v14 = vpop.eup %9145  ;;  %v13245_v10 = vadd.f32 %v13069_v58, %v2877_v7  ;;  %v13248_v37 = vadd.f32 %v13069_v58, %v2878_v11  ;;  %v2556_v2 = vadd.f32 %v13009_v41, %v12731_v22  ;;  %v15169_v34 = vld [vmem:[#allocation162_spill] sm:$0xff] }
 0x2f6   : > { %15165 = vst [vmem:[#allocation150_spill] sm:$0xff] %v13242_v14  ;;  %v6406_v23 = vmul.f32 %v15168_v60, %v4198_v6  ;;  %9159 = vrcp.f32 %v5687_v39  ;;  %v6411_v57 = vmul.f32 %v15169_v34, %v4219_v32  ;;  %v2548_v50 = vadd.f32 %v13009_v41, %v12737_v17  ;;  %v15170_v24 = vld [vmem:[#allocation62_spill] sm:$0xff]  ;;  %v15173_v39 = vld [vmem:[#allocation87_spill] sm:$0xff]  ;;  %v15174_v34 = vld [vmem:[#allocation65_spill] sm:$0xff] }
 0x2f7   : > { %15166 = vst [vmem:[#allocation69_spill] sm:$0xff] %v13245_v10  ;;  %15167 = vst [vmem:[#allocation152_spill] sm:$0xff] %v13248_v37  ;;  %v9148_v19 = vpop.eup %9147  ;;  %v4211_v5 = vadd.f32 %v12979_v0, %v12828_v38  ;;  %9161 = vrcp.f32 %v5685_v63  ;;  %v5688_v7 = vadd.f32 1.0, %v9144_v3  ;;  %v3282_v11 = vpack.c.bf16 %v13248_v37, %v13245_v10  ;;  %v15177_v10 = vld [vmem:[#allocation130_spill] sm:$0xff]  ;;  %v15208_v14 = vld [vmem:[#allocation76_spill] sm:$0xff] }
 0x2f8   : > { %v13261_v6 = vadd.f32 %v6406_v23, %v15170_v24  ;;  %v13265_v22 = vpop.eup %9149  ;;  %9163 = vpow2.f32 %v7491_v49  ;;  %v7494_v32 = vmul.f32 -1.442695, %v15173_v39  ;;  %v13269_v17 = vadd.f32 %v6411_v57, %v15174_v34  ;;  %v15178_v23 = vld [vmem:[#allocation180_spill] sm:$0xff]  ;;  %v15182_v34 = vld [vmem:[#allocation67_spill] sm:$0xff] }
 0x2f9   : > { %15172 = vst [vmem:[#allocation59_spill] sm:$0xff] %v13265_v22  ;;  %v6409_v38 = vmul.f32 %v15176_v25, %v4211_v5  ;;  %v9152_v3 = vpop.eup %9151  ;;  %v2883_v37 = vmul.f32 %v13055_v13, %v2556_v2  ;;  %v2559_v24 = vadd.f32 %v13009_v41, %v15177_v10  ;;  %v2551_v49 = vadd.f32 %v13009_v41, %v15179_v43 }
 0x2fa   : > { %15171 = vst [vmem:[#allocation86_spill] sm:$0xff] %v13261_v6  ;;  %v13263_v60 = vpop.f32.mrb[144].mxu1  ;;  %15175 = vst [vmem:[#allocation160_spill] sm:$0xff] %v13269_v17  ;;  %v4222_v6 = vadd.f32 %v12979_v0, %v15178_v23  ;;  %8324 = vmatprep.mubr.msk.bf16.mxu1 %vm3311_vm3, %v3282_v11  ;;  %v13284_v39 = vpop.eup %9153  ;;  %v5686_v25 = vadd.f32 1.0, %v9148_v19  ;;  %9165 = vpow2.f32 %v7489_v51  ;;  %v2881_v5 = vmul.f32 %v13055_v13, %v2548_v50  ;;  %v15184_v11 = vld [vmem:[#allocation164_spill] sm:$0xff]  ;;  %v15185_v50 = vld [vmem:[#allocation81_spill] sm:$0xff] }
 0x2fb   : > { %v13272_v63 = vpop.f32.mrb[145].mxu1  ;;  %15180 = vst [vmem:[#allocation60_spill] sm:$0xff] %v13284_v39  ;;  %8325 = vmatmul.mubr.msk.bf16.gmra.mrb[228].mxu1 %vm3311_vm3, %v3283_v12  ;;  %v13290_v10 = vpop.eup %9155  ;;  %9167 = vrcp.f32 %v5688_v7  ;;  %v13293_v23 = vadd.f32 %v6409_v38, %v15182_v34  ;;  %v2884_v43 = vmul.f32 %v13055_v13, %v2559_v24  ;;  %v5691_v52 = vadd.f32 1.0, %v9152_v3  ;;  %v15188_v38 = vld [vmem:[#allocation68_spill] sm:$0xff] }
 0x2fc   : > { %v13282_v57 = vpop.f32.mrb[146].mxu1  ;;  %15181 = vst [vmem:[#allocation77_spill] sm:$0xff] %v13290_v10  ;;  %v6412_v17 = vmul.f32 %v15184_v11, %v4222_v6  ;;  %9169 = vpow2.f32 %v7494_v32  ;;  %v2882_v51 = vmul.f32 %v13055_v13, %v2551_v49  ;;  %v4214_v19 = vadd.f32 %v12979_v0, %v12849_v20  ;;  %v15192_v20 = vld [vmem:[#allocation14_spill] sm:$0xff]  ;;  %v15193_v49 = vld [vmem:[#allocation157_spill] sm:$0xff]  ;;  %v15194_v11 = vld [vmem:[#allocation36_spill] sm:$0xff] }
 0x2fd   : > { %v13288_v2 = vpop.f32.mrb[147].mxu1  ;;  %15183 = vst [vmem:[#allocation151_spill] sm:$0xff] %v13293_v23  ;;  %v9158_v12 = vpop.eup %9157  ;;  %v7492_v39 = vmul.f32 -1.442695, %v15185_v50  ;;  %v13302_v10 = vadd.f32 %v13069_v58, %v2883_v37  ;;  %v13305_v7 = vadd.f32 %v13069_v58, %v2884_v43  ;;  %9171 = vrcp.f32 %v5686_v25 }
 0x2fe   : > { %v13308_v24 = vadd.f32 %v6412_v17, %v15188_v38  ;;  %v13311_v6 = vadd.f32 %v13069_v58, %v2881_v5  ;;  %v13314_v32 = vadd.f32 %v13069_v58, %v2882_v51  ;;  %v6410_v3 = vmul.f32 %v15192_v20, %v4214_v19  ;;  %v15197_v38 = vld [vmem:[#allocation70_spill] sm:$0xff] }
 0x2ff   : > { %15186 = vst [vmem:[#allocation153_spill] sm:$0xff] %v13302_v10  ;;  %15187 = vst [vmem:[#allocation33_spill] sm:$0xff] %v13305_v7  ;;  %v7495_v34 = vmul.f32 -1.442695, %v15193_v49  ;;  %v3285_v37 = vpack.c.bf16 %v13305_v7, %v13302_v10  ;;  %v2572_v43 = vadd.f32 %v13009_v41, %v15194_v11  ;;  %v4235_v17 = vadd.f32 %v12979_v0, %v12888_v31  ;;  %v15199_v7 = vld [vmem:[#allocation92_spill] sm:$0xff]  ;;  %v15200_v10 = vld [vmem:[#allocation166_spill] sm:$0xff] }
 0x300   : > { %15189 = vst [vmem:[#allocation162_spill] sm:$0xff] %v13308_v24  ;;  %15190 = vst [vmem:[#allocation62_spill] sm:$0xff] %v13311_v6  ;;  %v13324_v25 = vpop.eup %9159  ;;  %9173 = vrcp.f32 %v5691_v52  ;;  %v5689_v5 = vadd.f32 1.0, %v9158_v12  ;;  %v3284_v51 = vpack.c.bf16 %v13314_v32, %v13311_v6  ;;  %v13333_v20 = vadd.f32 %v6410_v3, %v15197_v38  ;;  %v15201_v52 = vld [vmem:[#allocation135_spill] sm:$0xff] }
 0x301   : > { %15191 = vst [vmem:[#allocation87_spill] sm:$0xff] %v13314_v32  ;;  %15195 = vst [vmem:[#allocation65_spill] sm:$0xff] %v13324_v25  ;;  %v13330_v19 = vpop.eup %9161  ;;  %9175 = vpow2.f32 %v7492_v39  ;;  %v7493_v31 = vmul.f32 -1.442695, %v15199_v7  ;;  %v6415_v24 = vmul.f32 %v15200_v10, %v4235_v17  ;;  %v2564_v12 = vadd.f32 %v13009_v41, %v15201_v52  ;;  %v15202_v3 = vld [vmem:[#allocation179_spill] sm:$0xff]  ;;  %v15207_v25 = vld [vmem:[#allocation10_spill] sm:$0xff] }
 0x302   : > { %v13328_v50 = vpop.f32.mrb[148].mxu1  ;;  %15196 = vst [vmem:[#allocation91_spill] sm:$0xff] %v13330_v19  ;;  %15198 = vst [vmem:[#allocation130_spill] sm:$0xff] %v13333_v20  ;;  %v9164_v11 = vpop.eup %9163  ;;  %v4227_v32 = vadd.f32 %v12979_v0, %v12902_v47  ;;  %8328 = vmatprep.mubr.msk.bf16.mxu1 %vm3311_vm3, %v3284_v51  ;;  %9177 = vpow2.f32 %v7495_v34  ;;  %v2887_v39 = vmul.f32 %v13055_v13, %v2572_v43  ;;  %v15203_v47 = vld [vmem:[#allocation83_spill] sm:$0xff]  ;;  %v15204_v51 = vld [vmem:[#allocation84_spill] sm:$0xff] }
 0x303   : > { %v13335_v49 = vpop.f32.mrb[149].mxu1  ;;  %v2575_v38 = vadd.f32 %v13009_v41, %v15202_v3  ;;  %v4238_v7 = vadd.f32 %v12979_v0, %v12914_v56  ;;  %8329 = vmatmul.mubr.msk.bf16.gmra.mrb[232].mxu1 %vm3311_vm3, %v3285_v37  ;;  %9179 = vrcp.f32 %v5689_v5  ;;  %v7498_v52 = vmul.f32 -1.442695, %v15203_v47  ;;  %v15206_v34 = vld [vmem:[#allocation98_spill] sm:$0xff]  ;;  %v15210_v47 = vld [vmem:[#allocation47_spill] sm:$0xff] }
 0x304   : > { %v13344_v6 = vpop.f32.mrb[150].mxu1  ;;  %v9166_v17 = vpop.eup %9165  ;;  %v13356_v20 = vadd.f32 %v6415_v24, %v15204_v51  ;;  %v6413_v23 = vmul.f32 %v15206_v34, %v4227_v32  ;;  %v5692_v19 = vadd.f32 1.0, %v9164_v11  ;;  %v2885_v3 = vmul.f32 %v13055_v13, %v2564_v12  ;;  %v15216_v34 = vld [vmem:[#allocation167_spill] sm:$0xff] }
 0x305   : > { %v13352_v10 = vpop.f32.mrb[151].mxu1  ;;  %v13359_v43 = vpop.eup %9167  ;;  %v2888_v56 = vmul.f32 %v13055_v13, %v2575_v38  ;;  %v6416_v37 = vmul.f32 %v15207_v25, %v4238_v7  ;;  %9181 = vpow2.f32 %v7493_v31  ;;  %v2567_v24 = vadd.f32 %v13009_v41, %v15210_v47  ;;  %v15213_v38 = vld [vmem:[#allocation5_spill] sm:$0xff] }
 0x306   : > { %15205 = vst [vmem:[#allocation180_spill] sm:$0xff] %v13356_v20  ;;  %v9170_v22 = vpop.eup %9169  ;;  %v13365_v5 = vadd.f32 %v6413_v23, %v15208_v14  ;;  %v4230_v32 = vadd.f32 %v12979_v0, %v12919_v8  ;;  %v5690_v51 = vadd.f32 1.0, %v9166_v17  ;;  %v13372_v11 = vadd.f32 %v13069_v58, %v2887_v39  ;;  %v15215_v14 = vld [vmem:[#allocation85_spill] sm:$0xff]  ;;  %v15230_v20 = vld [vmem:[#allocation43_spill] sm:$0xff] }
 0x307   : > { %v13375_v12 = vadd.f32 %v13069_v58, %v2888_v56  ;;  %v13378_v25 = vadd.f32 %v6416_v37, %v15213_v38  ;;  %v13380_v31 = vpop.eup %9171  ;;  %9183 = vpow2.f32 %v7498_v52  ;;  %v7496_v23 = vmul.f32 -1.442695, %v15215_v14  ;;  %v15220_v52 = vld [vmem:[#allocation89_spill] sm:$0xff] }
 0x308   : > { %15209 = vst [vmem:[#allocation128_spill] sm:$0xff] %v13365_v5  ;;  %15211 = vst [vmem:[#allocation67_spill] sm:$0xff] %v13372_v11  ;;  %v2886_v7 = vmul.f32 %v13055_v13, %v2567_v24  ;;  %v6414_v47 = vmul.f32 %v15216_v34, %v4230_v32  ;;  %9185 = vrcp.f32 %v5692_v19  ;;  %v5695_v8 = vadd.f32 1.0, %v9170_v22 }
 0x309   : > { %15212 = vst [vmem:[#allocation164_spill] sm:$0xff] %v13375_v12  ;;  %15214 = vst [vmem:[#allocation81_spill] sm:$0xff] %v13378_v25  ;;  %v13386_v39 = vadd.f32 %v13069_v58, %v2885_v3  ;;  %v3287_v17 = vpack.c.bf16 %v13375_v12, %v13372_v11  ;;  %v2588_v24 = vadd.f32 %v13009_v41, %v12857_v45  ;;  %9187 = vrcp.f32 %v5690_v51  ;;  %v15222_v3 = vld [vmem:[#allocation158_spill] sm:$0xff]  ;;  %v15225_v11 = vld [vmem:[#allocation133_spill] sm:$0xff] }
 0x30a   : > { %v13390_v56 = vpop.eup %9173  ;;  %v13393_v37 = vadd.f32 %v13069_v58, %v2886_v7  ;;  %v13396_v38 = vadd.f32 %v6414_v47, %v15220_v52  ;;  %v4251_v22 = vadd.f32 %v12979_v0, %v12962_v54  ;;  %v7499_v32 = vmul.f32 -1.442695, %v15222_v3  ;;  %v15223_v52 = vld [vmem:[#allocation170_spill] sm:$0xff]  ;;  %v15229_v25 = vld [vmem:[#allocation171_spill] sm:$0xff] }
 0x30b   : > { %15217 = vst [vmem:[#allocation68_spill] sm:$0xff] %v13386_v39  ;;  %15218 = vst [vmem:[#allocation14_spill] sm:$0xff] %v13390_v56  ;;  %v9176_v19 = vpop.eup %9175  ;;  %9189 = vpow2.f32 %v7496_v23  ;;  %v2580_v45 = vadd.f32 %v13009_v41, %v12867_v36  ;;  %v2891_v3 = vmul.f32 %v13055_v13, %v2588_v24  ;;  %v4243_v23 = vadd.f32 %v12979_v0, %v12972_v9  ;;  %v15226_v36 = vld [vmem:[#allocation93_spill] sm:$0xff] }
 0x30c   : > { %15219 = vst [vmem:[#allocation157_spill] sm:$0xff] %v13393_v37  ;;  %15221 = vst [vmem:[#allocation36_spill] sm:$0xff] %v13396_v38  ;;  %v13403_v14 = vpop.f32.mrb[152].mxu1  ;;  %v3286_v7 = vpack.c.bf16 %v13393_v37, %v13386_v39  ;;  %v9178_v47 = vpop.eup %9177  ;;  %9191 = vrcp.f32 %v5695_v8  ;;  %v6419_v12 = vmul.f32 %v15223_v52, %v4251_v22  ;;  %v2591_v37 = vadd.f32 %v13009_v41, %v15225_v11  ;;  %v15227_v39 = vld [vmem:[#allocation90_spill] sm:$0xff]  ;;  %v15231_v56 = vld [vmem:[#allocation105_spill] sm:$0xff] }
 0x30d   : > { %v13407_v34 = vpop.f32.mrb[153].mxu1  ;;  %v13414_v51 = vpop.eup %9179  ;;  %v4254_v8 = vadd.f32 %v12979_v0, %v12983_v30  ;;  %9193 = vpow2.f32 %v7499_v32  ;;  %v7497_v52 = vmul.f32 -1.442695, %v15226_v36  ;;  %v5693_v9 = vadd.f32 1.0, %v9176_v19  ;;  %v15233_v19 = vld [vmem:[#allocation82_spill] sm:$0xff] }
 0x30e   : > { %v13412_v54 = vpop.f32.mrb[154].mxu1  ;;  %15224 = vst [vmem:[#allocation70_spill] sm:$0xff] %v13414_v51  ;;  %8332 = vmatprep.mubr.msk.bf16.mxu1 %vm3311_vm3, %v3286_v7  ;;  %v13428_v38 = vadd.f32 %v15227_v39, %v6419_v12  ;;  %v6417_v5 = vmul.f32 %v15229_v25, %v4243_v23  ;;  %v2892_v11 = vmul.f32 %v13055_v13, %v2591_v37  ;;  %v5696_v51 = vadd.f32 1.0, %v9178_v47  ;;  %v15239_v23 = vld [vmem:[#allocation173_spill] sm:$0xff] }
 0x30f   : > { %v13424_v22 = vpop.f32.mrb[155].mxu1  ;;  %8333 = vmatmul.mubr.msk.bf16.gmra.mrb[236].mxu1 %vm3311_vm3, %v3287_v17  ;;  %v9182_v24 = vpop.eup %9181  ;;  %v6420_v30 = vmul.f32 %v15230_v20, %v4254_v8  ;;  %v2889_v7 = vmul.f32 %v13055_v13, %v2580_v45  ;;  %v2583_v32 = vadd.f32 %v13009_v41, %v15231_v56  ;;  %v4246_v12 = vadd.f32 %v12979_v0, %v12990_v27  ;;  %v15236_v20 = vld [vmem:[#allocation71_spill] sm:$0xff]  ;;  %v15238_v56 = vld [vmem:[#allocation88_spill] sm:$0xff] }
 0x310   : > { %15228 = vst [vmem:[#allocation92_spill] sm:$0xff] %v13428_v38  ;;  %v13440_v17 = vadd.f32 %v13069_v58, %v2891_v3  ;;  %v13443_v36 = vadd.f32 %v15233_v19, %v6417_v5  ;;  %v13446_v25 = vadd.f32 %v13069_v58, %v2892_v11  ;;  %9195 = vpow2.f32 %v7497_v52  ;;  %v15248_v38 = vld [vmem:[#allocation3_spill] sm:$0xff] }
 0x311   : > { %v9184_v39 = vpop.eup %9183  ;;  %v13449_v37 = vadd.f32 %v15236_v20, %v6420_v30  ;;  %v7502_v45 = vmul.f32 -1.442695, %v15238_v56  ;;  %v2890_v27 = vmul.f32 %v13055_v13, %v2583_v32  ;;  %v6418_v8 = vmul.f32 %v15239_v23, %v4246_v12  ;;  %v15242_v12 = vld [vmem:[#allocation2_spill] sm:$0xff] }
 0x312   : > { %15232 = vst [vmem:[#allocation166_spill] sm:$0xff] %v13440_v17  ;;  %15234 = vst [vmem:[#allocation135_spill] sm:$0xff] %v13443_v36  ;;  %v13451_v47 = vpop.eup %9185  ;;  %9197 = vrcp.f32 %v5693_v9  ;;  %v5694_v5 = vadd.f32 1.0, %v9182_v24  ;;  %v3289_v11 = vpack.c.bf16 %v13446_v25, %v13440_v17  ;;  %v4267_v30 = vadd.f32 %v12979_v0, %v13044_v53  ;;  %v15244_v53 = vld [vmem:[#allocation95_spill] sm:$0xff]  ;;  %v15245_v17 = vld [vmem:[#allocation109_spill] sm:$0xff] }
 0x313   : > { %15235 = vst [vmem:[#allocation179_spill] sm:$0xff] %v13446_v25  ;;  %15237 = vst [vmem:[#allocation83_spill] sm:$0xff] %v13449_v37  ;;  %v13464_v20 = vpop.eup %9187  ;;  %v13467_v52 = vadd.f32 %v13069_v58, %v2889_v7  ;;  %v13470_v32 = vadd.f32 %v13069_v58, %v2890_v27  ;;  %v13473_v56 = vadd.f32 %v15242_v12, %v6418_v8  ;;  %9199 = vrcp.f32 %v5696_v51  ;;  %v15246_v8 = vld [vmem:[#allocation161_spill] sm:$0xff] }
 0x314   : > { %v2604_v24 = vadd.f32 %v13009_v41, %v12926_v61  ;;  %v7500_v25 = vmul.f32 -1.442695, %v15244_v53  ;;  %v6423_v37 = vmul.f32 %v15245_v17, %v4267_v30  ;;  %v2596_v7 = vadd.f32 %v13009_v41, %v12934_v44 }
 0x315   : > { %v13456_v3 = vpop.f32.mrb[156].mxu1  ;;  %15240 = vst [vmem:[#allocation84_spill] sm:$0xff] %v13467_v52  ;;  %15241 = vst [vmem:[#allocation98_spill] sm:$0xff] %v13470_v32  ;;  %v9190_v23 = vpop.eup %9189  ;;  %9201 = vpow2.f32 %v7502_v45  ;;  %v7503_v12 = vmul.f32 -1.442695, %v15246_v8  ;;  %v3288_v61 = vpack.c.bf16 %v13470_v32, %v13467_v52  ;;  %v4259_v17 = vadd.f32 %v12979_v0, %v13050_v62  ;;  %v15251_v32 = vld [vmem:[#allocation115_spill] sm:$0xff] }
 0x316   : > { %v13462_v19 = vpop.f32.mrb[157].mxu1  ;;  %15243 = vst [vmem:[#allocation10_spill] sm:$0xff] %v13473_v56  ;;  %v13485_v27 = vpop.eup %9191  ;;  %9203 = vrcp.f32 %v5694_v5  ;;  %v15247_v56 = vld [vmem:[#allocation163_spill] sm:$0xff]  ;;  %v13492_v53 = vadd.f32 %v15248_v38, %v6423_v37  ;;  %v2895_v30 = vmul.f32 %v13055_v13, %v2604_v24  ;;  %v2607_v45 = vadd.f32 %v13009_v41, %v12940_v46 }
 0x317   : > { %v13477_v9 = vpop.f32.mrb[158].mxu1  ;;  %v7501_v51 = vmul.f32 -1.442695, %v15247_v56  ;;  %v9194_v44 = vpop.eup %9193  ;;  %v4270_v8 = vadd.f32 %v12979_v0, %v13060_v1  ;;  %v2599_v5 = vadd.f32 %v13009_v41, %v12947_v48  ;;  %8336 = vmatprep.mubr.msk.bf16.mxu1 %vm3311_vm3, %v3288_v61  ;;  %v5699_v56 = vadd.f32 1.0, %v9184_v39  ;;  %v15250_v37 = vld [vmem:[#allocation111_spill] sm:$0xff] }
 0x318   : > { %v13483_v36 = vpop.f32.mrb[159].mxu1  ;;  %15249 = vst [vmem:[#allocation76_spill] sm:$0xff] %v13492_v53  ;;  %9205 = vpow2.f32 %v7500_v25  ;;  %v2893_v38 = vmul.f32 %v13055_v13, %v2596_v7  ;;  %v6421_v62 = vmul.f32 %v15250_v37, %v4259_v17  ;;  %8337 = vmatmul.mubr.msk.bf16.gmra.mrb[240].mxu1 %vm3311_vm3, %v3289_v11  ;;  %v5697_v24 = vadd.f32 1.0, %v9190_v23  ;;  %v15252_v53 = vld [vmem:[#allocation4_spill] sm:$0xff] }
 0x319   : > { %9207 = vpow2.f32 %v7503_v12  ;;  %v2896_v46 = vmul.f32 %v13055_v13, %v2607_v45  ;;  %v6424_v52 = vmul.f32 %v15251_v32, %v4270_v8  ;;  %v5700_v1 = vadd.f32 1.0, %v9194_v44  ;;  %v15256_v11 = vld [vmem:[#allocation24_spill] sm:$0xff] }
 0x31a   : > { %9209 = vpow2.f32 %v7501_v51  ;;  %v13510_v48 = vadd.f32 %v15252_v53, %v6421_v62  ;;  %v2894_v39 = vmul.f32 %v13055_v13, %v2599_v5  ;;  %v9196_v25 = vpop.eup %9195  ;;  %v13514_v7 = vadd.f32 %v13069_v58, %v2895_v30  ;;  %v15258_v53 = vld [vmem:[#allocation94_spill] sm:$0xff]  ;;  %v15261_v8 = vld [vmem:[#allocation120_spill] sm:$0xff] }
 0x31b   : > { %v13517_v61 = vadd.f32 %v13069_v58, %v2896_v46  ;;  %v13520_v23 = vadd.f32 %v15256_v11, %v6424_v52  ;;  %v4262_v32 = vadd.f32 %v12979_v0, %v13083_v16  ;;  %9211 = vrcp.f32 %v5699_v56 }
 0x31c   : > { %15253 = vst [vmem:[#allocation47_spill] sm:$0xff] %v13510_v48  ;;  %15254 = vst [vmem:[#allocation5_spill] sm:$0xff] %v13514_v7  ;;  %v13526_v51 = vpop.eup %9197  ;;  %v7506_v17 = vmul.f32 -1.442695, %v15258_v53  ;;  %v13530_v44 = vadd.f32 %v13069_v58, %v2893_v38  ;;  %v13533_v30 = vadd.f32 %v13069_v58, %v2894_v39  ;;  %v2620_v5 = vadd.f32 %v13009_v41, %v12992_v18  ;;  %v15264_v18 = vld [vmem:[#allocation119_spill] sm:$0xff] }
 0x31d   : > { %15255 = vst [vmem:[#allocation85_spill] sm:$0xff] %v13517_v61  ;;  %15257 = vst [vmem:[#allocation167_spill] sm:$0xff] %v13520_v23  ;;  %v3291_v52 = vpack.c.bf16 %v13517_v61, %v13514_v7  ;;  %v6422_v16 = vmul.f32 %v15261_v8, %v4262_v32  ;;  %v4283_v56 = vadd.f32 %v12979_v0, %v13122_v28  ;;  %v13546_v38 = vpop.eup %9199  ;;  %9213 = vrcp.f32 %v5697_v24  ;;  %v15262_v32 = vld [vmem:[#allocation97_spill] sm:$0xff]  ;;  %v15265_v28 = vld [vmem:[#allocation96_spill] sm:$0xff] }
 0x31e   : > { %v13524_v12 = vpop.f32.mrb[160].mxu1  ;;  %15259 = vst [vmem:[#allocation89_spill] sm:$0xff] %v13530_v44  ;;  %15260 = vst [vmem:[#allocation158_spill] sm:$0xff] %v13533_v30  ;;  %v5698_v62 = vadd.f32 1.0, %v9196_v25  ;;  %v3290_v46 = vpack.c.bf16 %v13533_v30, %v13530_v44  ;;  %9215 = vrcp.f32 %v5700_v1  ;;  %v7504_v7 = vmul.f32 -1.442695, %v15265_v28 }
 0x31f   : > { %v13535_v45 = vpop.f32.mrb[161].mxu1  ;;  %v9202_v11 = vpop.eup %9201  ;;  %v13553_v53 = vadd.f32 %v15262_v32, %v6422_v16  ;;  %v6427_v8 = vmul.f32 %v15264_v18, %v4283_v56  ;;  %9217 = vpow2.f32 %v7506_v17  ;;  %v2612_v24 = vadd.f32 %v13009_v41, %v13002_v21  ;;  %v15266_v30 = vld [vmem:[#allocation27_spill] sm:$0xff]  ;;  %v15268_v21 = vld [vmem:[#allocation8_spill] sm:$0xff] }
 0x320   : > { %v13544_v37 = vpop.f32.mrb[162].mxu1  ;;  %v13556_v61 = vpop.eup %9203  ;;  %v4275_v25 = vadd.f32 %v12979_v0, %v13132_v4  ;;  %8340 = vmatprep.mubr.msk.bf16.mxu1 %vm3311_vm3, %v3290_v46  ;;  %v2899_v1 = vmul.f32 %v13055_v13, %v2620_v5  ;;  %v2623_v56 = vadd.f32 %v13009_v41, %v13015_v15  ;;  %v4286_v17 = vadd.f32 %v12979_v0, %v13140_v29  ;;  %v15269_v4 = vld [vmem:[#allocation122_spill] sm:$0xff]  ;;  %v15270_v46 = vld [vmem:[#allocation141_spill] sm:$0xff]  ;;  %v15274_v48 = vld [vmem:[#allocation7_spill] sm:$0xff] }
 0x321   : > { %v13550_v39 = vpop.f32.mrb[163].mxu1  ;;  %15263 = vst [vmem:[#allocation170_spill] sm:$0xff] %v13553_v53  ;;  %v13566_v16 = vadd.f32 %v15266_v30, %v6427_v8  ;;  %8341 = vmatmul.mubr.msk.bf16.gmra.mrb[244].mxu1 %vm3311_vm3, %v3291_v52  ;;  %9219 = vrcp.f32 %v5698_v62  ;;  %v7507_v18 = vmul.f32 -1.442695, %v15268_v21  ;;  %v2615_v5 = vadd.f32 %v13009_v41, %v15270_v46  ;;  %v15271_v15 = vld [vmem:[#allocation177_spill] sm:$0xff] }
 0x322   : > { %v9206_v32 = vpop.eup %9205  ;;  %v6425_v28 = vmul.f32 %v15269_v4, %v4275_v25  ;;  %v2897_v30 = vmul.f32 %v13055_v13, %v2612_v24  ;;  %v2900_v8 = vmul.f32 %v13055_v13, %v2623_v56  ;;  %v15272_v53 = vld [vmem:[#allocation53_spill] sm:$0xff]  ;;  %v5703_v23 = vadd.f32 1.0, %v9202_v11 }
 0x323   : > { %15267 = vst [vmem:[#allocation133_spill] sm:$0xff] %v13566_v16  ;;  %v9208_v44 = vpop.eup %9207  ;;  %v6428_v16 = vmul.f32 %v15271_v15, %v4286_v17  ;;  %v4278_v29 = vadd.f32 %v12979_v0, %v15272_v53  ;;  %9221 = vpow2.f32 %v7504_v7  ;;  %v15273_v62 = vld [vmem:[#allocation165_spill] sm:$0xff]  ;;  %v13589_v46 = vadd.f32 %v13069_v58, %v2899_v1 }
 0x324   : > { %v9210_v52 = vpop.eup %9209  ;;  %v7505_v21 = vmul.f32 -1.442695, %v15273_v62  ;;  %v13584_v25 = vadd.f32 %v15274_v48, %v6425_v28  ;;  %v13592_v24 = vadd.f32 %v13069_v58, %v2900_v8  ;;  %v15278_v56 = vld [vmem:[#allocation9_spill] sm:$0xff]  ;;  %v2898_v53 = vmul.f32 %v13055_v13, %v2615_v5  ;;  %v15281_v28 = vld [vmem:[#allocation28_spill] sm:$0xff]  ;;  %v15284_v5 = vld [vmem:[#allocation58_spill] sm:$0xff] }
 0x325   : > { %15276 = vst [vmem:[#allocation90_spill] sm:$0xff] %v13589_v46  ;;  %v13595_v17 = vadd.f32 %v15278_v56, %v6428_v16  ;;  %v13600_v7 = vpop.eup %9211  ;;  %v5701_v15 = vadd.f32 1.0, %v9206_v32  ;;  %v5704_v48 = vadd.f32 1.0, %v9208_v44  ;;  %9223 = vpow2.f32 %v7507_v18  ;;  %v15286_v18 = vld [vmem:[#allocation44_spill] sm:$0xff] }
 0x326   : > { %15275 = vst [vmem:[#allocation93_spill] sm:$0xff] %v13584_v25  ;;  %15277 = vst [vmem:[#allocation171_spill] sm:$0xff] %v13592_v24  ;;  %v6426_v62 = vmul.f32 %v15281_v28, %v4278_v29  ;;  %v13606_v1 = vadd.f32 %v13069_v58, %v2897_v30  ;;  %v3293_v16 = vpack.c.bf16 %v13592_v24, %v13589_v46  ;;  %v5702_v32 = vadd.f32 1.0, %v9210_v52  ;;  %v15290_v52 = vld [vmem:[#allocation63_spill] sm:$0xff] }
 0x327   : > { %v13586_v4 = vpop.f32.mrb[164].mxu1  ;;  %15279 = vst [vmem:[#allocation43_spill] sm:$0xff] %v13595_v17  ;;  %15280 = vst [vmem:[#allocation105_spill] sm:$0xff] %v13600_v7  ;;  %v13611_v8 = vadd.f32 %v13069_v58, %v2898_v53  ;;  %v2636_v56 = vadd.f32 %v13009_v41, %v15284_v5  ;;  %v13617_v44 = vpop.eup %9213  ;;  %9225 = vpow2.f32 %v7505_v21  ;;  %v4299_v30 = vadd.f32 %v12979_v0, %v13201_v42  ;;  %v15288_v53 = vld [vmem:[#allocation12_spill] sm:$0xff]  ;;  %v15289_v7 = vld [vmem:[#allocation29_spill] sm:$0xff] }
 0x328   : > { %v13598_v11 = vpop.f32.mrb[165].mxu1  ;;  %15282 = vst [vmem:[#allocation82_spill] sm:$0xff] %v13606_v1  ;;  %15285 = vst [vmem:[#allocation88_spill] sm:$0xff] %v13617_v44  ;;  %v13620_v29 = vadd.f32 %v15286_v18, %v6426_v62  ;;  %v13624_v28 = vpop.eup %9215  ;;  %9227 = vrcp.f32 %v5703_v23  ;;  %v7510_v24 = vmul.f32 -1.442695, %v15288_v53  ;;  %v2628_v21 = vadd.f32 %v13009_v41, %v15290_v52  ;;  %v15292_v18 = vld [vmem:[#allocation99_spill] sm:$0xff] }
 0x329   : > { %v13603_v25 = vpop.f32.mrb[166].mxu1  ;;  %15283 = vst [vmem:[#allocation71_spill] sm:$0xff] %v13611_v8  ;;  %v3292_v5 = vpack.c.bf16 %v13611_v8, %v13606_v1  ;;  %v9218_v46 = vpop.eup %9217  ;;  %9229 = vrcp.f32 %v5701_v15  ;;  %v6431_v44 = vmul.f32 %v15289_v7, %v4299_v30  ;;  %v2903_v62 = vmul.f32 %v13055_v13, %v2636_v56  ;;  %v15294_v15 = vld [vmem:[#allocation184_spill] sm:$0xff]  ;;  %v15301_v1 = vld [vmem:[#allocation131_spill] sm:$0xff] }
 0x32a   : > { %v13615_v17 = vpop.f32.mrb[167].mxu1  ;;  %15287 = vst [vmem:[#allocation173_spill] sm:$0xff] %v13620_v29  ;;  %9231 = vrcp.f32 %v5704_v48  ;;  %v4291_v42 = vadd.f32 %v12979_v0, %v13205_v59  ;;  %v2639_v7 = vadd.f32 %v13009_v41, %v15294_v15  ;;  %v5707_v30 = vadd.f32 1.0, %v9218_v46  ;;  %v15295_v48 = vld [vmem:[#allocation178_spill] sm:$0xff] }
 0x32b   : > { %8344 = vmatprep.mubr.msk.bf16.mxu1 %vm3311_vm3, %v3292_v5  ;;  %v13636_v23 = vpop.eup %9219  ;;  %9233 = vrcp.f32 %v5702_v32  ;;  %v13639_v53 = vadd.f32 %v15292_v18, %v6431_v44  ;;  %v4302_v59 = vadd.f32 %v12979_v0, %v13212_v40  ;;  %v2901_v32 = vmul.f32 %v13055_v13, %v2628_v21  ;;  %v15296_v18 = vld [vmem:[#allocation61_spill] sm:$0xff]  ;;  %v15299_v40 = vld [vmem:[#allocation11_spill] sm:$0xff] }
 0x32c   : > { %15291 = vst [vmem:[#allocation2_spill] sm:$0xff] %v13636_v23  ;;  %8345 = vmatmul.mubr.msk.bf16.gmra.mrb[248].mxu1 %vm3311_vm3, %v3293_v16  ;;  %9235 = vpow2.f32 %v7510_v24  ;;  %v6429_v56 = vmul.f32 %v15295_v48, %v4291_v42  ;;  %v2904_v44 = vmul.f32 %v13055_v13, %v2639_v7  ;;  %v2631_v8 = vadd.f32 %v13009_v41, %v15296_v18  ;;  %v15297_v24 = vld [vmem:[#allocation168_spill] sm:$0xff]  ;;  %v15303_v18 = vld [vmem:[#allocation134_spill] sm:$0xff] }
 0x32d   : > { %15293 = vst [vmem:[#allocation95_spill] sm:$0xff] %v13639_v53  ;;  %v9222_v5 = vpop.eup %9221  ;;  %v4294_v16 = vadd.f32 %v12979_v0, %v13222_v55  ;;  %v7508_v42 = vmul.f32 -1.442695, %v15297_v24  ;;  %v13659_v15 = vadd.f32 %v13069_v58, %v2903_v62  ;;  %v6432_v21 = vmul.f32 %v15301_v1, %v4302_v59 }
 0x32e   : > { %v13662_v48 = vadd.f32 %v15299_v40, %v6429_v56  ;;  %v13668_v41 = vadd.f32 %v13069_v58, %v2904_v44  ;;  %v2902_v55 = vmul.f32 %v13055_v13, %v2631_v8  ;;  %v4315_v24 = vadd.f32 %v12979_v0, %v13263_v60  ;;  %v15304_v56 = vld [vmem:[#allocation13_spill] sm:$0xff] }
 0x32f   : > { %v13647_v52 = vpop.f32.mrb[168].mxu1  ;;  %15298 = vst [vmem:[#allocation109_spill] sm:$0xff] %v13659_v15  ;;  %v9224_v7 = vpop.eup %9223  ;;  %v6430_v29 = vmul.f32 %v15303_v18, %v4294_v16  ;;  %v5705_v23 = vadd.f32 1.0, %v9222_v5  ;;  %v13677_v40 = vadd.f32 %v15304_v56, %v6432_v21  ;;  %v4307_v1 = vadd.f32 %v12979_v0, %v13272_v63  ;;  %v15309_v21 = vld [vmem:[#allocation34_spill] sm:$0xff]  ;;  %v15310_v18 = vld [vmem:[#allocation100_spill] sm:$0xff] }
 0x330   : > { %v13655_v46 = vpop.f32.mrb[169].mxu1  ;;  %15300 = vst [vmem:[#allocation161_spill] sm:$0xff] %v13662_v48  ;;  %15302 = vst [vmem:[#allocation163_spill] sm:$0xff] %v13668_v41  ;;  %v4318_v59 = vadd.f32 %v12979_v0, %v13282_v57  ;;  %v15306_v48 = vld [vmem:[#allocation101_spill] sm:$0xff]  ;;  %v13685_v8 = vadd.f32 %v13069_v58, %v2901_v32  ;;  %v3295_v60 = vpack.c.bf16 %v13668_v41, %v13659_v15  ;;  %9237 = vrcp.f32 %v5707_v30  ;;  %v15312_v15 = vld [vmem:[#allocation139_spill] sm:$0xff] }
 0x331   : > { %v13665_v53 = vpop.f32.mrb[170].mxu1  ;;  %15305 = vst [vmem:[#allocation3_spill] sm:$0xff] %v13677_v40  ;;  %v9226_v44 = vpop.eup %9225  ;;  %v7511_v13 = vmul.f32 -1.442695, %v15306_v48  ;;  %v13690_v5 = vadd.f32 %v13069_v58, %v2902_v55  ;;  %v13695_v63 = vadd.f32 %v15309_v21, %v6430_v29  ;;  %v6435_v0 = vmul.f32 %v15310_v18, %v4315_v24  ;;  %v15311_v57 = vld [vmem:[#allocation181_spill] sm:$0xff]  ;;  %v15313_v40 = vld [vmem:[#allocation107_spill] sm:$0xff] }
 0x332   : > { %v13674_v62 = vpop.f32.mrb[171].mxu1  ;;  %15307 = vst [vmem:[#allocation111_spill] sm:$0xff] %v13685_v8  ;;  %v13692_v16 = vpop.eup %9227  ;;  %v6433_v56 = vmul.f32 %v15311_v57, %v4307_v1  ;;  %v5708_v32 = vadd.f32 1.0, %v9224_v7  ;;  %9239 = vpow2.f32 %v7508_v42  ;;  %v6436_v58 = vmul.f32 %v15312_v15, %v4318_v59  ;;  %v15314_v21 = vld [vmem:[#allocation104_spill] sm:$0xff]  ;;  %v15315_v7 = vld [vmem:[#allocation169_spill] sm:$0xff]  ;;  %v15318_v59 = vld [vmem:[#allocation15_spill] sm:$0xff] }
 0x333   : > { %15308 = vst [vmem:[#allocation115_spill] sm:$0xff] %v13690_v5  ;;  %v13699_v48 = vpop.eup %9229  ;;  %v3294_v41 = vpack.c.bf16 %v13690_v5, %v13685_v8  ;;  %9241 = vrcp.f32 %v5705_v23  ;;  %v5706_v30 = vadd.f32 1.0, %v9226_v44  ;;  %v13707_v29 = vadd.f32 %v15313_v40, %v6435_v0  ;;  %v15316_v18 = vld [vmem:[#allocation17_spill] sm:$0xff]  ;;  %v13721_v15 = vld [vmem:[%s14365_s6] ss:$0 sm:$0xff] }
 0x334   : > { %v13704_v55 = vpop.eup %9231  ;;  %v13710_v24 = vadd.f32 %v15314_v21, %v6433_v56  ;;  %9243 = vpow2.f32 %v7511_v13  ;;  %v7509_v42 = vmul.f32 -1.442695, %v15315_v7  ;;  %v13716_v57 = vadd.f32 %v15316_v18, %v6436_v58  ;;  %v15319_v58 = vld [vmem:[#allocation41_spill] sm:$0xff]  ;;  %v15323_v8 = vld [vmem:[#allocation18_spill] sm:$0xff] }
 0x335   : > { %v13712_v1 = vpop.eup %9233  ;;  %v4310_v23 = vadd.f32 %v13721_v15, %v13288_v2  ;;  %8348 = vmatprep.mubr.msk.bf16.mxu1 %vm3311_vm3, %v3294_v41  ;;  %v7514_v44 = vmul.f32 -1.442695, %v15318_v59  ;;  %v4331_v13 = vadd.f32 %v13721_v15, %v13328_v50  ;;  %v4323_v0 = vadd.f32 %v13721_v15, %v13335_v49  ;;  %v15321_v18 = vld [vmem:[#allocation137_spill] sm:$0xff]  ;;  %v15322_v59 = vld [vmem:[#allocation75_spill] sm:$0xff] }
 0x336   : > { %15317 = vst [vmem:[#allocation4_spill] sm:$0xff] %v13716_v57  ;;  %v13726_v40 = vpop.eup %9235  ;;  %8349 = vmatmul.mubr.msk.bf16.gmra.mrb[252].mxu1 %vm3311_vm3, %v3295_v60  ;;  %v4334_v56 = vadd.f32 %v13721_v15, %v13344_v6  ;;  %9245 = vrcp.f32 %v5708_v32  ;;  %v4326_v41 = vadd.f32 %v13721_v15, %v13352_v10  ;;  %v4347_v21 = vadd.f32 %v13721_v15, %v13403_v14  ;;  %v15320_v60 = vld [vmem:[#allocation42_spill] sm:$0xff]  ;;  %v15324_v32 = vld [vmem:[#allocation148_spill] sm:$0xff] }
 0x337   : > { %v6434_v2 = vmul.f32 %v15319_v58, %v4310_v23  ;;  %9247 = vrcp.f32 %v5706_v30  ;;  %v6439_v7 = vmul.f32 %v15320_v60, %v4331_v13  ;;  %v6437_v50 = vmul.f32 %v15321_v18, %v4323_v0  ;;  %v15325_v58 = vld [vmem:[#allocation48_spill] sm:$0xff]  ;;  %v15326_v30 = vld [vmem:[#allocation159_spill] sm:$0xff]  ;;  %v15327_v0 = vld [vmem:[#allocation113_spill] sm:$0xff] }
 0x338   : > { %v6440_v5 = vmul.f32 %v15322_v59, %v4334_v56  ;;  %v6438_v23 = vmul.f32 %v15324_v32, %v4326_v41  ;;  %v6443_v57 = vmul.f32 %v15325_v58, %v4347_v21  ;;  %v4339_v10 = vadd.f32 %v13721_v15, %v13407_v34  ;;  %v15329_v60 = vld [vmem:[#allocation110_spill] sm:$0xff]  ;;  %v15335_v34 = vld [vmem:[#allocation49_spill] sm:$0xff]  ;;  %v15336_v58 = vld [vmem:[#allocation108_spill] sm:$0xff] }
 0x339   : > { %v13744_v49 = vpop.f32.mrb[172].mxu1  ;;  %v13747_v6 = vadd.f32 %v15323_v8, %v6434_v2  ;;  %9249 = vpow2.f32 %v7509_v42  ;;  %v13756_v13 = vadd.f32 %v15326_v30, %v6439_v7  ;;  %v13759_v56 = vadd.f32 %v15327_v0, %v6437_v50  ;;  %v15331_v2 = vld [vmem:[#allocation114_spill] sm:$0xff] }
 0x33a   : > { %v13753_v14 = vpop.f32.mrb[173].mxu1  ;;  %v13762_v18 = vadd.f32 %v15329_v60, %v6440_v5  ;;  %v13767_v41 = vadd.f32 %v15331_v2, %v6438_v23  ;;  %v15333_v21 = vld [vmem:[#allocation22_spill] sm:$0xff]  ;;  %v6441_v32 = vmul.f32 %v15335_v34, %v4339_v10  ;;  %v4350_v42 = vadd.f32 %v13721_v15, %v13412_v54  ;;  %v13777_v50 = vpop.eup %9237  ;;  %v15339_v54 = vld [vmem:[#allocation183_spill] sm:$0xff] }
 0x33b   : > { %15328 = vst [vmem:[#allocation24_spill] sm:$0xff] %v13759_v56  ;;  %v13764_v8 = vpop.f32.mrb[174].mxu1  ;;  %v13770_v59 = vadd.f32 %v15333_v21, %v6443_v57  ;;  %v7512_v5 = vmul.f32 -1.442695, %v15336_v58  ;;  %v4342_v30 = vadd.f32 %v13721_v15, %v13424_v22  ;;  %v4363_v23 = vadd.f32 %v13721_v15, %v13456_v3  ;;  %v15337_v10 = vld [vmem:[#allocation118_spill] sm:$0xff]  ;;  %v15340_v3 = vld [vmem:[#allocation79_spill] sm:$0xff] }
 0x33c   : > { %15330 = vst [vmem:[#allocation94_spill] sm:$0xff] %v13762_v18  ;;  %15332 = vst [vmem:[#allocation120_spill] sm:$0xff] %v13767_v41  ;;  %v13775_v7 = vpop.f32.mrb[175].mxu1  ;;  %v4355_v57 = vadd.f32 %v13721_v15, %v13462_v19  ;;  %v13786_v0 = vpop.eup %9239  ;;  %v13789_v60 = vadd.f32 %v15337_v10, %v6441_v32  ;;  %v6444_v2 = vmul.f32 %v15339_v54, %v4350_v42  ;;  %9251 = vpow2.f32 %v7514_v44  ;;  %v15342_v18 = vld [vmem:[#allocation26_spill] sm:$0xff]  ;;  %v15345_v44 = vld [vmem:[#allocation124_spill] sm:$0xff] }
 0x33d   : > { %15334 = vst [vmem:[#allocation97_spill] sm:$0xff] %v13770_v59  ;;  %v4366_v21 = vadd.f32 %v13721_v15, %v13477_v9  ;;  %v4358_v34 = vadd.f32 %v13721_v15, %v13483_v36  ;;  %v13796_v22 = vpop.eup %9241  ;;  %v6442_v58 = vmul.f32 %v15340_v3, %v4342_v30  ;;  %v15341_v59 = vld [vmem:[#allocation51_spill] sm:$0xff]  ;;  %9253 = vpow2.f32 %v7512_v5  ;;  %v15344_v36 = vld [vmem:[#allocation16_spill] sm:$0xff] }
 0x33e   : > { %15338 = vst [vmem:[#allocation119_spill] sm:$0xff] %v13789_v60  ;;  %v6447_v19 = vmul.f32 %v15341_v59, %v4363_v23  ;;  %v13800_v41 = vpop.eup %9243  ;;  %v13803_v32 = vadd.f32 %v15342_v18, %v6444_v2  ;;  %v6445_v42 = vmul.f32 %v13180_v35, %v4355_v57  ;;  %v13809_v54 = vmul.f32 -1.442695, %v15344_v36  ;;  %v15347_v30 = vld [vmem:[#allocation123_spill] sm:$0xff]  ;;  %v15351_v35 = vld [vmem:[#allocation129_spill] sm:$0xff] }
 0x33f   : > { %v6448_v10 = vmul.f32 %v13185_v33, %v4366_v21  ;;  %v6446_v9 = vmul.f32 %v13214_v26, %v4358_v34  ;;  %v13812_v60 = vadd.f32 %v15345_v44, %v6442_v58  ;;  %v15349_v18 = vld [vmem:[#allocation127_spill] sm:$0xff]  ;;  %v15353_v33 = vld [vmem:[#allocation32_spill] sm:$0xff]  ;;  %v4379_v5 = vadd.f32 %v13721_v15, %v13524_v12 }
 0x340   : > { %15343 = vst [vmem:[#allocation96_spill] sm:$0xff] %v13803_v32  ;;  %v13815_v59 = vadd.f32 %v15347_v30, %v6447_v19  ;;  %v13817_v23 = vpop.eup %9245  ;;  %v13820_v2 = vadd.f32 %v15349_v18, %v6445_v42  ;;  %v15355_v34 = vld [vmem:[#allocation172_spill] sm:$0xff]  ;;  %v4371_v58 = vadd.f32 %v13721_v15, %v13535_v45  ;;  %v4382_v19 = vadd.f32 %v13721_v15, %v13544_v37  ;;  %v15363_v56 = vld [vmem:[#allocation35_spill] sm:$0xff] }
 0x341   : > { %15346 = vst [vmem:[#allocation27_spill] sm:$0xff] %v13812_v60  ;;  %v13823_v57 = vadd.f32 %v15351_v35, %v6448_v10  ;;  %v13826_v26 = vadd.f32 %v15353_v33, %v6446_v9  ;;  %v13830_v21 = vpop.eup %9247  ;;  %v13833_v3 = vmul.f32 -1.442695, %v15355_v34  ;;  %v4374_v42 = vadd.f32 %v13721_v15, %v13550_v39  ;;  %v15356_v9 = vld [vmem:[#allocation150_spill] sm:$0xff]  ;;  %v15357_v35 = vld [vmem:[#allocation59_spill] sm:$0xff]  ;;  %v15358_v33 = vld [vmem:[#allocation60_spill] sm:$0xff] }
 0x342   : > { %15348 = vst [vmem:[#allocation8_spill] sm:$0xff] %v13815_v59  ;;  %15350 = vst [vmem:[#allocation122_spill] sm:$0xff] %v13820_v2  ;;  %v6451_v36 = vmul.f32 %v15356_v9, %v4379_v5  ;;  %v4395_v12 = vadd.f32 %v13721_v15, %v13586_v4  ;;  %v4387_v44 = vadd.f32 %v13721_v15, %v13598_v11  ;;  %v15359_v39 = vld [vmem:[#allocation77_spill] sm:$0xff]  ;;  %v15360_v4 = vld [vmem:[#allocation46_spill] sm:$0xff]  ;;  %9255 = vpow2.f32 %v13809_v54 }
 0x343   : > { %15352 = vst [vmem:[#allocation141_spill] sm:$0xff] %v13823_v57  ;;  %15354 = vst [vmem:[#allocation177_spill] sm:$0xff] %v13826_v26  ;;  %v4398_v30 = vadd.f32 %v13721_v15, %v13603_v25  ;;  %v13848_v45 = vpop.eup %9249  ;;  %v6449_v37 = vmul.f32 %v15357_v35, %v4371_v58  ;;  %v6452_v34 = vmul.f32 %v15358_v33, %v4382_v19  ;;  %v15361_v11 = vld [vmem:[#allocation65_spill] sm:$0xff]  ;;  %v15362_v59 = vld [vmem:[#allocation91_spill] sm:$0xff]  ;;  %9257 = vpow2.f32 %v13833_v3 }
 0x344   : > { %v8274_v10 = vpop.f32.mrb[176].mxu1  ;;  %v6450_v26 = vmul.f32 %v15359_v39, %v4374_v42  ;;  %v4390_v5 = vadd.f32 %v13721_v15, %v13615_v17  ;;  %v13856_v57 = vadd.f32 %v15360_v4, %v6451_v36  ;;  %v6455_v2 = vmul.f32 %v15361_v11, %v4395_v12  ;;  %v15364_v19 = vld [vmem:[#allocation37_spill] sm:$0xff]  ;;  %v15365_v42 = vld [vmem:[#allocation38_spill] sm:$0xff]  ;;  %v15366_v36 = vld [vmem:[#allocation103_spill] sm:$0xff] }
 0x345   : > { %v4434_v18 = vpop.f32.mrb[177].mxu1  ;;  %v6453_v25 = vmul.f32 %v15362_v59, %v4387_v44  ;;  %v6456_v60 = vmul.f32 %v13359_v43, %v4398_v30  ;;  %v13862_v58 = vadd.f32 %v15363_v56, %v6449_v37  ;;  %v13865_v35 = vadd.f32 %v15364_v19, %v6452_v34  ;;  %v15367_v12 = vld [vmem:[#allocation140_spill] sm:$0xff]  ;;  %v15368_v59 = vld [vmem:[#allocation54_spill] sm:$0xff] }
 0x346   : > { %v8275_v9 = vpop.f32.mrb[178].mxu1  ;;  %v13868_v33 = vadd.f32 %v15365_v42, %v6450_v26  ;;  %v6454_v17 = vmul.f32 %v13380_v31, %v4390_v5  ;;  %v13872_v39 = vadd.f32 %v15366_v36, %v6455_v2  ;;  %v4411_v56 = vadd.f32 %v13721_v15, %v13647_v52  ;;  %v13882_v44 = vpop.eup %9251  ;;  %v15369_v30 = vld [vmem:[#allocation74_spill] sm:$0xff] }
 0x347   : > { %v4437_v32 = vpop.f32.mrb[179].mxu1  ;;  %v13875_v4 = vadd.f32 %v15367_v12, %v6453_v25  ;;  %v13878_v43 = vadd.f32 %v15368_v59, %v6456_v60  ;;  %v4403_v31 = vadd.f32 %v13721_v15, %v13655_v46  ;;  %v4414_v2 = vadd.f32 %v13721_v15, %v13665_v53  ;;  %v15370_v34 = vld [vmem:[#allocation14_spill] sm:$0xff]  ;;  %v13900_v25 = vpop.eup %9253  ;;  %v15373_v59 = vld [vmem:[#allocation143_spill] sm:$0xff] }
 0x348   : > { %v13885_v37 = vadd.f32 %v15369_v30, %v6454_v17  ;;  %v4406_v26 = vadd.f32 %v13721_v15, %v13674_v62  ;;  %v6459_v60 = vmul.f32 %v15370_v34, %v4411_v56  ;;  %v4427_v5 = vadd.f32 %v13721_v15, %v13744_v49  ;;  %v15371_v46 = vld [vmem:[#allocation70_spill] sm:$0xff]  ;;  %v15372_v17 = vld [vmem:[#allocation52_spill] sm:$0xff]  ;;  %v15374_v30 = vld [vmem:[#allocation45_spill] sm:$0xff] }
 0x349   : > { %v4419_v52 = vadd.f32 %v13721_v15, %v13753_v14  ;;  %v4430_v11 = vadd.f32 %v13721_v15, %v13764_v8  ;;  %v6457_v19 = vmul.f32 %v15371_v46, %v4403_v31  ;;  %v6460_v53 = vmul.f32 %v13451_v47, %v4414_v2 }
 0x34a   : > { %v6458_v42 = vmul.f32 %v13464_v20, %v4406_v26  ;;  %v4422_v62 = vadd.f32 %v13721_v15, %v13775_v7  ;;  %v13908_v36 = vadd.f32 %v15372_v17, %v6459_v60  ;;  %v6463_v49 = vmul.f32 %v13485_v27, %v4427_v5  ;;  %v15375_v20 = vld [vmem:[#allocation57_spill] sm:$0xff]  ;;  %v15376_v26 = vld [vmem:[#allocation6_spill] sm:$0xff] }
 0x34b   : > { %v6461_v14 = vmul.f32 %v13526_v51, %v4419_v52  ;;  %v6464_v8 = vmul.f32 %v13546_v38, %v4430_v11  ;;  %v13914_v56 = vadd.f32 %v15373_v59, %v6457_v19  ;;  %v13917_v47 = vadd.f32 %v15374_v30, %v6460_v53  ;;  %v15377_v27 = vld [vmem:[#allocation149_spill] sm:$0xff]  ;;  %v15378_v38 = vld [vmem:[#allocation50_spill] sm:$0xff]  ;;  %v15379_v11 = vld [vmem:[#allocation155_spill] sm:$0xff] }
 0x34c   : > { %v13920_v31 = vadd.f32 %v15375_v20, %v6458_v42  ;;  %v6462_v7 = vmul.f32 %v13556_v61, %v4422_v62  ;;  %v13924_v34 = vadd.f32 %v15376_v26, %v6463_v49  ;;  %v4443_v5 = vadd.f32 %v13721_v15, %v8274_v10  ;;  %v15380_v62 = vld [vmem:[#allocation105_spill] sm:$0xff]  ;;  %v15381_v10 = vld [vmem:[#allocation88_spill] sm:$0xff]  ;;  %v15382_v20 = vld [vmem:[#allocation2_spill] sm:$0xff] }
 0x34d   : > { %v13927_v51 = vadd.f32 %v15377_v27, %v6461_v14  ;;  %v13930_v60 = vadd.f32 %v15378_v38, %v6464_v8  ;;  %v4435_v19 = vadd.f32 %v13721_v15, %v4434_v18  ;;  %v4446_v61 = vadd.f32 %v13721_v15, %v8275_v9  ;;  %v15383_v9 = vld [vmem:[#allocation146_spill] sm:$0xff] }
 0x34e   : > { %v8278_v12 = vpop.f32.mrb[180].mxu1  ;;  %v13934_v46 = vadd.f32 %v15379_v11, %v6462_v7  ;;  %v4438_v53 = vadd.f32 %v13721_v15, %v4437_v32  ;;  %v6467_v17 = vmul.f32 %v15380_v62, %v4443_v5  ;;  %v15385_v5 = vld [vmem:[#allocation175_spill] sm:$0xff]  ;;  %v5711_v62 = vadd.f32 1.0, %v13726_v40 }
 0x34f   : > { %v4450_v2 = vpop.f32.mrb[181].mxu1  ;;  %v4459_v49 = vadd.f32 %v13721_v15, %v8278_v12  ;;  %v6465_v59 = vmul.f32 %v15381_v10, %v4435_v19  ;;  %v6468_v30 = vmul.f32 %v13624_v28, %v4446_v61  ;;  %v15386_v28 = vld [vmem:[#allocation80_spill] sm:$0xff]  ;;  %v5712_v54 = vadd.f32 1.0, %v13800_v41 }
 0x350   : > { %v8279_v52 = vpop.f32.mrb[182].mxu1  ;;  %v4451_v14 = vadd.f32 %v13721_v15, %v4450_v2  ;;  %v6466_v7 = vmul.f32 %v15382_v20, %v4438_v53  ;;  %v13948_v26 = vadd.f32 %v15383_v9, %v6467_v17  ;;  %v15384_v2 = vld [vmem:[#allocation23_spill] sm:$0xff]  ;;  %v15387_v61 = vld [vmem:[#allocation72_spill] sm:$0xff]  ;;  %v15390_v17 = vld [vmem:[#allocation86_spill] sm:$0xff]  ;;  %9259 = vrcp.f32 %v5711_v62 }
 0x351   : > { %v4453_v42 = vpop.f32.mrb[183].mxu1  ;;  %v4462_v8 = vadd.f32 %v13721_v15, %v8279_v52  ;;  %v6471_v32 = vmul.f32 %v13692_v16, %v4459_v49  ;;  %v13954_v38 = vadd.f32 %v15384_v2, %v6465_v59  ;;  %v13957_v52 = vadd.f32 %v15385_v5, %v6468_v30  ;;  %v15388_v16 = vld [vmem:[#allocation66_spill] sm:$0xff]  ;;  %v15391_v59 = vld [vmem:[#allocation112_spill] sm:$0xff] }
 0x352   : > { %v4454_v18 = vadd.f32 %v13721_v15, %v4453_v42  ;;  %v6469_v27 = vmul.f32 %v13699_v48, %v4451_v14  ;;  %v13960_v11 = vadd.f32 %v15386_v28, %v6466_v7  ;;  %v7518_v30 = vmul.f32 -1.442695, %v15391_v59  ;;  %v15394_v5 = vld [vmem:[#allocation160_spill] sm:$0xff] }
 0x353   : > { %v6472_v12 = vmul.f32 %v13704_v55, %v4462_v8  ;;  %v13965_v53 = vadd.f32 %v15387_v61, %v6471_v32  ;;  %v15389_v55 = vld [vmem:[#allocation176_spill] sm:$0xff]  ;;  %v5710_v40 = vadd.f32 1.0, %v13848_v45  ;;  %v15396_v61 = vld [vmem:[#allocation151_spill] sm:$0xff] }
 0x354   : > { %v6470_v19 = vmul.f32 %v13712_v1, %v4454_v18  ;;  %v13968_v48 = vadd.f32 %v15388_v16, %v6469_v27  ;;  %v5709_v1 = vadd.f32 1.0, %v13786_v0  ;;  %v15392_v0 = vld [vmem:[#allocation20_spill] sm:$0xff] }
 0x355   : > { %v13971_v42 = vadd.f32 %v15389_v55, %v6472_v12  ;;  %v7516_v32 = vmul.f32 -1.442695, %v15392_v0  ;;  %v15393_v12 = vld [vmem:[#allocation19_spill] sm:$0xff] }
 0x356   : > { %v13976_v49 = vadd.f32 %v15390_v17, %v6470_v19  ;;  %9261 = vrcp.f32 %v5709_v1  ;;  %v7519_v2 = vmul.f32 -1.442695, %v15393_v12  ;;  %v9256_v17 = vpop.eup %9255  ;;  %v15398_v1 = vld [vmem:[#allocation130_spill] sm:$0xff] }
 0x357   : > { %v8282_v14 = vpop.f32.mrb[184].mxu1  ;;  %9263 = vrcp.f32 %v5712_v54  ;;  %v9258_v54 = vpop.eup %9257 }
 0x358   : > { %v4475_v8 = vadd.f32 %v13721_v15, %v8282_v14  ;;  %v4466_v10 = vpop.f32.mrb[185].mxu1  ;;  %9265 = vpow2.f32 %v7518_v30  ;;  %v5714_v59 = vadd.f32 1.0, %v9258_v54  ;;  %v15399_v30 = vld [vmem:[#allocation116_spill] sm:$0xff] }
 0x359   : > { %v4467_v20 = vadd.f32 %v13721_v15, %v4466_v10  ;;  %v8283_v7 = vpop.f32.mrb[186].mxu1  ;;  %9267 = vrcp.f32 %v5710_v40  ;;  %v5716_v10 = vadd.f32 1.0, %v9256_v17 }
 0x35a   : > { %v6475_v3 = vmul.f32 %v13777_v50, %v4475_v8  ;;  %v4478_v18 = vadd.f32 %v13721_v15, %v8283_v7  ;;  %v4469_v9 = vpop.f32.mrb[187].mxu1  ;;  %v15395_v50 = vld [vmem:[#allocation21_spill] sm:$0xff]  ;;  %9269 = vpow2.f32 %v7516_v32  ;;  %v5713_v8 = vadd.f32 1.0, %v13900_v25 }
 0x35b   : > { %v6473_v41 = vmul.f32 %v13796_v22, %v4467_v20  ;;  %v4470_v27 = vadd.f32 %v13721_v15, %v4469_v9  ;;  %v7517_v19 = vmul.f32 -1.442695, %v15395_v50  ;;  %v15397_v22 = vld [vmem:[#allocation162_spill] sm:$0xff]  ;;  %9271 = vpow2.f32 %v7519_v2  ;;  %v15401_v25 = vld [vmem:[#allocation121_spill] sm:$0xff] }
 0x35c   : > { %v13991_v28 = vadd.f32 %v15394_v5, %v6475_v3  ;;  %v6476_v45 = vmul.f32 %v13817_v23, %v4478_v18  ;;  %v5715_v23 = vadd.f32 1.0, %v13882_v44  ;;  %v7522_v20 = vmul.f32 -1.442695, %v15399_v30  ;;  %v15400_v3 = vld [vmem:[#allocation25_spill] sm:$0xff]  ;;  %v15402_v2 = vld [vmem:[#allocation174_spill] sm:$0xff] }
 0x35d   : > { %v13996_v16 = vadd.f32 %v15396_v61, %v6473_v41  ;;  %v6474_v55 = vmul.f32 %v13830_v21, %v4470_v27  ;;  %9273 = vpow2.f32 %v7517_v19  ;;  %v9260_v21 = vpop.eup %9259  ;;  %v7520_v18 = vmul.f32 -1.442695, %v15400_v3 }
 0x35e   : > { %v14000_v62 = vadd.f32 %v15397_v22, %v6476_v45  ;;  %9275 = vrcp.f32 %v5715_v23  ;;  %v7523_v32 = vmul.f32 -1.442695, %v15401_v25  ;;  %v7521_v5 = vmul.f32 -1.442695, %v15402_v2  ;;  %v15407_v2 = vld [vmem:[#allocation125_spill] sm:$0xff] }
 0x35f   : > { %v14003_v14 = vadd.f32 %v15398_v1, %v6474_v55  ;;  %9277 = vrcp.f32 %v5713_v8  ;;  %v15403_v1 = vld [vmem:[#allocation180_spill] sm:$0xff] }
 0x360   : > { %v9262_v40 = vpop.eup %9261  ;;  %9279 = vrcp.f32 %v5716_v10  ;;  %v15404_v10 = vld [vmem:[#allocation128_spill] sm:$0xff] }
 0x361   : > { %v9264_v44 = vpop.eup %9263  ;;  %9281 = vrcp.f32 %v5714_v59 }
 0x362   : > { %v8286_v7 = vpop.f32.mrb[188].mxu1  ;;  %v9266_v12 = vpop.eup %9265  ;;  %9283 = vpow2.f32 %v7522_v20 }
 0x363   : > { %v4491_v9 = vadd.f32 %v13721_v15, %v8286_v7  ;;  %v4482_v0 = vpop.f32.mrb[189].mxu1  ;;  %v9268_v61 = vpop.eup %9267  ;;  %9285 = vpow2.f32 %v7520_v18  ;;  %v5719_v20 = vadd.f32 1.0, %v9266_v12  ;;  %v15405_v7 = vld [vmem:[#allocation81_spill] sm:$0xff] }
 0x364   : > { %v4483_v41 = vadd.f32 %v13721_v15, %v4482_v0  ;;  %v8287_v27 = vpop.f32.mrb[190].mxu1  ;;  %v9270_v17 = vpop.eup %9269  ;;  %9287 = vpow2.f32 %v7523_v32 }
 0x365   : > { %v6479_v45 = vmul.f32 %v9260_v21, %v4491_v9  ;;  %v4494_v50 = vadd.f32 %v13721_v15, %v8287_v27  ;;  %v4485_v19 = vpop.f32.mrb[191].mxu1  ;;  %v9272_v8 = vpop.eup %9271  ;;  %9289 = vpow2.f32 %v7521_v5  ;;  %v5717_v3 = vadd.f32 1.0, %v9270_v17  ;;  %v15406_v9 = vld [vmem:[#allocation36_spill] sm:$0xff] }
 0x366   : > { %v6477_v55 = vmul.f32 %v9262_v40, %v4483_v41  ;;  %v4486_v22 = vadd.f32 %v13721_v15, %v4485_v19  ;;  %v5720_v18 = vadd.f32 1.0, %v9272_v8  ;;  %9291 = vrcp.f32 %v5719_v20  ;;  %v15409_v8 = vld [vmem:[#allocation30_spill] sm:$0xff] }
 0x367   : > { %v14021_v54 = vadd.f32 %v15403_v1, %v6479_v45  ;;  %v6480_v23 = vmul.f32 %v9264_v44, %v4494_v50  ;;  %v9274_v30 = vpop.eup %9273  ;;  %v7526_v5 = vmul.f32 -1.442695, %v15407_v2  ;;  %9293 = vrcp.f32 %v5717_v3 }
 0x368   : > { %v14024_v59 = vadd.f32 %v15404_v10, %v6477_v55  ;;  %v6478_v21 = vmul.f32 %v9268_v61, %v4486_v22  ;;  %v9276_v25 = vpop.eup %9275  ;;  %v5718_v32 = vadd.f32 1.0, %v9274_v30  ;;  %v15408_v61 = vld [vmem:[#allocation126_spill] sm:$0xff]  ;;  %9295 = vrcp.f32 %v5720_v18  ;;  %v15412_v18 = vld [vmem:[#allocation135_spill] sm:$0xff] }
 0x369   : > { %v14027_v40 = vadd.f32 %v15405_v7, %v6480_v23  ;;  %v9278_v12 = vpop.eup %9277  ;;  %v7524_v55 = vmul.f32 -1.442695, %v15408_v61  ;;  %v7527_v10 = vmul.f32 -1.442695, %v15409_v8  ;;  %v15410_v7 = vld [vmem:[#allocation92_spill] sm:$0xff] }
 0x36a   : > { %v14030_v0 = vadd.f32 %v15406_v9, %v6478_v21  ;;  %v9280_v19 = vpop.eup %9279  ;;  %9297 = vrcp.f32 %v5718_v32 }
 0x36b   : > { %v9282_v23 = vpop.eup %9281  ;;  %9299 = vpow2.f32 %v7526_v5 }
 0x36c   : > { %v9284_v20 = vpop.eup %9283  ;;  %9301 = vpow2.f32 %v7524_v55 }
 0x36d   : > { %v9286_v3 = vpop.eup %9285  ;;  %v5723_v5 = vadd.f32 1.0, %v9284_v20  ;;  %9303 = vpow2.f32 %v7527_v10 }
 0x36f   : > { %v8290_v44 = vpop.f32.mrb[192].mxu1 }
 0x370   : > { %v4507_v41 = vadd.f32 %v13721_v15, %v8290_v44  ;;  %v4498_v27 = vpop.f32.mrb[193].mxu1 }
 0x371   : > { %v4499_v45 = vadd.f32 %v13721_v15, %v4498_v27  ;;  %v8291_v50 = vpop.f32.mrb[194].mxu1  ;;  %v15411_v27 = vld [vmem:[#allocation31_spill] sm:$0xff] }
 0x372   : > { %v6483_v22 = vmul.f32 %v9276_v25, %v4507_v41  ;;  %v4510_v17 = vadd.f32 %v13721_v15, %v8291_v50  ;;  %v4501_v1 = vpop.f32.mrb[195].mxu1  ;;  %v7525_v2 = vmul.f32 -1.442695, %v15411_v27 }
 0x373   : > { %v6481_v21 = vmul.f32 %v9278_v12, %v4499_v45  ;;  %v4502_v30 = vadd.f32 %v13721_v15, %v4501_v1  ;;  %v9288_v12 = vpop.eup %9287  ;;  %v15413_v45 = vld [vmem:[#allocation83_spill] sm:$0xff]  ;;  %v5721_v1 = vadd.f32 1.0, %v9286_v3 }
 0x374   : > { %v6675_v9 = vadd.f32 %v15410_v7, %v6483_v22  ;;  %v6484_v44 = vmul.f32 %v9280_v19, %v4510_v17  ;;  %v9290_v19 = vpop.eup %9289  ;;  %v15414_v22 = vld [vmem:[#allocation10_spill] sm:$0xff]  ;;  %9305 = vpow2.f32 %v7525_v2 }
 0x375   : > { %v6673_v25 = vadd.f32 %v15412_v18, %v6481_v21  ;;  %v6482_v41 = vmul.f32 %v9282_v23, %v4502_v30  ;;  %v5724_v21 = vadd.f32 1.0, %v9288_v12  ;;  %v5722_v30 = vadd.f32 1.0, %v9290_v19  ;;  %v9292_v7 = vpop.eup %9291  ;;  %v15416_v18 = vld [vmem:[#allocation136_spill] sm:$0xff] }
 0x376   : > { %v6739_v32 = vmul.f32 0.25, %v6675_v9  ;;  %v6676_v50 = vadd.f32 %v15413_v45, %v6484_v44  ;;  %9307 = vrcp.f32 %v5723_v5  ;;  %v15415_v9 = vld [vmem:[#allocation102_spill] sm:$0xff]  ;;  %v9294_v2 = vpop.eup %9293 }
 0x377   : > { %v6737_v61 = vmul.f32 0.25, %v6673_v25  ;;  %v6674_v17 = vadd.f32 %v15414_v22, %v6482_v41  ;;  %v8294_v23 = vpop.f32.mrb[196].mxu1  ;;  %v7530_v44 = vmul.f32 -1.442695, %v15415_v9  ;;  %9309 = vrcp.f32 %v5721_v1  ;;  %v9296_v45 = vpop.eup %9295 }
 0x378   : > { %6803 = vst.msk [vmem:[%s14050_s19 + $0x10] sm:$0xff] %vm3311_vm3, %v6739_v32  ;;  %v6740_v8 = vmul.f32 0.25, %v6676_v50  ;;  %v4523_v20 = vadd.f32 %v13721_v15, %v8294_v23  ;;  %v4514_v10 = vpop.f32.mrb[197].mxu1  ;;  %v7528_v25 = vmul.f32 -1.442695, %v15416_v18  ;;  %9311 = vrcp.f32 %v5724_v21  ;;  %v15417_v50 = vld [vmem:[#allocation132_spill] sm:$0xff]  ;;  %v9298_v22 = vpop.eup %9297 }
 0x379   : > { %6801 = vst.msk [vmem:[%s14050_s19] sm:$0xff] %vm3311_vm3, %v6737_v61  ;;  %v6738_v55 = vmul.f32 0.25, %v6674_v17  ;;  %v4515_v3 = vadd.f32 %v13721_v15, %v4514_v10  ;;  %v8295_v27 = vpop.f32.mrb[198].mxu1  ;;  %v7531_v19 = vmul.f32 -1.442695, %v15417_v50  ;;  %9313 = vrcp.f32 %v5722_v30  ;;  %v15418_v17 = vld [vmem:[#allocation76_spill] sm:$0xff]  ;;  %v9300_v1 = vpop.eup %9299 }
 0x37a   : > { %6804 = vst.msk [vmem:[%s14050_s19 + $0x18] sm:$0xff] %vm3311_vm3, %v6740_v8  ;;  %v6487_v41 = vmul.f32 %v9292_v7, %v4523_v20  ;;  %v4526_v12 = vadd.f32 %v13721_v15, %v8295_v27  ;;  %v4517_v32 = vpop.f32.mrb[199].mxu1  ;;  %9315 = vpow2.f32 %v7530_v44  ;;  %v15419_v23 = vld [vmem:[#allocation106_spill] sm:$0xff]  ;;  %v15420_v10 = vld [vmem:[#allocation47_spill] sm:$0xff]  ;;  %v9302_v21 = vpop.eup %9301 }
 0x37b   : > { %6802 = vst.msk [vmem:[%s14050_s19 + $0x8] sm:$0xff] %vm3311_vm3, %v6738_v55  ;;  %v6485_v5 = vmul.f32 %v9294_v2, %v4515_v3  ;;  %v4518_v61 = vadd.f32 %v13721_v15, %v4517_v32  ;;  %v7529_v20 = vmul.f32 -1.442695, %v15419_v23  ;;  %9317 = vpow2.f32 %v7528_v25  ;;  %v15421_v27 = vld [vmem:[#allocation167_spill] sm:$0xff]  ;;  %v9304_v18 = vpop.eup %9303 }
 0x37c   : > { %v6679_v8 = vadd.f32 %v15418_v17, %v6487_v41  ;;  %v6488_v55 = vmul.f32 %v9296_v45, %v4526_v12  ;;  %9319 = vpow2.f32 %v7531_v19  ;;  %v15422_v41 = vld [vmem:[#allocation170_spill] sm:$0xff]  ;;  %v5727_v32 = vadd.f32 1.0, %v9300_v1  ;;  %v15423_v19 = vld [vmem:[#allocation64_spill] sm:$0xff] }
 0x37d   : > { %v6677_v7 = vadd.f32 %v15420_v10, %v6485_v5  ;;  %v6486_v9 = vmul.f32 %v9298_v22, %v4518_v61  ;;  %v5725_v50 = vadd.f32 1.0, %v9302_v21  ;;  %9321 = vpow2.f32 %v7529_v20 }
 0x37e   : > { %v6743_v3 = vmul.f32 0.25, %v6679_v8  ;;  %v6680_v2 = vadd.f32 %v15421_v27, %v6488_v55  ;;  %v9306_v45 = vpop.eup %9305  ;;  %v5728_v5 = vadd.f32 1.0, %v9304_v18  ;;  %v7534_v17 = vmul.f32 -1.442695, %v15423_v19 }
 0x37f   : > { %v6741_v30 = vmul.f32 0.25, %v6677_v7  ;;  %v6678_v12 = vadd.f32 %v15422_v41, %v6486_v9  ;;  %9323 = vrcp.f32 %v5727_v32  ;;  %v5726_v23 = vadd.f32 1.0, %v9306_v45  ;;  %v15424_v9 = vld [vmem:[#allocation39_spill] sm:$0xff]  ;;  %v15426_v45 = vld [vmem:[#allocation182_spill] sm:$0xff] }
 0x380   : > { %6807 = vst.msk [vmem:[%s14050_s19 + $0x30] sm:$0xff] %vm3311_vm3, %v6743_v3  ;;  %v6744_v44 = vmul.f32 0.25, %v6680_v2  ;;  %v9308_v22 = vpop.eup %9307  ;;  %9325 = vrcp.f32 %v5725_v50  ;;  %v7532_v21 = vmul.f32 -1.442695, %v15424_v9 }
 0x381   : > { %6805 = vst.msk [vmem:[%s14050_s19 + $0x20] sm:$0xff] %vm3311_vm3, %v6741_v30  ;;  %v6742_v25 = vmul.f32 0.25, %v6678_v12  ;;  %v9310_v1 = vpop.eup %9309  ;;  %9327 = vrcp.f32 %v5728_v5  ;;  %v15425_v30 = vld [vmem:[#allocation40_spill] sm:$0xff] }
 0x382   : > { %6808 = vst.msk [vmem:[%s14050_s19 + $0x38] sm:$0xff] %vm3311_vm3, %v6744_v44  ;;  %v9312_v7 = vpop.eup %9311  ;;  %v7535_v41 = vmul.f32 -1.442695, %v15425_v30  ;;  %9329 = vpow2.f32 %v7534_v17  ;;  %v15430_v30 = vld [vmem:[#allocation173_spill] sm:$0xff] }
 0x383   : > { %6806 = vst.msk [vmem:[%s14050_s19 + $0x28] sm:$0xff] %vm3311_vm3, %v6742_v25  ;;  %v9314_v18 = vpop.eup %9313  ;;  %v7533_v25 = vmul.f32 -1.442695, %v15426_v45  ;;  %9331 = vrcp.f32 %v5726_v23 }
 0x384   : > { %v9316_v32 = vpop.eup %9315  ;;  %9333 = vpow2.f32 %v7532_v21 }
 0x385   : > { %9335 = vpow2.f32 %v7535_v41 }
 0x386   : > { %9337 = vpow2.f32 %v7533_v25 }
 0x387   : > { %v8298_v61 = vpop.f32.mrb[200].mxu1 }
 0x388   : > { %v4539_v8 = vadd.f32 %v13721_v15, %v8298_v61  ;;  %v4530_v55 = vpop.f32.mrb[201].mxu1  ;;  %v15427_v61 = vld [vmem:[#allocation133_spill] sm:$0xff] }
 0x389   : > { %v4531_v20 = vadd.f32 %v13721_v15, %v4530_v55  ;;  %v8299_v10 = vpop.f32.mrb[202].mxu1  ;;  %v9318_v55 = vpop.eup %9317 }
 0x38a   : > { %v6491_v3 = vmul.f32 %v9308_v22, %v4539_v8  ;;  %v4542_v27 = vadd.f32 %v13721_v15, %v8299_v10  ;;  %v4533_v2 = vpop.f32.mrb[203].mxu1  ;;  %v15428_v22 = vld [vmem:[#allocation93_spill] sm:$0xff]  ;;  %v9320_v5 = vpop.eup %9319 }
 0x38b   : > { %v6489_v12 = vmul.f32 %v9310_v1, %v4531_v20  ;;  %v4534_v44 = vadd.f32 %v13721_v15, %v4533_v2  ;;  %v15429_v20 = vld [vmem:[#allocation43_spill] sm:$0xff]  ;;  %v5731_v2 = vadd.f32 1.0, %v9316_v32 }
 0x38c   : > { %v6683_v19 = vadd.f32 %v15427_v61, %v6491_v3  ;;  %v6492_v50 = vmul.f32 %v9312_v7, %v4542_v27  ;;  %v9322_v7 = vpop.eup %9321  ;;  %v5729_v27 = vadd.f32 1.0, %v9318_v55 }
 0x38d   : > { %v6681_v8 = vadd.f32 %v15428_v22, %v6489_v12  ;;  %v6490_v10 = vmul.f32 %v9314_v18, %v4534_v44  ;;  %v5732_v12 = vadd.f32 1.0, %v9320_v5  ;;  %v15431_v18 = vld [vmem:[#allocation56_spill] sm:$0xff]  ;;  %v9324_v41 = vpop.eup %9323  ;;  %9339 = vrcp.f32 %v5731_v2 }
 0x38e   : > { %v6747_v1 = vmul.f32 0.25, %v6683_v19  ;;  %v6684_v9 = vadd.f32 %v15429_v20, %v6492_v50  ;;  %v7538_v44 = vmul.f32 -1.442695, %v15431_v18  ;;  %v5730_v45 = vadd.f32 1.0, %v9322_v7  ;;  %v9326_v19 = vpop.eup %9325  ;;  %v15432_v50 = vld [vmem:[#allocation138_spill] sm:$0xff]  ;;  %v15433_v5 = vld [vmem:[#allocation144_spill] sm:$0xff] }
 0x38f   : > { %v6745_v17 = vmul.f32 0.25, %v6681_v8  ;;  %v6682_v3 = vadd.f32 %v15430_v30, %v6490_v10  ;;  %v8302_v32 = vpop.f32.mrb[204].mxu1  ;;  %9341 = vrcp.f32 %v5729_v27  ;;  %v7536_v55 = vmul.f32 -1.442695, %v15432_v50  ;;  %v9328_v10 = vpop.eup %9327  ;;  %v15434_v30 = vld [vmem:[#allocation78_spill] sm:$0xff] }
 0x390   : > { %6811 = vst.msk [vmem:[%s14050_s19 + $0x50] sm:$0xff] %vm3311_vm3, %v6747_v1  ;;  %v6748_v23 = vmul.f32 0.25, %v6684_v9  ;;  %v4555_v61 = vadd.f32 %v13721_v15, %v8302_v32  ;;  %v4546_v25 = vpop.f32.mrb[205].mxu1  ;;  %9343 = vrcp.f32 %v5732_v12  ;;  %v7539_v1 = vmul.f32 -1.442695, %v15433_v5 }
 0x391   : > { %6809 = vst.msk [vmem:[%s14050_s19 + $0x40] sm:$0xff] %vm3311_vm3, %v6745_v17  ;;  %v6746_v21 = vmul.f32 0.25, %v6682_v3  ;;  %v4547_v22 = vadd.f32 %v13721_v15, %v4546_v25  ;;  %v8303_v8 = vpop.f32.mrb[206].mxu1  ;;  %v9330_v17 = vpop.eup %9329  ;;  %9345 = vpow2.f32 %v7538_v44  ;;  %v7537_v3 = vmul.f32 -1.442695, %v15434_v30  ;;  %v15436_v25 = vld [vmem:[#allocation161_spill] sm:$0xff] }
 0x392   : > { %6812 = vst.msk [vmem:[%s14050_s19 + $0x58] sm:$0xff] %vm3311_vm3, %v6748_v23  ;;  %v6495_v20 = vmul.f32 %v9324_v41, %v4555_v61  ;;  %v4558_v9 = vadd.f32 %v13721_v15, %v8303_v8  ;;  %v4549_v2 = vpop.f32.mrb[207].mxu1  ;;  %v9332_v23 = vpop.eup %9331  ;;  %9347 = vrcp.f32 %v5730_v45  ;;  %v15437_v8 = vld [vmem:[#allocation3_spill] sm:$0xff]  ;;  %v5735_v5 = vadd.f32 1.0, %v9330_v17  ;;  %v15438_v17 = vld [vmem:[#allocation142_spill] sm:$0xff] }
 0x393   : > { %6810 = vst.msk [vmem:[%s14050_s19 + $0x48] sm:$0xff] %vm3311_vm3, %v6746_v21  ;;  %v6493_v7 = vmul.f32 %v9326_v19, %v4547_v22  ;;  %v4550_v27 = vadd.f32 %v13721_v15, %v4549_v2  ;;  %v15435_v21 = vld [vmem:[#allocation95_spill] sm:$0xff]  ;;  %v9334_v12 = vpop.eup %9333  ;;  %9349 = vpow2.f32 %v7536_v55 }
 0x394   : > { %v6687_v18 = vadd.f32 %v15435_v21, %v6495_v20  ;;  %v6496_v32 = vmul.f32 %v9328_v10, %v4558_v9  ;;  %v9336_v50 = vpop.eup %9335  ;;  %9351 = vpow2.f32 %v7539_v1  ;;  %v5733_v10 = vadd.f32 1.0, %v9334_v12 }
 0x395   : > { %v6685_v41 = vadd.f32 %v15436_v25, %v6493_v7  ;;  %v6494_v61 = vmul.f32 %v9332_v23, %v4550_v27  ;;  %v9338_v22 = vpop.eup %9337  ;;  %9353 = vpow2.f32 %v7537_v3  ;;  %v5736_v9 = vadd.f32 1.0, %v9336_v50 }
 0x396   : > { %v6751_v44 = vmul.f32 0.25, %v6687_v18  ;;  %v6688_v19 = vadd.f32 %v15437_v8, %v6496_v32  ;;  %v5734_v30 = vadd.f32 1.0, %v9338_v22  ;;  %9355 = vrcp.f32 %v5735_v5  ;;  %v15439_v18 = vld [vmem:[#allocation185_spill] sm:$0xff]  ;;  %v15441_v5 = vld [vmem:[#allocation186_spill] sm:$0xff] }
 0x397   : > { %v6749_v45 = vmul.f32 0.25, %v6685_v41  ;;  %v6686_v20 = vadd.f32 %v13695_v63, %v6494_v61  ;;  %v9340_v1 = vpop.eup %9339  ;;  %v7542_v3 = vmul.f32 -1.442695, %v15438_v17  ;;  %9357 = vrcp.f32 %v5733_v10  ;;  %v15440_v61 = vld [vmem:[#allocation154_spill] sm:$0xff] }
 0x398   : > { %6815 = vst.msk [vmem:[%s14050_s19 + $0x70] sm:$0xff] %vm3311_vm3, %v6751_v44  ;;  %v6752_v55 = vmul.f32 0.25, %v6688_v19  ;;  %v7540_v32 = vmul.f32 -1.442695, %v15439_v18  ;;  %9359 = vrcp.f32 %v5736_v9  ;;  %v7543_v50 = vmul.f32 -1.442695, %v15440_v61 }
 0x399   : > { %6813 = vst.msk [vmem:[%s14050_s19 + $0x60] sm:$0xff] %vm3311_vm3, %v6749_v45  ;;  %v6750_v2 = vmul.f32 0.25, %v6686_v20  ;;  %v9342_v27 = vpop.eup %9341  ;;  %9361 = vrcp.f32 %v5734_v30  ;;  %v7541_v45 = vmul.f32 -1.442695, %v15441_v5  ;;  %v15442_v18 = vld [vmem:[#allocation4_spill] sm:$0xff] }
 0x39a   : > { %6816 = vst.msk [vmem:[%s14050_s19 + $0x78] sm:$0xff] %vm3311_vm3, %v6752_v55  ;;  %v9344_v21 = vpop.eup %9343  ;;  %9363 = vpow2.f32 %v7542_v3 }
 0x39b   : > { %v8306_v7 = vpop.f32.mrb[208].mxu1  ;;  %6814 = vst.msk [vmem:[%s14050_s19 + $0x68] sm:$0xff] %vm3311_vm3, %v6750_v2  ;;  %v9346_v41 = vpop.eup %9345  ;;  %9365 = vpow2.f32 %v7540_v32 }
 0x39c   : > { %v4571_v63 = vadd.f32 %v13721_v15, %v8306_v7  ;;  %v4562_v23 = vpop.f32.mrb[209].mxu1  ;;  %v9348_v22 = vpop.eup %9347  ;;  %9367 = vpow2.f32 %v7543_v50 }
 0x39d   : > { %v4563_v12 = vadd.f32 %v13721_v15, %v4562_v23  ;;  %v8307_v25 = vpop.f32.mrb[210].mxu1  ;;  %v9350_v55 = vpop.eup %9349  ;;  %v5739_v23 = vadd.f32 1.0, %v9346_v41  ;;  %9369 = vpow2.f32 %v7541_v45  ;;  %v15444_v45 = vld [vmem:[#allocation156_spill] sm:$0xff] }
 0x39e   : > { %v6499_v44 = vmul.f32 %v9340_v1, %v4571_v63  ;;  %v4574_v8 = vadd.f32 %v13721_v15, %v8307_v25  ;;  %v4565_v19 = vpop.f32.mrb[211].mxu1  ;;  %v9352_v9 = vpop.eup %9351 }
 0x39f   : > { %v6497_v20 = vmul.f32 %v9342_v27, %v4563_v12  ;;  %v4566_v10 = vadd.f32 %v13721_v15, %v4565_v19  ;;  %v9354_v63 = vpop.eup %9353  ;;  %v5737_v12 = vadd.f32 1.0, %v9350_v55  ;;  %v5740_v25 = vadd.f32 1.0, %v9352_v9  ;;  %v15445_v9 = vld [vmem:[#allocation145_spill] sm:$0xff] }
 0x3a0   : > { %v6691_v2 = vadd.f32 %v13707_v29, %v6499_v44  ;;  %v6500_v7 = vmul.f32 %v9344_v21, %v4574_v8  ;;  %v5738_v32 = vadd.f32 1.0, %v9354_v63  ;;  %v9356_v44 = vpop.eup %9355  ;;  %9371 = vrcp.f32 %v5739_v23  ;;  %v15443_v8 = vld [vmem:[#allocation117_spill] sm:$0xff] }
 0x3a1   : > { %v6689_v1 = vadd.f32 %v13710_v24, %v6497_v20  ;;  %v6498_v17 = vmul.f32 %v9348_v22, %v4566_v10  ;;  %v7546_v19 = vmul.f32 -1.442695, %v15443_v8  ;;  %v9358_v5 = vpop.eup %9357  ;;  %9373 = vrcp.f32 %v5737_v12 }
 0x3a2   : > { %v6755_v30 = vmul.f32 0.25, %v6691_v2  ;;  %v6692_v27 = vadd.f32 %v15442_v18, %v6500_v7  ;;  %v7544_v20 = vmul.f32 -1.442695, %v15444_v45  ;;  %v9360_v7 = vpop.eup %9359  ;;  %9375 = vrcp.f32 %v5740_v25 }
 0x3a3   : > { %v6753_v3 = vmul.f32 0.25, %v6689_v1  ;;  %v6690_v29 = vadd.f32 %v13747_v6, %v6498_v17  ;;  %v7547_v1 = vmul.f32 -1.442695, %v15445_v9  ;;  %v9362_v23 = vpop.eup %9361  ;;  %9377 = vrcp.f32 %v5738_v32 }
 0x3a4   : > { %6819 = vst.msk [vmem:[%s14050_s19 + $0x90] sm:$0xff] %vm3311_vm3, %v6755_v30  ;;  %v6756_v21 = vmul.f32 0.25, %v6692_v27  ;;  %v8310_v24 = vpop.f32.mrb[212].mxu1  ;;  %v15446_v30 = vld [vmem:[#allocation147_spill] sm:$0xff]  ;;  %9379 = vpow2.f32 %v7546_v19 }
 0x3a5   : > { %6817 = vst.msk [vmem:[%s14050_s19 + $0x80] sm:$0xff] %vm3311_vm3, %v6753_v3  ;;  %v6754_v41 = vmul.f32 0.25, %v6690_v29  ;;  %v4587_v61 = vadd.f32 %v13721_v15, %v8310_v24  ;;  %v4578_v50 = vpop.f32.mrb[213].mxu1  ;;  %v7545_v18 = vmul.f32 -1.442695, %v15446_v30  ;;  %v9364_v3 = vpop.eup %9363  ;;  %v15447_v29 = vld [vmem:[#allocation24_spill] sm:$0xff]  ;;  %9381 = vpow2.f32 %v7544_v20 }
 0x3a6   : > { %6820 = vst.msk [vmem:[%s14050_s19 + $0x98] sm:$0xff] %vm3311_vm3, %v6756_v21  ;;  %v4579_v6 = vadd.f32 %v13721_v15, %v4578_v50  ;;  %v8311_v22 = vpop.f32.mrb[214].mxu1  ;;  %v9366_v25 = vpop.eup %9365  ;;  %9383 = vpow2.f32 %v7547_v1 }
 0x3a7   : > { %6818 = vst.msk [vmem:[%s14050_s19 + $0x88] sm:$0xff] %vm3311_vm3, %v6754_v41  ;;  %v6503_v10 = vmul.f32 %v9356_v44, %v4587_v61  ;;  %v4590_v55 = vadd.f32 %v13721_v15, %v8311_v22  ;;  %v4581_v2 = vpop.f32.mrb[215].mxu1  ;;  %v15448_v61 = vld [vmem:[#allocation94_spill] sm:$0xff]  ;;  %v9368_v50 = vpop.eup %9367  ;;  %v15449_v44 = vld [vmem:[#allocation120_spill] sm:$0xff]  ;;  %9385 = vpow2.f32 %v7545_v18  ;;  %v5741_v22 = vadd.f32 1.0, %v9366_v25  ;;  %v15452_v25 = vld [vmem:[#allocation55_spill] sm:$0xff] }
 0x3a8   : > { %v6501_v17 = vmul.f32 %v9358_v5, %v4579_v6  ;;  %v4582_v63 = vadd.f32 %v13721_v15, %v4581_v2  ;;  %v9370_v8 = vpop.eup %9369  ;;  %v5743_v6 = vadd.f32 1.0, %v9364_v3  ;;  %v5744_v45 = vadd.f32 1.0, %v9368_v50  ;;  %v14166_v2 = vld [vmem:[%s14365_s6] ss:$0 sm:$0xff] }
 0x3a9   : > { %v6695_v27 = vadd.f32 %v13756_v13, %v6503_v10  ;;  %v6504_v12 = vmul.f32 %v9360_v7, %v4590_v55  ;;  %v5742_v55 = vadd.f32 1.0, %v9370_v8 }
 0x3aa   : > { %v6693_v21 = vadd.f32 %v15447_v29, %v6501_v17  ;;  %v6502_v24 = vmul.f32 %v9362_v23, %v4582_v63  ;;  %v9372_v10 = vpop.eup %9371  ;;  %9387 = vrcp.f32 %v5743_v6  ;;  %v15450_v17 = vld [vmem:[#allocation73_spill] sm:$0xff] }
 0x3ab   : > { %v6759_v41 = vmul.f32 0.25, %v6695_v27  ;;  %v6696_v15 = vadd.f32 %v15448_v61, %v6504_v12  ;;  %v9374_v1 = vpop.eup %9373  ;;  %v7550_v63 = vmul.f32 -1.442695, %v15450_v17  ;;  %9389 = vrcp.f32 %v5741_v22  ;;  %v15451_v27 = vld [vmem:[#allocation69_spill] sm:$0xff]  ;;  %v15455_v22 = vld [vmem:[#allocation119_spill] sm:$0xff] }
 0x3ac   : > { %v6757_v32 = vmul.f32 0.25, %v6693_v21  ;;  %v6694_v13 = vadd.f32 %v15449_v44, %v6502_v24  ;;  %v9376_v18 = vpop.eup %9375  ;;  %v7548_v12 = vmul.f32 -1.442695, %v15451_v27  ;;  %9391 = vrcp.f32 %v5744_v45 }
 0x3ad   : > { %6823 = vst.msk [vmem:[%s14050_s19 + $0xb0] sm:$0xff] %vm3311_vm3, %v6759_v41  ;;  %v6760_v19 = vmul.f32 0.25, %v6696_v15  ;;  %v9378_v24 = vpop.eup %9377  ;;  %v7551_v41 = vmul.f32 -1.442695, %v15452_v25  ;;  %9393 = vrcp.f32 %v5742_v55 }
 0x3ae   : > { %6821 = vst.msk [vmem:[%s14050_s19 + $0xa0] sm:$0xff] %vm3311_vm3, %v6757_v32  ;;  %v6758_v5 = vmul.f32 0.25, %v6694_v13  ;;  %v8314_v20 = vpop.f32.mrb[216].mxu1  ;;  %v9380_v50 = vpop.eup %9379  ;;  %v15453_v32 = vld [vmem:[#allocation152_spill] sm:$0xff]  ;;  %v15454_v13 = vld [vmem:[#allocation97_spill] sm:$0xff]  ;;  %9395 = vpow2.f32 %v7550_v63 }
 0x3af   : > { %6824 = vst.msk [vmem:[%s14050_s19 + $0xb8] sm:$0xff] %vm3311_vm3, %v6760_v19  ;;  %v4603_v7 = vadd.f32 %v14166_v2, %v8314_v20  ;;  %v4594_v9 = vpop.f32.mrb[217].mxu1  ;;  %v7549_v44 = vmul.f32 -1.442695, %v15453_v32  ;;  %v9382_v19 = vpop.eup %9381  ;;  %9397 = vpow2.f32 %v7548_v12  ;;  %v5747_v55 = vadd.f32 1.0, %v9380_v50  ;;  %v15459_v50 = vld [vmem:[#allocation62_spill] sm:$0xff] }
 0x3b0   : > { %6822 = vst.msk [vmem:[%s14050_s19 + $0xa8] sm:$0xff] %vm3311_vm3, %v6758_v5  ;;  %v4595_v23 = vadd.f32 %v14166_v2, %v4594_v9  ;;  %v8315_v30 = vpop.f32.mrb[218].mxu1  ;;  %v9384_v45 = vpop.eup %9383  ;;  %9399 = vpow2.f32 %v7551_v41  ;;  %v7552_v32 = vmul.f32 -1.442695, %v15459_v50 }
 0x3b1   : > { %v6507_v3 = vmul.f32 %v9372_v10, %v4603_v7  ;;  %v4606_v29 = vadd.f32 %v14166_v2, %v8315_v30  ;;  %v4597_v21 = vpop.f32.mrb[219].mxu1  ;;  %v15456_v7 = vld [vmem:[#allocation96_spill] sm:$0xff]  ;;  %9401 = vpow2.f32 %v7549_v44  ;;  %v5748_v27 = vadd.f32 1.0, %v9384_v45 }
 0x3b2   : > { %v6505_v61 = vmul.f32 %v9374_v1, %v4595_v23  ;;  %v4598_v15 = vadd.f32 %v14166_v2, %v4597_v21  ;;  %v9386_v1 = vpop.eup %9385  ;;  %v15457_v23 = vld [vmem:[#allocation27_spill] sm:$0xff]  ;;  %9403 = vrcp.f32 %v5747_v55 }
 0x3b3   : > { %v6699_v8 = vadd.f32 %v15454_v13, %v6507_v3  ;;  %v6508_v6 = vmul.f32 %v9376_v18, %v4606_v29  ;;  %v5745_v18 = vadd.f32 1.0, %v9382_v19  ;;  %v5746_v3 = vadd.f32 1.0, %v9386_v1 }
 0x3b4   : > { %v6697_v5 = vadd.f32 %v15455_v22, %v6505_v61  ;;  %v6506_v20 = vmul.f32 %v9378_v24, %v4598_v15  ;;  %v9388_v21 = vpop.eup %9387  ;;  %v15458_v24 = vld [vmem:[#allocation153_spill] sm:$0xff] }
 0x3b5   : > { %v6763_v10 = vmul.f32 0.25, %v6699_v8  ;;  %v6700_v9 = vadd.f32 %v15456_v7, %v6508_v6  ;;  %v7554_v25 = vmul.f32 -1.442695, %v15458_v24  ;;  %v9390_v15 = vpop.eup %9389  ;;  %9405 = vrcp.f32 %v5745_v18  ;;  %v15460_v6 = vld [vmem:[#allocation33_spill] sm:$0xff] }
 0x3b6   : > { %v6761_v17 = vmul.f32 0.25, %v6697_v5  ;;  %v6698_v30 = vadd.f32 %v15457_v23, %v6506_v20  ;;  %v9392_v8 = vpop.eup %9391  ;;  %9407 = vrcp.f32 %v5748_v27  ;;  %v7555_v19 = vmul.f32 -1.442695, %v15460_v6 }
 0x3b7   : > { %6827 = vst.msk [vmem:[%s14050_s19 + $0xd0] sm:$0xff] %vm3311_vm3, %v6763_v10  ;;  %v6764_v63 = vmul.f32 0.25, %v6700_v9  ;;  %v9394_v45 = vpop.eup %9393  ;;  %9409 = vrcp.f32 %v5746_v3  ;;  %v15461_v10 = vld [vmem:[#allocation87_spill] sm:$0xff] }
 0x3b8   : > { %6825 = vst.msk [vmem:[%s14050_s19 + $0xc0] sm:$0xff] %vm3311_vm3, %v6761_v17  ;;  %v6762_v12 = vmul.f32 0.25, %v6698_v30  ;;  %v7553_v7 = vmul.f32 -1.442695, %v15461_v10  ;;  %v9396_v55 = vpop.eup %9395  ;;  %9411 = vpow2.f32 %v7554_v25  ;;  %v15462_v17 = vld [vmem:[#allocation8_spill] sm:$0xff] }
 0x3b9   : > { %6828 = vst.msk [vmem:[%s14050_s19 + $0xd8] sm:$0xff] %vm3311_vm3, %v6764_v63  ;;  %v9398_v18 = vpop.eup %9397  ;;  %9413 = vpow2.f32 %v7552_v32  ;;  %v15463_v63 = vld [vmem:[#allocation122_spill] sm:$0xff] }
 0x3ba   : > { %6826 = vst.msk [vmem:[%s14050_s19 + $0xc8] sm:$0xff] %vm3311_vm3, %v6762_v12  ;;  %9415 = vpow2.f32 %v7555_v19 }
 0x3bb   : > { %v8318_v29 = vpop.f32.mrb[220].mxu1  ;;  %9417 = vpow2.f32 %v7553_v7 }
 0x3bc   : > { %v4619_v41 = vadd.f32 %v14166_v2, %v8318_v29  ;;  %v4610_v61 = vpop.f32.mrb[221].mxu1  ;;  %v9400_v29 = vpop.eup %9399 }
 0x3bd   : > { %v4611_v44 = vadd.f32 %v14166_v2, %v4610_v61  ;;  %v8319_v13 = vpop.f32.mrb[222].mxu1  ;;  %v5751_v61 = vadd.f32 1.0, %v9396_v55 }
 0x3be   : > { %v6511_v22 = vmul.f32 %v9388_v21, %v4619_v41  ;;  %v4622_v5 = vadd.f32 %v14166_v2, %v8319_v13  ;;  %v4613_v20 = vpop.f32.mrb[223].mxu1  ;;  %v15464_v21 = vld [vmem:[#allocation141_spill] sm:$0xff]  ;;  %v9402_v41 = vpop.eup %9401 }
 0x3bf   : > { %v6509_v9 = vmul.f32 %v9390_v15, %v4611_v44  ;;  %v4614_v1 = vadd.f32 %v14166_v2, %v4613_v20  ;;  %v15465_v15 = vld [vmem:[#allocation177_spill] sm:$0xff]  ;;  %v5749_v44 = vadd.f32 1.0, %v9398_v18  ;;  %v5750_v20 = vadd.f32 1.0, %v9402_v41  ;;  %v15467_v18 = vld [vmem:[#allocation68_spill] sm:$0xff] }
 0x3c0   : > { %v6703_v23 = vadd.f32 %v15462_v17, %v6511_v22  ;;  %v6512_v30 = vmul.f32 %v9392_v8, %v4622_v5  ;;  %v5752_v8 = vadd.f32 1.0, %v9400_v29  ;;  %v9404_v5 = vpop.eup %9403  ;;  %9419 = vrcp.f32 %v5751_v61 }
 0x3c1   : > { %v6701_v27 = vadd.f32 %v15463_v63, %v6509_v9  ;;  %v6510_v12 = vmul.f32 %v9394_v45, %v4614_v1  ;;  %v9406_v7 = vpop.eup %9405  ;;  %v15466_v9 = vld [vmem:[#allocation67_spill] sm:$0xff]  ;;  %9421 = vrcp.f32 %v5749_v44  ;;  %v7556_v63 = vmul.f32 -1.442695, %v15467_v18  ;;  %v15469_v44 = vld [vmem:[#allocation157_spill] sm:$0xff] }
 0x3c2   : > { %v6767_v3 = vmul.f32 0.25, %v6703_v23  ;;  %v6704_v24 = vadd.f32 %v15464_v21, %v6512_v30  ;;  %v7558_v1 = vmul.f32 -1.442695, %v15466_v9  ;;  %v9408_v30 = vpop.eup %9407  ;;  %9423 = vrcp.f32 %v5752_v8 }
 0x3c3   : > { %v6765_v25 = vmul.f32 0.25, %v6701_v27  ;;  %v6702_v50 = vadd.f32 %v15465_v15, %v6510_v12  ;;  %v8322_v13 = vpop.f32.mrb[224].mxu1  ;;  %v9410_v29 = vpop.eup %9409  ;;  %9425 = vrcp.f32 %v5750_v20 }
 0x3c4   : > { %6831 = vst.msk [vmem:[%s14050_s19 + $0xf0] sm:$0xff] %vm3311_vm3, %v6767_v3  ;;  %v6768_v32 = vmul.f32 0.25, %v6704_v24  ;;  %v4635_v19 = vadd.f32 %v14166_v2, %v8322_v13  ;;  %v4626_v22 = vpop.f32.mrb[225].mxu1  ;;  %v15468_v3 = vld [vmem:[#allocation164_spill] sm:$0xff]  ;;  %v9412_v61 = vpop.eup %9411  ;;  %9427 = vpow2.f32 %v7558_v1 }
 0x3c5   : > { %6829 = vst.msk [vmem:[%s14050_s19 + $0xe0] sm:$0xff] %vm3311_vm3, %v6765_v25  ;;  %v6766_v6 = vmul.f32 0.25, %v6702_v50  ;;  %v4627_v45 = vadd.f32 %v14166_v2, %v4626_v22  ;;  %v8323_v10 = vpop.f32.mrb[226].mxu1  ;;  %v7559_v21 = vmul.f32 -1.442695, %v15468_v3  ;;  %v9414_v50 = vpop.eup %9413  ;;  %9429 = vpow2.f32 %v7556_v63 }
 0x3c6   : > { %6832 = vst.msk [vmem:[%s14050_s19 + $0xf8] sm:$0xff] %vm3311_vm3, %v6768_v32  ;;  %v6515_v55 = vmul.f32 %v9404_v5, %v4635_v19  ;;  %v4638_v17 = vadd.f32 %v14166_v2, %v8323_v10  ;;  %v4629_v23 = vpop.f32.mrb[227].mxu1  ;;  %v7557_v32 = vmul.f32 -1.442695, %v15469_v44  ;;  %v5755_v5 = vadd.f32 1.0, %v9412_v61 }
 0x3c7   : > { %6830 = vst.msk [vmem:[%s14050_s19 + $0xe8] sm:$0xff] %vm3311_vm3, %v6766_v6  ;;  %v6513_v27 = vmul.f32 %v9406_v7, %v4627_v45  ;;  %v4630_v12 = vadd.f32 %v14166_v2, %v4629_v23  ;;  %v9416_v6 = vpop.eup %9415  ;;  %9431 = vpow2.f32 %v7559_v21  ;;  %v5753_v20 = vadd.f32 1.0, %v9414_v50 }
 0x3c8   : > { %v6707_v24 = vadd.f32 %v13856_v57, %v6515_v55  ;;  %v6516_v41 = vmul.f32 %v9408_v30, %v4638_v17  ;;  %v9418_v22 = vpop.eup %9417  ;;  %v5756_v10 = vadd.f32 1.0, %v9416_v6  ;;  %9433 = vpow2.f32 %v7557_v32  ;;  %v15470_v17 = vld [vmem:[#allocation166_spill] sm:$0xff] }
 0x3c9   : > { %v6705_v25 = vadd.f32 %v13862_v58, %v6513_v27  ;;  %v6514_v15 = vmul.f32 %v9410_v29, %v4630_v12  ;;  %9435 = vrcp.f32 %v5755_v5  ;;  %v7562_v23 = vmul.f32 -1.442695, %v15470_v17  ;;  %v15471_v27 = vld [vmem:[#allocation84_spill] sm:$0xff]  ;;  %v15474_v17 = vld [vmem:[#allocation5_spill] sm:$0xff] }
 0x3ca   : > { %v6771_v13 = vmul.f32 0.25, %v6707_v24  ;;  %v6708_v8 = vadd.f32 %v13865_v35, %v6516_v41  ;;  %v5754_v35 = vadd.f32 1.0, %v9418_v22  ;;  %v9420_v9 = vpop.eup %9419  ;;  %9437 = vrcp.f32 %v5753_v20  ;;  %v15472_v41 = vld [vmem:[#allocation179_spill] sm:$0xff] }
 0x3cb   : > { %v6769_v57 = vmul.f32 0.25, %v6705_v25  ;;  %v6706_v19 = vadd.f32 %v13868_v33, %v6514_v15  ;;  %v9422_v55 = vpop.eup %9421  ;;  %9439 = vrcp.f32 %v5756_v10  ;;  %v7560_v12 = vmul.f32 -1.442695, %v15471_v27 }
 0x3cc   : > { %6835 = vst.msk [vmem:[%s14050_s19 + $0x110] sm:$0xff] %vm3311_vm3, %v6771_v13  ;;  %v6772_v58 = vmul.f32 0.25, %v6708_v8  ;;  %v9424_v63 = vpop.eup %9423  ;;  %9441 = vrcp.f32 %v5754_v35  ;;  %v7563_v61 = vmul.f32 -1.442695, %v15472_v41  ;;  %v15473_v8 = vld [vmem:[#allocation98_spill] sm:$0xff] }
 0x3cd   : > { %6833 = vst.msk [vmem:[%s14050_s19 + $0x100] sm:$0xff] %vm3311_vm3, %v6769_v57  ;;  %v6770_v45 = vmul.f32 0.25, %v6706_v19  ;;  %v9426_v24 = vpop.eup %9425  ;;  %9443 = vpow2.f32 %v7562_v23  ;;  %v7561_v6 = vmul.f32 -1.442695, %v15473_v8  ;;  %v7566_v23 = vmul.f32 -1.442695, %v15474_v17 }
 0x3ce   : > { %6836 = vst.msk [vmem:[%s14050_s19 + $0x118] sm:$0xff] %vm3311_vm3, %v6772_v58  ;;  %v8326_v7 = vpop.f32.mrb[228].mxu1  ;;  %v9428_v50 = vpop.eup %9427  ;;  %9445 = vpow2.f32 %v7560_v12 }
 0x3cf   : > { %6834 = vst.msk [vmem:[%s14050_s19 + $0x108] sm:$0xff] %vm3311_vm3, %v6770_v45  ;;  %v4651_v33 = vadd.f32 %v14166_v2, %v8326_v7  ;;  %v4642_v1 = vpop.f32.mrb[229].mxu1  ;;  %v9430_v13 = vpop.eup %9429  ;;  %v5759_v20 = vadd.f32 1.0, %v9428_v50  ;;  %9447 = vpow2.f32 %v7563_v61 }
 0x3d0   : > { %v4643_v30 = vadd.f32 %v14166_v2, %v4642_v1  ;;  %v8327_v18 = vpop.f32.mrb[230].mxu1  ;;  %v5757_v35 = vadd.f32 1.0, %v9430_v13  ;;  %9449 = vpow2.f32 %v7561_v6  ;;  %v15477_v13 = vld [vmem:[#allocation158_spill] sm:$0xff] }
 0x3d1   : > { %v6519_v29 = vmul.f32 %v9420_v9, %v4651_v33  ;;  %v4654_v3 = vadd.f32 %v14166_v2, %v8327_v18  ;;  %v4645_v21 = vpop.f32.mrb[231].mxu1  ;;  %v9432_v22 = vpop.eup %9431  ;;  %9451 = vrcp.f32 %v5759_v20  ;;  %v7565_v8 = vmul.f32 -1.442695, %v15477_v13 }
 0x3d2   : > { %v6517_v25 = vmul.f32 %v9422_v55, %v4643_v30  ;;  %v4646_v15 = vadd.f32 %v14166_v2, %v4645_v21  ;;  %v9434_v10 = vpop.eup %9433  ;;  %v5760_v9 = vadd.f32 1.0, %v9432_v22  ;;  %9453 = vrcp.f32 %v5757_v35  ;;  %v15475_v21 = vld [vmem:[#allocation89_spill] sm:$0xff] }
 0x3d3   : > { %v6711_v44 = vadd.f32 %v13872_v39, %v6519_v29  ;;  %v6520_v32 = vmul.f32 %v9424_v63, %v4654_v3  ;;  %v9436_v55 = vpop.eup %9435  ;;  %v5758_v63 = vadd.f32 1.0, %v9434_v10 }
 0x3d4   : > { %v6709_v57 = vadd.f32 %v13875_v4, %v6517_v25  ;;  %v6518_v19 = vmul.f32 %v9426_v24, %v4646_v15  ;;  %v9438_v18 = vpop.eup %9437  ;;  %v7564_v24 = vmul.f32 -1.442695, %v15475_v21  ;;  %9455 = vrcp.f32 %v5760_v9  ;;  %v15476_v15 = vld [vmem:[#allocation85_spill] sm:$0xff]  ;;  %v15480_v21 = vld [vmem:[#allocation171_spill] sm:$0xff] }
 0x3d5   : > { %v6775_v5 = vmul.f32 0.25, %v6711_v44  ;;  %v6712_v58 = vadd.f32 %v13878_v43, %v6520_v32  ;;  %v9440_v3 = vpop.eup %9439  ;;  %v7567_v50 = vmul.f32 -1.442695, %v15476_v15  ;;  %9457 = vpow2.f32 %v7566_v23  ;;  %v15481_v15 = vld [vmem:[#allocation71_spill] sm:$0xff] }
 0x3d6   : > { %v6773_v45 = vmul.f32 0.25, %v6709_v57  ;;  %v6710_v39 = vadd.f32 %v13885_v37, %v6518_v19  ;;  %v8330_v4 = vpop.f32.mrb[232].mxu1  ;;  %v9442_v25 = vpop.eup %9441  ;;  %9459 = vrcp.f32 %v5758_v63 }
 0x3d7   : > { %6839 = vst.msk [vmem:[%s14050_s19 + $0x130] sm:$0xff] %vm3311_vm3, %v6775_v5  ;;  %v6776_v7 = vmul.f32 0.25, %v6712_v58  ;;  %v4667_v43 = vadd.f32 %v14166_v2, %v8330_v4  ;;  %v4658_v1 = vpop.f32.mrb[233].mxu1  ;;  %v9444_v19 = vpop.eup %9443  ;;  %9461 = vpow2.f32 %v7564_v24  ;;  %v7571_v24 = vmul.f32 -1.442695, %v15480_v21 }
 0x3d8   : > { %6837 = vst.msk [vmem:[%s14050_s19 + $0x120] sm:$0xff] %vm3311_vm3, %v6773_v45  ;;  %v6774_v33 = vmul.f32 0.25, %v6710_v39  ;;  %v4659_v37 = vadd.f32 %v14166_v2, %v4658_v1  ;;  %v8331_v30 = vpop.f32.mrb[234].mxu1  ;;  %v9446_v58 = vpop.eup %9445  ;;  %9463 = vpow2.f32 %v7567_v50  ;;  %v7569_v50 = vmul.f32 -1.442695, %v15481_v15 }
 0x3d9   : > { %6840 = vst.msk [vmem:[%s14050_s19 + $0x138] sm:$0xff] %vm3311_vm3, %v6776_v7  ;;  %v6523_v27 = vmul.f32 %v9436_v55, %v4667_v43  ;;  %v4670_v12 = vadd.f32 %v14166_v2, %v8331_v30  ;;  %v4661_v29 = vpop.f32.mrb[235].mxu1  ;;  %v9448_v45 = vpop.eup %9447  ;;  %9465 = vpow2.f32 %v7565_v8  ;;  %v5761_v7 = vadd.f32 1.0, %v9446_v58 }
 0x3da   : > { %6838 = vst.msk [vmem:[%s14050_s19 + $0x128] sm:$0xff] %vm3311_vm3, %v6774_v33  ;;  %v6521_v41 = vmul.f32 %v9438_v18, %v4659_v37  ;;  %v4662_v61 = vadd.f32 %v14166_v2, %v4661_v29  ;;  %v9450_v35 = vpop.eup %9449  ;;  %v15479_v18 = vld [vmem:[#allocation82_spill] sm:$0xff] }
 0x3db   : > { %v6715_v44 = vadd.f32 %v13908_v36, %v6523_v27  ;;  %v6524_v32 = vmul.f32 %v9440_v3, %v4670_v12  ;;  %v9452_v9 = vpop.eup %9451  ;;  %v5762_v17 = vadd.f32 1.0, %v9450_v35  ;;  %v7568_v63 = vmul.f32 -1.442695, %v15479_v18 }
 0x3dc   : > { %v6713_v6 = vadd.f32 %v13914_v56, %v6521_v41  ;;  %v6522_v57 = vmul.f32 %v9442_v25, %v4662_v61  ;;  %v5763_v56 = vadd.f32 1.0, %v9444_v19  ;;  %v9454_v55 = vpop.eup %9453 }
 0x3dd   : > { %v6779_v22 = vmul.f32 0.25, %v6715_v44  ;;  %v6716_v5 = vadd.f32 %v13917_v47, %v6524_v32  ;;  %v5764_v47 = vadd.f32 1.0, %v9448_v45 }
 0x3de   : > { %v6777_v20 = vmul.f32 0.25, %v6713_v6  ;;  %v6714_v36 = vadd.f32 %v13920_v31, %v6522_v57  ;;  %v15478_v31 = vld [vmem:[#allocation90_spill] sm:$0xff]  ;;  %9467 = vrcp.f32 %v5763_v56  ;;  %v9456_v30 = vpop.eup %9455 }
 0x3df   : > { %6843 = vst.msk [vmem:[%s14050_s19 + $0x150] sm:$0xff] %vm3311_vm3, %v6779_v22  ;;  %v6780_v39 = vmul.f32 0.25, %v6716_v5  ;;  %v7570_v33 = vmul.f32 -1.442695, %v15478_v31  ;;  %9469 = vrcp.f32 %v5761_v7  ;;  %v9458_v3 = vpop.eup %9457 }
 0x3e0   : > { %6841 = vst.msk [vmem:[%s14050_s19 + $0x140] sm:$0xff] %vm3311_vm3, %v6777_v20  ;;  %v6778_v10 = vmul.f32 0.25, %v6714_v36  ;;  %9471 = vrcp.f32 %v5764_v47  ;;  %v9460_v25 = vpop.eup %9459  ;;  %v5767_v58 = vadd.f32 1.0, %v9458_v3  ;;  %v15482_v47 = vld [vmem:[#allocation109_spill] sm:$0xff] }
 0x3e1   : > { %6844 = vst.msk [vmem:[%s14050_s19 + $0x158] sm:$0xff] %vm3311_vm3, %v6780_v39  ;;  %9473 = vpow2.f32 %v7570_v33  ;;  %v9462_v13 = vpop.eup %9461 }
 0x3e2   : > { %6842 = vst.msk [vmem:[%s14050_s19 + $0x148] sm:$0xff] %vm3311_vm3, %v6778_v10  ;;  %v8334_v4 = vpop.f32.mrb[236].mxu1  ;;  %9475 = vrcp.f32 %v5762_v17  ;;  %v9464_v57 = vpop.eup %9463  ;;  %v5765_v36 = vadd.f32 1.0, %v9462_v13 }
 0x3e3   : > { %v4683_v43 = vadd.f32 %v14166_v2, %v8334_v4  ;;  %v4674_v1 = vpop.f32.mrb[237].mxu1  ;;  %9477 = vpow2.f32 %v7568_v63  ;;  %v9466_v5 = vpop.eup %9465  ;;  %v5768_v45 = vadd.f32 1.0, %v9464_v57  ;;  %v7574_v4 = vmul.f32 -1.442695, %v15482_v47 }
 0x3e4   : > { %v4675_v23 = vadd.f32 %v14166_v2, %v4674_v1  ;;  %v8335_v37 = vpop.f32.mrb[238].mxu1  ;;  %9479 = vpow2.f32 %v7571_v24  ;;  %v5766_v56 = vadd.f32 1.0, %v9466_v5 }
 0x3e5   : > { %v6527_v27 = vmul.f32 %v9452_v9, %v4683_v43  ;;  %v4686_v12 = vadd.f32 %v14166_v2, %v8335_v37  ;;  %v4677_v29 = vpop.f32.mrb[239].mxu1  ;;  %9481 = vpow2.f32 %v7569_v50  ;;  %v15483_v43 = vld [vmem:[#allocation111_spill] sm:$0xff] }
 0x3e6   : > { %v6525_v41 = vmul.f32 %v9454_v55, %v4675_v23  ;;  %v4678_v61 = vadd.f32 %v14166_v2, %v4677_v29  ;;  %9483 = vrcp.f32 %v5767_v58  ;;  %v7572_v1 = vmul.f32 -1.442695, %v15483_v43  ;;  %v15485_v29 = vld [vmem:[#allocation115_spill] sm:$0xff] }
 0x3e7   : > { %v6719_v44 = vadd.f32 %v13924_v34, %v6527_v27  ;;  %v6528_v32 = vmul.f32 %v9456_v30, %v4686_v12  ;;  %9485 = vrcp.f32 %v5765_v36  ;;  %v15484_v30 = vld [vmem:[#allocation163_spill] sm:$0xff]  ;;  %v7573_v3 = vmul.f32 -1.442695, %v15485_v29 }
 0x3e8   : > { %v6717_v8 = vadd.f32 %v13927_v51, %v6525_v41  ;;  %v6526_v6 = vmul.f32 %v9460_v25, %v4678_v61  ;;  %v9468_v10 = vpop.eup %9467  ;;  %9487 = vrcp.f32 %v5768_v45  ;;  %v7575_v18 = vmul.f32 -1.442695, %v15484_v30 }
 0x3e9   : > { %v6783_v19 = vmul.f32 0.25, %v6719_v44  ;;  %v6720_v22 = vadd.f32 %v13930_v60, %v6528_v32  ;;  %v9470_v7 = vpop.eup %9469  ;;  %9489 = vrcp.f32 %v5766_v56 }
 0x3ea   : > { %v6781_v20 = vmul.f32 0.25, %v6717_v8  ;;  %v6718_v34 = vadd.f32 %v13934_v46, %v6526_v6  ;;  %v9472_v33 = vpop.eup %9471  ;;  %9491 = vpow2.f32 %v7574_v4 }
 0x3eb   : > { %6847 = vst.msk [vmem:[%s14050_s19 + $0x170] sm:$0xff] %vm3311_vm3, %v6783_v19  ;;  %v6784_v51 = vmul.f32 0.25, %v6720_v22  ;;  %v8338_v60 = vpop.f32.mrb[240].mxu1  ;;  %v9474_v37 = vpop.eup %9473  ;;  %9493 = vpow2.f32 %v7572_v1 }
 0x3ec   : > { %6845 = vst.msk [vmem:[%s14050_s19 + $0x160] sm:$0xff] %vm3311_vm3, %v6781_v20  ;;  %v6782_v39 = vmul.f32 0.25, %v6718_v34  ;;  %v4699_v35 = vadd.f32 %v14166_v2, %v8338_v60  ;;  %v4690_v46 = vpop.f32.mrb[241].mxu1  ;;  %v9476_v12 = vpop.eup %9475  ;;  %v5771_v13 = vadd.f32 1.0, %v9474_v37  ;;  %9495 = vpow2.f32 %v7575_v18 }
 0x3ed   : > { %6848 = vst.msk [vmem:[%s14050_s19 + $0x178] sm:$0xff] %vm3311_vm3, %v6784_v51  ;;  %v4691_v9 = vadd.f32 %v14166_v2, %v4690_v46  ;;  %v8339_v31 = vpop.f32.mrb[242].mxu1  ;;  %v9478_v41 = vpop.eup %9477  ;;  %9497 = vpow2.f32 %v7573_v3 }
 0x3ee   : > { %6846 = vst.msk [vmem:[%s14050_s19 + $0x168] sm:$0xff] %vm3311_vm3, %v6782_v39  ;;  %v6531_v55 = vmul.f32 %v9468_v10, %v4699_v35  ;;  %v4702_v17 = vadd.f32 %v14166_v2, %v8339_v31  ;;  %v4693_v23 = vpop.f32.mrb[243].mxu1  ;;  %v9480_v15 = vpop.eup %9479  ;;  %v5769_v6 = vadd.f32 1.0, %v9478_v41  ;;  %9499 = vrcp.f32 %v5771_v13 }
 0x3ef   : > { %v6529_v63 = vmul.f32 %v9470_v7, %v4691_v9  ;;  %v4694_v27 = vadd.f32 %v14166_v2, %v4693_v23  ;;  %v9482_v32 = vpop.eup %9481  ;;  %v5772_v19 = vadd.f32 1.0, %v9480_v15 }
 0x3f0   : > { %v6723_v21 = vadd.f32 %v13948_v26, %v6531_v55  ;;  %v6532_v24 = vmul.f32 %v9472_v33, %v4702_v17  ;;  %v9484_v58 = vpop.eup %9483  ;;  %v5770_v20 = vadd.f32 1.0, %v9482_v32  ;;  %9501 = vrcp.f32 %v5769_v6 }
 0x3f1   : > { %v6721_v61 = vadd.f32 %v13954_v38, %v6529_v63  ;;  %v6530_v25 = vmul.f32 %v9476_v12, %v4694_v27  ;;  %v9486_v36 = vpop.eup %9485  ;;  %9503 = vrcp.f32 %v5772_v19 }
 0x3f2   : > { %v6787_v50 = vmul.f32 0.25, %v6723_v21  ;;  %v6724_v44 = vadd.f32 %v13957_v52, %v6532_v24  ;;  %v9488_v56 = vpop.eup %9487  ;;  %9505 = vrcp.f32 %v5770_v20 }
 0x3f3   : > { %v6785_v8 = vmul.f32 0.25, %v6721_v61  ;;  %v6722_v26 = vadd.f32 %v13960_v11, %v6530_v25  ;;  %v9490_v35 = vpop.eup %9489 }
 0x3f4   : > { %6851 = vst.msk [vmem:[%s14050_s19 + $0x190] sm:$0xff] %vm3311_vm3, %v6787_v50  ;;  %v6788_v38 = vmul.f32 0.25, %v6724_v44  ;;  %v8342_v57 = vpop.f32.mrb[244].mxu1  ;;  %v9492_v9 = vpop.eup %9491 }
 0x3f5   : > { %6849 = vst.msk [vmem:[%s14050_s19 + $0x180] sm:$0xff] %vm3311_vm3, %v6785_v8  ;;  %v6786_v22 = vmul.f32 0.25, %v6722_v26  ;;  %v4715_v52 = vadd.f32 %v14166_v2, %v8342_v57  ;;  %v4706_v5 = vpop.f32.mrb[245].mxu1  ;;  %v9494_v43 = vpop.eup %9493  ;;  %v5775_v37 = vadd.f32 1.0, %v9492_v9 }
 0x3f6   : > { %6852 = vst.msk [vmem:[%s14050_s19 + $0x198] sm:$0xff] %vm3311_vm3, %v6788_v38  ;;  %v4707_v11 = vadd.f32 %v14166_v2, %v4706_v5  ;;  %v8343_v34 = vpop.f32.mrb[246].mxu1  ;;  %v9496_v17 = vpop.eup %9495  ;;  %v5773_v30 = vadd.f32 1.0, %v9494_v43 }
 0x3f7   : > { %6850 = vst.msk [vmem:[%s14050_s19 + $0x188] sm:$0xff] %vm3311_vm3, %v6786_v22  ;;  %v6535_v51 = vmul.f32 %v9484_v58, %v4715_v52  ;;  %v4718_v45 = vadd.f32 %v14166_v2, %v8343_v34  ;;  %v4709_v39 = vpop.f32.mrb[247].mxu1  ;;  %v9498_v23 = vpop.eup %9497  ;;  %v5776_v63 = vadd.f32 1.0, %v9496_v17  ;;  %9507 = vrcp.f32 %v5775_v37 }
 0x3f8   : > { %v6533_v60 = vmul.f32 %v9486_v36, %v4707_v11  ;;  %v4710_v10 = vadd.f32 %v14166_v2, %v4709_v39  ;;  %v5774_v12 = vadd.f32 1.0, %v9498_v23  ;;  %9509 = vrcp.f32 %v5773_v30 }
 0x3f9   : > { %v6727_v46 = vadd.f32 %v13965_v53, %v6535_v51  ;;  %v6536_v7 = vmul.f32 %v9488_v56, %v4718_v45  ;;  %9511 = vrcp.f32 %v5776_v63 }
 0x3fa   : > { %v6725_v47 = vadd.f32 %v13968_v48, %v6533_v60  ;;  %v6534_v4 = vmul.f32 %v9490_v35, %v4710_v10  ;;  %9513 = vrcp.f32 %v5774_v12 }
 0x3fb   : > { %v6791_v31 = vmul.f32 0.25, %v6727_v46  ;;  %v6728_v33 = vadd.f32 %v13971_v42, %v6536_v7 }
 0x3fc   : > { %v6789_v1 = vmul.f32 0.25, %v6725_v47  ;;  %v6726_v55 = vadd.f32 %v13976_v49, %v6534_v4  ;;  %v9500_v49 = vpop.eup %9499 }
 0x3fd   : > { %6855 = vst.msk [vmem:[%s14050_s19 + $0x1b0] sm:$0xff] %vm3311_vm3, %v6791_v31  ;;  %v6792_v53 = vmul.f32 0.25, %v6728_v33  ;;  %v9502_v21 = vpop.eup %9501 }
 0x3fe   : > { %6853 = vst.msk [vmem:[%s14050_s19 + $0x1a0] sm:$0xff] %vm3311_vm3, %v6789_v1  ;;  %v6790_v48 = vmul.f32 0.25, %v6726_v55  ;;  %v9504_v25 = vpop.eup %9503 }
 0x3ff   : > { %6856 = vst.msk [vmem:[%s14050_s19 + $0x1b8] sm:$0xff] %vm3311_vm3, %v6792_v53  ;;  %v8346_v18 = vpop.f32.mrb[248].mxu1  ;;  %v9506_v44 = vpop.eup %9505 }
 0x400   : > { %6854 = vst.msk [vmem:[%s14050_s19 + $0x1a8] sm:$0xff] %vm3311_vm3, %v6790_v48  ;;  %v4731_v42 = vadd.f32 %v14166_v2, %v8346_v18  ;;  %v4722_v27 = vpop.f32.mrb[249].mxu1 }
 0x401   : > { %v4723_v29 = vadd.f32 %v14166_v2, %v4722_v27  ;;  %v8347_v3 = vpop.f32.mrb[250].mxu1  ;;  %v9508_v58 = vpop.eup %9507 }
 0x402   : > { %v6539_v24 = vmul.f32 %v9500_v49, %v4731_v42  ;;  %v4734_v41 = vadd.f32 %v14166_v2, %v8347_v3  ;;  %v4725_v61 = vpop.f32.mrb[251].mxu1  ;;  %v9510_v11 = vpop.eup %9509 }
 0x403   : > { %v6537_v15 = vmul.f32 %v9502_v21, %v4723_v29  ;;  %v4726_v50 = vadd.f32 %v14166_v2, %v4725_v61  ;;  %v9512_v51 = vpop.eup %9511 }
 0x404   : > { %v6731_v32 = vadd.f32 %v13991_v28, %v6539_v24  ;;  %v6540_v13 = vmul.f32 %v9504_v25, %v4734_v41  ;;  %v9514_v56 = vpop.eup %9513 }
 0x405   : > { %v6729_v8 = vadd.f32 %v13996_v16, %v6537_v15  ;;  %v6538_v26 = vmul.f32 %v9506_v44, %v4726_v50 }
 0x406   : > { %v6795_v6 = vmul.f32 0.25, %v6731_v32  ;;  %v6732_v38 = vadd.f32 %v14000_v62, %v6540_v13 }
 0x407   : > { %v6793_v57 = vmul.f32 0.25, %v6729_v8  ;;  %v6730_v19 = vadd.f32 %v14003_v14, %v6538_v26 }
 0x408   : > { %6859 = vst.msk [vmem:[%s14050_s19 + $0x1d0] sm:$0xff] %vm3311_vm3, %v6795_v6  ;;  %v6796_v22 = vmul.f32 0.25, %v6732_v38 }
 0x409   : > { %6857 = vst.msk [vmem:[%s14050_s19 + $0x1c0] sm:$0xff] %vm3311_vm3, %v6793_v57  ;;  %v6794_v52 = vmul.f32 0.25, %v6730_v19  ;;  %v8350_v28 = vpop.f32.mrb[252].mxu1 }
 0x40a   : > { %6860 = vst.msk [vmem:[%s14050_s19 + $0x1d8] sm:$0xff] %vm3311_vm3, %v6796_v22  ;;  %v4747_v16 = vadd.f32 %v14166_v2, %v8350_v28  ;;  %v4738_v5 = vpop.f32.mrb[253].mxu1 }
 0x40b   : > { %6858 = vst.msk [vmem:[%s14050_s19 + $0x1c8] sm:$0xff] %vm3311_vm3, %v6794_v52  ;;  %v4739_v62 = vadd.f32 %v14166_v2, %v4738_v5  ;;  %v8351_v20 = vpop.f32.mrb[254].mxu1 }
 0x40c   : > { %v6543_v14 = vmul.f32 %v9508_v58, %v4747_v16  ;;  %v4750_v34 = vadd.f32 %v14166_v2, %v8351_v20  ;;  %v4741_v36 = vpop.f32.mrb[255].mxu1 }
 0x40d   : > { %v6541_v45 = vmul.f32 %v9510_v11, %v4739_v62  ;;  %v4742_v39 = vadd.f32 %v14166_v2, %v4741_v36 }
 0x40e   : > { %v6735_v60 = vadd.f32 %v14021_v54, %v6543_v14  ;;  %v6544_v10 = vmul.f32 %v9512_v51, %v4750_v34 }
 0x40f   : > { %v6733_v35 = vadd.f32 %v14024_v59, %v6541_v45  ;;  %v6542_v46 = vmul.f32 %v9514_v56, %v4742_v39 }
 0x410   : > { %v6799_v7 = vmul.f32 0.25, %v6735_v60  ;;  %v6736_v47 = vadd.f32 %v14027_v40, %v6544_v10 }
 0x411   : > { %v6797_v4 = vmul.f32 0.25, %v6733_v35  ;;  %v6734_v9 = vadd.f32 %v14030_v0, %v6542_v46 }
 0x412   : > { %6863 = vst.msk [vmem:[%s14050_s19 + $0x1f0] sm:$0xff] %vm3311_vm3, %v6799_v7  ;;  %v6800_v31 = vmul.f32 0.25, %v6736_v47 }
 0x413   : > { %6861 = vst.msk [vmem:[%s14050_s19 + $0x1e0] sm:$0xff] %vm3311_vm3, %v6797_v4  ;;  %v6798_v33 = vmul.f32 0.25, %v6734_v9 }
 0x414   : > { %6864 = vst.msk [vmem:[%s14050_s19 + $0x1f8] sm:$0xff] %vm3311_vm3, %v6800_v31 }
 0x415   : > { %6862 = vst.msk [vmem:[%s14050_s19 + $0x1e8] sm:$0xff] %vm3311_vm3, %v6798_v33 }
 0x416 PF: > { %s17_s24 = sadd.s32 1, %s9541_s24  }
 0x417   : > { %p14_p5 = scmp.ge.s32.totalorder %s17_s24, 4  }
 0x419   :  { %16 = sbr.rel (!%p14_p5) target bundleno = 1 (0x1), region = 78 }

</bundles_post_ra>
